<compile_context>
chip_gen: v6e
topology: v6e:2x2x1
jax: 0.10.0
libtpu: 0.0.40
codegen_flags: <defaults>
</compile_context>

<pallas_src>
import numpy as np
import jax
import jax.numpy as jnp
from jax.experimental import pallas as pl
from jax.experimental.pallas import tpu as pltpu

# ----------------- module-consistent config -----------------
NOISE_SIZE = 16
N_CLASSES = 4
G_DIM = 8            # divisible by 4; spatial path 2 -> 4 -> 8
EMB_DIM = 10         # nn.Embedding(n_classes, 10)
BATCH = 2
EPS = 1e-5           # BatchNorm2d default eps
NEG_SLOPE = 0.2      # LeakyReLU(0.2)

S0 = G_DIM // 4      # 2
S1 = 2 * S0          # 4
S2 = G_DIM           # 8
C1, C2, C_OUT = 512, 128, 3
KSIZE = 4
KPAD = 32            # noise+emb (26) zero-padded so the expanded Linear input is 4*32 = 128 lanes
COUT_PAD = 128       # final 3 output channels zero-padded to a full lane width


def _vmem_limit_bytes():
    """Generation-aware VMEM request with headroom (v7x: 64 MiB, v5e/v6e: 128 MiB)."""
    try:
        cap = int(pltpu.get_tpu_info().vmem_capacity_bytes)
        return min(cap * 3 // 4, 96 * 1024 * 1024)
    except Exception:
        return 32 * 1024 * 1024   # conservative fallback; resident footprint is only ~4 MiB


_VMEM_LIMIT = _vmem_limit_bytes()


# ----------------------- the fused Pallas kernel ----------------------------

def _cgan_generator_kernel(zaug_ref, waug_ref, brows_ref, g1_ref, b1_ref,
                           w1_ref, t1_ref, g2_ref, b2_ref, w2_ref, t2_ref,
                           o_ref):
    """Whole generator forward on VMEM-resident tiles.

    Activation row layout is (batch, h, w) on sublanes, channels on lanes:
      h1/y1 : (B*S0*S0, 512)   after Linear / BatchNorm2d(512)
      acc1  : (B*S1*S1, 128)   after ConvTranspose2d(512->128)
      out   : (B*S2*S2, 128)   after ConvTranspose2d(128->3) (+ zero pad) + tanh
    Each stride-2 ConvTranspose is computed as: for every kernel tap (kh,kw),
    (rows_in, Cin) @ W[:, :, kh, kw]  then a constant 0/1 scatter matrix
    (rows_out, rows_in) accumulates that tap into the right output pixels.
    """
    # generator1: Linear(noise+10 -> 512*S0*S0), evaluated directly in
    # (batch*spatial, channel) layout via a block-diagonal expanded input.
    h1 = jnp.dot(zaug_ref[...], waug_ref[...],
                 preferred_element_type=jnp.float32) + brows_ref[...]

    # BatchNorm2d(512), training-mode (biased) statistics over the N*H*W rows.
    m1 = jnp.mean(h1, axis=0, keepdims=True)
    v1 = jnp.mean(jnp.square(h1 - m1), axis=0, keepdims=True)
    y1 = (h1 - m1) * jax.lax.rsqrt(v1 + EPS) * g1_ref[...] + b1_ref[...]
    y1b = y1.astype(jnp.bfloat16)

    # ConvTranspose2d(512 -> 128, k=4, s=2, p=1, bias=False), bf16 weights / f32 accumulate.
    acc1 = jnp.zeros((t1_ref.shape[1], w1_ref.shape[2]), jnp.float32)
    for kk in range(w1_ref.shape[0]):
        tap = jnp.dot(y1b, w1_ref[kk], preferred_element_type=jnp.float32)
        acc1 = acc1 + jnp.dot(t1_ref[kk], tap, preferred_element_type=jnp.float32)

    # BatchNorm2d(128) + LeakyReLU(0.2), f32.
    m2 = jnp.mean(acc1, axis=0, keepdims=True)
    v2 = jnp.mean(jnp.square(acc1 - m2), axis=0, keepdims=True)
    y2 = (acc1 - m2) * jax.lax.rsqrt(v2 + EPS) * g2_ref[...] + b2_ref[...]
    y2 = jnp.where(y2 >= 0.0, y2, NEG_SLOPE * y2)
    y2b = y2.astype(jnp.bfloat16)

    # ConvTranspose2d(128 -> 3, k=4, s=2, p=1, bias=False), channels padded to 128 lanes, + Tanh.
    acc2 = jnp.zeros((t2_ref.shape[1], w2_ref.shape[2]), jnp.float32)
    for kk in range(w2_ref.shape[0]):
        tap = jnp.dot(y2b, w2_ref[kk], preferred_element_type=jnp.float32)
        acc2 = acc2 + jnp.dot(t2_ref[kk], tap, preferred_element_type=jnp.float32)

    o_ref[...] = jnp.tanh(acc2).astype(o_ref.dtype)


# ------------------ parameter construction / repacking ----------------------

def _scatter_mats(batch, hin, win, k, stride, pad):
    """t[kh*k+kw, b*Ho*Wo + oh*Wo + ow, b*hin*win + ih*win + iw] = 1 iff
    oh = ih*stride - pad + kh and ow = iw*stride - pad + kw are in range."""
    hout = (hin - 1) * stride - 2 * pad + k
    wout = (win - 1) * stride - 2 * pad + k
    t = np.zeros((k * k, batch * hout * wout, batch * hin * win), np.float32)
    for kh in range(k):
        for kw in range(k):
            for ih in range(hin):
                oh = ih * stride - pad + kh
                if not 0 <= oh < hout:
                    continue
                for iw in range(win):
                    ow = iw * stride - pad + kw
                    if not 0 <= ow < wout:
                        continue
                    for b in range(batch):
                        t[kh * k + kw,
                          b * hout * wout + oh * wout + ow,
                          b * hin * win + ih * win + iw] = 1.0
    return t


def init_params(key):
    """Native (PyTorch-layout) parameters of the module."""
    lin_out = C1 * S0 * S0
    ks = jax.random.split(key, 9)
    return {
        "emb":   jax.random.normal(ks[0], (N_CLASSES, EMB_DIM), jnp.float32),
        "w_lin": 0.05 * jax.random.normal(ks[1], (NOISE_SIZE + EMB_DIM, lin_out), jnp.float32),
        "b_lin": 0.05 * jax.random.normal(ks[2], (lin_out,), jnp.float32),
        "g1":    1.0 + 0.1 * jax.random.normal(ks[3], (C1,), jnp.float32),
        "b1":    0.1 * jax.random.normal(ks[4], (C1,), jnp.float32),
        "w_ct1": 0.05 * jax.random.normal(ks[5], (C1, C2, KSIZE, KSIZE), jnp.float32),
        "w_ct2": 0.05 * jax.random.normal(ks[6], (C2, C_OUT, KSIZE, KSIZE), jnp.float32),
        "g2":    1.0 + 0.1 * jax.random.normal(ks[7], (C2,), jnp.float32),
        "b2":    0.1 * jax.random.normal(ks[8], (C2,), jnp.float32),
    }


def prepare_kernel_params(params, batch):
    """Repack native parameters for the fused kernel (done once, on host)."""
    assert NOISE_SIZE + EMB_DIM <= KPAD
    hw0 = S0 * S0
    k_in = NOISE_SIZE + EMB_DIM

    w_lin = np.asarray(params["w_lin"], np.float32)   # (k_in, C1*hw0); column = c*hw0 + hw
    b_lin = np.asarray(params["b_lin"], np.float32)

    # Linear weight in block-diagonal-input layout: row (hw, k) -> column c.
    waug = np.zeros((hw0 * KPAD, C1), np.float32)
    brows = np.zeros((batch * hw0, C1), np.float32)
    for hw in range(hw0):
        waug[hw * KPAD: hw * KPAD + k_in, :] = w_lin[:, hw::hw0]
        for b in range(batch):
            brows[b * hw0 + hw, :] = b_lin[hw::hw0]

    # Per-tap ConvTranspose weights, channels on lanes; the big ones in bf16.
    w1 = np.asarray(params["w_ct1"], np.float32)                       # (512, 128, 4, 4)
    w1k = np.transpose(w1, (2, 3, 0, 1)).reshape(KSIZE * KSIZE, C1, C2)
    w2 = np.asarray(params["w_ct2"], np.float32)                       # (128, 3, 4, 4)
    w2k = np.zeros((KSIZE * KSIZE, C2, COUT_PAD), np.float32)
    w2k[:, :, :C_OUT] = np.transpose(w2, (2, 3, 0, 1)).reshape(KSIZE * KSIZE, C2, C_OUT)

    return {
        "emb":   params["emb"],
        "waug":  jnp.asarray(waug),
        "brows": jnp.asarray(brows),
        "g1": params["g1"].reshape(1, C1), "b1": params["b1"].reshape(1, C1),
        "g2": params["g2"].reshape(1, C2), "b2": params["b2"].reshape(1, C2),
        "w1k": jnp.asarray(w1k, jnp.bfloat16),
        "t1":  jnp.asarray(_scatter_mats(batch, S0, S0, KSIZE, 2, 1)),
        "w2k": jnp.asarray(w2k, jnp.bfloat16),
        "t2":  jnp.asarray(_scatter_mats(batch, S1, S1, KSIZE, 2, 1)),
    }


# --------------------------- forward (single pallas_call) -------------------

@jax.jit
def conditional_generator_forward(kparams, x, labels):
    b = x.shape[0]
    hw0 = S0 * S0

    # TODO(synk): the nn.Embedding row-gather + concat stay as tiny plain-JAX glue
    # (an in-kernel scalar-prefetch gather is possible but not worth it at this size).
    emb = kparams["emb"][labels.astype(jnp.int32)]                      # (B, 10)
    z = jnp.concatenate([x, emb], axis=1)                               # (B, 26)
    z = jnp.pad(z, ((0, 0), (0, KPAD - z.shape[1])))                    # (B, 32)
    eye = jnp.eye(hw0, dtype=z.dtype)
    zaug = (eye[None, :, :, None] * z[:, None, None, :]).reshape(b * hw0, hw0 * KPAD)  # (B*4, 128)

    out = pl.pallas_call(
        _cgan_generator_kernel,
        out_shape=jax.ShapeDtypeStruct((b * S2 * S2, COUT_PAD), jnp.float32),
        compiler_params=pltpu.CompilerParams(vmem_limit_bytes=_VMEM_LIMIT),
    )(zaug, kparams["waug"], kparams["brows"], kparams["g1"], kparams["b1"],
      kparams["w1k"], kparams["t1"], kparams["g2"], kparams["b2"],
      kparams["w2k"], kparams["t2"])

    # (B*8*8, 128) -> NCHW (B, 3, 8, 8), matching the PyTorch module output.
    return out[:, :C_OUT].reshape(b, S2, S2, C_OUT).transpose(0, 3, 1, 2)


# ------------------------- pure-JAX f32 reference ---------------------------

def _convtranspose2d_as_matrix(w, hin, win, stride=2, pad=1):
    """Reference-only dense matrix: flatten_NCHW(x) @ M == ConvTranspose2d(x, w, s, p)."""
    w = np.asarray(w, np.float32)
    cin, cout, k, _ = w.shape
    hout = (hin - 1) * stride - 2 * pad + k
    wout = (win - 1) * stride - 2 * pad + k
    m = np.zeros((cin, hin, win, cout, hout, wout), np.float32)
    for kh in range(k):
        for kw in range(k):
            for ih in range(hin):
                oh = ih * stride - pad + kh
                if not 0 <= oh < hout:
                    continue
                for iw in range(win):
                    ow = iw * stride - pad + kw
                    if not 0 <= ow < wout:
                        continue
                    m[:, ih, iw, :, oh, ow] += w[:, :, kh, kw]
    return jnp.asarray(m.reshape(cin * hin * win, cout * hout * wout))


def _bn_ref(x, g, b):
    m = jnp.mean(x, axis=(0, 2, 3), keepdims=True)
    v = jnp.mean(jnp.square(x - m), axis=(0, 2, 3), keepdims=True)
    return (x - m) * jax.lax.rsqrt(v + EPS) * g.reshape(1, -1, 1, 1) + b.reshape(1, -1, 1, 1)


def reference_forward(params, x, labels):
    """Pure-JAX f32 reference with exact module semantics (no Pallas)."""
    b = x.shape[0]
    emb = params["emb"][labels.astype(jnp.int32)]
    z = jnp.concatenate([x, emb], axis=1)
    h = (z @ params["w_lin"] + params["b_lin"]).reshape(b, C1, S0, S0)
    h = _bn_ref(h, params["g1"], params["b1"])
    h = (h.reshape(b, -1) @ _convtranspose2d_as_matrix(params["w_ct1"], S0, S0)).reshape(b, C2, S1, S1)
    h = _bn_ref(h, params["g2"], params["b2"])
    h = jnp.where(h >= 0.0, h, NEG_SLOPE * h)
    h = (h.reshape(b, -1) @ _convtranspose2d_as_matrix(params["w_ct2"], S1, S1)).reshape(b, C_OUT, S2, S2)
    return jnp.tanh(h)


# ----------------------------------- main ------------------------------------

if __name__ == "__main__":
    key = jax.random.PRNGKey(0)
    pkey, xkey, lkey = jax.random.split(key, 3)

    params = init_params(pkey)
    kparams = prepare_kernel_params(params, BATCH)

    x = jax.random.normal(xkey, (BATCH, NOISE_SIZE), jnp.float32)
    labels = jax.random.randint(lkey, (BATCH,), 0, N_CLASSES, dtype=jnp.int32)

    out = conditional_generator_forward(kparams, x, labels)
    out = jax.block_until_ready(out)

    assert out.shape == (BATCH, 3, G_DIM, G_DIM), out.shape
    assert out.dtype == jnp.float32
    assert bool(jnp.all(jnp.isfinite(out)))
    assert bool(jnp.all(jnp.abs(out) <= 1.0))   # tanh output range

    # Numerical check vs. the pure-JAX f32 reference (bf16 weights -> loose tolerance).
    ref = reference_forward(params, x, labels)
    err = float(jnp.max(jnp.abs(out - ref)))
    assert err < 1e-1, f"max abs error vs reference: {err}"

    print("KERNEL_OK")
</pallas_src>

<mosaic_0001>
module attributes {stable_mosaic.version = 11 : i64} {
  func.func @_cgan_generator_kernel(%arg0: memref<8x128xf32, #tpu.memory_space<vmem>>, %arg1: memref<128x512xf32, #tpu.memory_space<vmem>>, %arg2: memref<8x512xf32, #tpu.memory_space<vmem>>, %arg3: memref<1x512xf32, #tpu.memory_space<vmem>>, %arg4: memref<1x512xf32, #tpu.memory_space<vmem>>, %arg5: memref<16x512x128xbf16, #tpu.memory_space<vmem>>, %arg6: memref<16x32x8xf32, #tpu.memory_space<vmem>>, %arg7: memref<1x128xf32, #tpu.memory_space<vmem>>, %arg8: memref<1x128xf32, #tpu.memory_space<vmem>>, %arg9: memref<16x128x128xbf16, #tpu.memory_space<vmem>>, %arg10: memref<16x128x32xf32, #tpu.memory_space<vmem>>, %arg11: memref<128x128xf32, #tpu.memory_space<vmem>>) attributes {dimension_semantics = [], scalar_prefetch = 0 : i64, scratch_operands = 0 : i64, tpu.core_type = #tpu.core_type<tc>} {
    %c0 = arith.constant 0 : index
    %c0_0 = arith.constant 0 : index
    %0 = vector.load %arg0[%c0, %c0_0] : memref<8x128xf32, #tpu.memory_space<vmem>>, vector<8x128xf32>
    %c0_1 = arith.constant 0 : index
    %c0_2 = arith.constant 0 : index
    %1 = vector.load %arg1[%c0_1, %c0_2] : memref<128x512xf32, #tpu.memory_space<vmem>>, vector<128x512xf32>
    %cst = arith.constant dense<0.000000e+00> : vector<8x512xf32>
    %2 = tpu.matmul %0, %1, %cst {dimension_numbers = #tpu.dot_dimension_numbers<[1], [0], [0], [1], [0, 0, 1, 1], [], []>} : vector<8x128xf32>, vector<128x512xf32>, vector<8x512xf32> -> vector<8x512xf32>
    %c0_3 = arith.constant 0 : index
    %c0_4 = arith.constant 0 : index
    %3 = vector.load %arg2[%c0_3, %c0_4] : memref<8x512xf32, #tpu.memory_space<vmem>>, vector<8x512xf32>
    %4 = arith.addf %2, %3 : vector<8x512xf32>
    %cst_5 = arith.constant dense<0.000000e+00> : vector<512xf32>
    %5 = vector.multi_reduction <add>, %4, %cst_5 [0] : vector<8x512xf32> to vector<512xf32>
    %6 = vector.shape_cast %5 : vector<512xf32> to vector<1x512xf32>
    %cst_6 = arith.constant 8.000000e+00 : f32
    %7 = vector.broadcast %cst_6 : f32 to vector<1x512xf32>
    %8 = arith.divf %6, %7 : vector<1x512xf32>
    %9 = vector.broadcast %8 : vector<1x512xf32> to vector<8x512xf32>
    %10 = arith.subf %4, %9 : vector<8x512xf32>
    %11 = arith.mulf %10, %10 : vector<8x512xf32>
    %cst_7 = arith.constant dense<0.000000e+00> : vector<512xf32>
    %12 = vector.multi_reduction <add>, %11, %cst_7 [0] : vector<8x512xf32> to vector<512xf32>
    %13 = vector.shape_cast %12 : vector<512xf32> to vector<1x512xf32>
    %cst_8 = arith.constant 8.000000e+00 : f32
    %14 = vector.broadcast %cst_8 : f32 to vector<1x512xf32>
    %15 = arith.divf %13, %14 : vector<1x512xf32>
    %16 = vector.broadcast %8 : vector<1x512xf32> to vector<8x512xf32>
    %17 = arith.subf %4, %16 : vector<8x512xf32>
    %cst_9 = arith.constant 9.99999974E-6 : f32
    %18 = vector.broadcast %cst_9 : f32 to vector<1x512xf32>
    %19 = arith.addf %15, %18 : vector<1x512xf32>
    %20 = math.rsqrt %19 : vector<1x512xf32>
    %21 = vector.broadcast %20 : vector<1x512xf32> to vector<8x512xf32>
    %22 = arith.mulf %17, %21 : vector<8x512xf32>
    %c0_10 = arith.constant 0 : index
    %c0_11 = arith.constant 0 : index
    %23 = vector.load %arg3[%c0_10, %c0_11] : memref<1x512xf32, #tpu.memory_space<vmem>>, vector<1x512xf32>
    %24 = vector.broadcast %23 : vector<1x512xf32> to vector<8x512xf32>
    %25 = arith.mulf %22, %24 : vector<8x512xf32>
    %c0_12 = arith.constant 0 : index
    %c0_13 = arith.constant 0 : index
    %26 = vector.load %arg4[%c0_12, %c0_13] : memref<1x512xf32, #tpu.memory_space<vmem>>, vector<1x512xf32>
    %27 = vector.broadcast %26 : vector<1x512xf32> to vector<8x512xf32>
    %28 = arith.addf %25, %27 : vector<8x512xf32>
    %29 = arith.truncf %28 : vector<8x512xf32> to vector<8x512xbf16>
    %cst_14 = arith.constant 0.000000e+00 : f32
    %30 = vector.broadcast %cst_14 : f32 to vector<32x128xf32>
    %c0_15 = arith.constant 0 : index
    %c0_16 = arith.constant 0 : index
    %c0_17 = arith.constant 0 : index
    %31 = vector.load %arg5[%c0_15, %c0_16, %c0_17] : memref<16x512x128xbf16, #tpu.memory_space<vmem>>, vector<1x512x128xbf16>
    %32 = vector.shape_cast %31 : vector<1x512x128xbf16> to vector<512x128xbf16>
    %cst_18 = arith.constant dense<0.000000e+00> : vector<8x128xf32>
    %33 = tpu.matmul %29, %32, %cst_18 {dimension_numbers = #tpu.dot_dimension_numbers<[1], [0], [0], [1], [0, 0, 1, 1], [], []>} : vector<8x512xbf16>, vector<512x128xbf16>, vector<8x128xf32> -> vector<8x128xf32>
    %c0_19 = arith.constant 0 : index
    %c0_20 = arith.constant 0 : index
    %c0_21 = arith.constant 0 : index
    %34 = vector.load %arg6[%c0_19, %c0_20, %c0_21] : memref<16x32x8xf32, #tpu.memory_space<vmem>>, vector<1x32x8xf32>
    %35 = vector.shape_cast %34 : vector<1x32x8xf32> to vector<32x8xf32>
    %cst_22 = arith.constant dense<0.000000e+00> : vector<32x128xf32>
    %36 = tpu.matmul %35, %33, %cst_22 {dimension_numbers = #tpu.dot_dimension_numbers<[1], [0], [0], [1], [0, 0, 1, 1], [], []>} : vector<32x8xf32>, vector<8x128xf32>, vector<32x128xf32> -> vector<32x128xf32>
    %37 = arith.addf %30, %36 : vector<32x128xf32>
    %c1 = arith.constant 1 : index
    %c0_23 = arith.constant 0 : index
    %c0_24 = arith.constant 0 : index
    %38 = vector.load %arg5[%c1, %c0_23, %c0_24] : memref<16x512x128xbf16, #tpu.memory_space<vmem>>, vector<1x512x128xbf16>
    %39 = vector.shape_cast %38 : vector<1x512x128xbf16> to vector<512x128xbf16>
    %cst_25 = arith.constant dense<0.000000e+00> : vector<8x128xf32>
    %40 = tpu.matmul %29, %39, %cst_25 {dimension_numbers = #tpu.dot_dimension_numbers<[1], [0], [0], [1], [0, 0, 1, 1], [], []>} : vector<8x512xbf16>, vector<512x128xbf16>, vector<8x128xf32> -> vector<8x128xf32>
    %c1_26 = arith.constant 1 : index
    %c0_27 = arith.constant 0 : index
    %c0_28 = arith.constant 0 : index
    %41 = vector.load %arg6[%c1_26, %c0_27, %c0_28] : memref<16x32x8xf32, #tpu.memory_space<vmem>>, vector<1x32x8xf32>
    %42 = vector.shape_cast %41 : vector<1x32x8xf32> to vector<32x8xf32>
    %cst_29 = arith.constant dense<0.000000e+00> : vector<32x128xf32>
    %43 = tpu.matmul %42, %40, %cst_29 {dimension_numbers = #tpu.dot_dimension_numbers<[1], [0], [0], [1], [0, 0, 1, 1], [], []>} : vector<32x8xf32>, vector<8x128xf32>, vector<32x128xf32> -> vector<32x128xf32>
    %44 = arith.addf %37, %43 : vector<32x128xf32>
    %c2 = arith.constant 2 : index
    %c0_30 = arith.constant 0 : index
    %c0_31 = arith.constant 0 : index
    %45 = vector.load %arg5[%c2, %c0_30, %c0_31] : memref<16x512x128xbf16, #tpu.memory_space<vmem>>, vector<1x512x128xbf16>
    %46 = vector.shape_cast %45 : vector<1x512x128xbf16> to vector<512x128xbf16>
    %cst_32 = arith.constant dense<0.000000e+00> : vector<8x128xf32>
    %47 = tpu.matmul %29, %46, %cst_32 {dimension_numbers = #tpu.dot_dimension_numbers<[1], [0], [0], [1], [0, 0, 1, 1], [], []>} : vector<8x512xbf16>, vector<512x128xbf16>, vector<8x128xf32> -> vector<8x128xf32>
    %c2_33 = arith.constant 2 : index
    %c0_34 = arith.constant 0 : index
    %c0_35 = arith.constant 0 : index
    %48 = vector.load %arg6[%c2_33, %c0_34, %c0_35] : memref<16x32x8xf32, #tpu.memory_space<vmem>>, vector<1x32x8xf32>
    %49 = vector.shape_cast %48 : vector<1x32x8xf32> to vector<32x8xf32>
    %cst_36 = arith.constant dense<0.000000e+00> : vector<32x128xf32>
    %50 = tpu.matmul %49, %47, %cst_36 {dimension_numbers = #tpu.dot_dimension_numbers<[1], [0], [0], [1], [0, 0, 1, 1], [], []>} : vector<32x8xf32>, vector<8x128xf32>, vector<32x128xf32> -> vector<32x128xf32>
    %51 = arith.addf %44, %50 : vector<32x128xf32>
    %c3 = arith.constant 3 : index
    %c0_37 = arith.constant 0 : index
    %c0_38 = arith.constant 0 : index
    %52 = vector.load %arg5[%c3, %c0_37, %c0_38] : memref<16x512x128xbf16, #tpu.memory_space<vmem>>, vector<1x512x128xbf16>
    %53 = vector.shape_cast %52 : vector<1x512x128xbf16> to vector<512x128xbf16>
    %cst_39 = arith.constant dense<0.000000e+00> : vector<8x128xf32>
    %54 = tpu.matmul %29, %53, %cst_39 {dimension_numbers = #tpu.dot_dimension_numbers<[1], [0], [0], [1], [0, 0, 1, 1], [], []>} : vector<8x512xbf16>, vector<512x128xbf16>, vector<8x128xf32> -> vector<8x128xf32>
    %c3_40 = arith.constant 3 : index
    %c0_41 = arith.constant 0 : index
    %c0_42 = arith.constant 0 : index
    %55 = vector.load %arg6[%c3_40, %c0_41, %c0_42] : memref<16x32x8xf32, #tpu.memory_space<vmem>>, vector<1x32x8xf32>
    %56 = vector.shape_cast %55 : vector<1x32x8xf32> to vector<32x8xf32>
    %cst_43 = arith.constant dense<0.000000e+00> : vector<32x128xf32>
    %57 = tpu.matmul %56, %54, %cst_43 {dimension_numbers = #tpu.dot_dimension_numbers<[1], [0], [0], [1], [0, 0, 1, 1], [], []>} : vector<32x8xf32>, vector<8x128xf32>, vector<32x128xf32> -> vector<32x128xf32>
    %58 = arith.addf %51, %57 : vector<32x128xf32>
    %c4 = arith.constant 4 : index
    %c0_44 = arith.constant 0 : index
    %c0_45 = arith.constant 0 : index
    %59 = vector.load %arg5[%c4, %c0_44, %c0_45] : memref<16x512x128xbf16, #tpu.memory_space<vmem>>, vector<1x512x128xbf16>
    %60 = vector.shape_cast %59 : vector<1x512x128xbf16> to vector<512x128xbf16>
    %cst_46 = arith.constant dense<0.000000e+00> : vector<8x128xf32>
    %61 = tpu.matmul %29, %60, %cst_46 {dimension_numbers = #tpu.dot_dimension_numbers<[1], [0], [0], [1], [0, 0, 1, 1], [], []>} : vector<8x512xbf16>, vector<512x128xbf16>, vector<8x128xf32> -> vector<8x128xf32>
    %c4_47 = arith.constant 4 : index
    %c0_48 = arith.constant 0 : index
    %c0_49 = arith.constant 0 : index
    %62 = vector.load %arg6[%c4_47, %c0_48, %c0_49] : memref<16x32x8xf32, #tpu.memory_space<vmem>>, vector<1x32x8xf32>
    %63 = vector.shape_cast %62 : vector<1x32x8xf32> to vector<32x8xf32>
    %cst_50 = arith.constant dense<0.000000e+00> : vector<32x128xf32>
    %64 = tpu.matmul %63, %61, %cst_50 {dimension_numbers = #tpu.dot_dimension_numbers<[1], [0], [0], [1], [0, 0, 1, 1], [], []>} : vector<32x8xf32>, vector<8x128xf32>, vector<32x128xf32> -> vector<32x128xf32>
    %65 = arith.addf %58, %64 : vector<32x128xf32>
    %c5 = arith.constant 5 : index
    %c0_51 = arith.constant 0 : index
    %c0_52 = arith.constant 0 : index
    %66 = vector.load %arg5[%c5, %c0_51, %c0_52] : memref<16x512x128xbf16, #tpu.memory_space<vmem>>, vector<1x512x128xbf16>
    %67 = vector.shape_cast %66 : vector<1x512x128xbf16> to vector<512x128xbf16>
    %cst_53 = arith.constant dense<0.000000e+00> : vector<8x128xf32>
    %68 = tpu.matmul %29, %67, %cst_53 {dimension_numbers = #tpu.dot_dimension_numbers<[1], [0], [0], [1], [0, 0, 1, 1], [], []>} : vector<8x512xbf16>, vector<512x128xbf16>, vector<8x128xf32> -> vector<8x128xf32>
    %c5_54 = arith.constant 5 : index
    %c0_55 = arith.constant 0 : index
    %c0_56 = arith.constant 0 : index
    %69 = vector.load %arg6[%c5_54, %c0_55, %c0_56] : memref<16x32x8xf32, #tpu.memory_space<vmem>>, vector<1x32x8xf32>
    %70 = vector.shape_cast %69 : vector<1x32x8xf32> to vector<32x8xf32>
    %cst_57 = arith.constant dense<0.000000e+00> : vector<32x128xf32>
    %71 = tpu.matmul %70, %68, %cst_57 {dimension_numbers = #tpu.dot_dimension_numbers<[1], [0], [0], [1], [0, 0, 1, 1], [], []>} : vector<32x8xf32>, vector<8x128xf32>, vector<32x128xf32> -> vector<32x128xf32>
    %72 = arith.addf %65, %71 : vector<32x128xf32>
    %c6 = arith.constant 6 : index
    %c0_58 = arith.constant 0 : index
    %c0_59 = arith.constant 0 : index
    %73 = vector.load %arg5[%c6, %c0_58, %c0_59] : memref<16x512x128xbf16, #tpu.memory_space<vmem>>, vector<1x512x128xbf16>
    %74 = vector.shape_cast %73 : vector<1x512x128xbf16> to vector<512x128xbf16>
    %cst_60 = arith.constant dense<0.000000e+00> : vector<8x128xf32>
    %75 = tpu.matmul %29, %74, %cst_60 {dimension_numbers = #tpu.dot_dimension_numbers<[1], [0], [0], [1], [0, 0, 1, 1], [], []>} : vector<8x512xbf16>, vector<512x128xbf16>, vector<8x128xf32> -> vector<8x128xf32>
    %c6_61 = arith.constant 6 : index
    %c0_62 = arith.constant 0 : index
    %c0_63 = arith.constant 0 : index
    %76 = vector.load %arg6[%c6_61, %c0_62, %c0_63] : memref<16x32x8xf32, #tpu.memory_space<vmem>>, vector<1x32x8xf32>
    %77 = vector.shape_cast %76 : vector<1x32x8xf32> to vector<32x8xf32>
    %cst_64 = arith.constant dense<0.000000e+00> : vector<32x128xf32>
    %78 = tpu.matmul %77, %75, %cst_64 {dimension_numbers = #tpu.dot_dimension_numbers<[1], [0], [0], [1], [0, 0, 1, 1], [], []>} : vector<32x8xf32>, vector<8x128xf32>, vector<32x128xf32> -> vector<32x128xf32>
    %79 = arith.addf %72, %78 : vector<32x128xf32>
    %c7 = arith.constant 7 : index
    %c0_65 = arith.constant 0 : index
    %c0_66 = arith.constant 0 : index
    %80 = vector.load %arg5[%c7, %c0_65, %c0_66] : memref<16x512x128xbf16, #tpu.memory_space<vmem>>, vector<1x512x128xbf16>
    %81 = vector.shape_cast %80 : vector<1x512x128xbf16> to vector<512x128xbf16>
    %cst_67 = arith.constant dense<0.000000e+00> : vector<8x128xf32>
    %82 = tpu.matmul %29, %81, %cst_67 {dimension_numbers = #tpu.dot_dimension_numbers<[1], [0], [0], [1], [0, 0, 1, 1], [], []>} : vector<8x512xbf16>, vector<512x128xbf16>, vector<8x128xf32> -> vector<8x128xf32>
    %c7_68 = arith.constant 7 : index
    %c0_69 = arith.constant 0 : index
    %c0_70 = arith.constant 0 : index
    %83 = vector.load %arg6[%c7_68, %c0_69, %c0_70] : memref<16x32x8xf32, #tpu.memory_space<vmem>>, vector<1x32x8xf32>
    %84 = vector.shape_cast %83 : vector<1x32x8xf32> to vector<32x8xf32>
    %cst_71 = arith.constant dense<0.000000e+00> : vector<32x128xf32>
    %85 = tpu.matmul %84, %82, %cst_71 {dimension_numbers = #tpu.dot_dimension_numbers<[1], [0], [0], [1], [0, 0, 1, 1], [], []>} : vector<32x8xf32>, vector<8x128xf32>, vector<32x128xf32> -> vector<32x128xf32>
    %86 = arith.addf %79, %85 : vector<32x128xf32>
    %c8 = arith.constant 8 : index
    %c0_72 = arith.constant 0 : index
    %c0_73 = arith.constant 0 : index
    %87 = vector.load %arg5[%c8, %c0_72, %c0_73] : memref<16x512x128xbf16, #tpu.memory_space<vmem>>, vector<1x512x128xbf16>
    %88 = vector.shape_cast %87 : vector<1x512x128xbf16> to vector<512x128xbf16>
    %cst_74 = arith.constant dense<0.000000e+00> : vector<8x128xf32>
    %89 = tpu.matmul %29, %88, %cst_74 {dimension_numbers = #tpu.dot_dimension_numbers<[1], [0], [0], [1], [0, 0, 1, 1], [], []>} : vector<8x512xbf16>, vector<512x128xbf16>, vector<8x128xf32> -> vector<8x128xf32>
    %c8_75 = arith.constant 8 : index
    %c0_76 = arith.constant 0 : index
    %c0_77 = arith.constant 0 : index
    %90 = vector.load %arg6[%c8_75, %c0_76, %c0_77] : memref<16x32x8xf32, #tpu.memory_space<vmem>>, vector<1x32x8xf32>
    %91 = vector.shape_cast %90 : vector<1x32x8xf32> to vector<32x8xf32>
    %cst_78 = arith.constant dense<0.000000e+00> : vector<32x128xf32>
    %92 = tpu.matmul %91, %89, %cst_78 {dimension_numbers = #tpu.dot_dimension_numbers<[1], [0], [0], [1], [0, 0, 1, 1], [], []>} : vector<32x8xf32>, vector<8x128xf32>, vector<32x128xf32> -> vector<32x128xf32>
    %93 = arith.addf %86, %92 : vector<32x128xf32>
    %c9 = arith.constant 9 : index
    %c0_79 = arith.constant 0 : index
    %c0_80 = arith.constant 0 : index
    %94 = vector.load %arg5[%c9, %c0_79, %c0_80] : memref<16x512x128xbf16, #tpu.memory_space<vmem>>, vector<1x512x128xbf16>
    %95 = vector.shape_cast %94 : vector<1x512x128xbf16> to vector<512x128xbf16>
    %cst_81 = arith.constant dense<0.000000e+00> : vector<8x128xf32>
    %96 = tpu.matmul %29, %95, %cst_81 {dimension_numbers = #tpu.dot_dimension_numbers<[1], [0], [0], [1], [0, 0, 1, 1], [], []>} : vector<8x512xbf16>, vector<512x128xbf16>, vector<8x128xf32> -> vector<8x128xf32>
    %c9_82 = arith.constant 9 : index
    %c0_83 = arith.constant 0 : index
    %c0_84 = arith.constant 0 : index
    %97 = vector.load %arg6[%c9_82, %c0_83, %c0_84] : memref<16x32x8xf32, #tpu.memory_space<vmem>>, vector<1x32x8xf32>
    %98 = vector.shape_cast %97 : vector<1x32x8xf32> to vector<32x8xf32>
    %cst_85 = arith.constant dense<0.000000e+00> : vector<32x128xf32>
    %99 = tpu.matmul %98, %96, %cst_85 {dimension_numbers = #tpu.dot_dimension_numbers<[1], [0], [0], [1], [0, 0, 1, 1], [], []>} : vector<32x8xf32>, vector<8x128xf32>, vector<32x128xf32> -> vector<32x128xf32>
    %100 = arith.addf %93, %99 : vector<32x128xf32>
    %c10 = arith.constant 10 : index
    %c0_86 = arith.constant 0 : index
    %c0_87 = arith.constant 0 : index
    %101 = vector.load %arg5[%c10, %c0_86, %c0_87] : memref<16x512x128xbf16, #tpu.memory_space<vmem>>, vector<1x512x128xbf16>
    %102 = vector.shape_cast %101 : vector<1x512x128xbf16> to vector<512x128xbf16>
    %cst_88 = arith.constant dense<0.000000e+00> : vector<8x128xf32>
    %103 = tpu.matmul %29, %102, %cst_88 {dimension_numbers = #tpu.dot_dimension_numbers<[1], [0], [0], [1], [0, 0, 1, 1], [], []>} : vector<8x512xbf16>, vector<512x128xbf16>, vector<8x128xf32> -> vector<8x128xf32>
    %c10_89 = arith.constant 10 : index
    %c0_90 = arith.constant 0 : index
    %c0_91 = arith.constant 0 : index
    %104 = vector.load %arg6[%c10_89, %c0_90, %c0_91] : memref<16x32x8xf32, #tpu.memory_space<vmem>>, vector<1x32x8xf32>
    %105 = vector.shape_cast %104 : vector<1x32x8xf32> to vector<32x8xf32>
    %cst_92 = arith.constant dense<0.000000e+00> : vector<32x128xf32>
    %106 = tpu.matmul %105, %103, %cst_92 {dimension_numbers = #tpu.dot_dimension_numbers<[1], [0], [0], [1], [0, 0, 1, 1], [], []>} : vector<32x8xf32>, vector<8x128xf32>, vector<32x128xf32> -> vector<32x128xf32>
    %107 = arith.addf %100, %106 : vector<32x128xf32>
    %c11 = arith.constant 11 : index
    %c0_93 = arith.constant 0 : index
    %c0_94 = arith.constant 0 : index
    %108 = vector.load %arg5[%c11, %c0_93, %c0_94] : memref<16x512x128xbf16, #tpu.memory_space<vmem>>, vector<1x512x128xbf16>
    %109 = vector.shape_cast %108 : vector<1x512x128xbf16> to vector<512x128xbf16>
    %cst_95 = arith.constant dense<0.000000e+00> : vector<8x128xf32>
    %110 = tpu.matmul %29, %109, %cst_95 {dimension_numbers = #tpu.dot_dimension_numbers<[1], [0], [0], [1], [0, 0, 1, 1], [], []>} : vector<8x512xbf16>, vector<512x128xbf16>, vector<8x128xf32> -> vector<8x128xf32>
    %c11_96 = arith.constant 11 : index
    %c0_97 = arith.constant 0 : index
    %c0_98 = arith.constant 0 : index
    %111 = vector.load %arg6[%c11_96, %c0_97, %c0_98] : memref<16x32x8xf32, #tpu.memory_space<vmem>>, vector<1x32x8xf32>
    %112 = vector.shape_cast %111 : vector<1x32x8xf32> to vector<32x8xf32>
    %cst_99 = arith.constant dense<0.000000e+00> : vector<32x128xf32>
    %113 = tpu.matmul %112, %110, %cst_99 {dimension_numbers = #tpu.dot_dimension_numbers<[1], [0], [0], [1], [0, 0, 1, 1], [], []>} : vector<32x8xf32>, vector<8x128xf32>, vector<32x128xf32> -> vector<32x128xf32>
    %114 = arith.addf %107, %113 : vector<32x128xf32>
    %c12 = arith.constant 12 : index
    %c0_100 = arith.constant 0 : index
    %c0_101 = arith.constant 0 : index
    %115 = vector.load %arg5[%c12, %c0_100, %c0_101] : memref<16x512x128xbf16, #tpu.memory_space<vmem>>, vector<1x512x128xbf16>
    %116 = vector.shape_cast %115 : vector<1x512x128xbf16> to vector<512x128xbf16>
    %cst_102 = arith.constant dense<0.000000e+00> : vector<8x128xf32>
    %117 = tpu.matmul %29, %116, %cst_102 {dimension_numbers = #tpu.dot_dimension_numbers<[1], [0], [0], [1], [0, 0, 1, 1], [], []>} : vector<8x512xbf16>, vector<512x128xbf16>, vector<8x128xf32> -> vector<8x128xf32>
    %c12_103 = arith.constant 12 : index
    %c0_104 = arith.constant 0 : index
    %c0_105 = arith.constant 0 : index
    %118 = vector.load %arg6[%c12_103, %c0_104, %c0_105] : memref<16x32x8xf32, #tpu.memory_space<vmem>>, vector<1x32x8xf32>
    %119 = vector.shape_cast %118 : vector<1x32x8xf32> to vector<32x8xf32>
    %cst_106 = arith.constant dense<0.000000e+00> : vector<32x128xf32>
    %120 = tpu.matmul %119, %117, %cst_106 {dimension_numbers = #tpu.dot_dimension_numbers<[1], [0], [0], [1], [0, 0, 1, 1], [], []>} : vector<32x8xf32>, vector<8x128xf32>, vector<32x128xf32> -> vector<32x128xf32>
    %121 = arith.addf %114, %120 : vector<32x128xf32>
    %c13 = arith.constant 13 : index
    %c0_107 = arith.constant 0 : index
    %c0_108 = arith.constant 0 : index
    %122 = vector.load %arg5[%c13, %c0_107, %c0_108] : memref<16x512x128xbf16, #tpu.memory_space<vmem>>, vector<1x512x128xbf16>
    %123 = vector.shape_cast %122 : vector<1x512x128xbf16> to vector<512x128xbf16>
    %cst_109 = arith.constant dense<0.000000e+00> : vector<8x128xf32>
    %124 = tpu.matmul %29, %123, %cst_109 {dimension_numbers = #tpu.dot_dimension_numbers<[1], [0], [0], [1], [0, 0, 1, 1], [], []>} : vector<8x512xbf16>, vector<512x128xbf16>, vector<8x128xf32> -> vector<8x128xf32>
    %c13_110 = arith.constant 13 : index
    %c0_111 = arith.constant 0 : index
    %c0_112 = arith.constant 0 : index
    %125 = vector.load %arg6[%c13_110, %c0_111, %c0_112] : memref<16x32x8xf32, #tpu.memory_space<vmem>>, vector<1x32x8xf32>
    %126 = vector.shape_cast %125 : vector<1x32x8xf32> to vector<32x8xf32>
    %cst_113 = arith.constant dense<0.000000e+00> : vector<32x128xf32>
    %127 = tpu.matmul %126, %124, %cst_113 {dimension_numbers = #tpu.dot_dimension_numbers<[1], [0], [0], [1], [0, 0, 1, 1], [], []>} : vector<32x8xf32>, vector<8x128xf32>, vector<32x128xf32> -> vector<32x128xf32>
    %128 = arith.addf %121, %127 : vector<32x128xf32>
    %c14 = arith.constant 14 : index
    %c0_114 = arith.constant 0 : index
    %c0_115 = arith.constant 0 : index
    %129 = vector.load %arg5[%c14, %c0_114, %c0_115] : memref<16x512x128xbf16, #tpu.memory_space<vmem>>, vector<1x512x128xbf16>
    %130 = vector.shape_cast %129 : vector<1x512x128xbf16> to vector<512x128xbf16>
    %cst_116 = arith.constant dense<0.000000e+00> : vector<8x128xf32>
    %131 = tpu.matmul %29, %130, %cst_116 {dimension_numbers = #tpu.dot_dimension_numbers<[1], [0], [0], [1], [0, 0, 1, 1], [], []>} : vector<8x512xbf16>, vector<512x128xbf16>, vector<8x128xf32> -> vector<8x128xf32>
    %c14_117 = arith.constant 14 : index
    %c0_118 = arith.constant 0 : index
    %c0_119 = arith.constant 0 : index
    %132 = vector.load %arg6[%c14_117, %c0_118, %c0_119] : memref<16x32x8xf32, #tpu.memory_space<vmem>>, vector<1x32x8xf32>
    %133 = vector.shape_cast %132 : vector<1x32x8xf32> to vector<32x8xf32>
    %cst_120 = arith.constant dense<0.000000e+00> : vector<32x128xf32>
    %134 = tpu.matmul %133, %131, %cst_120 {dimension_numbers = #tpu.dot_dimension_numbers<[1], [0], [0], [1], [0, 0, 1, 1], [], []>} : vector<32x8xf32>, vector<8x128xf32>, vector<32x128xf32> -> vector<32x128xf32>
    %135 = arith.addf %128, %134 : vector<32x128xf32>
    %c15 = arith.constant 15 : index
    %c0_121 = arith.constant 0 : index
    %c0_122 = arith.constant 0 : index
    %136 = vector.load %arg5[%c15, %c0_121, %c0_122] : memref<16x512x128xbf16, #tpu.memory_space<vmem>>, vector<1x512x128xbf16>
    %137 = vector.shape_cast %136 : vector<1x512x128xbf16> to vector<512x128xbf16>
    %cst_123 = arith.constant dense<0.000000e+00> : vector<8x128xf32>
    %138 = tpu.matmul %29, %137, %cst_123 {dimension_numbers = #tpu.dot_dimension_numbers<[1], [0], [0], [1], [0, 0, 1, 1], [], []>} : vector<8x512xbf16>, vector<512x128xbf16>, vector<8x128xf32> -> vector<8x128xf32>
    %c15_124 = arith.constant 15 : index
    %c0_125 = arith.constant 0 : index
    %c0_126 = arith.constant 0 : index
    %139 = vector.load %arg6[%c15_124, %c0_125, %c0_126] : memref<16x32x8xf32, #tpu.memory_space<vmem>>, vector<1x32x8xf32>
    %140 = vector.shape_cast %139 : vector<1x32x8xf32> to vector<32x8xf32>
    %cst_127 = arith.constant dense<0.000000e+00> : vector<32x128xf32>
    %141 = tpu.matmul %140, %138, %cst_127 {dimension_numbers = #tpu.dot_dimension_numbers<[1], [0], [0], [1], [0, 0, 1, 1], [], []>} : vector<32x8xf32>, vector<8x128xf32>, vector<32x128xf32> -> vector<32x128xf32>
    %142 = arith.addf %135, %141 : vector<32x128xf32>
    %cst_128 = arith.constant dense<0.000000e+00> : vector<128xf32>
    %143 = vector.multi_reduction <add>, %142, %cst_128 [0] : vector<32x128xf32> to vector<128xf32>
    %144 = vector.shape_cast %143 : vector<128xf32> to vector<1x128xf32>
    %cst_129 = arith.constant 3.200000e+01 : f32
    %145 = vector.broadcast %cst_129 : f32 to vector<1x128xf32>
    %146 = arith.divf %144, %145 : vector<1x128xf32>
    %147 = vector.broadcast %146 : vector<1x128xf32> to vector<32x128xf32>
    %148 = arith.subf %142, %147 : vector<32x128xf32>
    %149 = arith.mulf %148, %148 : vector<32x128xf32>
    %cst_130 = arith.constant dense<0.000000e+00> : vector<128xf32>
    %150 = vector.multi_reduction <add>, %149, %cst_130 [0] : vector<32x128xf32> to vector<128xf32>
    %151 = vector.shape_cast %150 : vector<128xf32> to vector<1x128xf32>
    %cst_131 = arith.constant 3.200000e+01 : f32
    %152 = vector.broadcast %cst_131 : f32 to vector<1x128xf32>
    %153 = arith.divf %151, %152 : vector<1x128xf32>
    %154 = vector.broadcast %146 : vector<1x128xf32> to vector<32x128xf32>
    %155 = arith.subf %142, %154 : vector<32x128xf32>
    %cst_132 = arith.constant 9.99999974E-6 : f32
    %156 = vector.broadcast %cst_132 : f32 to vector<1x128xf32>
    %157 = arith.addf %153, %156 : vector<1x128xf32>
    %158 = math.rsqrt %157 : vector<1x128xf32>
    %159 = vector.broadcast %158 : vector<1x128xf32> to vector<32x128xf32>
    %160 = arith.mulf %155, %159 : vector<32x128xf32>
    %c0_133 = arith.constant 0 : index
    %c0_134 = arith.constant 0 : index
    %161 = vector.load %arg7[%c0_133, %c0_134] : memref<1x128xf32, #tpu.memory_space<vmem>>, vector<1x128xf32>
    %162 = vector.broadcast %161 : vector<1x128xf32> to vector<32x128xf32>
    %163 = arith.mulf %160, %162 : vector<32x128xf32>
    %c0_135 = arith.constant 0 : index
    %c0_136 = arith.constant 0 : index
    %164 = vector.load %arg8[%c0_135, %c0_136] : memref<1x128xf32, #tpu.memory_space<vmem>>, vector<1x128xf32>
    %165 = vector.broadcast %164 : vector<1x128xf32> to vector<32x128xf32>
    %166 = arith.addf %163, %165 : vector<32x128xf32>
    %cst_137 = arith.constant 0.000000e+00 : f32
    %167 = vector.broadcast %cst_137 : f32 to vector<32x128xf32>
    %168 = arith.cmpf oge, %166, %167 : vector<32x128xf32>
    %cst_138 = arith.constant 2.000000e-01 : f32
    %169 = vector.broadcast %cst_138 : f32 to vector<32x128xf32>
    %170 = arith.mulf %169, %166 : vector<32x128xf32>
    %171 = arith.select %168, %166, %170 : vector<32x128xi1>, vector<32x128xf32>
    %172 = arith.truncf %171 : vector<32x128xf32> to vector<32x128xbf16>
    %cst_139 = arith.constant 0.000000e+00 : f32
    %173 = vector.broadcast %cst_139 : f32 to vector<128x128xf32>
    %c0_140 = arith.constant 0 : index
    %c0_141 = arith.constant 0 : index
    %c0_142 = arith.constant 0 : index
    %174 = vector.load %arg9[%c0_140, %c0_141, %c0_142] : memref<16x128x128xbf16, #tpu.memory_space<vmem>>, vector<1x128x128xbf16>
    %175 = vector.shape_cast %174 : vector<1x128x128xbf16> to vector<128x128xbf16>
    %cst_143 = arith.constant dense<0.000000e+00> : vector<32x128xf32>
    %176 = tpu.matmul %172, %175, %cst_143 {dimension_numbers = #tpu.dot_dimension_numbers<[1], [0], [0], [1], [0, 0, 1, 1], [], []>} : vector<32x128xbf16>, vector<128x128xbf16>, vector<32x128xf32> -> vector<32x128xf32>
    %c0_144 = arith.constant 0 : index
    %c0_145 = arith.constant 0 : index
    %c0_146 = arith.constant 0 : index
    %177 = vector.load %arg10[%c0_144, %c0_145, %c0_146] : memref<16x128x32xf32, #tpu.memory_space<vmem>>, vector<1x128x32xf32>
    %178 = vector.shape_cast %177 : vector<1x128x32xf32> to vector<128x32xf32>
    %cst_147 = arith.constant dense<0.000000e+00> : vector<128x128xf32>
    %179 = tpu.matmul %178, %176, %cst_147 {dimension_numbers = #tpu.dot_dimension_numbers<[1], [0], [0], [1], [0, 0, 1, 1], [], []>} : vector<128x32xf32>, vector<32x128xf32>, vector<128x128xf32> -> vector<128x128xf32>
    %180 = arith.addf %173, %179 : vector<128x128xf32>
    %c1_148 = arith.constant 1 : index
    %c0_149 = arith.constant 0 : index
    %c0_150 = arith.constant 0 : index
    %181 = vector.load %arg9[%c1_148, %c0_149, %c0_150] : memref<16x128x128xbf16, #tpu.memory_space<vmem>>, vector<1x128x128xbf16>
    %182 = vector.shape_cast %181 : vector<1x128x128xbf16> to vector<128x128xbf16>
    %cst_151 = arith.constant dense<0.000000e+00> : vector<32x128xf32>
    %183 = tpu.matmul %172, %182, %cst_151 {dimension_numbers = #tpu.dot_dimension_numbers<[1], [0], [0], [1], [0, 0, 1, 1], [], []>} : vector<32x128xbf16>, vector<128x128xbf16>, vector<32x128xf32> -> vector<32x128xf32>
    %c1_152 = arith.constant 1 : index
    %c0_153 = arith.constant 0 : index
    %c0_154 = arith.constant 0 : index
    %184 = vector.load %arg10[%c1_152, %c0_153, %c0_154] : memref<16x128x32xf32, #tpu.memory_space<vmem>>, vector<1x128x32xf32>
    %185 = vector.shape_cast %184 : vector<1x128x32xf32> to vector<128x32xf32>
    %cst_155 = arith.constant dense<0.000000e+00> : vector<128x128xf32>
    %186 = tpu.matmul %185, %183, %cst_155 {dimension_numbers = #tpu.dot_dimension_numbers<[1], [0], [0], [1], [0, 0, 1, 1], [], []>} : vector<128x32xf32>, vector<32x128xf32>, vector<128x128xf32> -> vector<128x128xf32>
    %187 = arith.addf %180, %186 : vector<128x128xf32>
    %c2_156 = arith.constant 2 : index
    %c0_157 = arith.constant 0 : index
    %c0_158 = arith.constant 0 : index
    %188 = vector.load %arg9[%c2_156, %c0_157, %c0_158] : memref<16x128x128xbf16, #tpu.memory_space<vmem>>, vector<1x128x128xbf16>
    %189 = vector.shape_cast %188 : vector<1x128x128xbf16> to vector<128x128xbf16>
    %cst_159 = arith.constant dense<0.000000e+00> : vector<32x128xf32>
    %190 = tpu.matmul %172, %189, %cst_159 {dimension_numbers = #tpu.dot_dimension_numbers<[1], [0], [0], [1], [0, 0, 1, 1], [], []>} : vector<32x128xbf16>, vector<128x128xbf16>, vector<32x128xf32> -> vector<32x128xf32>
    %c2_160 = arith.constant 2 : index
    %c0_161 = arith.constant 0 : index
    %c0_162 = arith.constant 0 : index
    %191 = vector.load %arg10[%c2_160, %c0_161, %c0_162] : memref<16x128x32xf32, #tpu.memory_space<vmem>>, vector<1x128x32xf32>
    %192 = vector.shape_cast %191 : vector<1x128x32xf32> to vector<128x32xf32>
    %cst_163 = arith.constant dense<0.000000e+00> : vector<128x128xf32>
    %193 = tpu.matmul %192, %190, %cst_163 {dimension_numbers = #tpu.dot_dimension_numbers<[1], [0], [0], [1], [0, 0, 1, 1], [], []>} : vector<128x32xf32>, vector<32x128xf32>, vector<128x128xf32> -> vector<128x128xf32>
    %194 = arith.addf %187, %193 : vector<128x128xf32>
    %c3_164 = arith.constant 3 : index
    %c0_165 = arith.constant 0 : index
    %c0_166 = arith.constant 0 : index
    %195 = vector.load %arg9[%c3_164, %c0_165, %c0_166] : memref<16x128x128xbf16, #tpu.memory_space<vmem>>, vector<1x128x128xbf16>
    %196 = vector.shape_cast %195 : vector<1x128x128xbf16> to vector<128x128xbf16>
    %cst_167 = arith.constant dense<0.000000e+00> : vector<32x128xf32>
    %197 = tpu.matmul %172, %196, %cst_167 {dimension_numbers = #tpu.dot_dimension_numbers<[1], [0], [0], [1], [0, 0, 1, 1], [], []>} : vector<32x128xbf16>, vector<128x128xbf16>, vector<32x128xf32> -> vector<32x128xf32>
    %c3_168 = arith.constant 3 : index
    %c0_169 = arith.constant 0 : index
    %c0_170 = arith.constant 0 : index
    %198 = vector.load %arg10[%c3_168, %c0_169, %c0_170] : memref<16x128x32xf32, #tpu.memory_space<vmem>>, vector<1x128x32xf32>
    %199 = vector.shape_cast %198 : vector<1x128x32xf32> to vector<128x32xf32>
    %cst_171 = arith.constant dense<0.000000e+00> : vector<128x128xf32>
    %200 = tpu.matmul %199, %197, %cst_171 {dimension_numbers = #tpu.dot_dimension_numbers<[1], [0], [0], [1], [0, 0, 1, 1], [], []>} : vector<128x32xf32>, vector<32x128xf32>, vector<128x128xf32> -> vector<128x128xf32>
    %201 = arith.addf %194, %200 : vector<128x128xf32>
    %c4_172 = arith.constant 4 : index
    %c0_173 = arith.constant 0 : index
    %c0_174 = arith.constant 0 : index
    %202 = vector.load %arg9[%c4_172, %c0_173, %c0_174] : memref<16x128x128xbf16, #tpu.memory_space<vmem>>, vector<1x128x128xbf16>
    %203 = vector.shape_cast %202 : vector<1x128x128xbf16> to vector<128x128xbf16>
    %cst_175 = arith.constant dense<0.000000e+00> : vector<32x128xf32>
    %204 = tpu.matmul %172, %203, %cst_175 {dimension_numbers = #tpu.dot_dimension_numbers<[1], [0], [0], [1], [0, 0, 1, 1], [], []>} : vector<32x128xbf16>, vector<128x128xbf16>, vector<32x128xf32> -> vector<32x128xf32>
    %c4_176 = arith.constant 4 : index
    %c0_177 = arith.constant 0 : index
    %c0_178 = arith.constant 0 : index
    %205 = vector.load %arg10[%c4_176, %c0_177, %c0_178] : memref<16x128x32xf32, #tpu.memory_space<vmem>>, vector<1x128x32xf32>
    %206 = vector.shape_cast %205 : vector<1x128x32xf32> to vector<128x32xf32>
    %cst_179 = arith.constant dense<0.000000e+00> : vector<128x128xf32>
    %207 = tpu.matmul %206, %204, %cst_179 {dimension_numbers = #tpu.dot_dimension_numbers<[1], [0], [0], [1], [0, 0, 1, 1], [], []>} : vector<128x32xf32>, vector<32x128xf32>, vector<128x128xf32> -> vector<128x128xf32>
    %208 = arith.addf %201, %207 : vector<128x128xf32>
    %c5_180 = arith.constant 5 : index
    %c0_181 = arith.constant 0 : index
    %c0_182 = arith.constant 0 : index
    %209 = vector.load %arg9[%c5_180, %c0_181, %c0_182] : memref<16x128x128xbf16, #tpu.memory_space<vmem>>, vector<1x128x128xbf16>
    %210 = vector.shape_cast %209 : vector<1x128x128xbf16> to vector<128x128xbf16>
    %cst_183 = arith.constant dense<0.000000e+00> : vector<32x128xf32>
    %211 = tpu.matmul %172, %210, %cst_183 {dimension_numbers = #tpu.dot_dimension_numbers<[1], [0], [0], [1], [0, 0, 1, 1], [], []>} : vector<32x128xbf16>, vector<128x128xbf16>, vector<32x128xf32> -> vector<32x128xf32>
    %c5_184 = arith.constant 5 : index
    %c0_185 = arith.constant 0 : index
    %c0_186 = arith.constant 0 : index
    %212 = vector.load %arg10[%c5_184, %c0_185, %c0_186] : memref<16x128x32xf32, #tpu.memory_space<vmem>>, vector<1x128x32xf32>
    %213 = vector.shape_cast %212 : vector<1x128x32xf32> to vector<128x32xf32>
    %cst_187 = arith.constant dense<0.000000e+00> : vector<128x128xf32>
    %214 = tpu.matmul %213, %211, %cst_187 {dimension_numbers = #tpu.dot_dimension_numbers<[1], [0], [0], [1], [0, 0, 1, 1], [], []>} : vector<128x32xf32>, vector<32x128xf32>, vector<128x128xf32> -> vector<128x128xf32>
    %215 = arith.addf %208, %214 : vector<128x128xf32>
    %c6_188 = arith.constant 6 : index
    %c0_189 = arith.constant 0 : index
    %c0_190 = arith.constant 0 : index
    %216 = vector.load %arg9[%c6_188, %c0_189, %c0_190] : memref<16x128x128xbf16, #tpu.memory_space<vmem>>, vector<1x128x128xbf16>
    %217 = vector.shape_cast %216 : vector<1x128x128xbf16> to vector<128x128xbf16>
    %cst_191 = arith.constant dense<0.000000e+00> : vector<32x128xf32>
    %218 = tpu.matmul %172, %217, %cst_191 {dimension_numbers = #tpu.dot_dimension_numbers<[1], [0], [0], [1], [0, 0, 1, 1], [], []>} : vector<32x128xbf16>, vector<128x128xbf16>, vector<32x128xf32> -> vector<32x128xf32>
    %c6_192 = arith.constant 6 : index
    %c0_193 = arith.constant 0 : index
    %c0_194 = arith.constant 0 : index
    %219 = vector.load %arg10[%c6_192, %c0_193, %c0_194] : memref<16x128x32xf32, #tpu.memory_space<vmem>>, vector<1x128x32xf32>
    %220 = vector.shape_cast %219 : vector<1x128x32xf32> to vector<128x32xf32>
    %cst_195 = arith.constant dense<0.000000e+00> : vector<128x128xf32>
    %221 = tpu.matmul %220, %218, %cst_195 {dimension_numbers = #tpu.dot_dimension_numbers<[1], [0], [0], [1], [0, 0, 1, 1], [], []>} : vector<128x32xf32>, vector<32x128xf32>, vector<128x128xf32> -> vector<128x128xf32>
    %222 = arith.addf %215, %221 : vector<128x128xf32>
    %c7_196 = arith.constant 7 : index
    %c0_197 = arith.constant 0 : index
    %c0_198 = arith.constant 0 : index
    %223 = vector.load %arg9[%c7_196, %c0_197, %c0_198] : memref<16x128x128xbf16, #tpu.memory_space<vmem>>, vector<1x128x128xbf16>
    %224 = vector.shape_cast %223 : vector<1x128x128xbf16> to vector<128x128xbf16>
    %cst_199 = arith.constant dense<0.000000e+00> : vector<32x128xf32>
    %225 = tpu.matmul %172, %224, %cst_199 {dimension_numbers = #tpu.dot_dimension_numbers<[1], [0], [0], [1], [0, 0, 1, 1], [], []>} : vector<32x128xbf16>, vector<128x128xbf16>, vector<32x128xf32> -> vector<32x128xf32>
    %c7_200 = arith.constant 7 : index
    %c0_201 = arith.constant 0 : index
    %c0_202 = arith.constant 0 : index
    %226 = vector.load %arg10[%c7_200, %c0_201, %c0_202] : memref<16x128x32xf32, #tpu.memory_space<vmem>>, vector<1x128x32xf32>
    %227 = vector.shape_cast %226 : vector<1x128x32xf32> to vector<128x32xf32>
    %cst_203 = arith.constant dense<0.000000e+00> : vector<128x128xf32>
    %228 = tpu.matmul %227, %225, %cst_203 {dimension_numbers = #tpu.dot_dimension_numbers<[1], [0], [0], [1], [0, 0, 1, 1], [], []>} : vector<128x32xf32>, vector<32x128xf32>, vector<128x128xf32> -> vector<128x128xf32>
    %229 = arith.addf %222, %228 : vector<128x128xf32>
    %c8_204 = arith.constant 8 : index
    %c0_205 = arith.constant 0 : index
    %c0_206 = arith.constant 0 : index
    %230 = vector.load %arg9[%c8_204, %c0_205, %c0_206] : memref<16x128x128xbf16, #tpu.memory_space<vmem>>, vector<1x128x128xbf16>
    %231 = vector.shape_cast %230 : vector<1x128x128xbf16> to vector<128x128xbf16>
    %cst_207 = arith.constant dense<0.000000e+00> : vector<32x128xf32>
    %232 = tpu.matmul %172, %231, %cst_207 {dimension_numbers = #tpu.dot_dimension_numbers<[1], [0], [0], [1], [0, 0, 1, 1], [], []>} : vector<32x128xbf16>, vector<128x128xbf16>, vector<32x128xf32> -> vector<32x128xf32>
    %c8_208 = arith.constant 8 : index
    %c0_209 = arith.constant 0 : index
    %c0_210 = arith.constant 0 : index
    %233 = vector.load %arg10[%c8_208, %c0_209, %c0_210] : memref<16x128x32xf32, #tpu.memory_space<vmem>>, vector<1x128x32xf32>
    %234 = vector.shape_cast %233 : vector<1x128x32xf32> to vector<128x32xf32>
    %cst_211 = arith.constant dense<0.000000e+00> : vector<128x128xf32>
    %235 = tpu.matmul %234, %232, %cst_211 {dimension_numbers = #tpu.dot_dimension_numbers<[1], [0], [0], [1], [0, 0, 1, 1], [], []>} : vector<128x32xf32>, vector<32x128xf32>, vector<128x128xf32> -> vector<128x128xf32>
    %236 = arith.addf %229, %235 : vector<128x128xf32>
    %c9_212 = arith.constant 9 : index
    %c0_213 = arith.constant 0 : index
    %c0_214 = arith.constant 0 : index
    %237 = vector.load %arg9[%c9_212, %c0_213, %c0_214] : memref<16x128x128xbf16, #tpu.memory_space<vmem>>, vector<1x128x128xbf16>
    %238 = vector.shape_cast %237 : vector<1x128x128xbf16> to vector<128x128xbf16>
    %cst_215 = arith.constant dense<0.000000e+00> : vector<32x128xf32>
    %239 = tpu.matmul %172, %238, %cst_215 {dimension_numbers = #tpu.dot_dimension_numbers<[1], [0], [0], [1], [0, 0, 1, 1], [], []>} : vector<32x128xbf16>, vector<128x128xbf16>, vector<32x128xf32> -> vector<32x128xf32>
    %c9_216 = arith.constant 9 : index
    %c0_217 = arith.constant 0 : index
    %c0_218 = arith.constant 0 : index
    %240 = vector.load %arg10[%c9_216, %c0_217, %c0_218] : memref<16x128x32xf32, #tpu.memory_space<vmem>>, vector<1x128x32xf32>
    %241 = vector.shape_cast %240 : vector<1x128x32xf32> to vector<128x32xf32>
    %cst_219 = arith.constant dense<0.000000e+00> : vector<128x128xf32>
    %242 = tpu.matmul %241, %239, %cst_219 {dimension_numbers = #tpu.dot_dimension_numbers<[1], [0], [0], [1], [0, 0, 1, 1], [], []>} : vector<128x32xf32>, vector<32x128xf32>, vector<128x128xf32> -> vector<128x128xf32>
    %243 = arith.addf %236, %242 : vector<128x128xf32>
    %c10_220 = arith.constant 10 : index
    %c0_221 = arith.constant 0 : index
    %c0_222 = arith.constant 0 : index
    %244 = vector.load %arg9[%c10_220, %c0_221, %c0_222] : memref<16x128x128xbf16, #tpu.memory_space<vmem>>, vector<1x128x128xbf16>
    %245 = vector.shape_cast %244 : vector<1x128x128xbf16> to vector<128x128xbf16>
    %cst_223 = arith.constant dense<0.000000e+00> : vector<32x128xf32>
    %246 = tpu.matmul %172, %245, %cst_223 {dimension_numbers = #tpu.dot_dimension_numbers<[1], [0], [0], [1], [0, 0, 1, 1], [], []>} : vector<32x128xbf16>, vector<128x128xbf16>, vector<32x128xf32> -> vector<32x128xf32>
    %c10_224 = arith.constant 10 : index
    %c0_225 = arith.constant 0 : index
    %c0_226 = arith.constant 0 : index
    %247 = vector.load %arg10[%c10_224, %c0_225, %c0_226] : memref<16x128x32xf32, #tpu.memory_space<vmem>>, vector<1x128x32xf32>
    %248 = vector.shape_cast %247 : vector<1x128x32xf32> to vector<128x32xf32>
    %cst_227 = arith.constant dense<0.000000e+00> : vector<128x128xf32>
    %249 = tpu.matmul %248, %246, %cst_227 {dimension_numbers = #tpu.dot_dimension_numbers<[1], [0], [0], [1], [0, 0, 1, 1], [], []>} : vector<128x32xf32>, vector<32x128xf32>, vector<128x128xf32> -> vector<128x128xf32>
    %250 = arith.addf %243, %249 : vector<128x128xf32>
    %c11_228 = arith.constant 11 : index
    %c0_229 = arith.constant 0 : index
    %c0_230 = arith.constant 0 : index
    %251 = vector.load %arg9[%c11_228, %c0_229, %c0_230] : memref<16x128x128xbf16, #tpu.memory_space<vmem>>, vector<1x128x128xbf16>
    %252 = vector.shape_cast %251 : vector<1x128x128xbf16> to vector<128x128xbf16>
    %cst_231 = arith.constant dense<0.000000e+00> : vector<32x128xf32>
    %253 = tpu.matmul %172, %252, %cst_231 {dimension_numbers = #tpu.dot_dimension_numbers<[1], [0], [0], [1], [0, 0, 1, 1], [], []>} : vector<32x128xbf16>, vector<128x128xbf16>, vector<32x128xf32> -> vector<32x128xf32>
    %c11_232 = arith.constant 11 : index
    %c0_233 = arith.constant 0 : index
    %c0_234 = arith.constant 0 : index
    %254 = vector.load %arg10[%c11_232, %c0_233, %c0_234] : memref<16x128x32xf32, #tpu.memory_space<vmem>>, vector<1x128x32xf32>
    %255 = vector.shape_cast %254 : vector<1x128x32xf32> to vector<128x32xf32>
    %cst_235 = arith.constant dense<0.000000e+00> : vector<128x128xf32>
    %256 = tpu.matmul %255, %253, %cst_235 {dimension_numbers = #tpu.dot_dimension_numbers<[1], [0], [0], [1], [0, 0, 1, 1], [], []>} : vector<128x32xf32>, vector<32x128xf32>, vector<128x128xf32> -> vector<128x128xf32>
    %257 = arith.addf %250, %256 : vector<128x128xf32>
    %c12_236 = arith.constant 12 : index
    %c0_237 = arith.constant 0 : index
    %c0_238 = arith.constant 0 : index
    %258 = vector.load %arg9[%c12_236, %c0_237, %c0_238] : memref<16x128x128xbf16, #tpu.memory_space<vmem>>, vector<1x128x128xbf16>
    %259 = vector.shape_cast %258 : vector<1x128x128xbf16> to vector<128x128xbf16>
    %cst_239 = arith.constant dense<0.000000e+00> : vector<32x128xf32>
    %260 = tpu.matmul %172, %259, %cst_239 {dimension_numbers = #tpu.dot_dimension_numbers<[1], [0], [0], [1], [0, 0, 1, 1], [], []>} : vector<32x128xbf16>, vector<128x128xbf16>, vector<32x128xf32> -> vector<32x128xf32>
    %c12_240 = arith.constant 12 : index
    %c0_241 = arith.constant 0 : index
    %c0_242 = arith.constant 0 : index
    %261 = vector.load %arg10[%c12_240, %c0_241, %c0_242] : memref<16x128x32xf32, #tpu.memory_space<vmem>>, vector<1x128x32xf32>
    %262 = vector.shape_cast %261 : vector<1x128x32xf32> to vector<128x32xf32>
    %cst_243 = arith.constant dense<0.000000e+00> : vector<128x128xf32>
    %263 = tpu.matmul %262, %260, %cst_243 {dimension_numbers = #tpu.dot_dimension_numbers<[1], [0], [0], [1], [0, 0, 1, 1], [], []>} : vector<128x32xf32>, vector<32x128xf32>, vector<128x128xf32> -> vector<128x128xf32>
    %264 = arith.addf %257, %263 : vector<128x128xf32>
    %c13_244 = arith.constant 13 : index
    %c0_245 = arith.constant 0 : index
    %c0_246 = arith.constant 0 : index
    %265 = vector.load %arg9[%c13_244, %c0_245, %c0_246] : memref<16x128x128xbf16, #tpu.memory_space<vmem>>, vector<1x128x128xbf16>
    %266 = vector.shape_cast %265 : vector<1x128x128xbf16> to vector<128x128xbf16>
    %cst_247 = arith.constant dense<0.000000e+00> : vector<32x128xf32>
    %267 = tpu.matmul %172, %266, %cst_247 {dimension_numbers = #tpu.dot_dimension_numbers<[1], [0], [0], [1], [0, 0, 1, 1], [], []>} : vector<32x128xbf16>, vector<128x128xbf16>, vector<32x128xf32> -> vector<32x128xf32>
    %c13_248 = arith.constant 13 : index
    %c0_249 = arith.constant 0 : index
    %c0_250 = arith.constant 0 : index
    %268 = vector.load %arg10[%c13_248, %c0_249, %c0_250] : memref<16x128x32xf32, #tpu.memory_space<vmem>>, vector<1x128x32xf32>
    %269 = vector.shape_cast %268 : vector<1x128x32xf32> to vector<128x32xf32>
    %cst_251 = arith.constant dense<0.000000e+00> : vector<128x128xf32>
    %270 = tpu.matmul %269, %267, %cst_251 {dimension_numbers = #tpu.dot_dimension_numbers<[1], [0], [0], [1], [0, 0, 1, 1], [], []>} : vector<128x32xf32>, vector<32x128xf32>, vector<128x128xf32> -> vector<128x128xf32>
    %271 = arith.addf %264, %270 : vector<128x128xf32>
    %c14_252 = arith.constant 14 : index
    %c0_253 = arith.constant 0 : index
    %c0_254 = arith.constant 0 : index
    %272 = vector.load %arg9[%c14_252, %c0_253, %c0_254] : memref<16x128x128xbf16, #tpu.memory_space<vmem>>, vector<1x128x128xbf16>
    %273 = vector.shape_cast %272 : vector<1x128x128xbf16> to vector<128x128xbf16>
    %cst_255 = arith.constant dense<0.000000e+00> : vector<32x128xf32>
    %274 = tpu.matmul %172, %273, %cst_255 {dimension_numbers = #tpu.dot_dimension_numbers<[1], [0], [0], [1], [0, 0, 1, 1], [], []>} : vector<32x128xbf16>, vector<128x128xbf16>, vector<32x128xf32> -> vector<32x128xf32>
    %c14_256 = arith.constant 14 : index
    %c0_257 = arith.constant 0 : index
    %c0_258 = arith.constant 0 : index
    %275 = vector.load %arg10[%c14_256, %c0_257, %c0_258] : memref<16x128x32xf32, #tpu.memory_space<vmem>>, vector<1x128x32xf32>
    %276 = vector.shape_cast %275 : vector<1x128x32xf32> to vector<128x32xf32>
    %cst_259 = arith.constant dense<0.000000e+00> : vector<128x128xf32>
    %277 = tpu.matmul %276, %274, %cst_259 {dimension_numbers = #tpu.dot_dimension_numbers<[1], [0], [0], [1], [0, 0, 1, 1], [], []>} : vector<128x32xf32>, vector<32x128xf32>, vector<128x128xf32> -> vector<128x128xf32>
    %278 = arith.addf %271, %277 : vector<128x128xf32>
    %c15_260 = arith.constant 15 : index
    %c0_261 = arith.constant 0 : index
    %c0_262 = arith.constant 0 : index
    %279 = vector.load %arg9[%c15_260, %c0_261, %c0_262] : memref<16x128x128xbf16, #tpu.memory_space<vmem>>, vector<1x128x128xbf16>
    %280 = vector.shape_cast %279 : vector<1x128x128xbf16> to vector<128x128xbf16>
    %cst_263 = arith.constant dense<0.000000e+00> : vector<32x128xf32>
    %281 = tpu.matmul %172, %280, %cst_263 {dimension_numbers = #tpu.dot_dimension_numbers<[1], [0], [0], [1], [0, 0, 1, 1], [], []>} : vector<32x128xbf16>, vector<128x128xbf16>, vector<32x128xf32> -> vector<32x128xf32>
    %c15_264 = arith.constant 15 : index
    %c0_265 = arith.constant 0 : index
    %c0_266 = arith.constant 0 : index
    %282 = vector.load %arg10[%c15_264, %c0_265, %c0_266] : memref<16x128x32xf32, #tpu.memory_space<vmem>>, vector<1x128x32xf32>
    %283 = vector.shape_cast %282 : vector<1x128x32xf32> to vector<128x32xf32>
    %cst_267 = arith.constant dense<0.000000e+00> : vector<128x128xf32>
    %284 = tpu.matmul %283, %281, %cst_267 {dimension_numbers = #tpu.dot_dimension_numbers<[1], [0], [0], [1], [0, 0, 1, 1], [], []>} : vector<128x32xf32>, vector<32x128xf32>, vector<128x128xf32> -> vector<128x128xf32>
    %285 = arith.addf %278, %284 : vector<128x128xf32>
    %286 = math.tanh %285 : vector<128x128xf32>
    %c0_268 = arith.constant 0 : index
    %c0_269 = arith.constant 0 : index
    %287 = vector.load %arg11[%c0_268, %c0_269] : memref<128x128xf32, #tpu.memory_space<vmem>>, vector<128x128xf32>
    tpu.vector_store %arg11[%c0_268, %c0_269], %286 {strides = array<i32>} : memref<128x128xf32, #tpu.memory_space<vmem>>, vector<128x128xf32>,
    return
  }
}

</mosaic_0001>

<bundles_post_ra>
// kernel: conditional_generator_forward.1
= control target key start
LH: loop header
LB: loop body
LE: loop exit
PB: predicated region body
PF: predicated region fallthrough
CT: control target
= control target key end

     0   :  { %16 = vsyncpa [#allocation3], 0  ;;  %s20231_s0 = inlined_call_operand.vmem [shape: f32[8,128], index: 0, kind: input, shape index: {}]   ;;  %s20232_s1 = inlined_call_operand.hbm [shape: f32[128,512], index: 1, kind: input, shape index: {}]   ;;  %s20233_s2 = inlined_call_operand.hbm [shape: f32[8,512], index: 2, kind: input, shape index: {}]   ;;  %s20234_s3 = inlined_call_operand.hbm [shape: f32[1,512], index: 3, kind: input, shape index: {}]   ;;  %s20235_s4 = inlined_call_operand.hbm [shape: f32[1,512], index: 4, kind: input, shape index: {}]   ;;  %s20236_s5 = inlined_call_operand.hbm [shape: bf16[16,512,128], index: 5, kind: input, shape index: {}]   ;;  %s20237_s6 = inlined_call_operand.vmem [shape: f32[16,32,8], index: 6, kind: input, shape index: {}]   ;;  %s20238_s7 = inlined_call_operand.hbm [shape: f32[1,128], index: 7, kind: input, shape index: {}]   ;;  %s20239_s8 = inlined_call_operand.hbm [shape: f32[1,128], index: 8, kind: input, shape index: {}]   ;;  %s20240_s9 = inlined_call_operand.vmem [shape: bf16[16,128,128], index: 9, kind: input, shape index: {}]   ;;  %s20241_s10 = inlined_call_operand.vmem [shape: f32[16,128,32], index: 10, kind: input, shape index: {}]   ;;  %s20242_s11 = inlined_call_operand.vmem [shape: f32[128,128], index: 11, kind: output, shape index: {}]  }
   0x1   :  { %17 = vsyncpa [#allocation5], 0 }
   0x2   :  { %18 = vsyncpa [#allocation8], 0 }
   0x3   :  { %19 = vsyncpa [#allocation11], 0  ;;  %s17633_s17 = smov [#allocation4]   ;;  %s17634_s19 = smov [#allocation7]  }
   0x4   :  { %s40_s18 = sshll.u32 %s17633_s17, 4  ;;  %s60_s20 = sshll.u32 %s17634_s19, 4  ;;  %s41_s18 = int_to_ptr.vmem [resolvable:$true] %s40_s18  ;;  %s61_s20 = int_to_ptr.vmem [resolvable:$true] %s60_s20 }
   0x5   :  { %s17493_s21 = scalar_lea.vmem %s41_s18, 512  ;;  %p17498_p1 = scmp.lt.s32.totalorder %s41_s18, %s41_s18 }
   0x6   :  { %p17494_p0 = scmp.ne.s32.totalorder %s41_s18, %s17493_s21  ;;  %p17499_p2 = scmp.lt.s32.totalorder %s17493_s21, %s17493_s21 }
   0x8   :  { %p17500_p3 = por %p17499_p2, %p17498_p1 }
   0xa   :  { %p17501_p4 = pnand %p17500_p3, %p17494_p0 }
   0xc   :  { %17504 = shalt.err (!%p17501_p4)
}
   0xd   :  { %43 = dma.hbm_to_vmem [thread:$0]  %s20233_s2, 512, %s41_s18, [#allocation5]  }
   0xe   :  { %s17513_s24 = scalar_lea.vmem %s61_s20, 64  ;;  %p17518_p6 = scmp.lt.s32.totalorder %s61_s20, %s61_s20 }
   0xf   :  { %p17514_p5 = scmp.ne.s32.totalorder %s61_s20, %s17513_s24  ;;  %p17519_p7 = scmp.lt.s32.totalorder %s17513_s24, %s17513_s24 }
  0x11   :  { %p17520_p8 = por %p17519_p7, %p17518_p6 }
  0x13   :  { %p17521_p9 = pnand %p17520_p8, %p17514_p5 }
  0x15   :  { %17524 = shalt.err (!%p17521_p9)
}
  0x16   :  { %63 = dma.hbm_to_vmem [thread:$0]  %s20235_s4, 64, %s61_s20, [#allocation8]  }
  0x17   :  { %s17635_s27 = smov [#allocation10]   ;;  %s17636_s29 = smov [#allocation2]  }
  0x18   :  { %s84_s28 = sshll.u32 %s17635_s27, 4  ;;  %s27_s30 = sshll.u32 %s17636_s29, 4  ;;  %s85_s28 = int_to_ptr.vmem [resolvable:$true] %s84_s28  ;;  %s28_s30 = int_to_ptr.vmem [resolvable:$true] %s27_s30 }
  0x19   :  { %s17533_s12 = scalar_lea.vmem %s85_s28, 16  ;;  %s17537_s2 = scalar_lea.vmem %s85_s28, 32 }
  0x1a   :  { %p17534_p10 = scmp.ne.s32.totalorder %s85_s28, %s17533_s12  ;;  %p17538_p11 = scmp.lt.s32.totalorder %s85_s28, %s85_s28 }
  0x1b   :  { %p17539_p12 = scmp.lt.s32.totalorder %s17537_s2, %s17533_s12 }
  0x1d   :  { %p17540_p13 = por %p17539_p12, %p17538_p11 }
  0x1f   :  { %p17541_p0 = pnand %p17540_p13, %p17534_p10 }
  0x21   :  { %17544 = shalt.err (!%p17541_p0)
}
  0x22   :  { %87 = dma.hbm_to_vmem [thread:$0]  %s20238_s7, 16, %s85_s28, [#allocation11]  }
  0x23   :  { %s17553_s15 = scalar_lea.vmem %s28_s30, 8192  ;;  %p17558_p2 = scmp.lt.s32.totalorder %s28_s30, %s28_s30 }
  0x24   :  { %p17554_p1 = scmp.ne.s32.totalorder %s28_s30, %s17553_s15  ;;  %p17559_p3 = scmp.lt.s32.totalorder %s17553_s15, %s17553_s15 }
  0x26   :  { %p17560_p4 = por %p17559_p3, %p17558_p2 }
  0x28   :  { %p17561_p5 = pnand %p17560_p4, %p17554_p1 }
  0x2a   :  { %17564 = shalt.err (!%p17561_p5)
}
  0x2b   :  { %s17637_s4 = smov 512   ;;  %s17638_s16 = smov 32  }
  0x2c   :  { %33 = dma.hbm_to_vmem [thread:$0]  %s20232_s1, 8192, %s28_s30, [#allocation3], %s17637_s4, %s17637_s4, %s17638_s16  }
  0x2d   :  { %s17639_s19 = smov [#allocation6]   ;;  %s17640_s21 = smov [#allocation9]  }
  0x2e   :  { %s50_s20 = sshll.u32 %s17639_s19, 4  ;;  %s69_s22 = sshll.u32 %s17640_s21, 4  ;;  %s51_s20 = int_to_ptr.vmem [resolvable:$true] %s50_s20  ;;  %s70_s22 = int_to_ptr.vmem [resolvable:$true] %s69_s22 }
  0x2f   :  { %s17573_s7 = scalar_lea.vmem %s51_s20, 64  ;;  %p17578_p7 = scmp.lt.s32.totalorder %s51_s20, %s51_s20 }
  0x30   :  { %p17574_p6 = scmp.ne.s32.totalorder %s51_s20, %s17573_s7  ;;  %p17579_p8 = scmp.lt.s32.totalorder %s17573_s7, %s17573_s7 }
  0x32   :  { %p17580_p9 = por %p17579_p8, %p17578_p7 }
  0x34   :  { %p17581_p10 = pnand %p17580_p9, %p17574_p6 }
  0x36   :  { %17584 = shalt.err (!%p17581_p10)
}
  0x37   :  { %53 = dma.hbm_to_vmem [thread:$0]  %s20234_s3, 64, %s51_s20, [#allocation5]  }
  0x38   :  { %s17593_s25 = scalar_lea.vmem %s70_s22, 65536  ;;  %p17598_p12 = scmp.lt.s32.totalorder %s70_s22, %s70_s22 }
  0x39   :  { %p17594_p11 = scmp.ne.s32.totalorder %s70_s22, %s17593_s25  ;;  %p17599_p13 = scmp.lt.s32.totalorder %s17593_s25, %s17593_s25 }
  0x3b   :  { %p17600_p0 = por %p17599_p13, %p17598_p12 }
  0x3d   :  { %p17601_p1 = pnand %p17600_p0, %p17594_p11 }
  0x3f   :  { %17604 = shalt.err (!%p17601_p1)
}
  0x40   :  { %s17641_s1 = smov 64   ;;  %s17642_s26 = smov 4  }
  0x41   :  { %75 = dma.hbm_to_vmem [thread:$0]  %s20236_s5, 65536, %s70_s22, [#allocation8], %s17641_s1, %s17641_s1, %s17642_s26  }
  0x42   :  { %s17643_s29 = smov [#allocation12]  }
  0x43   :  { %s94_s30 = sshll.u32 %s17643_s29, 4  ;;  %s95_s30 = int_to_ptr.vmem [resolvable:$true] %s94_s30 }
  0x44   :  { %s17613_s12 = scalar_lea.vmem %s95_s30, 16  ;;  %s17617_s2 = scalar_lea.vmem %s95_s30, 32 }
  0x45   :  { %p17614_p2 = scmp.ne.s32.totalorder %s95_s30, %s17613_s12  ;;  %p17618_p3 = scmp.lt.s32.totalorder %s95_s30, %s95_s30 }
  0x46   :  { %p17619_p4 = scmp.lt.s32.totalorder %s17617_s2, %s17613_s12 }
  0x48   :  { %p17620_p5 = por %p17619_p4, %p17618_p3 }
  0x4a   :  { %p17621_p6 = pnand %p17620_p5, %p17614_p2 }
  0x4c   :  { %17624 = shalt.err (!%p17621_p6)
}
  0x4d   :  { %97 = dma.hbm_to_vmem [thread:$0]  %s20239_s8, 16, %s95_s30, [#allocation11]  }
  0x4e   :  { %17625 = dma.done.wait [#allocation3], 8192  }
  0x4f   :  { %17626 = vsyncadd [#allocation3], 4294959104 }
  0x50   :  { %17627 = dma.done.wait [#allocation5], 576  }
  0x51   :  { %17628 = vsyncadd [#allocation5], 4294966720 }
  0x52   :  { %17629 = dma.done.wait [#allocation8], 65600  }
  0x53   :  { %17630 = vsyncadd [#allocation8], 4294901696 }
  0x54   :  { %17631 = dma.done.wait [#allocation11], 32  }
  0x55   :  { %17632 = vsyncadd [#allocation11], 4294967264  ;;  %v17644_v0 = vmov 0.0   ;;  %v186_v1 = vld [vmem:[#allocation2 + $0x1e8] sm:$0xff]  ;;  %v188_v2 = vld [vmem:[#allocation2 + $0x1f8] sm:$0xff]  ;;  %vm1150_vm0 = vcmask 64512  }
  0x56   :  { %257 = vmatprep.mubr.f32.mxu0 %v17644_v0  ;;  %328 = vmatprep.mubr.f32.mxu1 %v17644_v0  ;;  %v185_v3 = vld [vmem:[#allocation2 + $0x1e0] sm:$0xff]  ;;  %v187_v4 = vld [vmem:[#allocation2 + $0x1f0] sm:$0xff]  ;;  %v182_v5 = vld [vmem:[#allocation2 + $0x1c8] sm:$0xff]  ;;  %vm7878_vm5 = vcmask 261120  }
  0x57   :  { %193 = vmatprep.subr.mxu0 %v186_v1  ;;  %264 = vmatprep.subr.mxu1 %v188_v2  ;;  %v184_v6 = vld [vmem:[#allocation2 + $0x1d8] sm:$0xff]  ;;  %v181_v7 = vld [vmem:[#allocation2 + $0x1c0] sm:$0xff]  ;;  %v183_v8 = vld [vmem:[#allocation2 + $0x1d0] sm:$0xff] }
  0x58   :  { %194 = vmatpush1.msra.mxu0 %v185_v3  ;;  %265 = vmatpush1.msra.mxu1 %v187_v4  ;;  %v178_v9 = vld [vmem:[#allocation2 + $0x1a8] sm:$0xff]  ;;  %v180_v10 = vld [vmem:[#allocation2 + $0x1b8] sm:$0xff]  ;;  %v177_v11 = vld [vmem:[#allocation2 + $0x1a0] sm:$0xff] }
  0x59   :  { %195 = vmatprep.subr.mxu0 %v182_v5  ;;  %266 = vmatprep.subr.mxu1 %v184_v6  ;;  %v179_v12 = vld [vmem:[#allocation2 + $0x1b0] sm:$0xff]  ;;  %v174_v13 = vld [vmem:[#allocation2 + $0x188] sm:$0xff]  ;;  %v176_v14 = vld [vmem:[#allocation2 + $0x198] sm:$0xff] }
  0x5a   :  { %196 = vmatpush1.msra.mxu0 %v181_v7  ;;  %267 = vmatpush1.msra.mxu1 %v183_v8  ;;  %v173_v15 = vld [vmem:[#allocation2 + $0x180] sm:$0xff]  ;;  %v175_v16 = vld [vmem:[#allocation2 + $0x190] sm:$0xff]  ;;  %v170_v17 = vld [vmem:[#allocation2 + $0x168] sm:$0xff] }
  0x5b   :  { %197 = vmatprep.subr.mxu0 %v178_v9  ;;  %268 = vmatprep.subr.mxu1 %v180_v10  ;;  %v172_v18 = vld [vmem:[#allocation2 + $0x178] sm:$0xff]  ;;  %v169_v19 = vld [vmem:[#allocation2 + $0x160] sm:$0xff]  ;;  %v171_v20 = vld [vmem:[#allocation2 + $0x170] sm:$0xff] }
  0x5c   :  { %198 = vmatpush1.msra.mxu0 %v177_v11  ;;  %269 = vmatpush1.msra.mxu1 %v179_v12  ;;  %v166_v21 = vld [vmem:[#allocation2 + $0x148] sm:$0xff]  ;;  %v168_v22 = vld [vmem:[#allocation2 + $0x158] sm:$0xff]  ;;  %v165_v23 = vld [vmem:[#allocation2 + $0x140] sm:$0xff] }
  0x5d   :  { %199 = vmatprep.subr.mxu0 %v174_v13  ;;  %270 = vmatprep.subr.mxu1 %v176_v14  ;;  %v167_v24 = vld [vmem:[#allocation2 + $0x150] sm:$0xff]  ;;  %v162_v25 = vld [vmem:[#allocation2 + $0x128] sm:$0xff]  ;;  %v164_v26 = vld [vmem:[#allocation2 + $0x138] sm:$0xff] }
  0x5e   :  { %200 = vmatpush1.msra.mxu0 %v173_v15  ;;  %271 = vmatpush1.msra.mxu1 %v175_v16  ;;  %v161_v27 = vld [vmem:[#allocation2 + $0x120] sm:$0xff]  ;;  %v163_v28 = vld [vmem:[#allocation2 + $0x130] sm:$0xff]  ;;  %v158_v29 = vld [vmem:[#allocation2 + $0x108] sm:$0xff] }
  0x5f   :  { %201 = vmatprep.subr.mxu0 %v170_v17  ;;  %272 = vmatprep.subr.mxu1 %v172_v18  ;;  %v160_v30 = vld [vmem:[#allocation2 + $0x118] sm:$0xff]  ;;  %v157_v31 = vld [vmem:[#allocation2 + $0x100] sm:$0xff]  ;;  %v159_v32 = vld [vmem:[#allocation2 + $0x110] sm:$0xff] }
  0x60   :  { %202 = vmatpush1.msra.mxu0 %v169_v19  ;;  %273 = vmatpush1.msra.mxu1 %v171_v20  ;;  %v154_v33 = vld [vmem:[#allocation2 + $0xe8] sm:$0xff]  ;;  %v156_v34 = vld [vmem:[#allocation2 + $0xf8] sm:$0xff]  ;;  %v153_v35 = vld [vmem:[#allocation2 + $0xe0] sm:$0xff] }
  0x61   :  { %203 = vmatprep.subr.mxu0 %v166_v21  ;;  %274 = vmatprep.subr.mxu1 %v168_v22  ;;  %v155_v36 = vld [vmem:[#allocation2 + $0xf0] sm:$0xff]  ;;  %v150_v37 = vld [vmem:[#allocation2 + $0xc8] sm:$0xff]  ;;  %v152_v38 = vld [vmem:[#allocation2 + $0xd8] sm:$0xff] }
  0x62   :  { %204 = vmatpush1.msra.mxu0 %v165_v23  ;;  %275 = vmatpush1.msra.mxu1 %v167_v24  ;;  %v149_v39 = vld [vmem:[#allocation2 + $0xc0] sm:$0xff]  ;;  %v151_v40 = vld [vmem:[#allocation2 + $0xd0] sm:$0xff]  ;;  %v146_v41 = vld [vmem:[#allocation2 + $0xa8] sm:$0xff] }
  0x63   :  { %205 = vmatprep.subr.mxu0 %v162_v25  ;;  %276 = vmatprep.subr.mxu1 %v164_v26  ;;  %v148_v42 = vld [vmem:[#allocation2 + $0xb8] sm:$0xff]  ;;  %v145_v43 = vld [vmem:[#allocation2 + $0xa0] sm:$0xff]  ;;  %v147_v44 = vld [vmem:[#allocation2 + $0xb0] sm:$0xff] }
  0x64   :  { %206 = vmatpush1.msra.mxu0 %v161_v27  ;;  %277 = vmatpush1.msra.mxu1 %v163_v28  ;;  %v142_v45 = vld [vmem:[#allocation2 + $0x88] sm:$0xff]  ;;  %v144_v46 = vld [vmem:[#allocation2 + $0x98] sm:$0xff]  ;;  %v141_v47 = vld [vmem:[#allocation2 + $0x80] sm:$0xff] }
  0x65   :  { %207 = vmatprep.subr.mxu0 %v158_v29  ;;  %278 = vmatprep.subr.mxu1 %v160_v30  ;;  %v143_v48 = vld [vmem:[#allocation2 + $0x90] sm:$0xff]  ;;  %v138_v49 = vld [vmem:[#allocation2 + $0x68] sm:$0xff]  ;;  %v140_v50 = vld [vmem:[#allocation2 + $0x78] sm:$0xff] }
  0x66   :  { %208 = vmatpush1.msra.mxu0 %v157_v31  ;;  %279 = vmatpush1.msra.mxu1 %v159_v32  ;;  %v137_v51 = vld [vmem:[#allocation2 + $0x60] sm:$0xff]  ;;  %v139_v52 = vld [vmem:[#allocation2 + $0x70] sm:$0xff]  ;;  %v134_v53 = vld [vmem:[#allocation2 + $0x48] sm:$0xff] }
  0x67   :  { %209 = vmatprep.subr.mxu0 %v154_v33  ;;  %280 = vmatprep.subr.mxu1 %v156_v34  ;;  %v136_v54 = vld [vmem:[#allocation2 + $0x58] sm:$0xff]  ;;  %v133_v55 = vld [vmem:[#allocation2 + $0x40] sm:$0xff]  ;;  %v135_v56 = vld [vmem:[#allocation2 + $0x50] sm:$0xff] }
  0x68   :  { %210 = vmatpush1.msra.mxu0 %v153_v35  ;;  %281 = vmatpush1.msra.mxu1 %v155_v36  ;;  %v130_v57 = vld [vmem:[#allocation2 + $0x28] sm:$0xff]  ;;  %v132_v58 = vld [vmem:[#allocation2 + $0x38] sm:$0xff]  ;;  %v129_v59 = vld [vmem:[#allocation2 + $0x20] sm:$0xff]  ;;  %v414_v36 = vlaneseq }
  0x69   :  { %211 = vmatprep.subr.mxu0 %v150_v37  ;;  %282 = vmatprep.subr.mxu1 %v152_v38  ;;  %v131_v60 = vld [vmem:[#allocation2 + $0x30] sm:$0xff]  ;;  %v126_v61 = vld [vmem:[#allocation2 + $0x8] sm:$0xff]  ;;  %v128_v62 = vld [vmem:[#allocation2 + $0x18] sm:$0xff] }
  0x6a   :  { %212 = vmatpush1.msra.mxu0 %v149_v39  ;;  %283 = vmatpush1.msra.mxu1 %v151_v40  ;;  %v125_v63 = vld [vmem:[#allocation2] sm:$0xff]  ;;  %v127_v0 = vld [vmem:[#allocation2 + $0x10] sm:$0xff]  ;;  %v16807_v6 = vld [vmem:[#allocation9 + $0x70] sm:$0xff]   ;;  %v17729_v37 = vshrl.u32 %v414_v36, 7 }
  0x6b   :  { %213 = vmatprep.subr.mxu0 %v146_v41  ;;  %284 = vmatprep.subr.mxu1 %v148_v42  ;;  %v124_v1 = vld [vmem:[%s20231_s0] sm:$0xff]  ;;  %v16808_v7 = vld [vmem:[#allocation9 + $0xf0] sm:$0xff]   ;;  %v16811_v10 = vld [vmem:[#allocation9 + $0x68] sm:$0xff]  }
  0x6c   :  { %214 = vmatpush1.msra.mxu0 %v145_v43  ;;  %285 = vmatpush1.msra.mxu1 %v147_v44  ;;  %v16803_v2 = vld [vmem:[#allocation9 + $0x78] sm:$0xff]   ;;  %v16809_v8 = vld [vmem:[#allocation9 + $0x30] sm:$0xff]   ;;  %v16812_v11 = vld [vmem:[#allocation9 + $0xe8] sm:$0xff]   ;;  %v416_v38 = vsub.s32 0, %v17729_v37  ;;  %v424_v39 = vsub.s32 2, %v17729_v37  ;;  %v420_v40 = vsub.s32 1, %v17729_v37 }
  0x6d   :  { %215 = vmatprep.subr.mxu0 %v142_v45  ;;  %286 = vmatprep.subr.mxu1 %v144_v46  ;;  %v16804_v3 = vld [vmem:[#allocation9 + $0xf8] sm:$0xff]   ;;  %v16810_v9 = vld [vmem:[#allocation9 + $0xb0] sm:$0xff]   ;;  %v16813_v12 = vld [vmem:[#allocation9 + $0x28] sm:$0xff]   ;;  %v428_v41 = vsub.s32 3, %v17729_v37 }
  0x6e   :  { %216 = vmatpush1.msra.mxu0 %v141_v47  ;;  %287 = vmatpush1.msra.mxu1 %v143_v48  ;;  %v16805_v4 = vld [vmem:[#allocation9 + $0x38] sm:$0xff]   ;;  %v16814_v13 = vld [vmem:[#allocation9 + $0xa8] sm:$0xff]   ;;  %v16815_v14 = vld [vmem:[#allocation9 + $0x60] sm:$0xff]  }
  0x6f   :  { %217 = vmatprep.subr.mxu0 %v138_v49  ;;  %288 = vmatprep.subr.mxu1 %v140_v50  ;;  %v16806_v5 = vld [vmem:[#allocation9 + $0xb8] sm:$0xff]   ;;  %v16816_v15 = vld [vmem:[#allocation9 + $0xe0] sm:$0xff]   ;;  %v16823_v22 = vld [vmem:[#allocation9 + $0x50] sm:$0xff]  }
  0x70   :  { %218 = vmatpush1.msra.mxu0 %v137_v51  ;;  %289 = vmatpush1.msra.mxu1 %v139_v52  ;;  %v16817_v16 = vld [vmem:[#allocation9 + $0x20] sm:$0xff]   ;;  %v16819_v18 = vld [vmem:[#allocation9 + $0x58] sm:$0xff]   ;;  %v16824_v23 = vld [vmem:[#allocation9 + $0xd0] sm:$0xff]  }
  0x71   :  { %219 = vmatprep.subr.mxu0 %v134_v53  ;;  %290 = vmatprep.subr.mxu1 %v136_v54  ;;  %v16818_v17 = vld [vmem:[#allocation9 + $0xa0] sm:$0xff]   ;;  %v16820_v19 = vld [vmem:[#allocation9 + $0xd8] sm:$0xff]   ;;  %v16825_v24 = vld [vmem:[#allocation9 + $0x10] sm:$0xff]  }
  0x72   :  { %220 = vmatpush1.msra.mxu0 %v133_v55  ;;  %291 = vmatpush1.msra.mxu1 %v135_v56  ;;  %v16821_v20 = vld [vmem:[#allocation9 + $0x18] sm:$0xff]   ;;  %v16826_v25 = vld [vmem:[#allocation9 + $0x90] sm:$0xff]   ;;  %v16827_v26 = vld [vmem:[#allocation9 + $0x48] sm:$0xff]  }
  0x73   :  { %221 = vmatprep.subr.mxu0 %v130_v57  ;;  %292 = vmatprep.subr.mxu1 %v132_v58  ;;  %v16822_v21 = vld [vmem:[#allocation9 + $0x98] sm:$0xff]   ;;  %v16828_v27 = vld [vmem:[#allocation9 + $0xc8] sm:$0xff]   ;;  %v16831_v30 = vld [vmem:[#allocation9 + $0x40] sm:$0xff]  }
  0x74   :  { %222 = vmatpush1.msra.mxu0 %v129_v59  ;;  %293 = vmatpush1.msra.mxu1 %v131_v60  ;;  %v16829_v28 = vld [vmem:[#allocation9 + $0x8] sm:$0xff]   ;;  %v16832_v31 = vld [vmem:[#allocation9 + $0xc0] sm:$0xff]   ;;  %v16835_v34 = vld [vmem:[#allocation9 + $0x178] sm:$0xff]  }
  0x75   :  { %223 = vmatprep.subr.mxu0 %v126_v61  ;;  %294 = vmatprep.subr.mxu1 %v128_v62  ;;  %v16830_v29 = vld [vmem:[#allocation9 + $0x88] sm:$0xff]   ;;  %v16833_v32 = vld [vmem:[#allocation9] sm:$0xff]   ;;  %v16836_v35 = vld [vmem:[#allocation9 + $0x1f8] sm:$0xff]  }
  0x76   :  { %224 = vmatpush1.msra.mxu0 %v125_v63  ;;  %295 = vmatpush1.msra.mxu1 %v127_v0  ;;  %v16834_v33 = vld [vmem:[#allocation9 + $0x80] sm:$0xff]   ;;  %v189_v42 = vld [vmem:[#allocation4] sm:$0xff]  ;;  %v191_v43 = vld [vmem:[#allocation4 + $0x10] sm:$0xff] }
  0x77   :  { %258 = vmatmul.mubr.f32.vlgmr.msra.gmra.mxu0 %v124_v1  ;;  %329 = vmatmul.mubr.f32.vlgmr.msra.gmra.mxu1 %v124_v1  ;;  %v190_v44 = vld [vmem:[#allocation4 + $0x8] sm:$0xff]  ;;  %v192_v45 = vld [vmem:[#allocation4 + $0x18] sm:$0xff] }
  0x78   :  { %14567 = vmatprep.subr.bf16.mxu0 %v16803_v2  ;;  %14589 = vmatprep.subr.bf16.mxu1 %v16804_v3  ;;  %v16841_v37 = vld [vmem:[#allocation9 + $0x130] sm:$0xff]  }
  0x79   :  { %14568 = vmatpush3.bf16.msra.mxu0 %v16805_v4  ;;  %14590 = vmatpush3.bf16.msra.mxu1 %v16806_v5 }
  0x7a   :  { %14569 = vmatprep.subr.bf16.mxu0 %v16807_v6  ;;  %14591 = vmatprep.subr.bf16.mxu1 %v16808_v7 }
  0x7d   :  { %14570 = vmatpush3.bf16.msra.mxu0 %v16809_v8  ;;  %14592 = vmatpush3.bf16.msra.mxu1 %v16810_v9 }
  0x7e   :  { %14571 = vmatprep.subr.bf16.mxu0 %v16811_v10  ;;  %14593 = vmatprep.subr.bf16.mxu1 %v16812_v11 }
  0x81   :  { %14572 = vmatpush3.bf16.msra.mxu0 %v16813_v12  ;;  %14594 = vmatpush3.bf16.msra.mxu1 %v16814_v13 }
  0x82   :  { %14573 = vmatprep.subr.bf16.mxu0 %v16815_v14  ;;  %14595 = vmatprep.subr.bf16.mxu1 %v16816_v15 }
  0x85   :  { %14574 = vmatpush3.bf16.msra.mxu0 %v16817_v16  ;;  %14596 = vmatpush3.bf16.msra.mxu1 %v16818_v17 }
  0x86   :  { %14575 = vmatprep.subr.bf16.mxu0 %v16819_v18  ;;  %14597 = vmatprep.subr.bf16.mxu1 %v16820_v19 }
  0x89   :  { %14576 = vmatpush3.bf16.msra.mxu0 %v16821_v20  ;;  %14598 = vmatpush3.bf16.msra.mxu1 %v16822_v21 }
  0x8a   :  { %14577 = vmatprep.subr.bf16.mxu0 %v16823_v22  ;;  %14599 = vmatprep.subr.bf16.mxu1 %v16824_v23 }
  0x8d   :  { %14578 = vmatpush3.bf16.msra.mxu0 %v16825_v24  ;;  %14600 = vmatpush3.bf16.msra.mxu1 %v16826_v25 }
  0x8e   :  { %14579 = vmatprep.subr.bf16.mxu0 %v16827_v26  ;;  %14601 = vmatprep.subr.bf16.mxu1 %v16828_v27 }
  0x91   :  { %14580 = vmatpush3.bf16.msra.mxu0 %v16829_v28  ;;  %14602 = vmatpush3.bf16.msra.mxu1 %v16830_v29 }
  0x92   :  { %14581 = vmatprep.subr.bf16.mxu0 %v16831_v30  ;;  %14603 = vmatprep.subr.bf16.mxu1 %v16832_v31 }
  0x95   :  { %14582 = vmatpush3.bf16.msra.mxu0 %v16833_v32  ;;  %14604 = vmatpush3.bf16.msra.mxu1 %v16834_v33 }
  0x96   :  { %14611 = vmatprep.subr.bf16.mxu0 %v16835_v34  ;;  %14633 = vmatprep.subr.bf16.mxu1 %v16836_v35 }
 0x137   :  { %v259_v46 = vpop.f32.mrf.mxu0  ;;  %v330_v47 = vpop.f32.mrf.mxu1 }
 0x138   :  { %v260_v48 = vadd.f32 %v259_v46, %v189_v42  ;;  %v331_v49 = vadd.f32 %v330_v47, %v191_v43 }
 0x139   :  { %v261_v50 = vpop.f32.mrf.mxu0  ;;  %v332_v51 = vpop.f32.mrf.mxu1 }
 0x13a   :  { %v335_v52 = vrot.slane %v260_v48, 4  ;;  %v347_v53 = vrot.slane %v331_v49, 4  ;;  %v262_v54 = vadd.f32 %v261_v50, %v190_v44  ;;  %v333_v55 = vadd.f32 %v332_v51, %v192_v45 }
 0x13c   :  { %v336_v56 = vadd.f32 %v335_v52, %v260_v48  ;;  %v348_v57 = vadd.f32 %v347_v53, %v331_v49  ;;  %v341_v58 = vrot.slane %v262_v54, 4  ;;  %v353_v59 = vrot.slane %v333_v55, 4 }
 0x13e   :  { %v337_v60 = vrot.slane %v336_v56, 2  ;;  %v349_v61 = vrot.slane %v348_v57, 2  ;;  %v342_v62 = vadd.f32 %v341_v58, %v262_v54  ;;  %v354_v63 = vadd.f32 %v353_v59, %v333_v55 }
 0x140   :  { %v338_v0 = vadd.f32 %v337_v60, %v336_v56  ;;  %v350_v1 = vadd.f32 %v349_v61, %v348_v57  ;;  %v343_v2 = vrot.slane %v342_v62, 2  ;;  %v355_v3 = vrot.slane %v354_v63, 2 }
 0x142   :  { %v339_v4 = vrot.slane %v338_v0, 1  ;;  %v351_v5 = vrot.slane %v350_v1, 1  ;;  %v344_v6 = vadd.f32 %v343_v2, %v342_v62  ;;  %v356_v7 = vadd.f32 %v355_v3, %v354_v63  ;;  %v412_v63 = vld [vmem:[#allocation6] sm:$0xf] }
 0x143   :  { %v425_v3 = vrot.slane %v412_v63, %v424_v39 }
 0x144   :  { %v340_v8 = vadd.f32 %v339_v4, %v338_v0  ;;  %v352_v9 = vadd.f32 %v351_v5, %v350_v1  ;;  %v345_v10 = vrot.slane %v344_v6, 1  ;;  %v357_v11 = vrot.slane %v356_v7, 1  ;;  %v438_v0 = vld [vmem:[#allocation7] sm:$0xf] }
 0x145   :  { %v417_v1 = vrot.slane %v412_v63, %v416_v38 }
 0x146   :  { %v360_v12 = vmul.f32 0.125, %v340_v8  ;;  %v362_v13 = vmul.f32 0.125, %v352_v9  ;;  %v346_v14 = vadd.f32 %v345_v10, %v344_v6  ;;  %v358_v15 = vadd.f32 %v357_v11, %v356_v7 }
 0x147   :  { %v421_v6 = vrot.slane %v412_v63, %v420_v40  ;;  %v443_v8 = vrot.slane %v438_v0, %v416_v38  ;;  %v429_v10 = vrot.slane %v412_v63, %v428_v41  ;;  %v16871_v63 = vld [vmem:[#allocation9 + $0x268] sm:$0xff]  }
 0x148   :  { %v364_v16 = vsub.f32 %v260_v48, %v360_v12  ;;  %v366_v17 = vsub.f32 %v331_v49, %v362_v13  ;;  %v361_v18 = vmul.f32 0.125, %v346_v14  ;;  %v363_v19 = vmul.f32 0.125, %v358_v15 }
 0x149   :  { %v451_v13 = vrot.slane %v438_v0, %v424_v39  ;;  %v447_v15 = vrot.slane %v438_v0, %v420_v40  ;;  %v16839_v39 = vld [vmem:[#allocation9 + $0x170] sm:$0xff]  }
 0x14a   :  { %v368_v20 = vmul.f32 %v364_v16, %v364_v16  ;;  %v370_v21 = vmul.f32 %v366_v17, %v366_v17  ;;  %v365_v22 = vsub.f32 %v262_v54, %v361_v18  ;;  %v367_v23 = vsub.f32 %v333_v55, %v363_v19  ;;  %v16840_v40 = vld [vmem:[#allocation9 + $0x1f0] sm:$0xff]  }
 0x14b   :  { %v455_v19 = vrot.slane %v438_v0, %v428_v41  ;;  %v16842_v41 = vld [vmem:[#allocation9 + $0x1b0] sm:$0xff]   ;;  %v16872_v0 = vld [vmem:[#allocation9 + $0x228] sm:$0xff]  }
 0x14c   :  { %v372_v24 = vrot.slane %v368_v20, 4  ;;  %v384_v25 = vrot.slane %v370_v21, 4  ;;  %v369_v26 = vmul.f32 %v365_v22, %v365_v22  ;;  %v371_v27 = vmul.f32 %v367_v23, %v367_v23 }
 0x14e   :  { %v373_v28 = vadd.f32 %v372_v24, %v368_v20  ;;  %v385_v29 = vadd.f32 %v384_v25, %v370_v21  ;;  %v378_v30 = vrot.slane %v369_v26, 4  ;;  %v390_v31 = vrot.slane %v371_v27, 4  ;;  %v16837_v25 = vld [vmem:[#allocation9 + $0x138] sm:$0xff]  }
 0x150   :  { %v374_v32 = vrot.slane %v373_v28, 2  ;;  %v386_v33 = vrot.slane %v385_v29, 2  ;;  %v379_v34 = vadd.f32 %v378_v30, %v369_v26  ;;  %v391_v35 = vadd.f32 %v390_v31, %v371_v27  ;;  %v16838_v27 = vld [vmem:[#allocation9 + $0x1b8] sm:$0xff]   ;;  %v16843_v30 = vld [vmem:[#allocation9 + $0x168] sm:$0xff]  }
 0x151   :  { %v16844_v31 = vld [vmem:[#allocation9 + $0x1e8] sm:$0xff]  }
 0x152   :  { %v375_v36 = vadd.f32 %v374_v32, %v373_v28  ;;  %v387_v42 = vadd.f32 %v386_v33, %v385_v29  ;;  %v380_v43 = vrot.slane %v379_v34, 2  ;;  %v392_v44 = vrot.slane %v391_v35, 2  ;;  %v16845_v32 = vld [vmem:[#allocation9 + $0x128] sm:$0xff]  }
 0x153   :  { %v16846_v33 = vld [vmem:[#allocation9 + $0x1a8] sm:$0xff]  }
 0x154   :  { %v376_v45 = vrot.slane %v375_v36, 1  ;;  %v388_v46 = vrot.slane %v387_v42, 1  ;;  %v381_v47 = vadd.f32 %v380_v43, %v379_v34  ;;  %v393_v48 = vadd.f32 %v392_v44, %v391_v35  ;;  %v16847_v34 = vld [vmem:[#allocation9 + $0x160] sm:$0xff]   ;;  %v16851_v43 = vld [vmem:[#allocation9 + $0x158] sm:$0xff]  }
 0x155   :  { %v16848_v35 = vld [vmem:[#allocation9 + $0x1e0] sm:$0xff]   ;;  %v16852_v44 = vld [vmem:[#allocation9 + $0x1d8] sm:$0xff]  }
 0x156   :  { %v377_v49 = vadd.f32 %v376_v45, %v375_v36  ;;  %v389_v50 = vadd.f32 %v388_v46, %v387_v42  ;;  %v382_v51 = vrot.slane %v381_v47, 1  ;;  %v394_v52 = vrot.slane %v393_v48, 1  ;;  %v16849_v36 = vld [vmem:[#allocation9 + $0x120] sm:$0xff]   ;;  %v16853_v45 = vld [vmem:[#allocation9 + $0x118] sm:$0xff]  }
 0x157   :  { %v16850_v42 = vld [vmem:[#allocation9 + $0x1a0] sm:$0xff]   ;;  %v16854_v46 = vld [vmem:[#allocation9 + $0x198] sm:$0xff]  }
 0x158   :  { %v396_v53 = vmul.f32 0.125, %v377_v49  ;;  %v398_v54 = vmul.f32 0.125, %v389_v50  ;;  %v383_v55 = vadd.f32 %v382_v51, %v381_v47  ;;  %v395_v56 = vadd.f32 %v394_v52, %v393_v48  ;;  %v16855_v47 = vld [vmem:[#allocation9 + $0x150] sm:$0xff]   ;;  %v16859_v51 = vld [vmem:[#allocation9 + $0x148] sm:$0xff]  }
 0x159   :  { %v16856_v48 = vld [vmem:[#allocation9 + $0x1d0] sm:$0xff]   ;;  %v16860_v52 = vld [vmem:[#allocation9 + $0x1c8] sm:$0xff]  }
 0x15a   :  { %v400_v57 = vadd.f32 1e-05, %v396_v53  ;;  %v402_v58 = vadd.f32 1e-05, %v398_v54  ;;  %v397_v59 = vmul.f32 0.125, %v383_v55  ;;  %v399_v60 = vmul.f32 0.125, %v395_v56 }
 0x15b   :  { %v16857_v49 = vld [vmem:[#allocation9 + $0x110] sm:$0xff]   ;;  %v16861_v53 = vld [vmem:[#allocation9 + $0x108] sm:$0xff]   ;;  %v16863_v55 = vld [vmem:[#allocation9 + $0x140] sm:$0xff]  }
 0x15c   :  { %17443 = vrsqrt.f32 %v400_v57  ;;  %v401_v61 = vadd.f32 1e-05, %v397_v59  ;;  %v403_v62 = vadd.f32 1e-05, %v399_v60  ;;  %v16858_v50 = vld [vmem:[#allocation9 + $0x190] sm:$0xff]   ;;  %v16862_v54 = vld [vmem:[#allocation9 + $0x188] sm:$0xff]  }
 0x15d   :  { %17445 = vrsqrt.f32 %v402_v58  ;;  %v16864_v56 = vld [vmem:[#allocation9 + $0x1c0] sm:$0xff]   ;;  %v16867_v59 = vld [vmem:[#allocation9 + $0x278] sm:$0xff]  }
 0x15e   :  { %17447 = vrsqrt.f32 %v401_v61  ;;  %v16865_v57 = vld [vmem:[#allocation9 + $0x100] sm:$0xff]   ;;  %v16868_v60 = vld [vmem:[#allocation9 + $0x238] sm:$0xff]   ;;  %v16869_v61 = vld [vmem:[#allocation9 + $0x270] sm:$0xff]  }
 0x15f   :  { %17449 = vrsqrt.f32 %v403_v62  ;;  %v16866_v58 = vld [vmem:[#allocation9 + $0x180] sm:$0xff]   ;;  %v16870_v62 = vld [vmem:[#allocation9 + $0x230] sm:$0xff]  }
 0x169   :  { %v17444_v2 = vpop.eup %17443 }
 0x16a   :  { %v17446_v4 = vpop.eup %17445  ;;  %v408_v5 = vmul.f32 %v17444_v2, %v364_v16  ;;  %v16874_v2 = vld [vmem:[#allocation9 + $0x220] sm:$0xff]  }
 0x16b   :  { %v17448_v7 = vpop.eup %17447  ;;  %v410_v9 = vmul.f32 %v17446_v4, %v366_v17  ;;  %v16876_v4 = vld [vmem:[#allocation9 + $0x218] sm:$0xff]  }
 0x16c   :  { %v17450_v11 = vpop.eup %17449  ;;  %v434_v12 = vmul.f32 %v417_v1, %v408_v5  ;;  %v409_v14 = vmul.f32 %v17448_v7, %v365_v22  ;;  %v16873_v1 = vld [vmem:[#allocation9 + $0x260] sm:$0xff]   ;;  %v16877_v5 = vld [vmem:[#allocation9 + $0x250] sm:$0xff]   ;;  %v16879_v7 = vld [vmem:[#allocation9 + $0x248] sm:$0xff]  }
 0x16d   :  { %v436_v16 = vmul.f32 %v425_v3, %v410_v9  ;;  %v411_v18 = vmul.f32 %v17450_v11, %v367_v23  ;;  %v16875_v3 = vld [vmem:[#allocation9 + $0x258] sm:$0xff]   ;;  %v16881_v9 = vld [vmem:[#allocation9 + $0x240] sm:$0xff]  }
 0x16e   :  { %v435_v20 = vmul.f32 %v421_v6, %v409_v14  ;;  %v460_v38 = vadd.f32 %v443_v8, %v434_v12  ;;  %v16878_v6 = vld [vmem:[#allocation9 + $0x210] sm:$0xff]   ;;  %v16880_v8 = vld [vmem:[#allocation9 + $0x208] sm:$0xff]   ;;  %v13129_v11 = vld [vmem:[%s20237_s6 + $0x20] sm:$0xff] }
 0x16f   :  { %v437_v17 = vmul.f32 %v429_v10, %v411_v18  ;;  %v462_v21 = vadd.f32 %v451_v13, %v436_v16  ;;  %v16882_v10 = vld [vmem:[#allocation9 + $0x200] sm:$0xff]  }
 0x170   :  { %v461_v24 = vadd.f32 %v447_v15, %v435_v20  ;;  %v17753_v22 = vpack.c.bf16 %v460_v38, %v460_v38 }
 0x171   :  { %v463_v26 = vadd.f32 %v455_v19, %v437_v17  ;;  %v17757_v23 = vpack.c.bf16 %v462_v21, %v462_v21 }
 0x172   :  { %v17751_v28 = vpack.c.bf16 %v461_v24, %v461_v24 }
 0x173   :  { %v17755_v29 = vpack.c.bf16 %v463_v26, %v463_v26 }
 0x174   :  { %756 = vmatprep.mubr.bf16.mxu0 %v17751_v28 }
 0x175   :  { %796 = vmatprep.mubr.bf16.mxu1 %v17755_v29  ;;  %757 = vmatmul.mubr.bf16.vlgmr.msra.gmra.mxu0 %v17753_v22 }
 0x176   :  { %797 = vmatmul.mubr.bf16.vlgmr.msra.gmra.mxu1 %v17757_v23  ;;  %14612 = vmatpush3.bf16.msra.mxu0 %v16837_v25 }
 0x177   :  { %14634 = vmatpush3.bf16.msra.mxu1 %v16838_v27  ;;  %1097 = vmatprep.mubr.bf16.mxu0 %v17751_v28 }
 0x178   :  { %1137 = vmatprep.mubr.bf16.mxu1 %v17755_v29  ;;  %14613 = vmatprep.subr.bf16.mxu0 %v16839_v39 }
 0x179   :  { %14635 = vmatprep.subr.bf16.mxu1 %v16840_v40 }
 0x17a   :  { %14614 = vmatpush3.bf16.msra.mxu0 %v16841_v37 }
 0x17b   :  { %14636 = vmatpush3.bf16.msra.mxu1 %v16842_v41  ;;  %14615 = vmatprep.subr.bf16.mxu0 %v16843_v30 }
 0x17c   :  { %14637 = vmatprep.subr.bf16.mxu1 %v16844_v31 }
 0x17e   :  { %14616 = vmatpush3.bf16.msra.mxu0 %v16845_v32  ;;  %v13130_v32 = vld [vmem:[%s20237_s6 + $0x28] sm:$0xff] }
 0x17f   :  { %14638 = vmatpush3.bf16.msra.mxu1 %v16846_v33  ;;  %14617 = vmatprep.subr.bf16.mxu0 %v16847_v34  ;;  %v13131_v34 = vld [vmem:[%s20237_s6 + $0x30] sm:$0xff] }
 0x180   :  { %14639 = vmatprep.subr.bf16.mxu1 %v16848_v35  ;;  %v16883_v35 = vld [vmem:[#allocation9 + $0x2f8] sm:$0xff]  }
 0x182   :  { %14618 = vmatpush3.bf16.msra.mxu0 %v16849_v36  ;;  %v13132_v36 = vld [vmem:[%s20237_s6 + $0x38] sm:$0xff] }
 0x183   :  { %14640 = vmatpush3.bf16.msra.mxu1 %v16850_v42  ;;  %14619 = vmatprep.subr.bf16.mxu0 %v16851_v43  ;;  %v804_v42 = vld [vmem:[%s20237_s6] sm:$0xff]  ;;  %v805_v43 = vld [vmem:[%s20237_s6 + $0x8] sm:$0xff] }
 0x184   :  { %14641 = vmatprep.subr.bf16.mxu1 %v16852_v44  ;;  %v16884_v44 = vld [vmem:[#allocation9 + $0x2b8] sm:$0xff]  }
 0x186   :  { %14620 = vmatpush3.bf16.msra.mxu0 %v16853_v45  ;;  %v806_v45 = vld [vmem:[%s20237_s6 + $0x10] sm:$0xff] }
 0x187   :  { %14642 = vmatpush3.bf16.msra.mxu1 %v16854_v46  ;;  %14621 = vmatprep.subr.bf16.mxu0 %v16855_v47  ;;  %v16885_v46 = vld [vmem:[#allocation9 + $0x2f0] sm:$0xff]  }
 0x188   :  { %14643 = vmatprep.subr.bf16.mxu1 %v16856_v48  ;;  %v807_v47 = vld [vmem:[%s20237_s6 + $0x18] sm:$0xff] }
 0x189   :  { %v16886_v48 = vld [vmem:[#allocation9 + $0x2b0] sm:$0xff]  }
 0x18a   :  { %14622 = vmatpush3.bf16.msra.mxu0 %v16857_v49  ;;  %v16887_v49 = vld [vmem:[#allocation9 + $0x2e8] sm:$0xff]  }
 0x18b   :  { %14644 = vmatpush3.bf16.msra.mxu1 %v16858_v50  ;;  %14623 = vmatprep.subr.bf16.mxu0 %v16859_v51  ;;  %v16888_v50 = vld [vmem:[#allocation9 + $0x2a8] sm:$0xff]   ;;  %v16889_v51 = vld [vmem:[#allocation9 + $0x2e0] sm:$0xff]  }
 0x18c   :  { %14645 = vmatprep.subr.bf16.mxu1 %v16860_v52  ;;  %v16890_v52 = vld [vmem:[#allocation9 + $0x2a0] sm:$0xff]  }
 0x18e   :  { %14624 = vmatpush3.bf16.msra.mxu0 %v16861_v53  ;;  %v16891_v53 = vld [vmem:[#allocation9 + $0x2d8] sm:$0xff]  }
 0x18f   :  { %14646 = vmatpush3.bf16.msra.mxu1 %v16862_v54  ;;  %14625 = vmatprep.subr.bf16.mxu0 %v16863_v55  ;;  %v16892_v54 = vld [vmem:[#allocation9 + $0x298] sm:$0xff]  }
 0x190   :  { %14647 = vmatprep.subr.bf16.mxu1 %v16864_v56  ;;  %v16893_v56 = vld [vmem:[#allocation9 + $0x2d0] sm:$0xff]  }
 0x192   :  { %14626 = vmatpush3.bf16.msra.mxu0 %v16865_v57 }
 0x193   :  { %14648 = vmatpush3.bf16.msra.mxu1 %v16866_v58  ;;  %14665 = vmatprep.subr.bf16.mxu0 %v16867_v59  ;;  %v16894_v58 = vld [vmem:[#allocation9 + $0x290] sm:$0xff]  }
 0x195   :  { %1098 = vmatmul.mubr.bf16.vlgmr.msra.gmra.mxu0 %v17753_v22 }
 0x196   :  { %1138 = vmatmul.mubr.bf16.vlgmr.msra.gmra.mxu1 %v17757_v23  ;;  %14666 = vmatpush3.bf16.msra.mxu0 %v16868_v60  ;;  %v16895_v60 = vld [vmem:[#allocation9 + $0x2c8] sm:$0xff]  }
 0x197   :  { %1634 = vmatprep.mubr.bf16.mxu0 %v17751_v28  ;;  %14667 = vmatprep.subr.bf16.mxu0 %v16869_v61 }
 0x198   :  { %15833 = vmatprep.mubr.msk.f32.mxu1 %vm1150_vm0, %v13129_v11  ;;  %v16909_v11 = vld [vmem:[#allocation9 + $0x350] sm:$0xff]  }
 0x19a   :  { %14668 = vmatpush3.bf16.msra.mxu0 %v16870_v62  ;;  %v16896_v62 = vld [vmem:[#allocation9 + $0x288] sm:$0xff]  }
 0x19b   :  { %14669 = vmatprep.subr.bf16.mxu0 %v16871_v63  ;;  %v16897_v63 = vld [vmem:[#allocation9 + $0x2c0] sm:$0xff]  }
 0x19e   :  { %14670 = vmatpush3.bf16.msra.mxu0 %v16872_v0  ;;  %v16898_v0 = vld [vmem:[#allocation9 + $0x280] sm:$0xff]  }
 0x19f   :  { %14671 = vmatprep.subr.bf16.mxu0 %v16873_v1  ;;  %v16899_v1 = vld [vmem:[#allocation9 + $0x378] sm:$0xff]  }
 0x1a2   :  { %14672 = vmatpush3.bf16.msra.mxu0 %v16874_v2  ;;  %v16900_v2 = vld [vmem:[#allocation9 + $0x338] sm:$0xff]  }
 0x1a3   :  { %14673 = vmatprep.subr.bf16.mxu0 %v16875_v3  ;;  %v16901_v3 = vld [vmem:[#allocation9 + $0x370] sm:$0xff]  }
 0x1a6   :  { %14674 = vmatpush3.bf16.msra.mxu0 %v16876_v4  ;;  %v16902_v4 = vld [vmem:[#allocation9 + $0x330] sm:$0xff]  }
 0x1a7   :  { %14675 = vmatprep.subr.bf16.mxu0 %v16877_v5  ;;  %v16903_v5 = vld [vmem:[#allocation9 + $0x368] sm:$0xff]  }
 0x1aa   :  { %14676 = vmatpush3.bf16.msra.mxu0 %v16878_v6  ;;  %v16904_v6 = vld [vmem:[#allocation9 + $0x328] sm:$0xff]  }
 0x1ab   :  { %14677 = vmatprep.subr.bf16.mxu0 %v16879_v7  ;;  %v16905_v7 = vld [vmem:[#allocation9 + $0x360] sm:$0xff]  }
 0x1ae   :  { %14678 = vmatpush3.bf16.msra.mxu0 %v16880_v8  ;;  %v16906_v8 = vld [vmem:[#allocation9 + $0x320] sm:$0xff]  }
 0x1af   :  { %14679 = vmatprep.subr.bf16.mxu0 %v16881_v9  ;;  %v16907_v9 = vld [vmem:[#allocation9 + $0x358] sm:$0xff]  }
 0x1b2   :  { %14680 = vmatpush3.bf16.msra.mxu0 %v16882_v10  ;;  %v16908_v10 = vld [vmem:[#allocation9 + $0x318] sm:$0xff]  }
 0x1b5   :  { %1635 = vmatmul.mubr.bf16.vlgmr.msra.gmra.mxu0 %v17753_v22 }
 0x235   :  { %v14583_v12 = vpop.f32.mrf.mxu0 }
 0x236   :  { %v14605_v13 = vpop.f32.mrf.mxu1 }
 0x237   :  { %v14584_v14 = vpop.f32.mrf.mxu0 }
 0x238   :  { %v14606_v15 = vpop.f32.mrf.mxu1  ;;  %v14585_v26 = vadd.f32 %v14584_v14, %v14583_v12  ;;  %v16910_v12 = vld [vmem:[#allocation9 + $0x310] sm:$0xff]   ;;  %v16912_v14 = vld [vmem:[#allocation9 + $0x308] sm:$0xff]  }
 0x239   :  { %v14586_v16 = vpop.f32.mrf.mxu0  ;;  %v14607_v27 = vadd.f32 %v14606_v15, %v14605_v13  ;;  %v16911_v13 = vld [vmem:[#allocation9 + $0x348] sm:$0xff]   ;;  %v16913_v15 = vld [vmem:[#allocation9 + $0x340] sm:$0xff]  }
 0x23a   :  { %v14608_v18 = vpop.f32.mrf.mxu1  ;;  %v16914_v16 = vld [vmem:[#allocation9 + $0x300] sm:$0xff]  }
 0x23b   :  { %v14587_v19 = vpop.f32.mrf.mxu0  ;;  %v799_v33 = vadd.f32 %v14607_v27, %v14585_v26  ;;  %v13173_v18 = vld [vmem:[%s20237_s6 + $0x40] sm:$0xff] }
 0x23c   :  { %v14609_v20 = vpop.f32.mrf.mxu1  ;;  %15849 = vmatprep.mubr.msk.f32.mxu0 %vm1150_vm0, %v13173_v18 }
 0x255   :  { %v14627_v38 = vpop.f32.mrf.mxu0 }
 0x256   :  { %v14649_v17 = vpop.f32.mrf.mxu1 }
 0x257   :  { %v14628_v21 = vpop.f32.mrf.mxu0 }
 0x258   :  { %v14629_v24 = vadd.f32 %v14628_v21, %v14627_v38  ;;  %v14650_v25 = vpop.f32.mrf.mxu1 }
 0x259   :  { %v14651_v39 = vadd.f32 %v14650_v25, %v14649_v17  ;;  %v14630_v40 = vpop.f32.mrf.mxu0 }
 0x25a   :  { %v14652_v37 = vpop.f32.mrf.mxu1 }
 0x25b   :  { %v1140_v41 = vadd.f32 %v14651_v39, %v14629_v24  ;;  %v14631_v30 = vpop.f32.mrf.mxu0 }
 0x25c   :  { %v14653_v31 = vpop.f32.mrf.mxu1 }
 0x25d   :  { %15831 = vmatprep.subr.mxu1 %v1140_v41 }
 0x25e   :  { %15832 = vmatpush3.msra.mxu1 %v1140_v41 }
 0x25f   :  { %15834 = vmatmul.mubr.msk.f32.vlgmr.msra.gmra.mxu1 %vm1150_vm0, %v13130_v32  ;;  %15839 = vmatprep.subr.mxu1 %v799_v33 }
 0x260   :  { %15840 = vmatpush3.msra.mxu1 %v799_v33  ;;  %15836 = vmatprep.mubr.msk.f32.mxu1 %vm1150_vm0, %v13131_v34  ;;  %v16915_v33 = vld [vmem:[#allocation9 + $0x3f8] sm:$0xff]  }
 0x261   :  { %14687 = vmatprep.subr.bf16.mxu1 %v16883_v35  ;;  %v13174_v35 = vld [vmem:[%s20237_s6 + $0x48] sm:$0xff] }
 0x263   :  { %15837 = vmatmul.mubr.msk.f32.gmra.mxu1 %vm1150_vm0, %v13132_v36  ;;  %v16916_v36 = vld [vmem:[#allocation9 + $0x3b8] sm:$0xff]  }
 0x264   :  { %15841 = vmatprep.mubr.msk.f32.mxu1 %vm1150_vm0, %v804_v42  ;;  %v13175_v42 = vld [vmem:[%s20237_s6 + $0x50] sm:$0xff] }
 0x267   :  { %15842 = vmatmul.mubr.msk.f32.vlgmr.msra.gmra.mxu1 %vm1150_vm0, %v805_v43  ;;  %v16917_v43 = vld [vmem:[#allocation9 + $0x3f0] sm:$0xff]  }
 0x268   :  { %14688 = vmatpush3.bf16.msra.mxu1 %v16884_v44  ;;  %15844 = vmatprep.mubr.msk.f32.mxu1 %vm1150_vm0, %v806_v45  ;;  %v13176_v44 = vld [vmem:[%s20237_s6 + $0x58] sm:$0xff] }
 0x269   :  { %14689 = vmatprep.subr.bf16.mxu1 %v16885_v46  ;;  %v16918_v45 = vld [vmem:[#allocation9 + $0x3b0] sm:$0xff]   ;;  %v16919_v46 = vld [vmem:[#allocation9 + $0x3e8] sm:$0xff]  }
 0x26b   :  { %15845 = vmatmul.mubr.msk.f32.gmra.mxu1 %vm1150_vm0, %v807_v47  ;;  %v16920_v47 = vld [vmem:[#allocation9 + $0x3a8] sm:$0xff]  }
 0x26c   :  { %14690 = vmatpush3.bf16.msra.mxu1 %v16886_v48  ;;  %1674 = vmatprep.mubr.bf16.mxu1 %v17755_v29  ;;  %v16921_v48 = vld [vmem:[#allocation9 + $0x3e0] sm:$0xff]  }
 0x26d   :  { %14691 = vmatprep.subr.bf16.mxu1 %v16887_v49  ;;  %v16922_v49 = vld [vmem:[#allocation9 + $0x3a0] sm:$0xff]  }
 0x270   :  { %14692 = vmatpush3.bf16.msra.mxu1 %v16888_v50  ;;  %v16923_v50 = vld [vmem:[#allocation9 + $0x3d8] sm:$0xff]  }
 0x271   :  { %14693 = vmatprep.subr.bf16.mxu1 %v16889_v51  ;;  %v16924_v51 = vld [vmem:[#allocation9 + $0x398] sm:$0xff]  }
 0x274   :  { %14694 = vmatpush3.bf16.msra.mxu1 %v16890_v52  ;;  %v16925_v52 = vld [vmem:[#allocation9 + $0x3d0] sm:$0xff]  }
 0x275   :  { %v17802_v55 = vpop.f32.mrf.mxu0  ;;  %14695 = vmatprep.subr.bf16.mxu1 %v16891_v53  ;;  %v16926_v53 = vld [vmem:[#allocation9 + $0x390] sm:$0xff]  }
 0x277   :  { %v17804_v57 = vpop.f32.mrf.mxu0 }
 0x278   :  { %14696 = vmatpush3.bf16.msra.mxu1 %v16892_v54  ;;  %v14683_v41 = vadd.f32 %v17804_v57, %v17802_v55  ;;  %v16927_v54 = vld [vmem:[#allocation9 + $0x3c8] sm:$0xff]  }
 0x279   :  { %v14684_v59 = vpop.f32.mrf.mxu0  ;;  %14697 = vmatprep.subr.bf16.mxu1 %v16893_v56  ;;  %v16928_v55 = vld [vmem:[#allocation9 + $0x388] sm:$0xff]   ;;  %v16929_v56 = vld [vmem:[#allocation9 + $0x3c0] sm:$0xff]  }
 0x27a   :  { %v16930_v59 = vld [vmem:[#allocation9 + $0x380] sm:$0xff]  }
 0x27b   :  { %v14685_v61 = vpop.f32.mrf.mxu0 }
 0x27c   :  { %14698 = vmatpush3.bf16.msra.mxu1 %v16894_v58 }
 0x27d   :  { %14699 = vmatprep.subr.bf16.mxu1 %v16895_v60  ;;  %v16931_v60 = vld [vmem:[#allocation9 + $0x478] sm:$0xff]  }
 0x280   :  { %14700 = vmatpush3.bf16.msra.mxu1 %v16896_v62 }
 0x281   :  { %14701 = vmatprep.subr.bf16.mxu1 %v16897_v63  ;;  %v16932_v63 = vld [vmem:[#allocation9 + $0x438] sm:$0xff]  }
 0x284   :  { %14702 = vmatpush3.bf16.msra.mxu1 %v16898_v0  ;;  %v16933_v0 = vld [vmem:[#allocation9 + $0x470] sm:$0xff]  }
 0x285   :  { %14714 = vmatprep.subr.bf16.mxu1 %v16899_v1  ;;  %v16934_v1 = vld [vmem:[#allocation9 + $0x430] sm:$0xff]  }
 0x287   :  { %1675 = vmatmul.mubr.bf16.vlgmr.msra.gmra.mxu1 %v17757_v23 }
 0x288   :  { %14715 = vmatpush3.bf16.msra.mxu1 %v16900_v2  ;;  %2077 = vmatprep.mubr.bf16.mxu1 %v17751_v28  ;;  %v16935_v2 = vld [vmem:[#allocation9 + $0x468] sm:$0xff]  }
 0x289   :  { %14716 = vmatprep.subr.bf16.mxu1 %v16901_v3  ;;  %v16936_v3 = vld [vmem:[#allocation9 + $0x428] sm:$0xff]  }
 0x28c   :  { %14717 = vmatpush3.bf16.msra.mxu1 %v16902_v4  ;;  %v16937_v4 = vld [vmem:[#allocation9 + $0x460] sm:$0xff]  }
 0x28d   :  { %14718 = vmatprep.subr.bf16.mxu1 %v16903_v5  ;;  %v16938_v5 = vld [vmem:[#allocation9 + $0x420] sm:$0xff]  }
 0x290   :  { %14719 = vmatpush3.bf16.msra.mxu1 %v16904_v6  ;;  %v16939_v6 = vld [vmem:[#allocation9 + $0x458] sm:$0xff]  }
 0x291   :  { %14720 = vmatprep.subr.bf16.mxu1 %v16905_v7  ;;  %v16940_v7 = vld [vmem:[#allocation9 + $0x418] sm:$0xff]  }
 0x294   :  { %14721 = vmatpush3.bf16.msra.mxu1 %v16906_v8  ;;  %v16941_v8 = vld [vmem:[#allocation9 + $0x450] sm:$0xff]  }
 0x295   :  { %14722 = vmatprep.subr.bf16.mxu1 %v16907_v9  ;;  %v16942_v9 = vld [vmem:[#allocation9 + $0x410] sm:$0xff]  }
 0x298   :  { %14723 = vmatpush3.bf16.msra.mxu1 %v16908_v10  ;;  %v16943_v10 = vld [vmem:[#allocation9 + $0x448] sm:$0xff]  }
 0x299   :  { %14724 = vmatprep.subr.bf16.mxu1 %v16909_v11  ;;  %v16944_v11 = vld [vmem:[#allocation9 + $0x408] sm:$0xff]  }
 0x29c   :  { %14725 = vmatpush3.bf16.msra.mxu1 %v16910_v12  ;;  %v16945_v12 = vld [vmem:[#allocation9 + $0x440] sm:$0xff]  }
 0x29d   :  { %14726 = vmatprep.subr.bf16.mxu1 %v16911_v13  ;;  %v16946_v13 = vld [vmem:[#allocation9 + $0x400] sm:$0xff]  }
 0x2a0   :  { %14727 = vmatpush3.bf16.msra.mxu1 %v16912_v14  ;;  %v13213_v14 = vld [vmem:[%s20237_s6 + $0x60] sm:$0xff] }
 0x2a1   :  { %14728 = vmatprep.subr.bf16.mxu1 %v16913_v15 }
 0x2a4   :  { %14729 = vmatpush3.bf16.msra.mxu1 %v16914_v16 }
 0x2a7   :  { %2078 = vmatmul.mubr.bf16.vlgmr.msra.gmra.mxu1 %v17753_v22 }
 0x2a8   :  { %15857 = vmatprep.mubr.msk.f32.mxu1 %vm1150_vm0, %v13213_v14 }
 0x31f   :  { %v15835_v19 = vpop.f32.mrf.mxu1 }
 0x321   :  { %v17813_v20 = vpop.f32.mrf.mxu1 }
 0x323   :  { %v15838_v38 = vpop.f32.mrf.mxu1 }
 0x325   :  { %v17815_v17 = vpop.f32.mrf.mxu1 }
 0x327   :  { %v15843_v21 = vpop.f32.mrf.mxu1 }
 0x328   :  { %v17817_v24 = vadd.f32 %v15843_v21, %v15835_v19 }
 0x329   :  { %v17819_v25 = vpop.f32.mrf.mxu1 }
 0x32b   :  { %v15846_v26 = vpop.f32.mrf.mxu1 }
 0x32c   :  { %v17821_v27 = vadd.f32 %v15846_v26, %v15838_v38 }
 0x32d   :  { %v17823_v39 = vpop.f32.mrf.mxu1 }
 0x347   :  { %v14703_v40 = vpop.f32.mrf.mxu1 }
 0x349   :  { %v14704_v37 = vpop.f32.mrf.mxu1 }
 0x34a   :  { %v14705_v30 = vadd.f32 %v14704_v37, %v14703_v40 }
 0x34b   :  { %v14706_v31 = vpop.f32.mrf.mxu1 }
 0x34c   :  { %v1677_v32 = vadd.f32 %v14705_v30, %v14683_v41 }
 0x34d   :  { %v14707_v34 = vpop.f32.mrf.mxu1 }
 0x34e   :  { %15847 = vmatprep.subr.mxu0 %v1677_v32  ;;  %v16948_v34 = vld [vmem:[#allocation9 + $0x4b8] sm:$0xff]  }
 0x34f   :  { %15848 = vmatpush3.msra.mxu0 %v1677_v32  ;;  %v16947_v32 = vld [vmem:[#allocation9 + $0x4f8] sm:$0xff]  }
 0x350   :  { %15850 = vmatmul.mubr.msk.f32.vlgmr.msra.gmra.mxu0 %vm1150_vm0, %v13174_v35  ;;  %14736 = vmatprep.subr.bf16.mxu0 %v16915_v33  ;;  %v16949_v35 = vld [vmem:[#allocation9 + $0x4f0] sm:$0xff]  }
 0x351   :  { %14737 = vmatpush3.bf16.msra.mxu0 %v16916_v36  ;;  %15852 = vmatprep.mubr.msk.f32.mxu0 %vm1150_vm0, %v13175_v42  ;;  %v13216_v36 = vld [vmem:[%s20237_s6 + $0x78] sm:$0xff] }
 0x352   :  { %14738 = vmatprep.subr.bf16.mxu0 %v16917_v43  ;;  %v16950_v42 = vld [vmem:[#allocation9 + $0x4b0] sm:$0xff]   ;;  %v16951_v43 = vld [vmem:[#allocation9 + $0x4e8] sm:$0xff]  }
 0x354   :  { %15853 = vmatmul.mubr.msk.f32.gmra.mxu0 %vm1150_vm0, %v13176_v44  ;;  %v16952_v44 = vld [vmem:[#allocation9 + $0x4a8] sm:$0xff]  }
 0x355   :  { %14739 = vmatpush3.bf16.msra.mxu0 %v16918_v45  ;;  %2117 = vmatprep.mubr.bf16.mxu0 %v17755_v29  ;;  %v16953_v45 = vld [vmem:[#allocation9 + $0x4e0] sm:$0xff]  }
 0x356   :  { %14740 = vmatprep.subr.bf16.mxu0 %v16919_v46  ;;  %v16954_v46 = vld [vmem:[#allocation9 + $0x4a0] sm:$0xff]  }
 0x359   :  { %14741 = vmatpush3.bf16.msra.mxu0 %v16920_v47  ;;  %v16955_v47 = vld [vmem:[#allocation9 + $0x4d8] sm:$0xff]  }
 0x35a   :  { %14742 = vmatprep.subr.bf16.mxu0 %v16921_v48  ;;  %v16956_v48 = vld [vmem:[#allocation9 + $0x498] sm:$0xff]  }
 0x35d   :  { %14743 = vmatpush3.bf16.msra.mxu0 %v16922_v49  ;;  %v16957_v49 = vld [vmem:[#allocation9 + $0x4d0] sm:$0xff]  }
 0x35e   :  { %14744 = vmatprep.subr.bf16.mxu0 %v16923_v50  ;;  %v16958_v50 = vld [vmem:[#allocation9 + $0x490] sm:$0xff]  }
 0x361   :  { %14745 = vmatpush3.bf16.msra.mxu0 %v16924_v51  ;;  %v16959_v51 = vld [vmem:[#allocation9 + $0x4c8] sm:$0xff]  }
 0x362   :  { %14746 = vmatprep.subr.bf16.mxu0 %v16925_v52  ;;  %v16960_v52 = vld [vmem:[#allocation9 + $0x488] sm:$0xff]  }
 0x365   :  { %14747 = vmatpush3.bf16.msra.mxu0 %v16926_v53  ;;  %v16961_v53 = vld [vmem:[#allocation9 + $0x4c0] sm:$0xff]  }
 0x366   :  { %14748 = vmatprep.subr.bf16.mxu0 %v16927_v54 }
 0x367   :  { %v14730_v57 = vpop.f32.mrf.mxu1 }
 0x369   :  { %v14731_v58 = vpop.f32.mrf.mxu1  ;;  %14749 = vmatpush3.bf16.msra.mxu0 %v16928_v55 }
 0x36a   :  { %14750 = vmatprep.subr.bf16.mxu0 %v16929_v56  ;;  %v14732_v37 = vadd.f32 %v14731_v58, %v14730_v57  ;;  %v16962_v56 = vld [vmem:[#allocation9 + $0x480] sm:$0xff]   ;;  %v16963_v58 = vld [vmem:[#allocation9 + $0x578] sm:$0xff]  }
 0x36b   :  { %v14733_v61 = vpop.f32.mrf.mxu1 }
 0x36c   :  { %v16964_v61 = vld [vmem:[#allocation9 + $0x538] sm:$0xff]  }
 0x36d   :  { %v14734_v62 = vpop.f32.mrf.mxu1  ;;  %14751 = vmatpush3.bf16.msra.mxu0 %v16930_v59 }
 0x36e   :  { %14763 = vmatprep.subr.bf16.mxu0 %v16931_v60  ;;  %v16965_v62 = vld [vmem:[#allocation9 + $0x570] sm:$0xff]  }
 0x370   :  { %2118 = vmatmul.mubr.bf16.vlgmr.msra.gmra.mxu0 %v17757_v23 }
 0x371   :  { %14764 = vmatpush3.bf16.msra.mxu0 %v16932_v63  ;;  %2520 = vmatprep.mubr.bf16.mxu0 %v17751_v28  ;;  %v16966_v63 = vld [vmem:[#allocation9 + $0x530] sm:$0xff]  }
 0x372   :  { %14765 = vmatprep.subr.bf16.mxu0 %v16933_v0  ;;  %v16967_v0 = vld [vmem:[#allocation9 + $0x568] sm:$0xff]  }
 0x375   :  { %14766 = vmatpush3.bf16.msra.mxu0 %v16934_v1  ;;  %v16968_v1 = vld [vmem:[#allocation9 + $0x528] sm:$0xff]  }
 0x376   :  { %14767 = vmatprep.subr.bf16.mxu0 %v16935_v2  ;;  %v16969_v2 = vld [vmem:[#allocation9 + $0x560] sm:$0xff]  }
 0x379   :  { %14768 = vmatpush3.bf16.msra.mxu0 %v16936_v3  ;;  %v16970_v3 = vld [vmem:[#allocation9 + $0x520] sm:$0xff]  }
 0x37a   :  { %14769 = vmatprep.subr.bf16.mxu0 %v16937_v4  ;;  %v16971_v4 = vld [vmem:[#allocation9 + $0x558] sm:$0xff]  }
 0x37d   :  { %14770 = vmatpush3.bf16.msra.mxu0 %v16938_v5  ;;  %v16972_v5 = vld [vmem:[#allocation9 + $0x518] sm:$0xff]  }
 0x37e   :  { %14771 = vmatprep.subr.bf16.mxu0 %v16939_v6  ;;  %v16973_v6 = vld [vmem:[#allocation9 + $0x550] sm:$0xff]  }
 0x381   :  { %14772 = vmatpush3.bf16.msra.mxu0 %v16940_v7  ;;  %v16974_v7 = vld [vmem:[#allocation9 + $0x510] sm:$0xff]  }
 0x382   :  { %14773 = vmatprep.subr.bf16.mxu0 %v16941_v8  ;;  %v16975_v8 = vld [vmem:[#allocation9 + $0x548] sm:$0xff]  }
 0x385   :  { %14774 = vmatpush3.bf16.msra.mxu0 %v16942_v9  ;;  %v16976_v9 = vld [vmem:[#allocation9 + $0x508] sm:$0xff]  }
 0x386   :  { %14775 = vmatprep.subr.bf16.mxu0 %v16943_v10  ;;  %v16977_v10 = vld [vmem:[#allocation9 + $0x540] sm:$0xff]  }
 0x389   :  { %14776 = vmatpush3.bf16.msra.mxu0 %v16944_v11  ;;  %v16978_v11 = vld [vmem:[#allocation9 + $0x500] sm:$0xff]  }
 0x38a   :  { %14777 = vmatprep.subr.bf16.mxu0 %v16945_v12  ;;  %v13253_v12 = vld [vmem:[%s20237_s6 + $0x80] sm:$0xff] }
 0x38d   :  { %14778 = vmatpush3.bf16.msra.mxu0 %v16946_v13 }
 0x390   :  { %2521 = vmatmul.mubr.bf16.vlgmr.msra.gmra.mxu0 %v17753_v22 }
 0x391   :  { %15865 = vmatprep.mubr.msk.f32.mxu0 %vm1150_vm0, %v13253_v12 }
 0x410   :  { %v15851_v15 = vpop.f32.mrf.mxu0 }
 0x411   :  { %v17848_v16 = vadd.f32 %v15851_v15, %v17817_v24  ;;  %v13214_v24 = vld [vmem:[%s20237_s6 + $0x68] sm:$0xff] }
 0x412   :  { %v17850_v18 = vpop.f32.mrf.mxu0 }
 0x414   :  { %v15854_v19 = vpop.f32.mrf.mxu0 }
 0x415   :  { %v17853_v38 = vadd.f32 %v15854_v19, %v17821_v27  ;;  %v13215_v27 = vld [vmem:[%s20237_s6 + $0x70] sm:$0xff] }
 0x416   :  { %v17855_v21 = vpop.f32.mrf.mxu0 }
 0x430   :  { %v14752_v26 = vpop.f32.mrf.mxu0 }
 0x432   :  { %v14753_v40 = vpop.f32.mrf.mxu0 }
 0x433   :  { %v14754_v41 = vadd.f32 %v14753_v40, %v14752_v26 }
 0x434   :  { %v14755_v30 = vpop.f32.mrf.mxu0 }
 0x435   :  { %v2120_v31 = vadd.f32 %v14754_v41, %v14732_v37 }
 0x436   :  { %v14756_v33 = vpop.f32.mrf.mxu0 }
 0x437   :  { %15855 = vmatprep.subr.mxu1 %v2120_v31  ;;  %v16979_v33 = vld [vmem:[#allocation9 + $0x5f8] sm:$0xff]  }
 0x438   :  { %15856 = vmatpush3.msra.mxu1 %v2120_v31 }
 0x439   :  { %15858 = vmatmul.mubr.msk.f32.vlgmr.msra.gmra.mxu1 %vm1150_vm0, %v13214_v24  ;;  %14785 = vmatprep.subr.bf16.mxu1 %v16947_v32 }
 0x43a   :  { %14786 = vmatpush3.bf16.msra.mxu1 %v16948_v34  ;;  %15860 = vmatprep.mubr.msk.f32.mxu1 %vm1150_vm0, %v13215_v27  ;;  %v16980_v34 = vld [vmem:[#allocation9 + $0x5b8] sm:$0xff]   ;;  %v16981_v27 = vld [vmem:[#allocation9 + $0x5f0] sm:$0xff]  }
 0x43b   :  { %14787 = vmatprep.subr.bf16.mxu1 %v16949_v35  ;;  %v13256_v35 = vld [vmem:[%s20237_s6 + $0x98] sm:$0xff] }
 0x43d   :  { %15861 = vmatmul.mubr.msk.f32.gmra.mxu1 %vm1150_vm0, %v13216_v36  ;;  %v16982_v36 = vld [vmem:[#allocation9 + $0x5b0] sm:$0xff]  }
 0x43e   :  { %14788 = vmatpush3.bf16.msra.mxu1 %v16950_v42  ;;  %2560 = vmatprep.mubr.bf16.mxu1 %v17755_v29  ;;  %v16983_v42 = vld [vmem:[#allocation9 + $0x5e8] sm:$0xff]  }
 0x43f   :  { %14789 = vmatprep.subr.bf16.mxu1 %v16951_v43  ;;  %v16984_v43 = vld [vmem:[#allocation9 + $0x5a8] sm:$0xff]  }
 0x442   :  { %14790 = vmatpush3.bf16.msra.mxu1 %v16952_v44  ;;  %v16985_v44 = vld [vmem:[#allocation9 + $0x5e0] sm:$0xff]  }
 0x443   :  { %14791 = vmatprep.subr.bf16.mxu1 %v16953_v45  ;;  %v16986_v45 = vld [vmem:[#allocation9 + $0x5a0] sm:$0xff]  }
 0x446   :  { %14792 = vmatpush3.bf16.msra.mxu1 %v16954_v46  ;;  %v16987_v46 = vld [vmem:[#allocation9 + $0x5d8] sm:$0xff]  }
 0x447   :  { %14793 = vmatprep.subr.bf16.mxu1 %v16955_v47  ;;  %v16988_v47 = vld [vmem:[#allocation9 + $0x598] sm:$0xff]  }
 0x44a   :  { %14794 = vmatpush3.bf16.msra.mxu1 %v16956_v48  ;;  %v16989_v48 = vld [vmem:[#allocation9 + $0x5d0] sm:$0xff]  }
 0x44b   :  { %14795 = vmatprep.subr.bf16.mxu1 %v16957_v49  ;;  %v16990_v49 = vld [vmem:[#allocation9 + $0x590] sm:$0xff]  }
 0x44e   :  { %14796 = vmatpush3.bf16.msra.mxu1 %v16958_v50  ;;  %v16991_v50 = vld [vmem:[#allocation9 + $0x5c8] sm:$0xff]  }
 0x44f   :  { %14797 = vmatprep.subr.bf16.mxu1 %v16959_v51  ;;  %v16992_v51 = vld [vmem:[#allocation9 + $0x588] sm:$0xff]  }
 0x450   :  { %v14779_v54 = vpop.f32.mrf.mxu0 }
 0x452   :  { %v14780_v55 = vpop.f32.mrf.mxu0  ;;  %14798 = vmatpush3.bf16.msra.mxu1 %v16960_v52  ;;  %v16993_v52 = vld [vmem:[#allocation9 + $0x5c0] sm:$0xff]  }
 0x453   :  { %v14781_v57 = vadd.f32 %v14780_v55, %v14779_v54  ;;  %14799 = vmatprep.subr.bf16.mxu1 %v16961_v53  ;;  %v16994_v55 = vld [vmem:[#allocation9 + $0x580] sm:$0xff]  }
 0x454   :  { %v14782_v59 = vpop.f32.mrf.mxu0 }
 0x455   :  { %v16996_v59 = vld [vmem:[#allocation9 + $0x638] sm:$0xff]  }
 0x456   :  { %v14783_v60 = vpop.f32.mrf.mxu0  ;;  %14800 = vmatpush3.bf16.msra.mxu1 %v16962_v56  ;;  %v16995_v56 = vld [vmem:[#allocation9 + $0x678] sm:$0xff]  }
 0x457   :  { %14812 = vmatprep.subr.bf16.mxu1 %v16963_v58  ;;  %v16997_v60 = vld [vmem:[#allocation9 + $0x670] sm:$0xff]  }
 0x459   :  { %2561 = vmatmul.mubr.bf16.vlgmr.msra.gmra.mxu1 %v17757_v23 }
 0x45a   :  { %14813 = vmatpush3.bf16.msra.mxu1 %v16964_v61  ;;  %2963 = vmatprep.mubr.bf16.mxu1 %v17751_v28  ;;  %v16998_v61 = vld [vmem:[#allocation9 + $0x630] sm:$0xff]  }
 0x45b   :  { %14814 = vmatprep.subr.bf16.mxu1 %v16965_v62  ;;  %v16999_v62 = vld [vmem:[#allocation9 + $0x668] sm:$0xff]  }
 0x45e   :  { %14815 = vmatpush3.bf16.msra.mxu1 %v16966_v63  ;;  %v17000_v63 = vld [vmem:[#allocation9 + $0x628] sm:$0xff]  }
 0x45f   :  { %14816 = vmatprep.subr.bf16.mxu1 %v16967_v0  ;;  %v17001_v0 = vld [vmem:[#allocation9 + $0x660] sm:$0xff]  }
 0x462   :  { %14817 = vmatpush3.bf16.msra.mxu1 %v16968_v1  ;;  %v17002_v1 = vld [vmem:[#allocation9 + $0x620] sm:$0xff]  }
 0x463   :  { %14818 = vmatprep.subr.bf16.mxu1 %v16969_v2  ;;  %v17003_v2 = vld [vmem:[#allocation9 + $0x658] sm:$0xff]  }
 0x466   :  { %14819 = vmatpush3.bf16.msra.mxu1 %v16970_v3  ;;  %v17004_v3 = vld [vmem:[#allocation9 + $0x618] sm:$0xff]  }
 0x467   :  { %14820 = vmatprep.subr.bf16.mxu1 %v16971_v4  ;;  %v17005_v4 = vld [vmem:[#allocation9 + $0x650] sm:$0xff]  }
 0x46a   :  { %14821 = vmatpush3.bf16.msra.mxu1 %v16972_v5  ;;  %v17006_v5 = vld [vmem:[#allocation9 + $0x610] sm:$0xff]  }
 0x46b   :  { %14822 = vmatprep.subr.bf16.mxu1 %v16973_v6  ;;  %v17007_v6 = vld [vmem:[#allocation9 + $0x648] sm:$0xff]  }
 0x46e   :  { %14823 = vmatpush3.bf16.msra.mxu1 %v16974_v7  ;;  %v17008_v7 = vld [vmem:[#allocation9 + $0x608] sm:$0xff]  }
 0x46f   :  { %14824 = vmatprep.subr.bf16.mxu1 %v16975_v8  ;;  %v17009_v8 = vld [vmem:[#allocation9 + $0x640] sm:$0xff]  }
 0x472   :  { %14825 = vmatpush3.bf16.msra.mxu1 %v16976_v9  ;;  %v17010_v9 = vld [vmem:[#allocation9 + $0x600] sm:$0xff]  }
 0x473   :  { %14826 = vmatprep.subr.bf16.mxu1 %v16977_v10  ;;  %v13293_v10 = vld [vmem:[%s20237_s6 + $0xa0] sm:$0xff] }
 0x476   :  { %14827 = vmatpush3.bf16.msra.mxu1 %v16978_v11 }
 0x479   :  { %2964 = vmatmul.mubr.bf16.vlgmr.msra.gmra.mxu1 %v17753_v22 }
 0x47a   :  { %15873 = vmatprep.mubr.msk.f32.mxu1 %vm1150_vm0, %v13293_v10  ;;  %v17041_v10 = vld [vmem:[#allocation9 + $0x740] sm:$0xff]  }
 0x4f9   :  { %v15859_v13 = vpop.f32.mrf.mxu1 }
 0x4fa   :  { %v17878_v14 = vadd.f32 %v15859_v13, %v17848_v16  ;;  %v13254_v16 = vld [vmem:[%s20237_s6 + $0x88] sm:$0xff] }
 0x4fb   :  { %v17880_v15 = vpop.f32.mrf.mxu1 }
 0x4fd   :  { %v15862_v19 = vpop.f32.mrf.mxu1 }
 0x4fe   :  { %v17883_v26 = vadd.f32 %v15862_v19, %v17853_v38  ;;  %v13255_v38 = vld [vmem:[%s20237_s6 + $0x90] sm:$0xff] }
 0x4ff   :  { %v17885_v40 = vpop.f32.mrf.mxu1 }
 0x519   :  { %v14801_v37 = vpop.f32.mrf.mxu1 }
 0x51b   :  { %v14802_v41 = vpop.f32.mrf.mxu1 }
 0x51c   :  { %v14803_v30 = vadd.f32 %v14802_v41, %v14801_v37 }
 0x51d   :  { %v14804_v31 = vpop.f32.mrf.mxu1 }
 0x51e   :  { %v2563_v32 = vadd.f32 %v14803_v30, %v14781_v57 }
 0x51f   :  { %v14805_v24 = vpop.f32.mrf.mxu1 }
 0x520   :  { %15863 = vmatprep.subr.mxu0 %v2563_v32 }
 0x521   :  { %15864 = vmatpush3.msra.mxu0 %v2563_v32 }
 0x522   :  { %15866 = vmatmul.mubr.msk.f32.vlgmr.msra.gmra.mxu0 %vm1150_vm0, %v13254_v16  ;;  %14834 = vmatprep.subr.bf16.mxu0 %v16979_v33 }
 0x523   :  { %14835 = vmatpush3.bf16.msra.mxu0 %v16980_v34  ;;  %15868 = vmatprep.mubr.msk.f32.mxu0 %vm1150_vm0, %v13255_v38  ;;  %v17011_v34 = vld [vmem:[#allocation9 + $0x6f8] sm:$0xff]  }
 0x524   :  { %14836 = vmatprep.subr.bf16.mxu0 %v16981_v27  ;;  %v17012_v27 = vld [vmem:[#allocation9 + $0x6b8] sm:$0xff]  }
 0x526   :  { %15869 = vmatmul.mubr.msk.f32.gmra.mxu0 %vm1150_vm0, %v13256_v35  ;;  %v17013_v35 = vld [vmem:[#allocation9 + $0x6f0] sm:$0xff]  }
 0x527   :  { %14837 = vmatpush3.bf16.msra.mxu0 %v16982_v36  ;;  %3003 = vmatprep.mubr.bf16.mxu0 %v17755_v29  ;;  %v13296_v36 = vld [vmem:[%s20237_s6 + $0xb8] sm:$0xff] }
 0x528   :  { %14838 = vmatprep.subr.bf16.mxu0 %v16983_v42  ;;  %v17014_v42 = vld [vmem:[#allocation9 + $0x6b0] sm:$0xff]  }
 0x52b   :  { %14839 = vmatpush3.bf16.msra.mxu0 %v16984_v43  ;;  %v17015_v43 = vld [vmem:[#allocation9 + $0x6e8] sm:$0xff]  }
 0x52c   :  { %14840 = vmatprep.subr.bf16.mxu0 %v16985_v44  ;;  %v17016_v44 = vld [vmem:[#allocation9 + $0x6a8] sm:$0xff]  }
 0x52f   :  { %14841 = vmatpush3.bf16.msra.mxu0 %v16986_v45  ;;  %v17017_v45 = vld [vmem:[#allocation9 + $0x6e0] sm:$0xff]  }
 0x530   :  { %14842 = vmatprep.subr.bf16.mxu0 %v16987_v46  ;;  %v17018_v46 = vld [vmem:[#allocation9 + $0x6a0] sm:$0xff]  }
 0x533   :  { %14843 = vmatpush3.bf16.msra.mxu0 %v16988_v47  ;;  %v17019_v47 = vld [vmem:[#allocation9 + $0x6d8] sm:$0xff]  }
 0x534   :  { %14844 = vmatprep.subr.bf16.mxu0 %v16989_v48  ;;  %v17020_v48 = vld [vmem:[#allocation9 + $0x698] sm:$0xff]  }
 0x537   :  { %14845 = vmatpush3.bf16.msra.mxu0 %v16990_v49  ;;  %v17021_v49 = vld [vmem:[#allocation9 + $0x6d0] sm:$0xff]  }
 0x538   :  { %14846 = vmatprep.subr.bf16.mxu0 %v16991_v50  ;;  %v17022_v50 = vld [vmem:[#allocation9 + $0x690] sm:$0xff]  }
 0x539   :  { %v14828_v53 = vpop.f32.mrf.mxu1 }
 0x53b   :  { %v14829_v54 = vpop.f32.mrf.mxu1  ;;  %14847 = vmatpush3.bf16.msra.mxu0 %v16992_v51  ;;  %v17023_v51 = vld [vmem:[#allocation9 + $0x6c8] sm:$0xff]  }
 0x53c   :  { %14848 = vmatprep.subr.bf16.mxu0 %v16993_v52  ;;  %v14830_v32 = vadd.f32 %v14829_v54, %v14828_v53  ;;  %v17024_v52 = vld [vmem:[#allocation9 + $0x688] sm:$0xff]   ;;  %v17025_v53 = vld [vmem:[#allocation9 + $0x6c0] sm:$0xff]  }
 0x53d   :  { %v14831_v57 = vpop.f32.mrf.mxu1 }
 0x53f   :  { %v14832_v58 = vpop.f32.mrf.mxu1  ;;  %14849 = vmatpush3.bf16.msra.mxu0 %v16994_v55 }
 0x540   :  { %14861 = vmatprep.subr.bf16.mxu0 %v16995_v56  ;;  %v17026_v56 = vld [vmem:[#allocation9 + $0x680] sm:$0xff]   ;;  %v17027_v58 = vld [vmem:[#allocation9 + $0x778] sm:$0xff]  }
 0x542   :  { %3004 = vmatmul.mubr.bf16.vlgmr.msra.gmra.mxu0 %v17757_v23 }
 0x543   :  { %14862 = vmatpush3.bf16.msra.mxu0 %v16996_v59  ;;  %3406 = vmatprep.mubr.bf16.mxu0 %v17751_v28 }
 0x544   :  { %14863 = vmatprep.subr.bf16.mxu0 %v16997_v60 }
 0x547   :  { %14864 = vmatpush3.bf16.msra.mxu0 %v16998_v61  ;;  %v17028_v61 = vld [vmem:[#allocation9 + $0x738] sm:$0xff]  }
 0x548   :  { %14865 = vmatprep.subr.bf16.mxu0 %v16999_v62  ;;  %v17029_v62 = vld [vmem:[#allocation9 + $0x770] sm:$0xff]  }
 0x54b   :  { %14866 = vmatpush3.bf16.msra.mxu0 %v17000_v63  ;;  %v17030_v63 = vld [vmem:[#allocation9 + $0x730] sm:$0xff]  }
 0x54c   :  { %14867 = vmatprep.subr.bf16.mxu0 %v17001_v0  ;;  %v17031_v0 = vld [vmem:[#allocation9 + $0x768] sm:$0xff]  }
 0x54f   :  { %14868 = vmatpush3.bf16.msra.mxu0 %v17002_v1  ;;  %v17032_v1 = vld [vmem:[#allocation9 + $0x728] sm:$0xff]  }
 0x550   :  { %14869 = vmatprep.subr.bf16.mxu0 %v17003_v2  ;;  %v17033_v2 = vld [vmem:[#allocation9 + $0x760] sm:$0xff]  }
 0x553   :  { %14870 = vmatpush3.bf16.msra.mxu0 %v17004_v3  ;;  %v17034_v3 = vld [vmem:[#allocation9 + $0x720] sm:$0xff]  }
 0x554   :  { %14871 = vmatprep.subr.bf16.mxu0 %v17005_v4  ;;  %v17035_v4 = vld [vmem:[#allocation9 + $0x758] sm:$0xff]  }
 0x557   :  { %14872 = vmatpush3.bf16.msra.mxu0 %v17006_v5  ;;  %v17036_v5 = vld [vmem:[#allocation9 + $0x718] sm:$0xff]  }
 0x558   :  { %14873 = vmatprep.subr.bf16.mxu0 %v17007_v6  ;;  %v17037_v6 = vld [vmem:[#allocation9 + $0x750] sm:$0xff]  }
 0x55b   :  { %14874 = vmatpush3.bf16.msra.mxu0 %v17008_v7  ;;  %v17038_v7 = vld [vmem:[#allocation9 + $0x710] sm:$0xff]  }
 0x55c   :  { %14875 = vmatprep.subr.bf16.mxu0 %v17009_v8  ;;  %v17039_v8 = vld [vmem:[#allocation9 + $0x748] sm:$0xff]  }
 0x55f   :  { %14876 = vmatpush3.bf16.msra.mxu0 %v17010_v9  ;;  %v17040_v9 = vld [vmem:[#allocation9 + $0x708] sm:$0xff]  }
 0x562   :  { %3407 = vmatmul.mubr.bf16.vlgmr.msra.gmra.mxu0 %v17753_v22 }
 0x5e2   :  { %v15867_v11 = vpop.f32.mrf.mxu0 }
 0x5e3   :  { %v17908_v12 = vadd.f32 %v15867_v11, %v17878_v14  ;;  %v13294_v14 = vld [vmem:[%s20237_s6 + $0xa8] sm:$0xff] }
 0x5e4   :  { %v17910_v13 = vpop.f32.mrf.mxu0  ;;  %v17042_v11 = vld [vmem:[#allocation9 + $0x700] sm:$0xff]  }
 0x5e6   :  { %v15870_v19 = vpop.f32.mrf.mxu0 }
 0x5e7   :  { %v17913_v37 = vadd.f32 %v15870_v19, %v17883_v26  ;;  %v13295_v26 = vld [vmem:[%s20237_s6 + $0xb0] sm:$0xff]  ;;  %v13333_v19 = vld [vmem:[%s20237_s6 + $0xc0] sm:$0xff] }
 0x5e8   :  { %v17915_v41 = vpop.f32.mrf.mxu0  ;;  %15881 = vmatprep.mubr.msk.f32.mxu0 %vm1150_vm0, %v13333_v19  ;;  %v17073_v19 = vld [vmem:[#allocation9 + $0x840] sm:$0xff]  }
 0x602   :  { %v14850_v30 = vpop.f32.mrf.mxu0 }
 0x604   :  { %v14851_v31 = vpop.f32.mrf.mxu0 }
 0x605   :  { %v14852_v33 = vadd.f32 %v14851_v31, %v14850_v30 }
 0x606   :  { %v14853_v24 = vpop.f32.mrf.mxu0 }
 0x607   :  { %v3006_v16 = vadd.f32 %v14852_v33, %v14830_v32 }
 0x608   :  { %v14854_v38 = vpop.f32.mrf.mxu0 }
 0x609   :  { %15871 = vmatprep.subr.mxu1 %v3006_v16 }
 0x60a   :  { %15872 = vmatpush3.msra.mxu1 %v3006_v16 }
 0x60b   :  { %15874 = vmatmul.mubr.msk.f32.vlgmr.msra.gmra.mxu1 %vm1150_vm0, %v13294_v14  ;;  %14883 = vmatprep.subr.bf16.mxu1 %v17011_v34 }
 0x60c   :  { %14884 = vmatpush3.bf16.msra.mxu1 %v17012_v27  ;;  %15876 = vmatprep.mubr.msk.f32.mxu1 %vm1150_vm0, %v13295_v26 }
 0x60d   :  { %14885 = vmatprep.subr.bf16.mxu1 %v17013_v35  ;;  %v17043_v35 = vld [vmem:[#allocation9 + $0x7f8] sm:$0xff]  }
 0x60f   :  { %15877 = vmatmul.mubr.msk.f32.gmra.mxu1 %vm1150_vm0, %v13296_v36 }
 0x610   :  { %14886 = vmatpush3.bf16.msra.mxu1 %v17014_v42  ;;  %3446 = vmatprep.mubr.bf16.mxu1 %v17755_v29  ;;  %v17044_v42 = vld [vmem:[#allocation9 + $0x7b8] sm:$0xff]  }
 0x611   :  { %14887 = vmatprep.subr.bf16.mxu1 %v17015_v43  ;;  %v17045_v43 = vld [vmem:[#allocation9 + $0x7f0] sm:$0xff]  }
 0x614   :  { %14888 = vmatpush3.bf16.msra.mxu1 %v17016_v44  ;;  %v13336_v44 = vld [vmem:[%s20237_s6 + $0xd8] sm:$0xff] }
 0x615   :  { %14889 = vmatprep.subr.bf16.mxu1 %v17017_v45  ;;  %v17046_v45 = vld [vmem:[#allocation9 + $0x7b0] sm:$0xff]  }
 0x618   :  { %14890 = vmatpush3.bf16.msra.mxu1 %v17018_v46  ;;  %v17047_v46 = vld [vmem:[#allocation9 + $0x7e8] sm:$0xff]  }
 0x619   :  { %14891 = vmatprep.subr.bf16.mxu1 %v17019_v47  ;;  %v17048_v47 = vld [vmem:[#allocation9 + $0x7a8] sm:$0xff]  }
 0x61c   :  { %14892 = vmatpush3.bf16.msra.mxu1 %v17020_v48  ;;  %v17049_v48 = vld [vmem:[#allocation9 + $0x7e0] sm:$0xff]  }
 0x61d   :  { %14893 = vmatprep.subr.bf16.mxu1 %v17021_v49  ;;  %v17050_v49 = vld [vmem:[#allocation9 + $0x7a0] sm:$0xff]  }
 0x620   :  { %14894 = vmatpush3.bf16.msra.mxu1 %v17022_v50  ;;  %v17051_v50 = vld [vmem:[#allocation9 + $0x7d8] sm:$0xff]  }
 0x621   :  { %14895 = vmatprep.subr.bf16.mxu1 %v17023_v51  ;;  %v17052_v51 = vld [vmem:[#allocation9 + $0x798] sm:$0xff]  }
 0x622   :  { %v14877_v54 = vpop.f32.mrf.mxu0 }
 0x624   :  { %v14878_v55 = vpop.f32.mrf.mxu0  ;;  %14896 = vmatpush3.bf16.msra.mxu1 %v17024_v52  ;;  %v17053_v52 = vld [vmem:[#allocation9 + $0x7d0] sm:$0xff]  }
 0x625   :  { %v14879_v57 = vadd.f32 %v14878_v55, %v14877_v54  ;;  %14897 = vmatprep.subr.bf16.mxu1 %v17025_v53  ;;  %v17054_v53 = vld [vmem:[#allocation9 + $0x790] sm:$0xff]   ;;  %v17055_v54 = vld [vmem:[#allocation9 + $0x7c8] sm:$0xff]  }
 0x626   :  { %v14880_v59 = vpop.f32.mrf.mxu0  ;;  %v17056_v55 = vld [vmem:[#allocation9 + $0x788] sm:$0xff]  }
 0x627   :  { %v17058_v59 = vld [vmem:[#allocation9 + $0x780] sm:$0xff]  }
 0x628   :  { %v14881_v60 = vpop.f32.mrf.mxu0  ;;  %14898 = vmatpush3.bf16.msra.mxu1 %v17026_v56  ;;  %v17057_v56 = vld [vmem:[#allocation9 + $0x7c0] sm:$0xff]  }
 0x629   :  { %14910 = vmatprep.subr.bf16.mxu1 %v17027_v58  ;;  %v17059_v60 = vld [vmem:[#allocation9 + $0x878] sm:$0xff]  }
 0x62b   :  { %3447 = vmatmul.mubr.bf16.vlgmr.msra.gmra.mxu1 %v17757_v23 }
 0x62c   :  { %14911 = vmatpush3.bf16.msra.mxu1 %v17028_v61  ;;  %3849 = vmatprep.mubr.bf16.mxu1 %v17751_v28 }
 0x62d   :  { %14912 = vmatprep.subr.bf16.mxu1 %v17029_v62 }
 0x630   :  { %14913 = vmatpush3.bf16.msra.mxu1 %v17030_v63  ;;  %v17060_v63 = vld [vmem:[#allocation9 + $0x838] sm:$0xff]  }
 0x631   :  { %14914 = vmatprep.subr.bf16.mxu1 %v17031_v0  ;;  %v17061_v0 = vld [vmem:[#allocation9 + $0x870] sm:$0xff]  }
 0x634   :  { %14915 = vmatpush3.bf16.msra.mxu1 %v17032_v1  ;;  %v17062_v1 = vld [vmem:[#allocation9 + $0x830] sm:$0xff]  }
 0x635   :  { %14916 = vmatprep.subr.bf16.mxu1 %v17033_v2  ;;  %v17063_v2 = vld [vmem:[#allocation9 + $0x868] sm:$0xff]  }
 0x638   :  { %14917 = vmatpush3.bf16.msra.mxu1 %v17034_v3  ;;  %v17064_v3 = vld [vmem:[#allocation9 + $0x828] sm:$0xff]  }
 0x639   :  { %14918 = vmatprep.subr.bf16.mxu1 %v17035_v4  ;;  %v17065_v4 = vld [vmem:[#allocation9 + $0x860] sm:$0xff]  }
 0x63c   :  { %14919 = vmatpush3.bf16.msra.mxu1 %v17036_v5  ;;  %v17066_v5 = vld [vmem:[#allocation9 + $0x820] sm:$0xff]  }
 0x63d   :  { %14920 = vmatprep.subr.bf16.mxu1 %v17037_v6  ;;  %v17067_v6 = vld [vmem:[#allocation9 + $0x858] sm:$0xff]  }
 0x640   :  { %14921 = vmatpush3.bf16.msra.mxu1 %v17038_v7  ;;  %v17068_v7 = vld [vmem:[#allocation9 + $0x818] sm:$0xff]  }
 0x641   :  { %14922 = vmatprep.subr.bf16.mxu1 %v17039_v8  ;;  %v17069_v8 = vld [vmem:[#allocation9 + $0x850] sm:$0xff]  }
 0x644   :  { %14923 = vmatpush3.bf16.msra.mxu1 %v17040_v9  ;;  %v17070_v9 = vld [vmem:[#allocation9 + $0x810] sm:$0xff]  }
 0x645   :  { %14924 = vmatprep.subr.bf16.mxu1 %v17041_v10  ;;  %v17071_v10 = vld [vmem:[#allocation9 + $0x848] sm:$0xff]  }
 0x648   :  { %14925 = vmatpush3.bf16.msra.mxu1 %v17042_v11  ;;  %v17072_v11 = vld [vmem:[#allocation9 + $0x808] sm:$0xff]  }
 0x64b   :  { %3850 = vmatmul.mubr.bf16.vlgmr.msra.gmra.mxu1 %v17753_v22 }
 0x6cb   :  { %v15875_v30 = vpop.f32.mrf.mxu1 }
 0x6cc   :  { %v17938_v31 = vadd.f32 %v15875_v30, %v17908_v12  ;;  %v13334_v12 = vld [vmem:[%s20237_s6 + $0xc8] sm:$0xff] }
 0x6cd   :  { %v17940_v32 = vpop.f32.mrf.mxu1  ;;  %v17074_v30 = vld [vmem:[#allocation9 + $0x800] sm:$0xff]  }
 0x6cf   :  { %v15878_v33 = vpop.f32.mrf.mxu1 }
 0x6d0   :  { %v17943_v24 = vadd.f32 %v15878_v33, %v17913_v37  ;;  %v13335_v37 = vld [vmem:[%s20237_s6 + $0xd0] sm:$0xff]  ;;  %v13373_v33 = vld [vmem:[%s20237_s6 + $0xe0] sm:$0xff] }
 0x6d1   :  { %v17945_v16 = vpop.f32.mrf.mxu1  ;;  %15889 = vmatprep.mubr.msk.f32.mxu1 %vm1150_vm0, %v13373_v33  ;;  %v17101_v33 = vld [vmem:[#allocation9 + $0x950] sm:$0xff]  }
 0x6eb   :  { %v14899_v34 = vpop.f32.mrf.mxu1 }
 0x6ed   :  { %v14900_v38 = vpop.f32.mrf.mxu1 }
 0x6ee   :  { %v14901_v14 = vadd.f32 %v14900_v38, %v14899_v34  ;;  %v1327_v34 = vadd.f32 %v17819_v25, %v17813_v20 }
 0x6ef   :  { %v14902_v27 = vpop.f32.mrf.mxu1 }
 0x6f0   :  { %v3449_v26 = vadd.f32 %v14901_v14, %v14879_v57  ;;  %v1784_v38 = vadd.f32 %v17850_v18, %v1327_v34  ;;  %v17102_v34 = vld [vmem:[#allocation9 + $0x910] sm:$0xff]  }
 0x6f1   :  { %v14903_v36 = vpop.f32.mrf.mxu1 }
 0x6f2   :  { %15879 = vmatprep.subr.mxu0 %v3449_v26  ;;  %v2227_v14 = vadd.f32 %v17880_v15, %v1784_v38  ;;  %v17103_v38 = vld [vmem:[#allocation9 + $0x948] sm:$0xff]  }
 0x6f3   :  { %15880 = vmatpush3.msra.mxu0 %v3449_v26 }
 0x6f4   :  { %15882 = vmatmul.mubr.msk.f32.vlgmr.msra.gmra.mxu0 %vm1150_vm0, %v13334_v12  ;;  %14932 = vmatprep.subr.bf16.mxu0 %v17043_v35  ;;  %v2670_v27 = vadd.f32 %v17910_v13, %v2227_v14  ;;  %v17104_v14 = vld [vmem:[#allocation9 + $0x908] sm:$0xff]  }
 0x6f5   :  { %14933 = vmatpush3.bf16.msra.mxu0 %v17044_v42  ;;  %15884 = vmatprep.mubr.msk.f32.mxu0 %vm1150_vm0, %v13335_v37 }
 0x6f6   :  { %14934 = vmatprep.subr.bf16.mxu0 %v17045_v43  ;;  %v3113_v35 = vadd.f32 %v17940_v32, %v2670_v27  ;;  %v17105_v27 = vld [vmem:[#allocation9 + $0x940] sm:$0xff]  }
 0x6f8   :  { %15885 = vmatmul.mubr.msk.f32.gmra.mxu0 %vm1150_vm0, %v13336_v44 }
 0x6f9   :  { %14935 = vmatpush3.bf16.msra.mxu0 %v17046_v45  ;;  %3889 = vmatprep.mubr.bf16.mxu0 %v17755_v29 }
 0x6fa   :  { %14936 = vmatprep.subr.bf16.mxu0 %v17047_v46  ;;  %v17075_v46 = vld [vmem:[#allocation9 + $0x8f8] sm:$0xff]  }
 0x6fd   :  { %14937 = vmatpush3.bf16.msra.mxu0 %v17048_v47  ;;  %v17076_v47 = vld [vmem:[#allocation9 + $0x8b8] sm:$0xff]  }
 0x6fe   :  { %14938 = vmatprep.subr.bf16.mxu0 %v17049_v48  ;;  %v17077_v48 = vld [vmem:[#allocation9 + $0x8f0] sm:$0xff]  }
 0x701   :  { %14939 = vmatpush3.bf16.msra.mxu0 %v17050_v49  ;;  %v13376_v49 = vld [vmem:[%s20237_s6 + $0xf8] sm:$0xff] }
 0x702   :  { %14940 = vmatprep.subr.bf16.mxu0 %v17051_v50  ;;  %v17078_v50 = vld [vmem:[#allocation9 + $0x8b0] sm:$0xff]  }
 0x705   :  { %14941 = vmatpush3.bf16.msra.mxu0 %v17052_v51  ;;  %v17079_v51 = vld [vmem:[#allocation9 + $0x8e8] sm:$0xff]  }
 0x706   :  { %14942 = vmatprep.subr.bf16.mxu0 %v17053_v52  ;;  %v17080_v52 = vld [vmem:[#allocation9 + $0x8a8] sm:$0xff]  }
 0x709   :  { %14943 = vmatpush3.bf16.msra.mxu0 %v17054_v53  ;;  %v17081_v53 = vld [vmem:[#allocation9 + $0x8e0] sm:$0xff]  }
 0x70a   :  { %14944 = vmatprep.subr.bf16.mxu0 %v17055_v54  ;;  %v17082_v54 = vld [vmem:[#allocation9 + $0x8a0] sm:$0xff]  }
 0x70b   :  { %v14926_v57 = vpop.f32.mrf.mxu1 }
 0x70d   :  { %v14927_v58 = vpop.f32.mrf.mxu1  ;;  %14945 = vmatpush3.bf16.msra.mxu0 %v17056_v55  ;;  %v17083_v55 = vld [vmem:[#allocation9 + $0x8d8] sm:$0xff]  }
 0x70e   :  { %14946 = vmatprep.subr.bf16.mxu0 %v17057_v56  ;;  %v14928_v15 = vadd.f32 %v14927_v58, %v14926_v57  ;;  %v17084_v56 = vld [vmem:[#allocation9 + $0x898] sm:$0xff]   ;;  %v17085_v57 = vld [vmem:[#allocation9 + $0x8d0] sm:$0xff]  }
 0x70f   :  { %v14929_v61 = vpop.f32.mrf.mxu1  ;;  %v17086_v58 = vld [vmem:[#allocation9 + $0x890] sm:$0xff]  }
 0x710   :  { %v17089_v61 = vld [vmem:[#allocation9 + $0x8c0] sm:$0xff]  }
 0x711   :  { %v14930_v62 = vpop.f32.mrf.mxu1  ;;  %14947 = vmatpush3.bf16.msra.mxu0 %v17058_v59  ;;  %v17087_v59 = vld [vmem:[#allocation9 + $0x8c8] sm:$0xff]  }
 0x712   :  { %14959 = vmatprep.subr.bf16.mxu0 %v17059_v60  ;;  %v17088_v60 = vld [vmem:[#allocation9 + $0x888] sm:$0xff]  }
 0x714   :  { %3890 = vmatmul.mubr.bf16.vlgmr.msra.gmra.mxu0 %v17757_v23 }
 0x715   :  { %14960 = vmatpush3.bf16.msra.mxu0 %v17060_v63  ;;  %4292 = vmatprep.mubr.bf16.mxu0 %v17751_v28 }
 0x716   :  { %14961 = vmatprep.subr.bf16.mxu0 %v17061_v0  ;;  %v17090_v0 = vld [vmem:[#allocation9 + $0x880] sm:$0xff]  }
 0x719   :  { %14962 = vmatpush3.bf16.msra.mxu0 %v17062_v1 }
 0x71a   :  { %14963 = vmatprep.subr.bf16.mxu0 %v17063_v2  ;;  %v17091_v2 = vld [vmem:[#allocation9 + $0x978] sm:$0xff]  }
 0x71d   :  { %14964 = vmatpush3.bf16.msra.mxu0 %v17064_v3 }
 0x71e   :  { %14965 = vmatprep.subr.bf16.mxu0 %v17065_v4 }
 0x721   :  { %14966 = vmatpush3.bf16.msra.mxu0 %v17066_v5  ;;  %v17092_v5 = vld [vmem:[#allocation9 + $0x938] sm:$0xff]  }
 0x722   :  { %14967 = vmatprep.subr.bf16.mxu0 %v17067_v6  ;;  %v17093_v6 = vld [vmem:[#allocation9 + $0x970] sm:$0xff]  }
 0x725   :  { %14968 = vmatpush3.bf16.msra.mxu0 %v17068_v7  ;;  %v17094_v7 = vld [vmem:[#allocation9 + $0x930] sm:$0xff]  }
 0x726   :  { %14969 = vmatprep.subr.bf16.mxu0 %v17069_v8  ;;  %v17095_v8 = vld [vmem:[#allocation9 + $0x968] sm:$0xff]  }
 0x729   :  { %14970 = vmatpush3.bf16.msra.mxu0 %v17070_v9  ;;  %v17096_v9 = vld [vmem:[#allocation9 + $0x928] sm:$0xff]  }
 0x72a   :  { %14971 = vmatprep.subr.bf16.mxu0 %v17071_v10  ;;  %v17097_v10 = vld [vmem:[#allocation9 + $0x960] sm:$0xff]  }
 0x72d   :  { %14972 = vmatpush3.bf16.msra.mxu0 %v17072_v11  ;;  %v17098_v11 = vld [vmem:[#allocation9 + $0x920] sm:$0xff]  }
 0x72e   :  { %14973 = vmatprep.subr.bf16.mxu0 %v17073_v19  ;;  %v17099_v19 = vld [vmem:[#allocation9 + $0x958] sm:$0xff]  }
 0x731   :  { %14974 = vmatpush3.bf16.msra.mxu0 %v17074_v30  ;;  %v17100_v30 = vld [vmem:[#allocation9 + $0x918] sm:$0xff]  }
 0x734   :  { %4293 = vmatmul.mubr.bf16.vlgmr.msra.gmra.mxu0 %v17753_v22 }
 0x7b4   :  { %v15883_v26 = vpop.f32.mrf.mxu0 }
 0x7b5   :  { %v17974_v36 = vadd.f32 %v15883_v26, %v17938_v31  ;;  %v13374_v31 = vld [vmem:[%s20237_s6 + $0xe8] sm:$0xff] }
 0x7b6   :  { %v3537_v12 = vpop.f32.mrf.mxu0  ;;  %v17106_v26 = vld [vmem:[#allocation9 + $0x900] sm:$0xff]  }
 0x7b7   :  { %v17976_v42 = vadd.f32 %v3537_v12, %v3113_v35  ;;  %v13413_v35 = vld [vmem:[%s20237_s6 + $0x100] sm:$0xff] }
 0x7b8   :  { %v15886_v37 = vpop.f32.mrf.mxu0  ;;  %15897 = vmatprep.mubr.msk.f32.mxu0 %vm1150_vm0, %v13413_v35  ;;  %v13453_v35 = vld [vmem:[%s20237_s6 + $0x120] sm:$0xff] }
 0x7b9   :  { %v17979_v43 = vadd.f32 %v15886_v37, %v17943_v24  ;;  %v13375_v24 = vld [vmem:[%s20237_s6 + $0xf0] sm:$0xff] }
 0x7ba   :  { %v17981_v20 = vpop.f32.mrf.mxu0 }
 0x7d4   :  { %v14948_v25 = vpop.f32.mrf.mxu0 }
 0x7d6   :  { %v14949_v18 = vpop.f32.mrf.mxu0 }
 0x7d7   :  { %v14950_v44 = vadd.f32 %v14949_v18, %v14948_v25 }
 0x7d8   :  { %v14951_v13 = vpop.f32.mrf.mxu0 }
 0x7d9   :  { %v3892_v45 = vadd.f32 %v14950_v44, %v14928_v15 }
 0x7da   :  { %v14952_v32 = vpop.f32.mrf.mxu0 }
 0x7db   :  { %15887 = vmatprep.subr.mxu1 %v3892_v45 }
 0x7dc   :  { %15888 = vmatpush3.msra.mxu1 %v3892_v45 }
 0x7dd   :  { %15890 = vmatmul.mubr.msk.f32.vlgmr.msra.gmra.mxu1 %vm1150_vm0, %v13374_v31  ;;  %14981 = vmatprep.subr.bf16.mxu1 %v17075_v46 }
 0x7de   :  { %14982 = vmatpush3.bf16.msra.mxu1 %v17076_v47  ;;  %15892 = vmatprep.mubr.msk.f32.mxu1 %vm1150_vm0, %v13375_v24  ;;  %v17107_v47 = vld [vmem:[#allocation9 + $0x9f8] sm:$0xff]  }
 0x7df   :  { %14983 = vmatprep.subr.bf16.mxu1 %v17077_v48  ;;  %v17108_v48 = vld [vmem:[#allocation9 + $0x9b8] sm:$0xff]  }
 0x7e1   :  { %15893 = vmatmul.mubr.msk.f32.gmra.mxu1 %vm1150_vm0, %v13376_v49  ;;  %v17109_v49 = vld [vmem:[#allocation9 + $0x9f0] sm:$0xff]  }
 0x7e2   :  { %14984 = vmatpush3.bf16.msra.mxu1 %v17078_v50  ;;  %4332 = vmatprep.mubr.bf16.mxu1 %v17755_v29  ;;  %v13416_v50 = vld [vmem:[%s20237_s6 + $0x118] sm:$0xff] }
 0x7e3   :  { %14985 = vmatprep.subr.bf16.mxu1 %v17079_v51  ;;  %v17110_v51 = vld [vmem:[#allocation9 + $0x9b0] sm:$0xff]  }
 0x7e6   :  { %14986 = vmatpush3.bf16.msra.mxu1 %v17080_v52  ;;  %v17111_v52 = vld [vmem:[#allocation9 + $0x9e8] sm:$0xff]  }
 0x7e7   :  { %14987 = vmatprep.subr.bf16.mxu1 %v17081_v53  ;;  %v17112_v53 = vld [vmem:[#allocation9 + $0x9a8] sm:$0xff]  }
 0x7ea   :  { %14988 = vmatpush3.bf16.msra.mxu1 %v17082_v54  ;;  %v17113_v54 = vld [vmem:[#allocation9 + $0x9e0] sm:$0xff]  }
 0x7eb   :  { %14989 = vmatprep.subr.bf16.mxu1 %v17083_v55  ;;  %v17114_v55 = vld [vmem:[#allocation9 + $0x9a0] sm:$0xff]  }
 0x7ee   :  { %14990 = vmatpush3.bf16.msra.mxu1 %v17084_v56  ;;  %v17115_v56 = vld [vmem:[#allocation9 + $0x9d8] sm:$0xff]  }
 0x7ef   :  { %14991 = vmatprep.subr.bf16.mxu1 %v17085_v57  ;;  %v17116_v57 = vld [vmem:[#allocation9 + $0x998] sm:$0xff]  }
 0x7f2   :  { %14992 = vmatpush3.bf16.msra.mxu1 %v17086_v58  ;;  %v17117_v58 = vld [vmem:[#allocation9 + $0x9d0] sm:$0xff]  }
 0x7f3   :  { %14993 = vmatprep.subr.bf16.mxu1 %v17087_v59  ;;  %v17118_v59 = vld [vmem:[#allocation9 + $0x990] sm:$0xff]  }
 0x7f4   :  { %v14975_v62 = vpop.f32.mrf.mxu0 }
 0x7f6   :  { %v14976_v63 = vpop.f32.mrf.mxu0  ;;  %14994 = vmatpush3.bf16.msra.mxu1 %v17088_v60  ;;  %v17119_v60 = vld [vmem:[#allocation9 + $0x9c8] sm:$0xff]  }
 0x7f7   :  { %v14977_v1 = vadd.f32 %v14976_v63, %v14975_v62  ;;  %14995 = vmatprep.subr.bf16.mxu1 %v17089_v61  ;;  %v17120_v61 = vld [vmem:[#allocation9 + $0x988] sm:$0xff]   ;;  %v17121_v62 = vld [vmem:[#allocation9 + $0x9c0] sm:$0xff]  }
 0x7f8   :  { %v14978_v3 = vpop.f32.mrf.mxu0 }
 0x7fa   :  { %v14979_v4 = vpop.f32.mrf.mxu0  ;;  %14996 = vmatpush3.bf16.msra.mxu1 %v17090_v0 }
 0x7fb   :  { %15008 = vmatprep.subr.bf16.mxu1 %v17091_v2  ;;  %v17123_v2 = vld [vmem:[#allocation9 + $0xa78] sm:$0xff]  }
 0x7fd   :  { %4333 = vmatmul.mubr.bf16.vlgmr.msra.gmra.mxu1 %v17757_v23 }
 0x7fe   :  { %15009 = vmatpush3.bf16.msra.mxu1 %v17092_v5  ;;  %4735 = vmatprep.mubr.bf16.mxu1 %v17751_v28  ;;  %v17124_v5 = vld [vmem:[#allocation9 + $0xa38] sm:$0xff]  }
 0x7ff   :  { %15010 = vmatprep.subr.bf16.mxu1 %v17093_v6  ;;  %v17125_v6 = vld [vmem:[#allocation9 + $0xa70] sm:$0xff]  }
 0x802   :  { %15011 = vmatpush3.bf16.msra.mxu1 %v17094_v7  ;;  %v17126_v7 = vld [vmem:[#allocation9 + $0xa30] sm:$0xff]  }
 0x803   :  { %15012 = vmatprep.subr.bf16.mxu1 %v17095_v8  ;;  %v17127_v8 = vld [vmem:[#allocation9 + $0xa68] sm:$0xff]  }
 0x806   :  { %15013 = vmatpush3.bf16.msra.mxu1 %v17096_v9  ;;  %v17128_v9 = vld [vmem:[#allocation9 + $0xa28] sm:$0xff]  }
 0x807   :  { %15014 = vmatprep.subr.bf16.mxu1 %v17097_v10  ;;  %v17129_v10 = vld [vmem:[#allocation9 + $0xa60] sm:$0xff]  }
 0x80a   :  { %15015 = vmatpush3.bf16.msra.mxu1 %v17098_v11  ;;  %v17130_v11 = vld [vmem:[#allocation9 + $0xa20] sm:$0xff]  }
 0x80b   :  { %15016 = vmatprep.subr.bf16.mxu1 %v17099_v19  ;;  %v17131_v19 = vld [vmem:[#allocation9 + $0xa58] sm:$0xff]  }
 0x80e   :  { %15017 = vmatpush3.bf16.msra.mxu1 %v17100_v30  ;;  %v17132_v30 = vld [vmem:[#allocation9 + $0xa18] sm:$0xff]  }
 0x80f   :  { %15018 = vmatprep.subr.bf16.mxu1 %v17101_v33  ;;  %v17133_v33 = vld [vmem:[#allocation9 + $0xa50] sm:$0xff]  }
 0x812   :  { %15019 = vmatpush3.bf16.msra.mxu1 %v17102_v34  ;;  %v17134_v34 = vld [vmem:[#allocation9 + $0xa10] sm:$0xff]  }
 0x813   :  { %15020 = vmatprep.subr.bf16.mxu1 %v17103_v38  ;;  %v17135_v38 = vld [vmem:[#allocation9 + $0xa48] sm:$0xff]  }
 0x816   :  { %15021 = vmatpush3.bf16.msra.mxu1 %v17104_v14  ;;  %v17136_v14 = vld [vmem:[#allocation9 + $0xa08] sm:$0xff]  }
 0x817   :  { %15022 = vmatprep.subr.bf16.mxu1 %v17105_v27  ;;  %v17137_v27 = vld [vmem:[#allocation9 + $0xa40] sm:$0xff]  }
 0x81a   :  { %15023 = vmatpush3.bf16.msra.mxu1 %v17106_v26  ;;  %v17138_v26 = vld [vmem:[#allocation9 + $0xa00] sm:$0xff]  }
 0x81d   :  { %4736 = vmatmul.mubr.bf16.vlgmr.msra.gmra.mxu1 %v17753_v22 }
 0x81e   :  { %15905 = vmatprep.mubr.msk.f32.mxu1 %vm1150_vm0, %v13453_v35  ;;  %v17167_v35 = vld [vmem:[#allocation9 + $0xb48] sm:$0xff]  }
 0x89d   :  { %v15891_v12 = vpop.f32.mrf.mxu1 }
 0x89e   :  { %v18004_v37 = vadd.f32 %v15891_v12, %v17974_v36  ;;  %v13414_v36 = vld [vmem:[%s20237_s6 + $0x108] sm:$0xff] }
 0x89f   :  { %v18006_v25 = vpop.f32.mrf.mxu1 }
 0x8a1   :  { %v15894_v18 = vpop.f32.mrf.mxu1 }
 0x8a2   :  { %v18009_v15 = vadd.f32 %v15894_v18, %v17979_v43  ;;  %v13415_v43 = vld [vmem:[%s20237_s6 + $0x110] sm:$0xff]  ;;  %v3999_v18 = vadd.f32 %v18006_v25, %v17976_v42  ;;  %v17140_v25 = vld [vmem:[#allocation9 + $0xab8] sm:$0xff]  }
 0x8a3   :  { %v18011_v44 = vpop.f32.mrf.mxu1 }
 0x8bd   :  { %v14997_v13 = vpop.f32.mrf.mxu1 }
 0x8bf   :  { %v14998_v45 = vpop.f32.mrf.mxu1 }
 0x8c0   :  { %v14999_v46 = vadd.f32 %v14998_v45, %v14997_v13 }
 0x8c1   :  { %v15000_v32 = vpop.f32.mrf.mxu1 }
 0x8c2   :  { %v4335_v31 = vadd.f32 %v14999_v46, %v14977_v1  ;;  %v17122_v1 = vld [vmem:[#allocation9 + $0x980] sm:$0xff]  }
 0x8c3   :  { %v15001_v24 = vpop.f32.mrf.mxu1 }
 0x8c4   :  { %15895 = vmatprep.subr.mxu0 %v4335_v31 }
 0x8c5   :  { %15896 = vmatpush3.msra.mxu0 %v4335_v31 }
 0x8c6   :  { %15898 = vmatmul.mubr.msk.f32.vlgmr.msra.gmra.mxu0 %vm1150_vm0, %v13414_v36  ;;  %15030 = vmatprep.subr.bf16.mxu0 %v17107_v47 }
 0x8c7   :  { %15031 = vmatpush3.bf16.msra.mxu0 %v17108_v48  ;;  %15900 = vmatprep.mubr.msk.f32.mxu0 %vm1150_vm0, %v13415_v43 }
 0x8c8   :  { %15032 = vmatprep.subr.bf16.mxu0 %v17109_v49 }
 0x8ca   :  { %15901 = vmatmul.mubr.msk.f32.gmra.mxu0 %vm1150_vm0, %v13416_v50 }
 0x8cb   :  { %15033 = vmatpush3.bf16.msra.mxu0 %v17110_v51  ;;  %4775 = vmatprep.mubr.bf16.mxu0 %v17755_v29  ;;  %v17139_v51 = vld [vmem:[#allocation9 + $0xaf8] sm:$0xff]  }
 0x8cc   :  { %15034 = vmatprep.subr.bf16.mxu0 %v17111_v52  ;;  %v17141_v52 = vld [vmem:[#allocation9 + $0xaf0] sm:$0xff]  }
 0x8cf   :  { %15035 = vmatpush3.bf16.msra.mxu0 %v17112_v53  ;;  %v13456_v53 = vld [vmem:[%s20237_s6 + $0x138] sm:$0xff] }
 0x8d0   :  { %15036 = vmatprep.subr.bf16.mxu0 %v17113_v54  ;;  %v17142_v54 = vld [vmem:[#allocation9 + $0xab0] sm:$0xff]  }
 0x8d3   :  { %15037 = vmatpush3.bf16.msra.mxu0 %v17114_v55  ;;  %v17143_v55 = vld [vmem:[#allocation9 + $0xae8] sm:$0xff]  }
 0x8d4   :  { %15038 = vmatprep.subr.bf16.mxu0 %v17115_v56  ;;  %v17144_v56 = vld [vmem:[#allocation9 + $0xaa8] sm:$0xff]  }
 0x8d7   :  { %15039 = vmatpush3.bf16.msra.mxu0 %v17116_v57  ;;  %v17145_v57 = vld [vmem:[#allocation9 + $0xae0] sm:$0xff]  }
 0x8d8   :  { %15040 = vmatprep.subr.bf16.mxu0 %v17117_v58  ;;  %v17146_v58 = vld [vmem:[#allocation9 + $0xaa0] sm:$0xff]  }
 0x8db   :  { %15041 = vmatpush3.bf16.msra.mxu0 %v17118_v59  ;;  %v17147_v59 = vld [vmem:[#allocation9 + $0xad8] sm:$0xff]  }
 0x8dc   :  { %15042 = vmatprep.subr.bf16.mxu0 %v17119_v60  ;;  %v17148_v60 = vld [vmem:[#allocation9 + $0xa98] sm:$0xff]  }
 0x8dd   :  { %v15024_v63 = vpop.f32.mrf.mxu1 }
 0x8df   :  { %v15025_v0 = vpop.f32.mrf.mxu1  ;;  %15043 = vmatpush3.bf16.msra.mxu0 %v17120_v61  ;;  %v17149_v61 = vld [vmem:[#allocation9 + $0xad0] sm:$0xff]  }
 0x8e0   :  { %15044 = vmatprep.subr.bf16.mxu0 %v17121_v62  ;;  %v15026_v48 = vadd.f32 %v15025_v0, %v15024_v63  ;;  %v17150_v62 = vld [vmem:[#allocation9 + $0xa90] sm:$0xff]   ;;  %v17151_v63 = vld [vmem:[#allocation9 + $0xac8] sm:$0xff]  }
 0x8e1   :  { %v15027_v3 = vpop.f32.mrf.mxu1  ;;  %v17152_v0 = vld [vmem:[#allocation9 + $0xa88] sm:$0xff]  }
 0x8e3   :  { %v15028_v4 = vpop.f32.mrf.mxu1  ;;  %15045 = vmatpush3.bf16.msra.mxu0 %v17122_v1  ;;  %v17153_v1 = vld [vmem:[#allocation9 + $0xac0] sm:$0xff]  }
 0x8e4   :  { %15057 = vmatprep.subr.bf16.mxu0 %v17123_v2  ;;  %v17154_v4 = vld [vmem:[#allocation9 + $0xa80] sm:$0xff]  }
 0x8e6   :  { %4776 = vmatmul.mubr.bf16.vlgmr.msra.gmra.mxu0 %v17757_v23 }
 0x8e7   :  { %15058 = vmatpush3.bf16.msra.mxu0 %v17124_v5  ;;  %5178 = vmatprep.mubr.bf16.mxu0 %v17751_v28 }
 0x8e8   :  { %15059 = vmatprep.subr.bf16.mxu0 %v17125_v6  ;;  %v17155_v6 = vld [vmem:[#allocation9 + $0xb78] sm:$0xff]  }
 0x8eb   :  { %15060 = vmatpush3.bf16.msra.mxu0 %v17126_v7 }
 0x8ec   :  { %15061 = vmatprep.subr.bf16.mxu0 %v17127_v8 }
 0x8ef   :  { %15062 = vmatpush3.bf16.msra.mxu0 %v17128_v9  ;;  %v17156_v9 = vld [vmem:[#allocation9 + $0xb38] sm:$0xff]  }
 0x8f0   :  { %15063 = vmatprep.subr.bf16.mxu0 %v17129_v10  ;;  %v17157_v10 = vld [vmem:[#allocation9 + $0xb70] sm:$0xff]  }
 0x8f3   :  { %15064 = vmatpush3.bf16.msra.mxu0 %v17130_v11  ;;  %v17158_v11 = vld [vmem:[#allocation9 + $0xb30] sm:$0xff]  }
 0x8f4   :  { %15065 = vmatprep.subr.bf16.mxu0 %v17131_v19  ;;  %v17159_v19 = vld [vmem:[#allocation9 + $0xb68] sm:$0xff]  }
 0x8f7   :  { %15066 = vmatpush3.bf16.msra.mxu0 %v17132_v30  ;;  %v17160_v30 = vld [vmem:[#allocation9 + $0xb28] sm:$0xff]  }
 0x8f8   :  { %15067 = vmatprep.subr.bf16.mxu0 %v17133_v33  ;;  %v17161_v33 = vld [vmem:[#allocation9 + $0xb60] sm:$0xff]  }
 0x8fb   :  { %15068 = vmatpush3.bf16.msra.mxu0 %v17134_v34  ;;  %v17162_v34 = vld [vmem:[#allocation9 + $0xb20] sm:$0xff]  }
 0x8fc   :  { %15069 = vmatprep.subr.bf16.mxu0 %v17135_v38  ;;  %v17163_v38 = vld [vmem:[#allocation9 + $0xb58] sm:$0xff]  }
 0x8ff   :  { %15070 = vmatpush3.bf16.msra.mxu0 %v17136_v14  ;;  %v17164_v14 = vld [vmem:[#allocation9 + $0xb18] sm:$0xff]  }
 0x900   :  { %15071 = vmatprep.subr.bf16.mxu0 %v17137_v27  ;;  %v17165_v27 = vld [vmem:[#allocation9 + $0xb50] sm:$0xff]  }
 0x903   :  { %15072 = vmatpush3.bf16.msra.mxu0 %v17138_v26  ;;  %v17166_v26 = vld [vmem:[#allocation9 + $0xb10] sm:$0xff]  }
 0x906   :  { %5179 = vmatmul.mubr.bf16.vlgmr.msra.gmra.mxu0 %v17753_v22 }
 0x986   :  { %v15899_v12 = vpop.f32.mrf.mxu0 }
 0x987   :  { %v18036_v13 = vadd.f32 %v15899_v12, %v18004_v37  ;;  %v13454_v37 = vld [vmem:[%s20237_s6 + $0x128] sm:$0xff]  ;;  %v17168_v12 = vld [vmem:[#allocation9 + $0xb08] sm:$0xff]  }
 0x988   :  { %v4423_v45 = vpop.f32.mrf.mxu0 }
 0x989   :  { %v18038_v46 = vadd.f32 %v4423_v45, %v3999_v18  ;;  %v17169_v18 = vld [vmem:[#allocation9 + $0xb40] sm:$0xff]  }
 0x98a   :  { %v15902_v32 = vpop.f32.mrf.mxu0  ;;  %v17170_v45 = vld [vmem:[#allocation9 + $0xb00] sm:$0xff]  }
 0x98b   :  { %v18041_v31 = vadd.f32 %v15902_v32, %v18009_v15  ;;  %v13455_v15 = vld [vmem:[%s20237_s6 + $0x130] sm:$0xff]  ;;  %v13493_v32 = vld [vmem:[%s20237_s6 + $0x140] sm:$0xff] }
 0x98c   :  { %v18043_v47 = vpop.f32.mrf.mxu0  ;;  %15913 = vmatprep.mubr.msk.f32.mxu0 %vm1150_vm0, %v13493_v32  ;;  %v17201_v32 = vld [vmem:[#allocation9 + $0xc40] sm:$0xff]  }
 0x9a6   :  { %v15046_v24 = vpop.f32.mrf.mxu0 }
 0x9a8   :  { %v15047_v36 = vpop.f32.mrf.mxu0 }
 0x9a9   :  { %v15048_v43 = vadd.f32 %v15047_v36, %v15046_v24 }
 0x9aa   :  { %v15049_v49 = vpop.f32.mrf.mxu0 }
 0x9ab   :  { %v4778_v50 = vadd.f32 %v15048_v43, %v15026_v48 }
 0x9ac   :  { %v15050_v42 = vpop.f32.mrf.mxu0 }
 0x9ad   :  { %15903 = vmatprep.subr.mxu1 %v4778_v50 }
 0x9ae   :  { %15904 = vmatpush3.msra.mxu1 %v4778_v50 }
 0x9af   :  { %15906 = vmatmul.mubr.msk.f32.vlgmr.msra.gmra.mxu1 %vm1150_vm0, %v13454_v37  ;;  %15079 = vmatprep.subr.bf16.mxu1 %v17139_v51 }
 0x9b0   :  { %15080 = vmatpush3.bf16.msra.mxu1 %v17140_v25  ;;  %15908 = vmatprep.mubr.msk.f32.mxu1 %vm1150_vm0, %v13455_v15 }
 0x9b1   :  { %15081 = vmatprep.subr.bf16.mxu1 %v17141_v52  ;;  %v17171_v52 = vld [vmem:[#allocation9 + $0xbf8] sm:$0xff]  }
 0x9b3   :  { %15909 = vmatmul.mubr.msk.f32.gmra.mxu1 %vm1150_vm0, %v13456_v53 }
 0x9b4   :  { %15082 = vmatpush3.bf16.msra.mxu1 %v17142_v54  ;;  %5218 = vmatprep.mubr.bf16.mxu1 %v17755_v29  ;;  %v17172_v54 = vld [vmem:[#allocation9 + $0xbb8] sm:$0xff]  }
 0x9b5   :  { %15083 = vmatprep.subr.bf16.mxu1 %v17143_v55  ;;  %v17173_v55 = vld [vmem:[#allocation9 + $0xbf0] sm:$0xff]  }
 0x9b8   :  { %15084 = vmatpush3.bf16.msra.mxu1 %v17144_v56  ;;  %v13496_v56 = vld [vmem:[%s20237_s6 + $0x158] sm:$0xff] }
 0x9b9   :  { %15085 = vmatprep.subr.bf16.mxu1 %v17145_v57  ;;  %v17174_v57 = vld [vmem:[#allocation9 + $0xbb0] sm:$0xff]  }
 0x9bc   :  { %15086 = vmatpush3.bf16.msra.mxu1 %v17146_v58  ;;  %v17175_v58 = vld [vmem:[#allocation9 + $0xbe8] sm:$0xff]  }
 0x9bd   :  { %15087 = vmatprep.subr.bf16.mxu1 %v17147_v59  ;;  %v17176_v59 = vld [vmem:[#allocation9 + $0xba8] sm:$0xff]  }
 0x9c0   :  { %15088 = vmatpush3.bf16.msra.mxu1 %v17148_v60  ;;  %v17177_v60 = vld [vmem:[#allocation9 + $0xbe0] sm:$0xff]  }
 0x9c1   :  { %15089 = vmatprep.subr.bf16.mxu1 %v17149_v61  ;;  %v17178_v61 = vld [vmem:[#allocation9 + $0xba0] sm:$0xff]  }
 0x9c4   :  { %15090 = vmatpush3.bf16.msra.mxu1 %v17150_v62  ;;  %v17179_v62 = vld [vmem:[#allocation9 + $0xbd8] sm:$0xff]  }
 0x9c5   :  { %15091 = vmatprep.subr.bf16.mxu1 %v17151_v63  ;;  %v17180_v63 = vld [vmem:[#allocation9 + $0xb98] sm:$0xff]  }
 0x9c6   :  { %v15073_v2 = vpop.f32.mrf.mxu0 }
 0x9c8   :  { %v15074_v3 = vpop.f32.mrf.mxu0  ;;  %15092 = vmatpush3.bf16.msra.mxu1 %v17152_v0  ;;  %v17181_v0 = vld [vmem:[#allocation9 + $0xbd0] sm:$0xff]  }
 0x9c9   :  { %v15075_v5 = vadd.f32 %v15074_v3, %v15073_v2  ;;  %15093 = vmatprep.subr.bf16.mxu1 %v17153_v1  ;;  %v17182_v1 = vld [vmem:[#allocation9 + $0xb90] sm:$0xff]   ;;  %v17183_v2 = vld [vmem:[#allocation9 + $0xbc8] sm:$0xff]  }
 0x9ca   :  { %v15076_v7 = vpop.f32.mrf.mxu0  ;;  %v17184_v3 = vld [vmem:[#allocation9 + $0xb88] sm:$0xff]  }
 0x9cb   :  { %v17186_v7 = vld [vmem:[#allocation9 + $0xb80] sm:$0xff]  }
 0x9cc   :  { %v15077_v8 = vpop.f32.mrf.mxu0  ;;  %15094 = vmatpush3.bf16.msra.mxu1 %v17154_v4  ;;  %v17185_v4 = vld [vmem:[#allocation9 + $0xbc0] sm:$0xff]  }
 0x9cd   :  { %15106 = vmatprep.subr.bf16.mxu1 %v17155_v6  ;;  %v17187_v8 = vld [vmem:[#allocation9 + $0xc78] sm:$0xff]  }
 0x9cf   :  { %5219 = vmatmul.mubr.bf16.vlgmr.msra.gmra.mxu1 %v17757_v23 }
 0x9d0   :  { %15107 = vmatpush3.bf16.msra.mxu1 %v17156_v9  ;;  %5621 = vmatprep.mubr.bf16.mxu1 %v17751_v28 }
 0x9d1   :  { %15108 = vmatprep.subr.bf16.mxu1 %v17157_v10 }
 0x9d4   :  { %15109 = vmatpush3.bf16.msra.mxu1 %v17158_v11  ;;  %v17188_v11 = vld [vmem:[#allocation9 + $0xc38] sm:$0xff]  }
 0x9d5   :  { %15110 = vmatprep.subr.bf16.mxu1 %v17159_v19  ;;  %v17189_v19 = vld [vmem:[#allocation9 + $0xc70] sm:$0xff]  }
 0x9d8   :  { %15111 = vmatpush3.bf16.msra.mxu1 %v17160_v30  ;;  %v17190_v30 = vld [vmem:[#allocation9 + $0xc30] sm:$0xff]  }
 0x9d9   :  { %15112 = vmatprep.subr.bf16.mxu1 %v17161_v33  ;;  %v17191_v33 = vld [vmem:[#allocation9 + $0xc68] sm:$0xff]  }
 0x9dc   :  { %15113 = vmatpush3.bf16.msra.mxu1 %v17162_v34  ;;  %v17192_v34 = vld [vmem:[#allocation9 + $0xc28] sm:$0xff]  }
 0x9dd   :  { %15114 = vmatprep.subr.bf16.mxu1 %v17163_v38  ;;  %v17193_v38 = vld [vmem:[#allocation9 + $0xc60] sm:$0xff]  }
 0x9e0   :  { %15115 = vmatpush3.bf16.msra.mxu1 %v17164_v14  ;;  %v17194_v14 = vld [vmem:[#allocation9 + $0xc20] sm:$0xff]  }
 0x9e1   :  { %15116 = vmatprep.subr.bf16.mxu1 %v17165_v27  ;;  %v17195_v27 = vld [vmem:[#allocation9 + $0xc58] sm:$0xff]  }
 0x9e4   :  { %15117 = vmatpush3.bf16.msra.mxu1 %v17166_v26  ;;  %v17196_v26 = vld [vmem:[#allocation9 + $0xc18] sm:$0xff]  }
 0x9e5   :  { %15118 = vmatprep.subr.bf16.mxu1 %v17167_v35  ;;  %v17197_v35 = vld [vmem:[#allocation9 + $0xc50] sm:$0xff]  }
 0x9e8   :  { %15119 = vmatpush3.bf16.msra.mxu1 %v17168_v12  ;;  %v17198_v12 = vld [vmem:[#allocation9 + $0xc10] sm:$0xff]  }
 0x9e9   :  { %15120 = vmatprep.subr.bf16.mxu1 %v17169_v18  ;;  %v17199_v18 = vld [vmem:[#allocation9 + $0xc48] sm:$0xff]  }
 0x9ec   :  { %15121 = vmatpush3.bf16.msra.mxu1 %v17170_v45  ;;  %v17200_v45 = vld [vmem:[#allocation9 + $0xc08] sm:$0xff]  }
 0x9ef   :  { %5622 = vmatmul.mubr.bf16.vlgmr.msra.gmra.mxu1 %v17753_v22 }
 0xa6f   :  { %v15907_v24 = vpop.f32.mrf.mxu1 }
 0xa70   :  { %v18066_v36 = vadd.f32 %v15907_v24, %v18036_v13  ;;  %v13494_v13 = vld [vmem:[%s20237_s6 + $0x148] sm:$0xff] }
 0xa71   :  { %v18068_v48 = vpop.f32.mrf.mxu1  ;;  %v17202_v24 = vld [vmem:[#allocation9 + $0xc00] sm:$0xff]  }
 0xa73   :  { %v15910_v43 = vpop.f32.mrf.mxu1 }
 0xa74   :  { %v18071_v49 = vadd.f32 %v15910_v43, %v18041_v31  ;;  %v13495_v31 = vld [vmem:[%s20237_s6 + $0x150] sm:$0xff]  ;;  %v13533_v43 = vld [vmem:[%s20237_s6 + $0x160] sm:$0xff] }
 0xa75   :  { %v18073_v50 = vpop.f32.mrf.mxu1  ;;  %15921 = vmatprep.mubr.msk.f32.mxu1 %vm1150_vm0, %v13533_v43  ;;  %v17229_v43 = vld [vmem:[#allocation9 + $0xd50] sm:$0xff]  }
 0xa8f   :  { %v15095_v51 = vpop.f32.mrf.mxu1 }
 0xa91   :  { %v15096_v42 = vpop.f32.mrf.mxu1 }
 0xa92   :  { %v15097_v37 = vadd.f32 %v15096_v42, %v15095_v51  ;;  %v4885_v42 = vadd.f32 %v18068_v48, %v18038_v46  ;;  %v17204_v48 = vld [vmem:[#allocation9 + $0xcb8] sm:$0xff]  }
 0xa93   :  { %v15098_v25 = vpop.f32.mrf.mxu1 }
 0xa94   :  { %v5221_v15 = vadd.f32 %v15097_v37, %v15075_v5 }
 0xa95   :  { %v15099_v53 = vpop.f32.mrf.mxu1 }
 0xa96   :  { %15911 = vmatprep.subr.mxu0 %v5221_v15 }
 0xa97   :  { %15912 = vmatpush3.msra.mxu0 %v5221_v15 }
 0xa98   :  { %15914 = vmatmul.mubr.msk.f32.vlgmr.msra.gmra.mxu0 %vm1150_vm0, %v13494_v13  ;;  %15128 = vmatprep.subr.bf16.mxu0 %v17171_v52 }
 0xa99   :  { %15129 = vmatpush3.bf16.msra.mxu0 %v17172_v54  ;;  %15916 = vmatprep.mubr.msk.f32.mxu0 %vm1150_vm0, %v13495_v31 }
 0xa9a   :  { %15130 = vmatprep.subr.bf16.mxu0 %v17173_v55 }
 0xa9c   :  { %15917 = vmatmul.mubr.msk.f32.gmra.mxu0 %vm1150_vm0, %v13496_v56 }
 0xa9d   :  { %15131 = vmatpush3.bf16.msra.mxu0 %v17174_v57  ;;  %5661 = vmatprep.mubr.bf16.mxu0 %v17755_v29 }
 0xa9e   :  { %15132 = vmatprep.subr.bf16.mxu0 %v17175_v58 }
 0xaa1   :  { %15133 = vmatpush3.bf16.msra.mxu0 %v17176_v59  ;;  %v17203_v59 = vld [vmem:[#allocation9 + $0xcf8] sm:$0xff]  }
 0xaa2   :  { %15134 = vmatprep.subr.bf16.mxu0 %v17177_v60  ;;  %v17205_v60 = vld [vmem:[#allocation9 + $0xcf0] sm:$0xff]  }
 0xaa5   :  { %15135 = vmatpush3.bf16.msra.mxu0 %v17178_v61  ;;  %v13536_v61 = vld [vmem:[%s20237_s6 + $0x178] sm:$0xff] }
 0xaa6   :  { %15136 = vmatprep.subr.bf16.mxu0 %v17179_v62  ;;  %v17206_v62 = vld [vmem:[#allocation9 + $0xcb0] sm:$0xff]  }
 0xaa9   :  { %15137 = vmatpush3.bf16.msra.mxu0 %v17180_v63  ;;  %v17207_v63 = vld [vmem:[#allocation9 + $0xce8] sm:$0xff]  }
 0xaaa   :  { %15138 = vmatprep.subr.bf16.mxu0 %v17181_v0  ;;  %v17208_v0 = vld [vmem:[#allocation9 + $0xca8] sm:$0xff]  }
 0xaad   :  { %15139 = vmatpush3.bf16.msra.mxu0 %v17182_v1  ;;  %v17209_v1 = vld [vmem:[#allocation9 + $0xce0] sm:$0xff]  }
 0xaae   :  { %15140 = vmatprep.subr.bf16.mxu0 %v17183_v2  ;;  %v17210_v2 = vld [vmem:[#allocation9 + $0xca0] sm:$0xff]  }
 0xaaf   :  { %v15122_v5 = vpop.f32.mrf.mxu1 }
 0xab1   :  { %v15123_v6 = vpop.f32.mrf.mxu1  ;;  %15141 = vmatpush3.bf16.msra.mxu0 %v17184_v3  ;;  %v17211_v3 = vld [vmem:[#allocation9 + $0xcd8] sm:$0xff]  }
 0xab2   :  { %15142 = vmatprep.subr.bf16.mxu0 %v17185_v4  ;;  %v15124_v55 = vadd.f32 %v15123_v6, %v15122_v5  ;;  %v17212_v4 = vld [vmem:[#allocation9 + $0xc98] sm:$0xff]   ;;  %v17213_v5 = vld [vmem:[#allocation9 + $0xcd0] sm:$0xff]  }
 0xab3   :  { %v15125_v9 = vpop.f32.mrf.mxu1  ;;  %v17214_v6 = vld [vmem:[#allocation9 + $0xc90] sm:$0xff]  }
 0xab4   :  { %v17217_v9 = vld [vmem:[#allocation9 + $0xcc0] sm:$0xff]  }
 0xab5   :  { %v15126_v10 = vpop.f32.mrf.mxu1  ;;  %15143 = vmatpush3.bf16.msra.mxu0 %v17186_v7  ;;  %v17215_v7 = vld [vmem:[#allocation9 + $0xcc8] sm:$0xff]  }
 0xab6   :  { %15155 = vmatprep.subr.bf16.mxu0 %v17187_v8  ;;  %v17216_v8 = vld [vmem:[#allocation9 + $0xc88] sm:$0xff]  }
 0xab8   :  { %5662 = vmatmul.mubr.bf16.vlgmr.msra.gmra.mxu0 %v17757_v23 }
 0xab9   :  { %15156 = vmatpush3.bf16.msra.mxu0 %v17188_v11  ;;  %6064 = vmatprep.mubr.bf16.mxu0 %v17751_v28 }
 0xaba   :  { %15157 = vmatprep.subr.bf16.mxu0 %v17189_v19  ;;  %v17218_v19 = vld [vmem:[#allocation9 + $0xc80] sm:$0xff]  }
 0xabd   :  { %15158 = vmatpush3.bf16.msra.mxu0 %v17190_v30 }
 0xabe   :  { %15159 = vmatprep.subr.bf16.mxu0 %v17191_v33  ;;  %v17219_v33 = vld [vmem:[#allocation9 + $0xd78] sm:$0xff]  }
 0xac1   :  { %15160 = vmatpush3.bf16.msra.mxu0 %v17192_v34 }
 0xac2   :  { %15161 = vmatprep.subr.bf16.mxu0 %v17193_v38 }
 0xac5   :  { %15162 = vmatpush3.bf16.msra.mxu0 %v17194_v14  ;;  %v17220_v14 = vld [vmem:[#allocation9 + $0xd38] sm:$0xff]  }
 0xac6   :  { %15163 = vmatprep.subr.bf16.mxu0 %v17195_v27  ;;  %v17221_v27 = vld [vmem:[#allocation9 + $0xd70] sm:$0xff]  }
 0xac9   :  { %15164 = vmatpush3.bf16.msra.mxu0 %v17196_v26  ;;  %v17222_v26 = vld [vmem:[#allocation9 + $0xd30] sm:$0xff]  }
 0xaca   :  { %15165 = vmatprep.subr.bf16.mxu0 %v17197_v35  ;;  %v17223_v35 = vld [vmem:[#allocation9 + $0xd68] sm:$0xff]  }
 0xacd   :  { %15166 = vmatpush3.bf16.msra.mxu0 %v17198_v12  ;;  %v17224_v12 = vld [vmem:[#allocation9 + $0xd28] sm:$0xff]  }
 0xace   :  { %15167 = vmatprep.subr.bf16.mxu0 %v17199_v18  ;;  %v17225_v18 = vld [vmem:[#allocation9 + $0xd60] sm:$0xff]  }
 0xad1   :  { %15168 = vmatpush3.bf16.msra.mxu0 %v17200_v45  ;;  %v17226_v45 = vld [vmem:[#allocation9 + $0xd20] sm:$0xff]  }
 0xad2   :  { %15169 = vmatprep.subr.bf16.mxu0 %v17201_v32  ;;  %v17227_v32 = vld [vmem:[#allocation9 + $0xd58] sm:$0xff]  }
 0xad5   :  { %15170 = vmatpush3.bf16.msra.mxu0 %v17202_v24  ;;  %v17228_v24 = vld [vmem:[#allocation9 + $0xd18] sm:$0xff]  }
 0xad8   :  { %6065 = vmatmul.mubr.bf16.vlgmr.msra.gmra.mxu0 %v17753_v22 }
 0xb58   :  { %v15915_v51 = vpop.f32.mrf.mxu0 }
 0xb59   :  { %v18098_v37 = vadd.f32 %v15915_v51, %v18066_v36  ;;  %v13534_v36 = vld [vmem:[%s20237_s6 + $0x168] sm:$0xff]  ;;  %v17230_v51 = vld [vmem:[#allocation9 + $0xd10] sm:$0xff]  }
 0xb5a   :  { %v5309_v25 = vpop.f32.mrf.mxu0 }
 0xb5b   :  { %v18100_v15 = vadd.f32 %v5309_v25, %v4885_v42  ;;  %v17231_v42 = vld [vmem:[#allocation9 + $0xd48] sm:$0xff]  }
 0xb5c   :  { %v15918_v52 = vpop.f32.mrf.mxu0  ;;  %v17232_v25 = vld [vmem:[#allocation9 + $0xd08] sm:$0xff]  }
 0xb5d   :  { %v18103_v53 = vadd.f32 %v15918_v52, %v18071_v49  ;;  %v13535_v49 = vld [vmem:[%s20237_s6 + $0x170] sm:$0xff]  ;;  %v17233_v52 = vld [vmem:[#allocation9 + $0xd40] sm:$0xff]  }
 0xb5e   :  { %v18105_v13 = vpop.f32.mrf.mxu0 }
 0xb78   :  { %v15144_v54 = vpop.f32.mrf.mxu0 }
 0xb7a   :  { %v15145_v31 = vpop.f32.mrf.mxu0 }
 0xb7b   :  { %v15146_v56 = vadd.f32 %v15145_v31, %v15144_v54  ;;  %v17234_v54 = vld [vmem:[#allocation9 + $0xd00] sm:$0xff]   ;;  %v13573_v31 = vld [vmem:[%s20237_s6 + $0x180] sm:$0xff] }
 0xb7c   :  { %v15147_v57 = vpop.f32.mrf.mxu0  ;;  %15929 = vmatprep.mubr.msk.f32.mxu0 %vm1150_vm0, %v13573_v31  ;;  %v17263_v31 = vld [vmem:[#allocation9 + $0xe48] sm:$0xff]  }
 0xb7d   :  { %v5664_v58 = vadd.f32 %v15146_v56, %v15124_v55 }
 0xb7e   :  { %v15148_v46 = vpop.f32.mrf.mxu0 }
 0xb7f   :  { %15919 = vmatprep.subr.mxu1 %v5664_v58 }
 0xb80   :  { %15920 = vmatpush3.msra.mxu1 %v5664_v58 }
 0xb81   :  { %15922 = vmatmul.mubr.msk.f32.vlgmr.msra.gmra.mxu1 %vm1150_vm0, %v13534_v36  ;;  %15177 = vmatprep.subr.bf16.mxu1 %v17203_v59 }
 0xb82   :  { %15178 = vmatpush3.bf16.msra.mxu1 %v17204_v48  ;;  %15924 = vmatprep.mubr.msk.f32.mxu1 %vm1150_vm0, %v13535_v49 }
 0xb83   :  { %15179 = vmatprep.subr.bf16.mxu1 %v17205_v60 }
 0xb85   :  { %15925 = vmatmul.mubr.msk.f32.gmra.mxu1 %vm1150_vm0, %v13536_v61 }
 0xb86   :  { %15180 = vmatpush3.bf16.msra.mxu1 %v17206_v62  ;;  %6104 = vmatprep.mubr.bf16.mxu1 %v17755_v29  ;;  %v17235_v62 = vld [vmem:[#allocation9 + $0xdf8] sm:$0xff]  }
 0xb87   :  { %15181 = vmatprep.subr.bf16.mxu1 %v17207_v63 }
 0xb8a   :  { %15182 = vmatpush3.bf16.msra.mxu1 %v17208_v0  ;;  %v17236_v0 = vld [vmem:[#allocation9 + $0xdb8] sm:$0xff]  }
 0xb8b   :  { %15183 = vmatprep.subr.bf16.mxu1 %v17209_v1  ;;  %v17237_v1 = vld [vmem:[#allocation9 + $0xdf0] sm:$0xff]  }
 0xb8e   :  { %15184 = vmatpush3.bf16.msra.mxu1 %v17210_v2  ;;  %v13576_v2 = vld [vmem:[%s20237_s6 + $0x198] sm:$0xff] }
 0xb8f   :  { %15185 = vmatprep.subr.bf16.mxu1 %v17211_v3  ;;  %v17238_v3 = vld [vmem:[#allocation9 + $0xdb0] sm:$0xff]  }
 0xb92   :  { %15186 = vmatpush3.bf16.msra.mxu1 %v17212_v4  ;;  %v17239_v4 = vld [vmem:[#allocation9 + $0xde8] sm:$0xff]  }
 0xb93   :  { %15187 = vmatprep.subr.bf16.mxu1 %v17213_v5  ;;  %v17240_v5 = vld [vmem:[#allocation9 + $0xda8] sm:$0xff]  }
 0xb96   :  { %15188 = vmatpush3.bf16.msra.mxu1 %v17214_v6  ;;  %v17241_v6 = vld [vmem:[#allocation9 + $0xde0] sm:$0xff]  }
 0xb97   :  { %15189 = vmatprep.subr.bf16.mxu1 %v17215_v7  ;;  %v17242_v7 = vld [vmem:[#allocation9 + $0xda0] sm:$0xff]  }
 0xb98   :  { %v15171_v10 = vpop.f32.mrf.mxu0 }
 0xb9a   :  { %v15172_v11 = vpop.f32.mrf.mxu0  ;;  %15190 = vmatpush3.bf16.msra.mxu1 %v17216_v8  ;;  %v17243_v8 = vld [vmem:[#allocation9 + $0xdd8] sm:$0xff]  }
 0xb9b   :  { %v15173_v30 = vadd.f32 %v15172_v11, %v15171_v10  ;;  %15191 = vmatprep.subr.bf16.mxu1 %v17217_v9  ;;  %v17244_v9 = vld [vmem:[#allocation9 + $0xd98] sm:$0xff]   ;;  %v17245_v10 = vld [vmem:[#allocation9 + $0xdd0] sm:$0xff]  }
 0xb9c   :  { %v15174_v34 = vpop.f32.mrf.mxu0  ;;  %v17246_v11 = vld [vmem:[#allocation9 + $0xd90] sm:$0xff]  }
 0xb9e   :  { %v15175_v38 = vpop.f32.mrf.mxu0  ;;  %15192 = vmatpush3.bf16.msra.mxu1 %v17218_v19  ;;  %v17247_v19 = vld [vmem:[#allocation9 + $0xdc8] sm:$0xff]  }
 0xb9f   :  { %15204 = vmatprep.subr.bf16.mxu1 %v17219_v33  ;;  %v17249_v33 = vld [vmem:[#allocation9 + $0xdc0] sm:$0xff]  }
 0xba1   :  { %6105 = vmatmul.mubr.bf16.vlgmr.msra.gmra.mxu1 %v17757_v23 }
 0xba2   :  { %15205 = vmatpush3.bf16.msra.mxu1 %v17220_v14  ;;  %6507 = vmatprep.mubr.bf16.mxu1 %v17751_v28  ;;  %v17250_v14 = vld [vmem:[#allocation9 + $0xd80] sm:$0xff]  }
 0xba3   :  { %15206 = vmatprep.subr.bf16.mxu1 %v17221_v27  ;;  %v17251_v27 = vld [vmem:[#allocation9 + $0xe78] sm:$0xff]  }
 0xba6   :  { %15207 = vmatpush3.bf16.msra.mxu1 %v17222_v26 }
 0xba7   :  { %15208 = vmatprep.subr.bf16.mxu1 %v17223_v35 }
 0xbaa   :  { %15209 = vmatpush3.bf16.msra.mxu1 %v17224_v12  ;;  %v17252_v12 = vld [vmem:[#allocation9 + $0xe38] sm:$0xff]  }
 0xbab   :  { %15210 = vmatprep.subr.bf16.mxu1 %v17225_v18  ;;  %v17253_v18 = vld [vmem:[#allocation9 + $0xe70] sm:$0xff]  }
 0xbae   :  { %15211 = vmatpush3.bf16.msra.mxu1 %v17226_v45  ;;  %v17254_v45 = vld [vmem:[#allocation9 + $0xe30] sm:$0xff]  }
 0xbaf   :  { %15212 = vmatprep.subr.bf16.mxu1 %v17227_v32  ;;  %v17255_v32 = vld [vmem:[#allocation9 + $0xe68] sm:$0xff]  }
 0xbb2   :  { %15213 = vmatpush3.bf16.msra.mxu1 %v17228_v24  ;;  %v17256_v24 = vld [vmem:[#allocation9 + $0xe28] sm:$0xff]  }
 0xbb3   :  { %15214 = vmatprep.subr.bf16.mxu1 %v17229_v43  ;;  %v17257_v43 = vld [vmem:[#allocation9 + $0xe60] sm:$0xff]  }
 0xbb6   :  { %15215 = vmatpush3.bf16.msra.mxu1 %v17230_v51  ;;  %v17258_v51 = vld [vmem:[#allocation9 + $0xe20] sm:$0xff]  }
 0xbb7   :  { %15216 = vmatprep.subr.bf16.mxu1 %v17231_v42  ;;  %v17259_v42 = vld [vmem:[#allocation9 + $0xe58] sm:$0xff]  }
 0xbba   :  { %15217 = vmatpush3.bf16.msra.mxu1 %v17232_v25  ;;  %v17260_v25 = vld [vmem:[#allocation9 + $0xe18] sm:$0xff]  }
 0xbbb   :  { %15218 = vmatprep.subr.bf16.mxu1 %v17233_v52  ;;  %v17261_v52 = vld [vmem:[#allocation9 + $0xe50] sm:$0xff]  }
 0xbbe   :  { %15219 = vmatpush3.bf16.msra.mxu1 %v17234_v54  ;;  %v17262_v54 = vld [vmem:[#allocation9 + $0xe10] sm:$0xff]  }
 0xbc1   :  { %6508 = vmatmul.mubr.bf16.vlgmr.msra.gmra.mxu1 %v17753_v22 }
 0xc41   :  { %v15923_v55 = vpop.f32.mrf.mxu1 }
 0xc42   :  { %v18128_v56 = vadd.f32 %v15923_v55, %v18098_v37  ;;  %v13574_v37 = vld [vmem:[%s20237_s6 + $0x188] sm:$0xff]  ;;  %v17264_v55 = vld [vmem:[#allocation9 + $0xe08] sm:$0xff]  }
 0xc43   :  { %v18130_v57 = vpop.f32.mrf.mxu1 }
 0xc45   :  { %v15926_v58 = vpop.f32.mrf.mxu1 }
 0xc46   :  { %v18133_v59 = vadd.f32 %v15926_v58, %v18103_v53  ;;  %v13575_v53 = vld [vmem:[%s20237_s6 + $0x190] sm:$0xff]  ;;  %v17265_v58 = vld [vmem:[#allocation9 + $0xe40] sm:$0xff]  }
 0xc47   :  { %v18135_v46 = vpop.f32.mrf.mxu1 }
 0xc61   :  { %v15193_v36 = vpop.f32.mrf.mxu1 }
 0xc63   :  { %v15194_v48 = vpop.f32.mrf.mxu1 }
 0xc64   :  { %v15195_v49 = vadd.f32 %v15194_v48, %v15193_v36  ;;  %v17266_v36 = vld [vmem:[#allocation9 + $0xe00] sm:$0xff]   ;;  %v13613_v48 = vld [vmem:[%s20237_s6 + $0x1a0] sm:$0xff] }
 0xc65   :  { %v15196_v60 = vpop.f32.mrf.mxu1  ;;  %15937 = vmatprep.mubr.msk.f32.mxu1 %vm1150_vm0, %v13613_v48  ;;  %v17291_v48 = vld [vmem:[#allocation9 + $0xf58] sm:$0xff]  }
 0xc66   :  { %v6107_v61 = vadd.f32 %v15195_v49, %v15173_v30  ;;  %v17248_v30 = vld [vmem:[#allocation9 + $0xd88] sm:$0xff]   ;;  %v5771_v60 = vadd.f32 %v18130_v57, %v18100_v15  ;;  %v17268_v57 = vld [vmem:[#allocation9 + $0xeb8] sm:$0xff]  }
 0xc67   :  { %v15197_v63 = vpop.f32.mrf.mxu1 }
 0xc68   :  { %15927 = vmatprep.subr.mxu0 %v6107_v61 }
 0xc69   :  { %15928 = vmatpush3.msra.mxu0 %v6107_v61 }
 0xc6a   :  { %15930 = vmatmul.mubr.msk.f32.vlgmr.msra.gmra.mxu0 %vm1150_vm0, %v13574_v37  ;;  %15226 = vmatprep.subr.bf16.mxu0 %v17235_v62 }
 0xc6b   :  { %15227 = vmatpush3.bf16.msra.mxu0 %v17236_v0  ;;  %15932 = vmatprep.mubr.msk.f32.mxu0 %vm1150_vm0, %v13575_v53 }
 0xc6c   :  { %15228 = vmatprep.subr.bf16.mxu0 %v17237_v1 }
 0xc6e   :  { %15933 = vmatmul.mubr.msk.f32.gmra.mxu0 %vm1150_vm0, %v13576_v2 }
 0xc6f   :  { %15229 = vmatpush3.bf16.msra.mxu0 %v17238_v3  ;;  %6547 = vmatprep.mubr.bf16.mxu0 %v17755_v29 }
 0xc70   :  { %15230 = vmatprep.subr.bf16.mxu0 %v17239_v4 }
 0xc73   :  { %15231 = vmatpush3.bf16.msra.mxu0 %v17240_v5 }
 0xc74   :  { %15232 = vmatprep.subr.bf16.mxu0 %v17241_v6 }
 0xc77   :  { %15233 = vmatpush3.bf16.msra.mxu0 %v17242_v7  ;;  %v17267_v7 = vld [vmem:[#allocation9 + $0xef8] sm:$0xff]  }
 0xc78   :  { %15234 = vmatprep.subr.bf16.mxu0 %v17243_v8  ;;  %v17269_v8 = vld [vmem:[#allocation9 + $0xef0] sm:$0xff]  }
 0xc7b   :  { %15235 = vmatpush3.bf16.msra.mxu0 %v17244_v9  ;;  %v13616_v9 = vld [vmem:[%s20237_s6 + $0x1b8] sm:$0xff] }
 0xc7c   :  { %15236 = vmatprep.subr.bf16.mxu0 %v17245_v10  ;;  %v17270_v10 = vld [vmem:[#allocation9 + $0xeb0] sm:$0xff]  }
 0xc7f   :  { %15237 = vmatpush3.bf16.msra.mxu0 %v17246_v11  ;;  %v17271_v11 = vld [vmem:[#allocation9 + $0xee8] sm:$0xff]  }
 0xc80   :  { %15238 = vmatprep.subr.bf16.mxu0 %v17247_v19  ;;  %v17272_v19 = vld [vmem:[#allocation9 + $0xea8] sm:$0xff]  }
 0xc81   :  { %v15220_v34 = vpop.f32.mrf.mxu1 }
 0xc83   :  { %v15221_v38 = vpop.f32.mrf.mxu1  ;;  %15239 = vmatpush3.bf16.msra.mxu0 %v17248_v30  ;;  %v17273_v30 = vld [vmem:[#allocation9 + $0xee0] sm:$0xff]  }
 0xc84   :  { %15240 = vmatprep.subr.bf16.mxu0 %v17249_v33  ;;  %v15222_v3 = vadd.f32 %v15221_v38, %v15220_v34  ;;  %v17274_v33 = vld [vmem:[#allocation9 + $0xea0] sm:$0xff]   ;;  %v17275_v34 = vld [vmem:[#allocation9 + $0xed8] sm:$0xff]  }
 0xc85   :  { %v15223_v26 = vpop.f32.mrf.mxu1  ;;  %v17276_v38 = vld [vmem:[#allocation9 + $0xe98] sm:$0xff]  }
 0xc86   :  { %v17279_v26 = vld [vmem:[#allocation9 + $0xec8] sm:$0xff]  }
 0xc87   :  { %v15224_v35 = vpop.f32.mrf.mxu1  ;;  %15241 = vmatpush3.bf16.msra.mxu0 %v17250_v14  ;;  %v17277_v14 = vld [vmem:[#allocation9 + $0xed0] sm:$0xff]  }
 0xc88   :  { %15253 = vmatprep.subr.bf16.mxu0 %v17251_v27  ;;  %v17278_v27 = vld [vmem:[#allocation9 + $0xe90] sm:$0xff]   ;;  %v17280_v35 = vld [vmem:[#allocation9 + $0xe88] sm:$0xff]  }
 0xc8a   :  { %6548 = vmatmul.mubr.bf16.vlgmr.msra.gmra.mxu0 %v17757_v23 }
 0xc8b   :  { %15254 = vmatpush3.bf16.msra.mxu0 %v17252_v12  ;;  %6950 = vmatprep.mubr.bf16.mxu0 %v17751_v28  ;;  %v17281_v12 = vld [vmem:[#allocation9 + $0xec0] sm:$0xff]  }
 0xc8c   :  { %15255 = vmatprep.subr.bf16.mxu0 %v17253_v18 }
 0xc8f   :  { %15256 = vmatpush3.bf16.msra.mxu0 %v17254_v45 }
 0xc90   :  { %15257 = vmatprep.subr.bf16.mxu0 %v17255_v32  ;;  %v17282_v32 = vld [vmem:[#allocation9 + $0xe80] sm:$0xff]  }
 0xc93   :  { %15258 = vmatpush3.bf16.msra.mxu0 %v17256_v24 }
 0xc94   :  { %15259 = vmatprep.subr.bf16.mxu0 %v17257_v43  ;;  %v17283_v43 = vld [vmem:[#allocation9 + $0xf78] sm:$0xff]  }
 0xc97   :  { %15260 = vmatpush3.bf16.msra.mxu0 %v17258_v51 }
 0xc98   :  { %15261 = vmatprep.subr.bf16.mxu0 %v17259_v42 }
 0xc9b   :  { %15262 = vmatpush3.bf16.msra.mxu0 %v17260_v25  ;;  %v17284_v25 = vld [vmem:[#allocation9 + $0xf38] sm:$0xff]  }
 0xc9c   :  { %15263 = vmatprep.subr.bf16.mxu0 %v17261_v52  ;;  %v17285_v52 = vld [vmem:[#allocation9 + $0xf70] sm:$0xff]  }
 0xc9f   :  { %15264 = vmatpush3.bf16.msra.mxu0 %v17262_v54  ;;  %v17286_v54 = vld [vmem:[#allocation9 + $0xf30] sm:$0xff]  }
 0xca0   :  { %15265 = vmatprep.subr.bf16.mxu0 %v17263_v31  ;;  %v17287_v31 = vld [vmem:[#allocation9 + $0xf68] sm:$0xff]  }
 0xca3   :  { %15266 = vmatpush3.bf16.msra.mxu0 %v17264_v55  ;;  %v17288_v55 = vld [vmem:[#allocation9 + $0xf28] sm:$0xff]  }
 0xca4   :  { %15267 = vmatprep.subr.bf16.mxu0 %v17265_v58  ;;  %v17289_v58 = vld [vmem:[#allocation9 + $0xf60] sm:$0xff]  }
 0xca7   :  { %15268 = vmatpush3.bf16.msra.mxu0 %v17266_v36  ;;  %v17290_v36 = vld [vmem:[#allocation9 + $0xf20] sm:$0xff]  }
 0xcaa   :  { %6951 = vmatmul.mubr.bf16.vlgmr.msra.gmra.mxu0 %v17753_v22 }
 0xd2a   :  { %v15931_v49 = vpop.f32.mrf.mxu0 }
 0xd2b   :  { %v18160_v61 = vadd.f32 %v15931_v49, %v18128_v56  ;;  %v13614_v56 = vld [vmem:[%s20237_s6 + $0x1a8] sm:$0xff]  ;;  %v17292_v49 = vld [vmem:[#allocation9 + $0xf18] sm:$0xff]  }
 0xd2c   :  { %v6195_v62 = vpop.f32.mrf.mxu0 }
 0xd2d   :  { %v18162_v63 = vadd.f32 %v6195_v62, %v5771_v60  ;;  %v17293_v60 = vld [vmem:[#allocation9 + $0xf50] sm:$0xff]  }
 0xd2e   :  { %v15934_v37 = vpop.f32.mrf.mxu0  ;;  %v17294_v62 = vld [vmem:[#allocation9 + $0xf10] sm:$0xff]  }
 0xd2f   :  { %v18165_v0 = vadd.f32 %v15934_v37, %v18133_v59  ;;  %v13615_v59 = vld [vmem:[%s20237_s6 + $0x1b0] sm:$0xff] }
 0xd30   :  { %v18167_v53 = vpop.f32.mrf.mxu0  ;;  %v17295_v37 = vld [vmem:[#allocation9 + $0xf48] sm:$0xff]  }
 0xd4a   :  { %v15242_v1 = vpop.f32.mrf.mxu0 }
 0xd4c   :  { %v15243_v2 = vpop.f32.mrf.mxu0 }
 0xd4d   :  { %v15244_v4 = vadd.f32 %v15243_v2, %v15242_v1  ;;  %v17297_v1 = vld [vmem:[#allocation9 + $0xf40] sm:$0xff]  }
 0xd4e   :  { %v15245_v5 = vpop.f32.mrf.mxu0  ;;  %v17298_v2 = vld [vmem:[#allocation9 + $0xf00] sm:$0xff]  }
 0xd4f   :  { %v6550_v6 = vadd.f32 %v15244_v4, %v15222_v3  ;;  %v13653_v3 = vld [vmem:[%s20237_s6 + $0x1c0] sm:$0xff] }
 0xd50   :  { %v15246_v15 = vpop.f32.mrf.mxu0  ;;  %15945 = vmatprep.mubr.msk.f32.mxu0 %vm1150_vm0, %v13653_v3 }
 0xd51   :  { %15935 = vmatprep.subr.mxu1 %v6550_v6 }
 0xd52   :  { %15936 = vmatpush3.msra.mxu1 %v6550_v6 }
 0xd53   :  { %15938 = vmatmul.mubr.msk.f32.vlgmr.msra.gmra.mxu1 %vm1150_vm0, %v13614_v56  ;;  %15275 = vmatprep.subr.bf16.mxu1 %v17267_v7 }
 0xd54   :  { %15276 = vmatpush3.bf16.msra.mxu1 %v17268_v57  ;;  %15940 = vmatprep.mubr.msk.f32.mxu1 %vm1150_vm0, %v13615_v59 }
 0xd55   :  { %15277 = vmatprep.subr.bf16.mxu1 %v17269_v8 }
 0xd57   :  { %15941 = vmatmul.mubr.msk.f32.gmra.mxu1 %vm1150_vm0, %v13616_v9 }
 0xd58   :  { %15278 = vmatpush3.bf16.msra.mxu1 %v17270_v10  ;;  %6990 = vmatprep.mubr.bf16.mxu1 %v17755_v29  ;;  %v17299_v10 = vld [vmem:[#allocation9 + $0xff8] sm:$0xff]  }
 0xd59   :  { %15279 = vmatprep.subr.bf16.mxu1 %v17271_v11 }
 0xd5c   :  { %15280 = vmatpush3.bf16.msra.mxu1 %v17272_v19  ;;  %v17300_v19 = vld [vmem:[#allocation9 + $0xfb8] sm:$0xff]  }
 0xd5d   :  { %15281 = vmatprep.subr.bf16.mxu1 %v17273_v30  ;;  %v17301_v30 = vld [vmem:[#allocation9 + $0xff0] sm:$0xff]  }
 0xd60   :  { %15282 = vmatpush3.bf16.msra.mxu1 %v17274_v33  ;;  %v13656_v33 = vld [vmem:[%s20237_s6 + $0x1d8] sm:$0xff] }
 0xd61   :  { %15283 = vmatprep.subr.bf16.mxu1 %v17275_v34  ;;  %v17302_v34 = vld [vmem:[#allocation9 + $0xfb0] sm:$0xff]  }
 0xd64   :  { %15284 = vmatpush3.bf16.msra.mxu1 %v17276_v38  ;;  %v17303_v38 = vld [vmem:[#allocation9 + $0xfe8] sm:$0xff]  }
 0xd65   :  { %15285 = vmatprep.subr.bf16.mxu1 %v17277_v14  ;;  %v17304_v14 = vld [vmem:[#allocation9 + $0xfa8] sm:$0xff]  }
 0xd68   :  { %15286 = vmatpush3.bf16.msra.mxu1 %v17278_v27  ;;  %v17305_v27 = vld [vmem:[#allocation9 + $0xfe0] sm:$0xff]  }
 0xd69   :  { %15287 = vmatprep.subr.bf16.mxu1 %v17279_v26  ;;  %v17306_v26 = vld [vmem:[#allocation9 + $0xfa0] sm:$0xff]  }
 0xd6a   :  { %v15269_v18 = vpop.f32.mrf.mxu0 }
 0xd6c   :  { %v15270_v45 = vpop.f32.mrf.mxu0  ;;  %15288 = vmatpush3.bf16.msra.mxu1 %v17280_v35  ;;  %v17307_v35 = vld [vmem:[#allocation9 + $0xfd8] sm:$0xff]  }
 0xd6d   :  { %v15271_v24 = vadd.f32 %v15270_v45, %v15269_v18  ;;  %15289 = vmatprep.subr.bf16.mxu1 %v17281_v12  ;;  %v17308_v12 = vld [vmem:[#allocation9 + $0xf98] sm:$0xff]   ;;  %v17309_v18 = vld [vmem:[#allocation9 + $0xfd0] sm:$0xff]  }
 0xd6e   :  { %v15272_v51 = vpop.f32.mrf.mxu0  ;;  %v17310_v45 = vld [vmem:[#allocation9 + $0xf90] sm:$0xff]  }
 0xd70   :  { %v15273_v42 = vpop.f32.mrf.mxu0  ;;  %15290 = vmatpush3.bf16.msra.mxu1 %v17282_v32  ;;  %v17311_v32 = vld [vmem:[#allocation9 + $0xfc8] sm:$0xff]  }
 0xd71   :  { %15302 = vmatprep.subr.bf16.mxu1 %v17283_v43  ;;  %v17313_v43 = vld [vmem:[#allocation9 + $0xfc0] sm:$0xff]  }
 0xd72   :  { %v17314_v42 = vld [vmem:[#allocation9 + $0xf80] sm:$0xff]  }
 0xd73   :  { %6991 = vmatmul.mubr.bf16.vlgmr.msra.gmra.mxu1 %v17757_v23 }
 0xd74   :  { %15303 = vmatpush3.bf16.msra.mxu1 %v17284_v25  ;;  %7393 = vmatprep.mubr.bf16.mxu1 %v17751_v28  ;;  %v17296_v28 = vld [vmem:[#allocation9 + $0xf08] sm:$0xff]  }
 0xd75   :  { %15304 = vmatprep.subr.bf16.mxu1 %v17285_v52 }
 0xd78   :  { %15305 = vmatpush3.bf16.msra.mxu1 %v17286_v54  ;;  %v13693_v54 = vld [vmem:[%s20237_s6 + $0x1e0] sm:$0xff] }
 0xd79   :  { %15306 = vmatprep.subr.bf16.mxu1 %v17287_v31  ;;  %v1337_v31 = vadd.f32 %v17823_v39, %v17815_v17 }
 0xd7c   :  { %15307 = vmatpush3.bf16.msra.mxu1 %v17288_v55  ;;  %v1786_v55 = vadd.f32 %v17855_v21, %v1337_v31 }
 0xd7d   :  { %15308 = vmatprep.subr.bf16.mxu1 %v17289_v58 }
 0xd7e   :  { %v2229_v58 = vadd.f32 %v17885_v40, %v1786_v55 }
 0xd80   :  { %15309 = vmatpush3.bf16.msra.mxu1 %v17290_v36  ;;  %v2672_v36 = vadd.f32 %v17915_v41, %v2229_v58 }
 0xd81   :  { %15310 = vmatprep.subr.bf16.mxu1 %v17291_v48 }
 0xd82   :  { %v3115_v48 = vadd.f32 %v17945_v16, %v2672_v36 }
 0xd84   :  { %15311 = vmatpush3.bf16.msra.mxu1 %v17292_v49  ;;  %v3558_v49 = vadd.f32 %v17981_v20, %v3115_v48 }
 0xd85   :  { %15312 = vmatprep.subr.bf16.mxu1 %v17293_v60 }
 0xd88   :  { %15313 = vmatpush3.bf16.msra.mxu1 %v17294_v62 }
 0xd89   :  { %15314 = vmatprep.subr.bf16.mxu1 %v17295_v37 }
 0xd8c   :  { %15315 = vmatpush3.bf16.msra.mxu1 %v17296_v28 }
 0xd8d   :  { %15316 = vmatprep.subr.bf16.mxu1 %v17297_v1 }
 0xd90   :  { %15317 = vmatpush3.bf16.msra.mxu1 %v17298_v2 }
 0xd93   :  { %7394 = vmatmul.mubr.bf16.vlgmr.msra.gmra.mxu1 %v17753_v22 }
 0xd94   :  { %15953 = vmatprep.mubr.msk.f32.mxu1 %vm1150_vm0, %v13693_v54 }
 0xe13   :  { %v15939_v4 = vpop.f32.mrf.mxu1 }
 0xe14   :  { %v18190_v5 = vadd.f32 %v15939_v4, %v18160_v61  ;;  %v13654_v61 = vld [vmem:[%s20237_s6 + $0x1c8] sm:$0xff] }
 0xe15   :  { %v18192_v6 = vpop.f32.mrf.mxu1 }
 0xe16   :  { %v6657_v39 = vadd.f32 %v18192_v6, %v18162_v63  ;;  %v13695_v6 = vld [vmem:[%s20237_s6 + $0x1f0] sm:$0xff] }
 0xe17   :  { %v15942_v7 = vpop.f32.mrf.mxu1 }
 0xe18   :  { %v18195_v15 = vadd.f32 %v15942_v7, %v18165_v0  ;;  %v13655_v0 = vld [vmem:[%s20237_s6 + $0x1d0] sm:$0xff]  ;;  %v13696_v7 = vld [vmem:[%s20237_s6 + $0x1f8] sm:$0xff] }
 0xe19   :  { %v18197_v56 = vpop.f32.mrf.mxu1 }
 0xe33   :  { %v15291_v57 = vpop.f32.mrf.mxu1 }
 0xe35   :  { %v15292_v22 = vpop.f32.mrf.mxu1 }
 0xe36   :  { %v15293_v59 = vadd.f32 %v15292_v22, %v15291_v57  ;;  %v17317_v57 = vld [vmem:[%s20240_s9 + $0x30] sm:$0xff]  }
 0xe37   :  { %v15294_v8 = vpop.f32.mrf.mxu1  ;;  %v17318_v22 = vld [vmem:[%s20240_s9 + $0x70] sm:$0xff]  }
 0xe38   :  { %v6993_v9 = vadd.f32 %v15293_v59, %v15271_v24  ;;  %v17312_v24 = vld [vmem:[#allocation9 + $0xf88] sm:$0xff]   ;;  %v17319_v59 = vld [vmem:[%s20240_s9 + $0x28] sm:$0xff]  }
 0xe39   :  { %v15295_v11 = vpop.f32.mrf.mxu1  ;;  %v17320_v8 = vld [vmem:[%s20240_s9 + $0x68] sm:$0xff]  }
 0xe3a   :  { %15943 = vmatprep.subr.mxu0 %v6993_v9  ;;  %v17323_v11 = vld [vmem:[%s20240_s9 + $0x18] sm:$0xff]  }
 0xe3b   :  { %15944 = vmatpush3.msra.mxu0 %v6993_v9  ;;  %v17321_v9 = vld [vmem:[%s20240_s9 + $0x20] sm:$0xff]  }
 0xe3c   :  { %15946 = vmatmul.mubr.msk.f32.vlgmr.msra.gmra.mxu0 %vm1150_vm0, %v13654_v61  ;;  %15324 = vmatprep.subr.bf16.mxu0 %v17299_v10  ;;  %v17322_v10 = vld [vmem:[%s20240_s9 + $0x60] sm:$0xff]   ;;  %v17324_v61 = vld [vmem:[%s20240_s9 + $0x58] sm:$0xff]  }
 0xe3d   :  { %15325 = vmatpush3.bf16.msra.mxu0 %v17300_v19  ;;  %15948 = vmatprep.mubr.msk.f32.mxu0 %vm1150_vm0, %v13655_v0  ;;  %v17325_v19 = vld [vmem:[%s20240_s9 + $0x10] sm:$0xff]  }
 0xe3e   :  { %15326 = vmatprep.subr.bf16.mxu0 %v17301_v30  ;;  %v17326_v0 = vld [vmem:[%s20240_s9 + $0x50] sm:$0xff]   ;;  %v17327_v30 = vld [vmem:[%s20240_s9 + $0x8] sm:$0xff]  }
 0xe40   :  { %15949 = vmatmul.mubr.msk.f32.gmra.mxu0 %vm1150_vm0, %v13656_v33  ;;  %v17328_v33 = vld [vmem:[%s20240_s9 + $0x48] sm:$0xff]  }
 0xe41   :  { %15327 = vmatpush3.bf16.msra.mxu0 %v17302_v34  ;;  %7433 = vmatprep.mubr.bf16.mxu0 %v17755_v29  ;;  %v17329_v34 = vld [vmem:[%s20240_s9] sm:$0xff]  }
 0xe42   :  { %15328 = vmatprep.subr.bf16.mxu0 %v17303_v38  ;;  %v17330_v38 = vld [vmem:[%s20240_s9 + $0x40] sm:$0xff]  }
 0xe45   :  { %15329 = vmatpush3.bf16.msra.mxu0 %v17304_v14 }
 0xe46   :  { %15330 = vmatprep.subr.bf16.mxu0 %v17305_v27 }
 0xe49   :  { %15331 = vmatpush3.bf16.msra.mxu0 %v17306_v26 }
 0xe4a   :  { %15332 = vmatprep.subr.bf16.mxu0 %v17307_v35 }
 0xe4d   :  { %15333 = vmatpush3.bf16.msra.mxu0 %v17308_v12 }
 0xe4e   :  { %15334 = vmatprep.subr.bf16.mxu0 %v17309_v18 }
 0xe51   :  { %15335 = vmatpush3.bf16.msra.mxu0 %v17310_v45 }
 0xe52   :  { %15336 = vmatprep.subr.bf16.mxu0 %v17311_v32 }
 0xe53   :  { %v15318_v29 = vpop.f32.mrf.mxu1 }
 0xe55   :  { %v15319_v51 = vpop.f32.mrf.mxu1  ;;  %15337 = vmatpush3.bf16.msra.mxu0 %v17312_v24 }
 0xe56   :  { %15338 = vmatprep.subr.bf16.mxu0 %v17313_v43  ;;  %v15320_v63 = vadd.f32 %v15319_v51, %v15318_v29 }
 0xe57   :  { %v15321_v25 = vpop.f32.mrf.mxu1 }
 0xe59   :  { %v15322_v52 = vpop.f32.mrf.mxu1  ;;  %15339 = vmatpush3.bf16.msra.mxu0 %v17314_v42 }
 0xe5c   :  { %7434 = vmatmul.mubr.bf16.vlgmr.msra.gmra.mxu0 %v17757_v23  ;;  %v4001_v23 = vadd.f32 %v18011_v44, %v3558_v49 }
 0xe5e   :  { %v4444_v60 = vadd.f32 %v18043_v47, %v4001_v23 }
 0xe60   :  { %v4887_v62 = vadd.f32 %v18073_v50, %v4444_v60 }
 0xe62   :  { %v5330_v37 = vadd.f32 %v18105_v13, %v4887_v62 }
 0xe64   :  { %v5773_v17 = vadd.f32 %v18135_v46, %v5330_v37 }
 0xe66   :  { %v6216_v41 = vadd.f32 %v18167_v53, %v5773_v17  ;;  %v13694_v53 = vld [vmem:[%s20237_s6 + $0x1e8] sm:$0xff] }
 0xe68   :  { %v6659_v44 = vadd.f32 %v18197_v56, %v6216_v41  ;;  %v17316_v56 = vld [vmem:[%s20240_s9 + $0x78] sm:$0xff]  }
 0xefc   :  { %v15947_v28 = vpop.f32.mrf.mxu0 }
 0xefd   :  { %v18232_v21 = vadd.f32 %v15947_v28, %v18190_v5 }
 0xefe   :  { %v7081_v40 = vpop.f32.mrf.mxu0 }
 0xeff   :  { %v18235_v16 = vadd.f32 %v7081_v40, %v6657_v39 }
 0xf00   :  { %v15950_v20 = vpop.f32.mrf.mxu0 }
 0xf01   :  { %v18239_v47 = vadd.f32 %v15950_v20, %v18195_v15  ;;  %v17315_v15 = vld [vmem:[%s20240_s9 + $0x38] sm:$0xff]  }
 0xf02   :  { %v7091_v50 = vpop.f32.mrf.mxu0  ;;  %15959 = vmatprep.subr.bf16.mxu0 %v17315_v15 }
 0xf03   :  { %v18241_v13 = vadd.f32 %v7091_v50, %v6659_v44  ;;  %15960 = vmatpush3.bf16.msra.mxu0 %v17315_v15 }
 0xf04   :  { %15961 = vmatprep.subr.bf16.mxu0 %v17317_v57 }
 0xf07   :  { %15962 = vmatpush3.bf16.msra.mxu0 %v17317_v57 }
 0xf08   :  { %15963 = vmatprep.subr.bf16.mxu0 %v17319_v59 }
 0xf0b   :  { %15964 = vmatpush3.bf16.msra.mxu0 %v17319_v59 }
 0xf0c   :  { %15965 = vmatprep.subr.bf16.mxu0 %v17321_v9 }
 0xf0f   :  { %15966 = vmatpush3.bf16.msra.mxu0 %v17321_v9 }
 0xf10   :  { %15967 = vmatprep.subr.bf16.mxu0 %v17323_v11 }
 0xf13   :  { %15968 = vmatpush3.bf16.msra.mxu0 %v17323_v11 }
 0xf14   :  { %15969 = vmatprep.subr.bf16.mxu0 %v17325_v19 }
 0xf17   :  { %15970 = vmatpush3.bf16.msra.mxu0 %v17325_v19 }
 0xf18   :  { %15971 = vmatprep.subr.bf16.mxu0 %v17327_v30 }
 0xf1b   :  { %15972 = vmatpush3.bf16.msra.mxu0 %v17327_v30 }
 0xf1c   :  { %v15340_v46 = vpop.f32.mrf.mxu0  ;;  %15973 = vmatprep.subr.bf16.mxu0 %v17329_v34 }
 0xf1e   :  { %v15341_v1 = vpop.f32.mrf.mxu0 }
 0xf1f   :  { %v15342_v2 = vadd.f32 %v15341_v1, %v15340_v46  ;;  %15974 = vmatpush3.bf16.msra.mxu0 %v17329_v34  ;;  %v13701_v46 = vld [vmem:[#allocation10] ss:$0 sm:$0xff]  ;;  %v13735_v34 = vld [vmem:[%s20241_s10 + $0x80] sm:$0xff] }
 0xf20   :  { %v15343_v3 = vpop.f32.mrf.mxu0 }
 0xf21   :  { %v7436_v4 = vadd.f32 %v15342_v2, %v15320_v63 }
 0xf22   :  { %v15344_v5 = vpop.f32.mrf.mxu0 }
 0xf23   :  { %15951 = vmatprep.subr.mxu1 %v7436_v4 }
 0xf24   :  { %15952 = vmatpush3.msra.mxu1 %v7436_v4  ;;  %v13702_v4 = vld [vmem:[#allocation12] ss:$0 sm:$0xff] }
 0xf25   :  { %15954 = vmatmul.mubr.msk.f32.vlgmr.msra.gmra.mxu1 %vm1150_vm0, %v13694_v53  ;;  %15979 = vmatprep.subr.bf16.mxu1 %v17316_v56 }
 0xf26   :  { %15956 = vmatprep.mubr.msk.f32.mxu1 %vm1150_vm0, %v13695_v6  ;;  %15980 = vmatpush3.bf16.msra.mxu1 %v17316_v56 }
 0xf27   :  { %15981 = vmatprep.subr.bf16.mxu1 %v17318_v22 }
 0xf29   :  { %15957 = vmatmul.mubr.msk.f32.gmra.mxu1 %vm1150_vm0, %v13696_v7 }
 0xf2a   :  { %15982 = vmatpush3.bf16.msra.mxu1 %v17318_v22 }
 0xf2b   :  { %15983 = vmatprep.subr.bf16.mxu1 %v17320_v8 }
 0xf2e   :  { %15984 = vmatpush3.bf16.msra.mxu1 %v17320_v8 }
 0xf2f   :  { %15985 = vmatprep.subr.bf16.mxu1 %v17322_v10 }
 0xf32   :  { %15986 = vmatpush3.bf16.msra.mxu1 %v17322_v10 }
 0xf33   :  { %15987 = vmatprep.subr.bf16.mxu1 %v17324_v61 }
 0xf36   :  { %15988 = vmatpush3.bf16.msra.mxu1 %v17324_v61 }
 0xf37   :  { %15989 = vmatprep.subr.bf16.mxu1 %v17326_v0 }
 0xf3a   :  { %15990 = vmatpush3.bf16.msra.mxu1 %v17326_v0 }
 0xf3b   :  { %15991 = vmatprep.subr.bf16.mxu1 %v17328_v33 }
 0xf3e   :  { %15992 = vmatpush3.bf16.msra.mxu1 %v17328_v33 }
 0xf3f   :  { %15993 = vmatprep.subr.bf16.mxu1 %v17330_v38 }
 0xf42   :  { %15994 = vmatpush3.bf16.msra.mxu1 %v17330_v38  ;;  %v7731_v38 = vld [vmem:[%s20241_s10] sm:$0xff] }
 0xfe5   :  { %v15955_v14 = vpop.f32.mrf.mxu1 }
 0xfe6   :  { %v7544_v26 = vadd.f32 %v15955_v14, %v18232_v21 }
 0xfe7   :  { %v7524_v27 = vpop.f32.mrf.mxu1 }
 0xfe8   :  { %v7543_v35 = vadd.f32 %v7524_v27, %v18235_v16 }
 0xfe9   :  { %v15958_v12 = vpop.f32.mrf.mxu1 }
 0xfea   :  { %v7547_v18 = vadd.f32 %v7544_v26, %v7543_v35  ;;  %v7546_v24 = vadd.f32 %v15958_v12, %v18239_v47 }
 0xfeb   :  { %v7534_v45 = vpop.f32.mrf.mxu1 }
 0xfec   :  { %v7545_v32 = vadd.f32 %v7534_v45, %v18241_v13 }
 0xfee   :  { %v7548_v43 = vadd.f32 %v7547_v18, %v7545_v32 }
 0xff0   :  { %v7549_v29 = vadd.f32 %v7548_v43, %v7546_v24  ;;  %v7732_v43 = vld [vmem:[%s20241_s10 + $0x8] sm:$0xff] }
 0xff2   :  { %v7550_v51 = vrot.slane %v7549_v29, 4 }
 0xff4   :  { %v7551_v42 = vadd.f32 %v7550_v51, %v7549_v29  ;;  %v17331_v29 = vld [vmem:[%s20240_s9 + $0xb8] sm:$0xff]   ;;  %v13737_v51 = vld [vmem:[%s20241_s10 + $0x90] sm:$0xff] }
 0xff6   :  { %v7552_v25 = vrot.slane %v7551_v42, 2 }
 0xff8   :  { %v7553_v52 = vadd.f32 %v7552_v25, %v7551_v42  ;;  %v7733_v42 = vld [vmem:[%s20241_s10 + $0x10] sm:$0xff] }
 0xff9   :  { %v17332_v25 = vld [vmem:[%s20240_s9 + $0xb0] sm:$0xff]  }
 0xffa   :  { %v7554_v54 = vrot.slane %v7553_v52, 1 }
 0xffc   :  { %v7555_v31 = vadd.f32 %v7554_v54, %v7553_v52  ;;  %v13738_v52 = vld [vmem:[%s20241_s10 + $0x98] sm:$0xff] }
 0xffd   :  { %v7734_v54 = vld [vmem:[%s20241_s10 + $0x18] sm:$0xff] }
 0xffe   :  { %v7557_v55 = vmul.f32 0.03125, %v7555_v31  ;;  %v13739_v31 = vld [vmem:[%s20241_s10 + $0xa0] sm:$0xff] }
0x1000   :  { %v7558_v58 = vsub.f32 %v7543_v35, %v7557_v55  ;;  %v7559_v36 = vsub.f32 %v7544_v26, %v7557_v55  ;;  %v7560_v48 = vsub.f32 %v7545_v32, %v7557_v55  ;;  %v7561_v49 = vsub.f32 %v7546_v24, %v7557_v55  ;;  %v13736_v24 = vld [vmem:[%s20241_s10 + $0x88] sm:$0xff]  ;;  %v7735_v55 = vld [vmem:[%s20241_s10 + $0x20] sm:$0xff] }
0x1002   :  { %v7562_v23 = vmul.f32 %v7558_v58, %v7558_v58  ;;  %v7563_v60 = vmul.f32 %v7559_v36, %v7559_v36  ;;  %v7564_v62 = vmul.f32 %v7560_v48, %v7560_v48  ;;  %v7565_v28 = vmul.f32 %v7561_v49, %v7561_v49 }
0x1004   :  { %v7566_v37 = vadd.f32 %v7563_v60, %v7562_v23  ;;  %v7737_v23 = vld [vmem:[%s20241_s10 + $0x30] sm:$0xff]  ;;  %v17334_v60 = vld [vmem:[%s20240_s9 + $0xa0] sm:$0xff]  }
0x1006   :  { %v7567_v17 = vadd.f32 %v7566_v37, %v7564_v62  ;;  %v13742_v62 = vld [vmem:[%s20241_s10 + $0xb8] sm:$0xff] }
0x1007   :  { %v7738_v37 = vld [vmem:[%s20241_s10 + $0x38] sm:$0xff] }
0x1008   :  { %v7568_v39 = vadd.f32 %v7567_v17, %v7565_v28  ;;  %v13743_v28 = vld [vmem:[%s20241_s10 + $0xc0] sm:$0xff] }
0x1009   :  { %v7739_v17 = vld [vmem:[%s20241_s10 + $0x40] sm:$0xff] }
0x100a   :  { %v7569_v21 = vrot.slane %v7568_v39, 4 }
0x100c   :  { %v7570_v40 = vadd.f32 %v7569_v21, %v7568_v39  ;;  %v17335_v39 = vld [vmem:[%s20240_s9 + $0x98] sm:$0xff]   ;;  %v13744_v21 = vld [vmem:[%s20241_s10 + $0xc8] sm:$0xff] }
0x100e   :  { %v7571_v41 = vrot.slane %v7570_v40, 2 }
0x1010   :  { %v7572_v16 = vadd.f32 %v7571_v41, %v7570_v40  ;;  %v7740_v40 = vld [vmem:[%s20241_s10 + $0x48] sm:$0xff]  ;;  %v13745_v41 = vld [vmem:[%s20241_s10 + $0xd0] sm:$0xff] }
0x1012   :  { %v7573_v20 = vrot.slane %v7572_v16, 1 }
0x1014   :  { %v7574_v44 = vadd.f32 %v7573_v20, %v7572_v16  ;;  %v7741_v16 = vld [vmem:[%s20241_s10 + $0x50] sm:$0xff] }
0x1015   :  { %v17336_v20 = vld [vmem:[%s20240_s9 + $0x90] sm:$0xff]  }
0x1016   :  { %v7575_v47 = vmul.f32 0.03125, %v7574_v44  ;;  %v13746_v44 = vld [vmem:[%s20241_s10 + $0xd8] sm:$0xff] }
0x1018   :  { %v7576_v50 = vadd.f32 1e-05, %v7575_v47  ;;  %v7742_v47 = vld [vmem:[%s20241_s10 + $0x58] sm:$0xff] }
0x101a   :  { %17451 = vrsqrt.f32 %v7576_v50  ;;  %v13747_v50 = vld [vmem:[%s20241_s10 + $0xe0] sm:$0xff] }
0x1027   :  { %v17452_v13 = vpop.eup %17451 }
0x1028   :  { %v7578_v1 = vmul.f32 %v17452_v13, %v7558_v58  ;;  %v7579_v63 = vmul.f32 %v17452_v13, %v7559_v36  ;;  %v7580_v2 = vmul.f32 %v17452_v13, %v7560_v48  ;;  %v7581_v3 = vmul.f32 %v17452_v13, %v7561_v49  ;;  %v17333_v58 = vld [vmem:[%s20240_s9 + $0xa8] sm:$0xff]   ;;  %v13741_v49 = vld [vmem:[%s20241_s10 + $0xb0] sm:$0xff]  ;;  %v7743_v13 = vld [vmem:[%s20241_s10 + $0x60] sm:$0xff] }
0x1029   :  { %v13740_v36 = vld [vmem:[%s20241_s10 + $0xa8] sm:$0xff] }
0x102a   :  { %v7589_v5 = vmul.f32 %v13701_v46, %v7578_v1  ;;  %v7590_v53 = vmul.f32 %v13701_v46, %v7579_v63  ;;  %v7591_v6 = vmul.f32 %v13701_v46, %v7580_v2  ;;  %v7592_v7 = vmul.f32 %v13701_v46, %v7581_v3  ;;  %v7736_v48 = vld [vmem:[%s20241_s10 + $0x28] sm:$0xff]  ;;  %v13749_v2 = vld [vmem:[%s20241_s10 + $0xf0] sm:$0xff] }
0x102b   :  { %v17337_v46 = vld [vmem:[%s20240_s9 + $0x88] sm:$0xff]   ;;  %v7745_v3 = vld [vmem:[%s20241_s10 + $0x70] sm:$0xff] }
0x102c   :  { %v7600_v15 = vadd.f32 %v13702_v4, %v7589_v5  ;;  %v7601_v56 = vadd.f32 %v13702_v4, %v7590_v53  ;;  %v7602_v57 = vadd.f32 %v13702_v4, %v7591_v6  ;;  %v7603_v22 = vadd.f32 %v13702_v4, %v7592_v7  ;;  %v13748_v1 = vld [vmem:[%s20241_s10 + $0xe8] sm:$0xff]  ;;  %v17338_v4 = vld [vmem:[%s20240_s9 + $0x80] sm:$0xff]   ;;  %v13750_v5 = vld [vmem:[%s20241_s10 + $0xf8] sm:$0xff] }
0x102d   :  { %v7744_v63 = vld [vmem:[%s20241_s10 + $0x68] sm:$0xff]  ;;  %v7746_v53 = vld [vmem:[%s20241_s10 + $0x78] sm:$0xff]  ;;  %v13807_v6 = vld [vmem:[%s20241_s10 + $0x100] sm:$0xff] }
0x102e   :  { %vm7604_vm1 = vcmp.ge.f32.partialorder %v7600_v15, 0.0  ;;  %vm7605_vm2 = vcmp.ge.f32.partialorder %v7601_v56, 0.0  ;;  %vm7606_vm3 = vcmp.ge.f32.partialorder %v7602_v57, 0.0  ;;  %vm7607_vm4 = vcmp.ge.f32.partialorder %v7603_v22, 0.0 }
0x102f   :  { %v7608_v59 = vmul.f32 0.2, %v7600_v15  ;;  %v7609_v8 = vmul.f32 0.2, %v7601_v56  ;;  %v7610_v9 = vmul.f32 0.2, %v7602_v57 }
0x1030   :  { %v7611_v10 = vmul.f32 0.2, %v7603_v22 }
0x1031   :  { %v7612_v11 = vsel %vm7604_vm1, %v7600_v15, %v7608_v59  ;;  %v7613_v61 = vsel %vm7605_vm2, %v7601_v56, %v7609_v8  ;;  %v7614_v19 = vsel %vm7606_vm3, %v7602_v57, %v7610_v9 }
0x1032   :  { %v7615_v0 = vsel %vm7607_vm4, %v7603_v22, %v7611_v10  ;;  %v18307_v30 = vpack.c.bf16 %v7613_v61, %v7612_v11 }
0x1033   :  { %v18309_v33 = vpack.c.bf16 %v7615_v0, %v7614_v19 }
0x1034   :  { %15975 = vmatprep.mubr.bf16.mxu0 %v18307_v30  ;;  %15995 = vmatprep.mubr.bf16.mxu1 %v18307_v30 }
0x1035   :  { %15976 = vmatmul.mubr.bf16.vlgmr.msra.gmra.mxu0 %v18309_v33  ;;  %15996 = vmatmul.mubr.bf16.vlgmr.msra.gmra.mxu1 %v18309_v33 }
0x1036   :  { %16007 = vmatprep.mubr.msk.f32.mxu0 %vm7878_vm5, %v13735_v34  ;;  %16039 = vmatprep.mubr.msk.f32.mxu1 %vm7878_vm5, %v7731_v38 }
0x10f5   :  { %v15977_v14 = vpop.f32.mrf.mxu0  ;;  %v15997_v27 = vpop.f32.mrf.mxu1 }
0x10f7   :  { %v7716_v26 = vpop.f32.mrf.mxu0  ;;  %v7846_v35 = vpop.f32.mrf.mxu1 }
0x10f9   :  { %v15978_v12 = vpop.f32.mrf.mxu0  ;;  %v15998_v18 = vpop.f32.mrf.mxu1 }
0x10fa   :  { %15999 = vmatprep.subr.mxu0 %v15998_v18  ;;  %16031 = vmatprep.subr.mxu1 %v15978_v12 }
0x10fb   :  { %16000 = vmatpush3.msra.mxu0 %v15998_v18  ;;  %16032 = vmatpush3.msra.mxu1 %v15978_v12  ;;  %v7719_v45 = vpop.f32.mrf.mxu0  ;;  %v7849_v32 = vpop.f32.mrf.mxu1 }
0x10fc   :  { %16001 = vmatprep.subr.mxu0 %v15997_v27  ;;  %16033 = vmatprep.subr.mxu1 %v15977_v14 }
0x10fd   :  { %16002 = vmatpush3.msra.mxu0 %v15997_v27  ;;  %16034 = vmatpush3.msra.mxu1 %v15977_v14 }
0x10fe   :  { %16003 = vmatprep.subr.mxu0 %v7849_v32  ;;  %16035 = vmatprep.subr.mxu1 %v7719_v45 }
0x10ff   :  { %16004 = vmatpush3.msra.mxu0 %v7849_v32  ;;  %16036 = vmatpush3.msra.mxu1 %v7719_v45 }
0x1100   :  { %16005 = vmatprep.subr.mxu0 %v7846_v35  ;;  %16037 = vmatprep.subr.mxu1 %v7716_v26 }
0x1101   :  { %16006 = vmatpush3.msra.mxu0 %v7846_v35  ;;  %16038 = vmatpush3.msra.mxu1 %v7716_v26 }
0x1102   :  { %16008 = vmatmul.mubr.msk.f32.vlgmr.msra.gmra.mxu0 %vm7878_vm5, %v13736_v24  ;;  %16040 = vmatmul.mubr.msk.f32.vlgmr.msra.gmra.mxu1 %vm7878_vm5, %v7732_v43 }
0x1103   :  { %16063 = vmatprep.subr.bf16.mxu0 %v17331_v29  ;;  %16010 = vmatprep.mubr.msk.f32.mxu0 %vm7878_vm5, %v13737_v51 }
0x1104   :  { %16064 = vmatpush3.bf16.msra.mxu0 %v17331_v29  ;;  %16042 = vmatprep.mubr.msk.f32.mxu1 %vm7878_vm5, %v7733_v42 }
0x1105   :  { %16065 = vmatprep.subr.bf16.mxu0 %v17332_v25 }
0x1106   :  { %16011 = vmatmul.mubr.msk.f32.gmra.mxu0 %vm7878_vm5, %v13738_v52  ;;  %16043 = vmatmul.mubr.msk.f32.gmra.mxu1 %vm7878_vm5, %v7734_v54 }
0x1107   :  { %16013 = vmatprep.mubr.msk.f32.mxu0 %vm7878_vm5, %v13739_v31  ;;  %16045 = vmatprep.mubr.msk.f32.mxu1 %vm7878_vm5, %v7735_v55 }
0x1108   :  { %16066 = vmatpush3.bf16.msra.mxu0 %v17332_v25 }
0x1109   :  { %16067 = vmatprep.subr.bf16.mxu0 %v17333_v58 }
0x110a   :  { %16014 = vmatmul.mubr.msk.f32.gmra.mxu0 %vm7878_vm5, %v13740_v36  ;;  %16046 = vmatmul.mubr.msk.f32.gmra.mxu1 %vm7878_vm5, %v7736_v48 }
0x110b   :  { %16016 = vmatprep.mubr.msk.f32.mxu0 %vm7878_vm5, %v13741_v49  ;;  %16048 = vmatprep.mubr.msk.f32.mxu1 %vm7878_vm5, %v7737_v23 }
0x110c   :  { %16068 = vmatpush3.bf16.msra.mxu0 %v17333_v58 }
0x110d   :  { %16069 = vmatprep.subr.bf16.mxu0 %v17334_v60 }
0x110e   :  { %16017 = vmatmul.mubr.msk.f32.gmra.mxu0 %vm7878_vm5, %v13742_v62  ;;  %16049 = vmatmul.mubr.msk.f32.gmra.mxu1 %vm7878_vm5, %v7738_v37 }
0x110f   :  { %16019 = vmatprep.mubr.msk.f32.mxu0 %vm7878_vm5, %v13743_v28  ;;  %16051 = vmatprep.mubr.msk.f32.mxu1 %vm7878_vm5, %v7739_v17 }
0x1110   :  { %16070 = vmatpush3.bf16.msra.mxu0 %v17334_v60 }
0x1111   :  { %16071 = vmatprep.subr.bf16.mxu0 %v17335_v39 }
0x1112   :  { %16020 = vmatmul.mubr.msk.f32.gmra.mxu0 %vm7878_vm5, %v13744_v21  ;;  %16052 = vmatmul.mubr.msk.f32.gmra.mxu1 %vm7878_vm5, %v7740_v40  ;;  %v13808_v21 = vld [vmem:[%s20241_s10 + $0x108] sm:$0xff]  ;;  %v13809_v40 = vld [vmem:[%s20241_s10 + $0x110] sm:$0xff] }
0x1113   :  { %16022 = vmatprep.mubr.msk.f32.mxu0 %vm7878_vm5, %v13745_v41  ;;  %16054 = vmatprep.mubr.msk.f32.mxu1 %vm7878_vm5, %v7741_v16  ;;  %v17340_v41 = vld [vmem:[%s20240_s9 + $0xf0] sm:$0xff]   ;;  %v13810_v16 = vld [vmem:[%s20241_s10 + $0x118] sm:$0xff] }
0x1114   :  { %16072 = vmatpush3.bf16.msra.mxu0 %v17335_v39  ;;  %v17339_v39 = vld [vmem:[%s20240_s9 + $0xf8] sm:$0xff]  }
0x1115   :  { %16073 = vmatprep.subr.bf16.mxu0 %v17336_v20 }
0x1116   :  { %16023 = vmatmul.mubr.msk.f32.gmra.mxu0 %vm7878_vm5, %v13746_v44  ;;  %16055 = vmatmul.mubr.msk.f32.gmra.mxu1 %vm7878_vm5, %v7742_v47  ;;  %v17341_v44 = vld [vmem:[%s20240_s9 + $0xe8] sm:$0xff]  }
0x1117   :  { %16025 = vmatprep.mubr.msk.f32.mxu0 %vm7878_vm5, %v13747_v50  ;;  %16057 = vmatprep.mubr.msk.f32.mxu1 %vm7878_vm5, %v7743_v13  ;;  %v13812_v47 = vld [vmem:[%s20241_s10 + $0x128] sm:$0xff]  ;;  %v13813_v50 = vld [vmem:[%s20241_s10 + $0x130] sm:$0xff]  ;;  %v17342_v13 = vld [vmem:[%s20240_s9 + $0xe0] sm:$0xff]  }
0x1118   :  { %16074 = vmatpush3.bf16.msra.mxu0 %v17336_v20  ;;  %v13811_v20 = vld [vmem:[%s20241_s10 + $0x120] sm:$0xff] }
0x1119   :  { %16075 = vmatprep.subr.bf16.mxu0 %v17337_v46 }
0x111a   :  { %16026 = vmatmul.mubr.msk.f32.gmra.mxu0 %vm7878_vm5, %v13748_v1  ;;  %16058 = vmatmul.mubr.msk.f32.gmra.mxu1 %vm7878_vm5, %v7744_v63  ;;  %v13815_v1 = vld [vmem:[%s20241_s10 + $0x140] sm:$0xff]  ;;  %v17343_v63 = vld [vmem:[%s20240_s9 + $0xd8] sm:$0xff]  }
0x111b   :  { %16028 = vmatprep.mubr.msk.f32.mxu0 %vm7878_vm5, %v13749_v2  ;;  %16060 = vmatprep.mubr.msk.f32.mxu1 %vm7878_vm5, %v7745_v3  ;;  %v13816_v2 = vld [vmem:[%s20241_s10 + $0x148] sm:$0xff]  ;;  %v13817_v3 = vld [vmem:[%s20241_s10 + $0x150] sm:$0xff] }
0x111c   :  { %16076 = vmatpush3.bf16.msra.mxu0 %v17337_v46  ;;  %v13814_v46 = vld [vmem:[%s20241_s10 + $0x138] sm:$0xff] }
0x111d   :  { %16077 = vmatprep.subr.bf16.mxu0 %v17338_v4 }
0x111e   :  { %16029 = vmatmul.mubr.msk.f32.gmra.mxu0 %vm7878_vm5, %v13750_v5  ;;  %16061 = vmatmul.mubr.msk.f32.gmra.mxu1 %vm7878_vm5, %v7746_v53  ;;  %v13818_v5 = vld [vmem:[%s20241_s10 + $0x158] sm:$0xff]  ;;  %v13819_v53 = vld [vmem:[%s20241_s10 + $0x160] sm:$0xff] }
0x111f   :  { %16079 = vmatprep.mubr.bf16.mxu0 %v18307_v30 }
0x1120   :  { %16078 = vmatpush3.bf16.msra.mxu0 %v17338_v4  ;;  %v17344_v4 = vld [vmem:[%s20240_s9 + $0xd0] sm:$0xff]  }
0x1123   :  { %16080 = vmatmul.mubr.bf16.vlgmr.msra.gmra.mxu0 %v18309_v33 }
0x1124   :  { %16091 = vmatprep.mubr.msk.f32.mxu0 %vm7878_vm5, %v13807_v6  ;;  %v17345_v6 = vld [vmem:[%s20240_s9 + $0xc8] sm:$0xff]  }
0x11c2   :  { %v16009_v7 = vpop.f32.mrf.mxu0  ;;  %v16041_v15 = vpop.f32.mrf.mxu1 }
0x11c3   :  { %v18473_v56 = vadd.f32 %v16041_v15, %v16009_v7  ;;  %v13820_v7 = vld [vmem:[%s20241_s10 + $0x168] sm:$0xff]  ;;  %v13821_v15 = vld [vmem:[%s20241_s10 + $0x170] sm:$0xff] }
0x11c4   :  { %v18475_v57 = vpop.f32.mrf.mxu0  ;;  %v18477_v22 = vpop.f32.mrf.mxu1 }
0x11c6   :  { %v16012_v59 = vpop.f32.mrf.mxu0  ;;  %v16044_v8 = vpop.f32.mrf.mxu1 }
0x11c7   :  { %v18479_v9 = vadd.f32 %v16044_v8, %v16012_v59  ;;  %v17346_v59 = vld [vmem:[%s20240_s9 + $0xc0] sm:$0xff]   ;;  %v13822_v8 = vld [vmem:[%s20241_s10 + $0x178] sm:$0xff] }
0x11c8   :  { %v18481_v10 = vpop.f32.mrf.mxu0  ;;  %v18483_v11 = vpop.f32.mrf.mxu1 }
0x11ca   :  { %v16015_v61 = vpop.f32.mrf.mxu0  ;;  %v16047_v19 = vpop.f32.mrf.mxu1 }
0x11cb   :  { %v18485_v0 = vadd.f32 %v16047_v19, %v16015_v61  ;;  %v17347_v61 = vld [vmem:[%s20240_s9 + $0x138] sm:$0xff]   ;;  %v17348_v19 = vld [vmem:[%s20240_s9 + $0x130] sm:$0xff]  }
0x11cc   :  { %v18487_v34 = vpop.f32.mrf.mxu0  ;;  %v18489_v38 = vpop.f32.mrf.mxu1 }
0x11ce   :  { %v16018_v14 = vpop.f32.mrf.mxu0  ;;  %v16050_v27 = vpop.f32.mrf.mxu1 }
0x11cf   :  { %v18491_v26 = vadd.f32 %v16050_v27, %v16018_v14  ;;  %v17349_v14 = vld [vmem:[%s20240_s9 + $0x128] sm:$0xff]   ;;  %v17350_v27 = vld [vmem:[%s20240_s9 + $0x120] sm:$0xff]  }
0x11d0   :  { %v18493_v35 = vpop.f32.mrf.mxu0  ;;  %v18495_v12 = vpop.f32.mrf.mxu1 }
0x11d2   :  { %v16021_v18 = vpop.f32.mrf.mxu0  ;;  %v16053_v45 = vpop.f32.mrf.mxu1 }
0x11d3   :  { %v18497_v32 = vadd.f32 %v16053_v45, %v16021_v18  ;;  %v17351_v18 = vld [vmem:[%s20240_s9 + $0x118] sm:$0xff]   ;;  %v17352_v45 = vld [vmem:[%s20240_s9 + $0x110] sm:$0xff]  }
0x11d4   :  { %v18499_v24 = vpop.f32.mrf.mxu0  ;;  %v18501_v43 = vpop.f32.mrf.mxu1 }
0x11d6   :  { %v16024_v29 = vpop.f32.mrf.mxu0  ;;  %v16056_v51 = vpop.f32.mrf.mxu1 }
0x11d7   :  { %v18503_v42 = vadd.f32 %v16056_v51, %v16024_v29  ;;  %v17353_v29 = vld [vmem:[%s20240_s9 + $0x108] sm:$0xff]   ;;  %v17354_v51 = vld [vmem:[%s20240_s9 + $0x100] sm:$0xff]  }
0x11d8   :  { %v18505_v25 = vpop.f32.mrf.mxu0  ;;  %v18507_v52 = vpop.f32.mrf.mxu1 }
0x11da   :  { %v16027_v54 = vpop.f32.mrf.mxu0  ;;  %v16059_v31 = vpop.f32.mrf.mxu1 }
0x11db   :  { %v18509_v55 = vadd.f32 %v16059_v31, %v16027_v54  ;;  %v17355_v54 = vld [vmem:[%s20240_s9 + $0x178] sm:$0xff]   ;;  %v17356_v31 = vld [vmem:[%s20240_s9 + $0x170] sm:$0xff]  }
0x11dc   :  { %v18511_v58 = vpop.f32.mrf.mxu0  ;;  %v18513_v36 = vpop.f32.mrf.mxu1 }
0x11de   :  { %v16030_v48 = vpop.f32.mrf.mxu0  ;;  %v16062_v49 = vpop.f32.mrf.mxu1 }
0x11df   :  { %v18515_v23 = vadd.f32 %v16062_v49, %v16030_v48  ;;  %v17357_v48 = vld [vmem:[%s20240_s9 + $0x168] sm:$0xff]   ;;  %v17358_v49 = vld [vmem:[%s20240_s9 + $0x160] sm:$0xff]  }
0x11e0   :  { %v18517_v60 = vpop.f32.mrf.mxu0 }
0x11e3   :  { %v16081_v62 = vpop.f32.mrf.mxu0 }
0x11e5   :  { %v8364_v37 = vpop.f32.mrf.mxu0 }
0x11e7   :  { %v16082_v28 = vpop.f32.mrf.mxu0 }
0x11e8   :  { %16083 = vmatprep.subr.mxu0 %v16082_v28 }
0x11e9   :  { %16084 = vmatpush3.msra.mxu0 %v16082_v28  ;;  %v8367_v17 = vpop.f32.mrf.mxu0  ;;  %v17361_v28 = vld [vmem:[%s20240_s9 + $0x148] sm:$0xff]  }
0x11ea   :  { %16085 = vmatprep.subr.mxu0 %v16081_v62 }
0x11eb   :  { %16086 = vmatpush3.msra.mxu0 %v16081_v62  ;;  %v17359_v62 = vld [vmem:[%s20240_s9 + $0x158] sm:$0xff]  }
0x11ec   :  { %16087 = vmatprep.subr.mxu0 %v8367_v17 }
0x11ed   :  { %16088 = vmatpush3.msra.mxu0 %v8367_v17  ;;  %v17362_v17 = vld [vmem:[%s20240_s9 + $0x140] sm:$0xff]  }
0x11ee   :  { %16089 = vmatprep.subr.mxu0 %v8364_v37 }
0x11ef   :  { %16090 = vmatpush3.msra.mxu0 %v8364_v37  ;;  %v17360_v37 = vld [vmem:[%s20240_s9 + $0x150] sm:$0xff]  }
0x11f0   :  { %16092 = vmatmul.mubr.msk.f32.vlgmr.msra.gmra.mxu0 %vm7878_vm5, %v13808_v21  ;;  %16115 = vmatprep.subr.bf16.mxu0 %v17339_v39  ;;  %v17364_v21 = vld [vmem:[%s20240_s9 + $0x1b0] sm:$0xff]  }
0x11f1   :  { %16116 = vmatpush3.bf16.msra.mxu0 %v17339_v39  ;;  %16094 = vmatprep.mubr.msk.f32.mxu0 %vm7878_vm5, %v13809_v40  ;;  %v17363_v39 = vld [vmem:[%s20240_s9 + $0x1b8] sm:$0xff]   ;;  %v17365_v40 = vld [vmem:[%s20240_s9 + $0x1a8] sm:$0xff]  }
0x11f2   :  { %16117 = vmatprep.subr.bf16.mxu0 %v17340_v41 }
0x11f4   :  { %16095 = vmatmul.mubr.msk.f32.gmra.mxu0 %vm7878_vm5, %v13810_v16  ;;  %v17367_v16 = vld [vmem:[%s20240_s9 + $0x198] sm:$0xff]  }
0x11f5   :  { %16118 = vmatpush3.bf16.msra.mxu0 %v17340_v41  ;;  %16097 = vmatprep.mubr.msk.f32.mxu0 %vm7878_vm5, %v13811_v20  ;;  %v17366_v41 = vld [vmem:[%s20240_s9 + $0x1a0] sm:$0xff]  }
0x11f6   :  { %16119 = vmatprep.subr.bf16.mxu0 %v17341_v44  ;;  %v13863_v20 = vld [vmem:[%s20241_s10 + $0x180] sm:$0xff] }
0x11f7   :  { %16143 = vmatprep.mubr.msk.f32.mxu1 %vm7878_vm5, %v13863_v20 }
0x11f8   :  { %16098 = vmatmul.mubr.msk.f32.gmra.mxu0 %vm7878_vm5, %v13812_v47  ;;  %v17369_v47 = vld [vmem:[%s20240_s9 + $0x188] sm:$0xff]  }
0x11f9   :  { %16120 = vmatpush3.bf16.msra.mxu0 %v17341_v44  ;;  %16100 = vmatprep.mubr.msk.f32.mxu0 %vm7878_vm5, %v13813_v50  ;;  %v17368_v44 = vld [vmem:[%s20240_s9 + $0x190] sm:$0xff]   ;;  %v17370_v50 = vld [vmem:[%s20240_s9 + $0x180] sm:$0xff]  }
0x11fa   :  { %16121 = vmatprep.subr.bf16.mxu0 %v17342_v13 }
0x11fc   :  { %16101 = vmatmul.mubr.msk.f32.gmra.mxu0 %vm7878_vm5, %v13814_v46  ;;  %v17372_v46 = vld [vmem:[%s20240_s9 + $0x1f0] sm:$0xff]  }
0x11fd   :  { %16122 = vmatpush3.bf16.msra.mxu0 %v17342_v13  ;;  %16103 = vmatprep.mubr.msk.f32.mxu0 %vm7878_vm5, %v13815_v1  ;;  %v17371_v13 = vld [vmem:[%s20240_s9 + $0x1f8] sm:$0xff]   ;;  %v17373_v1 = vld [vmem:[%s20240_s9 + $0x1e8] sm:$0xff]  }
0x11fe   :  { %16123 = vmatprep.subr.bf16.mxu0 %v17343_v63 }
0x1200   :  { %16104 = vmatmul.mubr.msk.f32.gmra.mxu0 %vm7878_vm5, %v13816_v2  ;;  %v17375_v2 = vld [vmem:[%s20240_s9 + $0x1d8] sm:$0xff]  }
0x1201   :  { %16124 = vmatpush3.bf16.msra.mxu0 %v17343_v63  ;;  %16106 = vmatprep.mubr.msk.f32.mxu0 %vm7878_vm5, %v13817_v3  ;;  %v17374_v63 = vld [vmem:[%s20240_s9 + $0x1e0] sm:$0xff]   ;;  %v17376_v3 = vld [vmem:[%s20240_s9 + $0x1d0] sm:$0xff]  }
0x1202   :  { %16125 = vmatprep.subr.bf16.mxu0 %v17344_v4 }
0x1204   :  { %16107 = vmatmul.mubr.msk.f32.gmra.mxu0 %vm7878_vm5, %v13818_v5  ;;  %v17378_v5 = vld [vmem:[%s20240_s9 + $0x1c0] sm:$0xff]  }
0x1205   :  { %16126 = vmatpush3.bf16.msra.mxu0 %v17344_v4  ;;  %16109 = vmatprep.mubr.msk.f32.mxu0 %vm7878_vm5, %v13819_v53  ;;  %v17377_v4 = vld [vmem:[%s20240_s9 + $0x1c8] sm:$0xff]   ;;  %v17379_v53 = vld [vmem:[%s20240_s9 + $0x238] sm:$0xff]  }
0x1206   :  { %16127 = vmatprep.subr.bf16.mxu0 %v17345_v6 }
0x1208   :  { %16110 = vmatmul.mubr.msk.f32.gmra.mxu0 %vm7878_vm5, %v13820_v7  ;;  %v17381_v7 = vld [vmem:[%s20240_s9 + $0x228] sm:$0xff]  }
0x1209   :  { %16128 = vmatpush3.bf16.msra.mxu0 %v17345_v6  ;;  %16112 = vmatprep.mubr.msk.f32.mxu0 %vm7878_vm5, %v13821_v15  ;;  %v17380_v6 = vld [vmem:[%s20240_s9 + $0x230] sm:$0xff]   ;;  %v17382_v15 = vld [vmem:[%s20240_s9 + $0x220] sm:$0xff]  }
0x120a   :  { %16129 = vmatprep.subr.bf16.mxu0 %v17346_v59 }
0x120c   :  { %16113 = vmatmul.mubr.msk.f32.gmra.mxu0 %vm7878_vm5, %v13822_v8  ;;  %v17384_v8 = vld [vmem:[%s20240_s9 + $0x210] sm:$0xff]  }
0x120d   :  { %16130 = vmatpush3.bf16.msra.mxu0 %v17346_v59  ;;  %16131 = vmatprep.mubr.bf16.mxu0 %v18307_v30  ;;  %v17383_v59 = vld [vmem:[%s20240_s9 + $0x218] sm:$0xff]  }
0x120e   :  { %16167 = vmatprep.subr.bf16.mxu0 %v17347_v61 }
0x1210   :  { %16132 = vmatmul.mubr.bf16.vlgmr.msra.gmra.mxu0 %v18309_v33 }
0x1211   :  { %16168 = vmatpush3.bf16.msra.mxu0 %v17347_v61  ;;  %16183 = vmatprep.mubr.bf16.mxu0 %v18307_v30  ;;  %v17385_v61 = vld [vmem:[%s20240_s9 + $0x208] sm:$0xff]  }
0x1212   :  { %16169 = vmatprep.subr.bf16.mxu0 %v17348_v19 }
0x1215   :  { %16170 = vmatpush3.bf16.msra.mxu0 %v17348_v19  ;;  %v17386_v19 = vld [vmem:[%s20240_s9 + $0x200] sm:$0xff]  }
0x1216   :  { %16171 = vmatprep.subr.bf16.mxu0 %v17349_v14 }
0x1219   :  { %16172 = vmatpush3.bf16.msra.mxu0 %v17349_v14  ;;  %v17387_v14 = vld [vmem:[%s20240_s9 + $0x278] sm:$0xff]  }
0x121a   :  { %16173 = vmatprep.subr.bf16.mxu0 %v17350_v27 }
0x121d   :  { %16174 = vmatpush3.bf16.msra.mxu0 %v17350_v27  ;;  %v17388_v27 = vld [vmem:[%s20240_s9 + $0x270] sm:$0xff]  }
0x121e   :  { %16175 = vmatprep.subr.bf16.mxu0 %v17351_v18 }
0x1221   :  { %16176 = vmatpush3.bf16.msra.mxu0 %v17351_v18 }
0x1222   :  { %16177 = vmatprep.subr.bf16.mxu0 %v17352_v45 }
0x1225   :  { %16178 = vmatpush3.bf16.msra.mxu0 %v17352_v45  ;;  %v8187_v45 = vadd.f32 %v18477_v22, %v18475_v57  ;;  %v17390_v22 = vld [vmem:[%s20240_s9 + $0x260] sm:$0xff]  }
0x1226   :  { %16179 = vmatprep.subr.bf16.mxu0 %v17353_v29 }
0x1229   :  { %16180 = vmatpush3.bf16.msra.mxu0 %v17353_v29 }
0x122a   :  { %16181 = vmatprep.subr.bf16.mxu0 %v17354_v51 }
0x122d   :  { %16182 = vmatpush3.bf16.msra.mxu0 %v17354_v51 }
0x122e   :  { %16219 = vmatprep.subr.bf16.mxu0 %v17355_v54 }
0x1230   :  { %16184 = vmatmul.mubr.bf16.vlgmr.msra.gmra.mxu0 %v18309_v33 }
0x1231   :  { %16220 = vmatpush3.bf16.msra.mxu0 %v17355_v54  ;;  %16235 = vmatprep.mubr.bf16.mxu0 %v18307_v30  ;;  %v17389_v54 = vld [vmem:[%s20240_s9 + $0x268] sm:$0xff]  }
0x1232   :  { %16221 = vmatprep.subr.bf16.mxu0 %v17356_v31 }
0x1235   :  { %16222 = vmatpush3.bf16.msra.mxu0 %v17356_v31 }
0x1236   :  { %16223 = vmatprep.subr.bf16.mxu0 %v17357_v48 }
0x1239   :  { %16224 = vmatpush3.bf16.msra.mxu0 %v17357_v48 }
0x123a   :  { %16225 = vmatprep.subr.bf16.mxu0 %v17358_v49 }
0x123d   :  { %16226 = vmatpush3.bf16.msra.mxu0 %v17358_v49  ;;  %v8197_v49 = vadd.f32 %v18483_v11, %v18481_v10 }
0x123e   :  { %16227 = vmatprep.subr.bf16.mxu0 %v17359_v62 }
0x1241   :  { %16228 = vmatpush3.bf16.msra.mxu0 %v17359_v62 }
0x1242   :  { %16229 = vmatprep.subr.bf16.mxu0 %v17360_v37 }
0x1245   :  { %16230 = vmatpush3.bf16.msra.mxu0 %v17360_v37 }
0x1246   :  { %16231 = vmatprep.subr.bf16.mxu0 %v17361_v28 }
0x1249   :  { %16232 = vmatpush3.bf16.msra.mxu0 %v17361_v28  ;;  %v8207_v28 = vadd.f32 %v18489_v38, %v18487_v34 }
0x124a   :  { %16233 = vmatprep.subr.bf16.mxu0 %v17362_v17 }
0x124d   :  { %16234 = vmatpush3.bf16.msra.mxu0 %v17362_v17 }
0x124e   :  { %16271 = vmatprep.subr.bf16.mxu0 %v17363_v39 }
0x1250   :  { %16236 = vmatmul.mubr.bf16.vlgmr.msra.gmra.mxu0 %v18309_v33 }
0x1251   :  { %16272 = vmatpush3.bf16.msra.mxu0 %v17363_v39  ;;  %16287 = vmatprep.mubr.bf16.mxu0 %v18307_v30 }
0x1252   :  { %16273 = vmatprep.subr.bf16.mxu0 %v17364_v21 }
0x1255   :  { %16274 = vmatpush3.bf16.msra.mxu0 %v17364_v21  ;;  %v8217_v21 = vadd.f32 %v18495_v12, %v18493_v35 }
0x1256   :  { %16275 = vmatprep.subr.bf16.mxu0 %v17365_v40 }
0x1259   :  { %16276 = vmatpush3.bf16.msra.mxu0 %v17365_v40 }
0x125a   :  { %16277 = vmatprep.subr.bf16.mxu0 %v17366_v41 }
0x125d   :  { %16278 = vmatpush3.bf16.msra.mxu0 %v17366_v41 }
0x125e   :  { %16279 = vmatprep.subr.bf16.mxu0 %v17367_v16 }
0x1261   :  { %16280 = vmatpush3.bf16.msra.mxu0 %v17367_v16  ;;  %v8227_v16 = vadd.f32 %v18501_v43, %v18499_v24 }
0x1262   :  { %16281 = vmatprep.subr.bf16.mxu0 %v17368_v44 }
0x1265   :  { %16282 = vmatpush3.bf16.msra.mxu0 %v17368_v44 }
0x1266   :  { %16283 = vmatprep.subr.bf16.mxu0 %v17369_v47 }
0x1269   :  { %16284 = vmatpush3.bf16.msra.mxu0 %v17369_v47  ;;  %v8237_v47 = vadd.f32 %v18507_v52, %v18505_v25  ;;  %v8256_v25 = vpop.f32.mrf.mxu1  ;;  %v17395_v52 = vld [vmem:[%s20240_s9 + $0x2b8] sm:$0xff]  }
0x126a   :  { %16285 = vmatprep.subr.bf16.mxu0 %v17370_v50 }
0x126d   :  { %16286 = vmatpush3.bf16.msra.mxu0 %v17370_v50 }
0x126e   :  { %16323 = vmatprep.subr.bf16.mxu0 %v17371_v13 }
0x1270   :  { %16288 = vmatmul.mubr.bf16.vlgmr.msra.gmra.mxu0 %v18309_v33 }
0x1271   :  { %16324 = vmatpush3.bf16.msra.mxu0 %v17371_v13  ;;  %16339 = vmatprep.mubr.bf16.mxu0 %v18307_v30 }
0x1272   :  { %16325 = vmatprep.subr.bf16.mxu0 %v17372_v46 }
0x1275   :  { %16326 = vmatpush3.bf16.msra.mxu0 %v17372_v46  ;;  %v8247_v46 = vadd.f32 %v18513_v36, %v18511_v58 }
0x1276   :  { %16327 = vmatprep.subr.bf16.mxu0 %v17373_v1 }
0x1279   :  { %16328 = vmatpush3.bf16.msra.mxu0 %v17373_v1 }
0x127a   :  { %16329 = vmatprep.subr.bf16.mxu0 %v17374_v63 }
0x127d   :  { %16330 = vmatpush3.bf16.msra.mxu0 %v17374_v63 }
0x127e   :  { %16331 = vmatprep.subr.bf16.mxu0 %v17375_v2 }
0x1281   :  { %16332 = vmatpush3.bf16.msra.mxu0 %v17375_v2 }
0x1282   :  { %16333 = vmatprep.subr.bf16.mxu0 %v17376_v3 }
0x1285   :  { %16334 = vmatpush3.bf16.msra.mxu0 %v17376_v3  ;;  %v8257_v3 = vadd.f32 %v8256_v25, %v18517_v60  ;;  %v17408_v25 = vld [vmem:[%s20240_s9 + $0x2d0] sm:$0xff]  }
0x1286   :  { %16335 = vmatprep.subr.bf16.mxu0 %v17377_v4 }
0x1289   :  { %16336 = vmatpush3.bf16.msra.mxu0 %v17377_v4 }
0x128a   :  { %16337 = vmatprep.subr.bf16.mxu0 %v17378_v5 }
0x128d   :  { %16338 = vmatpush3.bf16.msra.mxu0 %v17378_v5 }
0x128e   :  { %16375 = vmatprep.subr.bf16.mxu0 %v17379_v53 }
0x1290   :  { %16340 = vmatmul.mubr.bf16.vlgmr.msra.gmra.mxu0 %v18309_v33 }
0x1291   :  { %16376 = vmatpush3.bf16.msra.mxu0 %v17379_v53  ;;  %16391 = vmatprep.mubr.bf16.mxu0 %v18307_v30 }
0x1292   :  { %16377 = vmatprep.subr.bf16.mxu0 %v17380_v6 }
0x1295   :  { %16378 = vmatpush3.bf16.msra.mxu0 %v17380_v6  ;;  %v17398_v6 = vld [vmem:[%s20240_s9 + $0x2a0] sm:$0xff]  }
0x1296   :  { %16379 = vmatprep.subr.bf16.mxu0 %v17381_v7 }
0x1299   :  { %16380 = vmatpush3.bf16.msra.mxu0 %v17381_v7 }
0x129a   :  { %16381 = vmatprep.subr.bf16.mxu0 %v17382_v15 }
0x129d   :  { %16382 = vmatpush3.bf16.msra.mxu0 %v17382_v15  ;;  %v13864_v15 = vld [vmem:[%s20241_s10 + $0x188] sm:$0xff] }
0x129e   :  { %16383 = vmatprep.subr.bf16.mxu0 %v17383_v59 }
0x12a1   :  { %16384 = vmatpush3.bf16.msra.mxu0 %v17383_v59  ;;  %v17399_v59 = vld [vmem:[%s20240_s9 + $0x298] sm:$0xff]  }
0x12a2   :  { %16385 = vmatprep.subr.bf16.mxu0 %v17384_v8 }
0x12a5   :  { %16386 = vmatpush3.bf16.msra.mxu0 %v17384_v8  ;;  %v13865_v8 = vld [vmem:[%s20241_s10 + $0x190] sm:$0xff] }
0x12a6   :  { %16387 = vmatprep.subr.bf16.mxu0 %v17385_v61 }
0x12a9   :  { %16388 = vmatpush3.bf16.msra.mxu0 %v17385_v61  ;;  %v13866_v61 = vld [vmem:[%s20241_s10 + $0x198] sm:$0xff] }
0x12aa   :  { %16389 = vmatprep.subr.bf16.mxu0 %v17386_v19 }
0x12ad   :  { %16390 = vmatpush3.bf16.msra.mxu0 %v17386_v19  ;;  %v17400_v19 = vld [vmem:[%s20240_s9 + $0x290] sm:$0xff]  }
0x12ae   :  { %16427 = vmatprep.subr.bf16.mxu0 %v17387_v14 }
0x12b0   :  { %v16093_v18 = vpop.f32.mrf.mxu0  ;;  %16392 = vmatmul.mubr.bf16.vlgmr.msra.gmra.mxu0 %v18309_v33 }
0x12b1   :  { %v18748_v29 = vadd.f32 %v16093_v18, %v18473_v56  ;;  %16428 = vmatpush3.bf16.msra.mxu0 %v17387_v14  ;;  %16443 = vmatprep.mubr.bf16.mxu0 %v18307_v30  ;;  %v13867_v14 = vld [vmem:[%s20241_s10 + $0x1a0] sm:$0xff]  ;;  %v17401_v18 = vld [vmem:[%s20240_s9 + $0x288] sm:$0xff]  }
0x12b2   :  { %v8510_v51 = vpop.f32.mrf.mxu0  ;;  %16429 = vmatprep.subr.bf16.mxu0 %v17388_v27 }
0x12b3   :  { %v18754_v31 = vadd.f32 %v8510_v51, %v8187_v45  ;;  %v13869_v45 = vld [vmem:[%s20241_s10 + $0x1b0] sm:$0xff]  ;;  %v13870_v51 = vld [vmem:[%s20241_s10 + $0x1b8] sm:$0xff] }
0x12b4   :  { %v16096_v48 = vpop.f32.mrf.mxu0 }
0x12b5   :  { %v18759_v57 = vadd.f32 %v16096_v48, %v18479_v9  ;;  %16430 = vmatpush3.bf16.msra.mxu0 %v17388_v27  ;;  %v17391_v9 = vld [vmem:[%s20240_s9 + $0x258] sm:$0xff]   ;;  %v13868_v27 = vld [vmem:[%s20241_s10 + $0x1a8] sm:$0xff]  ;;  %v13871_v48 = vld [vmem:[%s20241_s10 + $0x1c0] sm:$0xff] }
0x12b6   :  { %v8520_v56 = vpop.f32.mrf.mxu0  ;;  %16431 = vmatprep.subr.bf16.mxu0 %v17389_v54 }
0x12b7   :  { %v18764_v62 = vadd.f32 %v8520_v56, %v8197_v49  ;;  %v13872_v49 = vld [vmem:[%s20241_s10 + $0x1c8] sm:$0xff]  ;;  %v17403_v56 = vld [vmem:[%s20240_s9 + $0x2f8] sm:$0xff]  }
0x12b8   :  { %v16099_v37 = vpop.f32.mrf.mxu0 }
0x12b9   :  { %v18769_v17 = vadd.f32 %v16099_v37, %v18485_v0  ;;  %16432 = vmatpush3.bf16.msra.mxu0 %v17389_v54  ;;  %v17392_v0 = vld [vmem:[%s20240_s9 + $0x250] sm:$0xff]   ;;  %v17402_v54 = vld [vmem:[%s20240_s9 + $0x280] sm:$0xff]   ;;  %v13874_v37 = vld [vmem:[%s20241_s10 + $0x1d8] sm:$0xff] }
0x12ba   :  { %v8530_v10 = vpop.f32.mrf.mxu0  ;;  %16433 = vmatprep.subr.bf16.mxu0 %v17390_v22 }
0x12bb   :  { %v18774_v11 = vadd.f32 %v8530_v10, %v8207_v28  ;;  %v13875_v28 = vld [vmem:[%s20241_s10 + $0x1e0] sm:$0xff]  ;;  %v17404_v10 = vld [vmem:[%s20240_s9 + $0x2f0] sm:$0xff]  }
0x12bc   :  { %v16102_v39 = vpop.f32.mrf.mxu0 }
0x12bd   :  { %v18779_v40 = vadd.f32 %v16102_v39, %v18491_v26  ;;  %16434 = vmatpush3.bf16.msra.mxu0 %v17390_v22  ;;  %v17393_v26 = vld [vmem:[%s20240_s9 + $0x248] sm:$0xff]   ;;  %v13873_v22 = vld [vmem:[%s20241_s10 + $0x1d0] sm:$0xff] }
0x12be   :  { %v8540_v34 = vpop.f32.mrf.mxu0  ;;  %16435 = vmatprep.subr.bf16.mxu0 %v17391_v9 }
0x12bf   :  { %v18784_v38 = vadd.f32 %v8540_v34, %v8217_v21  ;;  %v13876_v21 = vld [vmem:[%s20241_s10 + $0x1e8] sm:$0xff] }
0x12c0   :  { %v16105_v41 = vpop.f32.mrf.mxu0 }
0x12c1   :  { %v18789_v20 = vadd.f32 %v16105_v41, %v18497_v32  ;;  %16436 = vmatpush3.bf16.msra.mxu0 %v17391_v9  ;;  %v17394_v32 = vld [vmem:[%s20240_s9 + $0x240] sm:$0xff]   ;;  %v17405_v41 = vld [vmem:[%s20240_s9 + $0x2e8] sm:$0xff]  }
0x12c2   :  { %v8550_v35 = vpop.f32.mrf.mxu0  ;;  %16437 = vmatprep.subr.bf16.mxu0 %v17392_v0 }
0x12c3   :  { %v18794_v12 = vadd.f32 %v8550_v35, %v8227_v16  ;;  %v13878_v16 = vld [vmem:[%s20241_s10 + $0x1f8] sm:$0xff] }
0x12c4   :  { %v16108_v44 = vpop.f32.mrf.mxu0 }
0x12c5   :  { %v18799_v50 = vadd.f32 %v16108_v44, %v18503_v42  ;;  %16438 = vmatpush3.bf16.msra.mxu0 %v17392_v0  ;;  %v13877_v0 = vld [vmem:[%s20241_s10 + $0x1f0] sm:$0xff]  ;;  %v17406_v44 = vld [vmem:[%s20240_s9 + $0x2e0] sm:$0xff]  }
0x12c6   :  { %v8560_v24 = vpop.f32.mrf.mxu0  ;;  %16439 = vmatprep.subr.bf16.mxu0 %v17393_v26 }
0x12c7   :  { %v18804_v43 = vadd.f32 %v8560_v24, %v8237_v47  ;;  %v13920_v47 = vld [vmem:[%s20241_s10 + $0x208] sm:$0xff]  ;;  %v13921_v24 = vld [vmem:[%s20241_s10 + $0x210] sm:$0xff] }
0x12c8   :  { %v16111_v13 = vpop.f32.mrf.mxu0 }
0x12c9   :  { %v18809_v1 = vadd.f32 %v16111_v13, %v18509_v55  ;;  %16440 = vmatpush3.bf16.msra.mxu0 %v17393_v26  ;;  %v17396_v55 = vld [vmem:[%s20240_s9 + $0x2b0] sm:$0xff]   ;;  %v13919_v26 = vld [vmem:[%s20241_s10 + $0x200] sm:$0xff]  ;;  %v13922_v13 = vld [vmem:[%s20241_s10 + $0x218] sm:$0xff] }
0x12ca   :  { %v8570_v42 = vpop.f32.mrf.mxu0  ;;  %16441 = vmatprep.subr.bf16.mxu0 %v17394_v32 }
0x12cb   :  { %v18814_v63 = vadd.f32 %v8570_v42, %v8247_v46  ;;  %v13923_v46 = vld [vmem:[%s20241_s10 + $0x220] sm:$0xff]  ;;  %v13924_v42 = vld [vmem:[%s20241_s10 + $0x228] sm:$0xff] }
0x12cc   :  { %v16114_v2 = vpop.f32.mrf.mxu0 }
0x12cd   :  { %v18818_v4 = vadd.f32 %v16114_v2, %v18515_v23  ;;  %16442 = vmatpush3.bf16.msra.mxu0 %v17394_v32  ;;  %v17397_v23 = vld [vmem:[%s20240_s9 + $0x2a8] sm:$0xff]   ;;  %v17407_v32 = vld [vmem:[%s20240_s9 + $0x2d8] sm:$0xff]  }
0x12ce   :  { %v8580_v58 = vpop.f32.mrf.mxu0  ;;  %16479 = vmatprep.subr.bf16.mxu0 %v17395_v52  ;;  %v17409_v2 = vld [vmem:[%s20240_s9 + $0x2c8] sm:$0xff]  }
0x12cf   :  { %v18823_v36 = vadd.f32 %v8580_v58, %v8257_v3  ;;  %v13926_v3 = vld [vmem:[%s20241_s10 + $0x238] sm:$0xff]  ;;  %v13927_v58 = vld [vmem:[%s20241_s10 + $0x240] sm:$0xff] }
0x12d0   :  { %v16133_v5 = vpop.f32.mrf.mxu0  ;;  %16444 = vmatmul.mubr.bf16.vlgmr.msra.gmra.mxu0 %v18309_v33 }
0x12d1   :  { %16480 = vmatpush3.bf16.msra.mxu0 %v17395_v52  ;;  %16495 = vmatprep.mubr.bf16.mxu0 %v18307_v30  ;;  %v13925_v52 = vld [vmem:[%s20241_s10 + $0x230] sm:$0xff] }
0x12d2   :  { %v8704_v53 = vpop.f32.mrf.mxu0  ;;  %16481 = vmatprep.subr.bf16.mxu0 %v17396_v55 }
0x12d4   :  { %v16134_v60 = vpop.f32.mrf.mxu0 }
0x12d5   :  { %16135 = vmatprep.subr.mxu1 %v16134_v60  ;;  %16482 = vmatpush3.bf16.msra.mxu0 %v17396_v55  ;;  %v17410_v55 = vld [vmem:[%s20240_s9 + $0x2c0] sm:$0xff]  }
0x12d6   :  { %16136 = vmatpush3.msra.mxu1 %v16134_v60  ;;  %16483 = vmatprep.subr.bf16.mxu0 %v17397_v23  ;;  %v8707_v7 = vpop.f32.mrf.mxu0  ;;  %v13930_v60 = vld [vmem:[%s20241_s10 + $0x258] sm:$0xff] }
0x12d7   :  { %16137 = vmatprep.subr.mxu1 %v16133_v5 }
0x12d8   :  { %16138 = vmatpush3.msra.mxu1 %v16133_v5  ;;  %v13928_v5 = vld [vmem:[%s20241_s10 + $0x248] sm:$0xff] }
0x12d9   :  { %16139 = vmatprep.subr.mxu1 %v8707_v7  ;;  %16484 = vmatpush3.bf16.msra.mxu0 %v17397_v23  ;;  %v17411_v23 = vld [vmem:[%s20240_s9 + $0x338] sm:$0xff]  }
0x12da   :  { %16140 = vmatpush3.msra.mxu1 %v8707_v7  ;;  %16485 = vmatprep.subr.bf16.mxu0 %v17398_v6 }
0x12db   :  { %16141 = vmatprep.subr.mxu1 %v8704_v53 }
0x12dc   :  { %16142 = vmatpush3.msra.mxu1 %v8704_v53  ;;  %v13929_v53 = vld [vmem:[%s20241_s10 + $0x250] sm:$0xff] }
0x12dd   :  { %16144 = vmatmul.mubr.msk.f32.vlgmr.msra.gmra.mxu1 %vm7878_vm5, %v13864_v15  ;;  %16486 = vmatpush3.bf16.msra.mxu0 %v17398_v6  ;;  %v17412_v6 = vld [vmem:[%s20240_s9 + $0x330] sm:$0xff]   ;;  %v13931_v15 = vld [vmem:[%s20241_s10 + $0x260] sm:$0xff] }
0x12de   :  { %16146 = vmatprep.mubr.msk.f32.mxu1 %vm7878_vm5, %v13865_v8  ;;  %16487 = vmatprep.subr.bf16.mxu0 %v17399_v59  ;;  %v13932_v8 = vld [vmem:[%s20241_s10 + $0x268] sm:$0xff] }
0x12e1   :  { %16147 = vmatmul.mubr.msk.f32.gmra.mxu1 %vm7878_vm5, %v13866_v61  ;;  %16488 = vmatpush3.bf16.msra.mxu0 %v17399_v59 }
0x12e2   :  { %16149 = vmatprep.mubr.msk.f32.mxu1 %vm7878_vm5, %v13867_v14  ;;  %16489 = vmatprep.subr.bf16.mxu0 %v17400_v19  ;;  %v17413_v14 = vld [vmem:[%s20240_s9 + $0x328] sm:$0xff]  }
0x12e5   :  { %16150 = vmatmul.mubr.msk.f32.gmra.mxu1 %vm7878_vm5, %v13868_v27  ;;  %16490 = vmatpush3.bf16.msra.mxu0 %v17400_v19  ;;  %v13933_v19 = vld [vmem:[%s20241_s10 + $0x270] sm:$0xff]  ;;  %v13934_v27 = vld [vmem:[%s20241_s10 + $0x278] sm:$0xff] }
0x12e6   :  { %16152 = vmatprep.mubr.msk.f32.mxu1 %vm7878_vm5, %v13869_v45  ;;  %16491 = vmatprep.subr.bf16.mxu0 %v17401_v18  ;;  %v13975_v45 = vld [vmem:[%s20241_s10 + $0x280] sm:$0xff] }
0x12e9   :  { %16153 = vmatmul.mubr.msk.f32.gmra.mxu1 %vm7878_vm5, %v13870_v51  ;;  %16492 = vmatpush3.bf16.msra.mxu0 %v17401_v18  ;;  %v17414_v51 = vld [vmem:[%s20240_s9 + $0x320] sm:$0xff]  }
0x12ea   :  { %16155 = vmatprep.mubr.msk.f32.mxu1 %vm7878_vm5, %v13871_v48  ;;  %16493 = vmatprep.subr.bf16.mxu0 %v17402_v54  ;;  %v13977_v48 = vld [vmem:[%s20241_s10 + $0x290] sm:$0xff] }
0x12ed   :  { %16156 = vmatmul.mubr.msk.f32.gmra.mxu1 %vm7878_vm5, %v13872_v49  ;;  %16494 = vmatpush3.bf16.msra.mxu0 %v17402_v54  ;;  %v13976_v54 = vld [vmem:[%s20241_s10 + $0x288] sm:$0xff]  ;;  %v17415_v49 = vld [vmem:[%s20240_s9 + $0x318] sm:$0xff]  }
0x12ee   :  { %16158 = vmatprep.mubr.msk.f32.mxu1 %vm7878_vm5, %v13873_v22  ;;  %16531 = vmatprep.subr.bf16.mxu0 %v17403_v56  ;;  %v13979_v22 = vld [vmem:[%s20241_s10 + $0x2a0] sm:$0xff] }
0x12f0   :  { %v16185_v9 = vpop.f32.mrf.mxu0  ;;  %16496 = vmatmul.mubr.bf16.vlgmr.msra.gmra.mxu0 %v18309_v33 }
0x12f1   :  { %16159 = vmatmul.mubr.msk.f32.gmra.mxu1 %vm7878_vm5, %v13874_v37  ;;  %16532 = vmatpush3.bf16.msra.mxu0 %v17403_v56  ;;  %v13978_v56 = vld [vmem:[%s20241_s10 + $0x298] sm:$0xff]  ;;  %v17416_v37 = vld [vmem:[%s20240_s9 + $0x310] sm:$0xff]  }
0x12f2   :  { %16547 = vmatprep.mubr.bf16.mxu0 %v18307_v30  ;;  %v9044_v39 = vpop.f32.mrf.mxu0  ;;  %16161 = vmatprep.mubr.msk.f32.mxu1 %vm7878_vm5, %v13875_v28  ;;  %v13980_v28 = vld [vmem:[%s20241_s10 + $0x2a8] sm:$0xff] }
0x12f3   :  { %16533 = vmatprep.subr.bf16.mxu0 %v17404_v10 }
0x12f4   :  { %v16186_v34 = vpop.f32.mrf.mxu0 }
0x12f5   :  { %16162 = vmatmul.mubr.msk.f32.gmra.mxu1 %vm7878_vm5, %v13876_v21  ;;  %16187 = vmatprep.subr.mxu1 %v16186_v34  ;;  %v13983_v21 = vld [vmem:[%s20241_s10 + $0x2c0] sm:$0xff] }
0x12f6   :  { %16534 = vmatpush3.bf16.msra.mxu0 %v17404_v10  ;;  %16188 = vmatpush3.msra.mxu1 %v16186_v34  ;;  %v9047_v35 = vpop.f32.mrf.mxu0  ;;  %v13981_v10 = vld [vmem:[%s20241_s10 + $0x2b0] sm:$0xff]  ;;  %v17418_v34 = vld [vmem:[%s20240_s9 + $0x300] sm:$0xff]  }
0x12f7   :  { %16189 = vmatprep.subr.mxu1 %v16185_v9  ;;  %16164 = vmatprep.mubr.msk.f32.mxu1 %vm7878_vm5, %v13877_v0  ;;  %v13984_v0 = vld [vmem:[%s20241_s10 + $0x2c8] sm:$0xff] }
0x12f8   :  { %16190 = vmatpush3.msra.mxu1 %v16185_v9  ;;  %16535 = vmatprep.subr.bf16.mxu0 %v17405_v41  ;;  %v17417_v9 = vld [vmem:[%s20240_s9 + $0x308] sm:$0xff]  }
0x12f9   :  { %16165 = vmatmul.mubr.msk.f32.gmra.mxu1 %vm7878_vm5, %v13878_v16  ;;  %16191 = vmatprep.subr.mxu1 %v9047_v35  ;;  %v17419_v16 = vld [vmem:[%s20240_s9 + $0x378] sm:$0xff]  }
0x12fa   :  { %16536 = vmatpush3.bf16.msra.mxu0 %v17405_v41  ;;  %16192 = vmatpush3.msra.mxu1 %v9047_v35  ;;  %v13985_v41 = vld [vmem:[%s20241_s10 + $0x2d0] sm:$0xff]  ;;  %v13986_v35 = vld [vmem:[%s20241_s10 + $0x2d8] sm:$0xff] }
0x12fb   :  { %16193 = vmatprep.subr.mxu1 %v9044_v39  ;;  %16195 = vmatprep.mubr.msk.f32.mxu1 %vm7878_vm5, %v13919_v26  ;;  %v17420_v26 = vld [vmem:[%s20240_s9 + $0x370] sm:$0xff]  }
0x12fc   :  { %16194 = vmatpush3.msra.mxu1 %v9044_v39  ;;  %16537 = vmatprep.subr.bf16.mxu0 %v17406_v44  ;;  %v13982_v39 = vld [vmem:[%s20241_s10 + $0x2b8] sm:$0xff] }
0x12fd   :  { %16196 = vmatmul.mubr.msk.f32.vlgmr.msra.gmra.mxu1 %vm7878_vm5, %v13920_v47  ;;  %v13987_v47 = vld [vmem:[%s20241_s10 + $0x2e0] sm:$0xff] }
0x12fe   :  { %16538 = vmatpush3.bf16.msra.mxu0 %v17406_v44  ;;  %16198 = vmatprep.mubr.msk.f32.mxu1 %vm7878_vm5, %v13921_v24 }
0x12ff   :  { %16539 = vmatprep.subr.bf16.mxu0 %v17407_v32 }
0x1301   :  { %16199 = vmatmul.mubr.msk.f32.gmra.mxu1 %vm7878_vm5, %v13922_v13 }
0x1302   :  { %16540 = vmatpush3.bf16.msra.mxu0 %v17407_v32  ;;  %16201 = vmatprep.mubr.msk.f32.mxu1 %vm7878_vm5, %v13923_v46  ;;  %v13988_v32 = vld [vmem:[%s20241_s10 + $0x2e8] sm:$0xff]  ;;  %v13989_v46 = vld [vmem:[%s20241_s10 + $0x2f0] sm:$0xff] }
0x1303   :  { %16541 = vmatprep.subr.bf16.mxu0 %v17408_v25 }
0x1305   :  { %16202 = vmatmul.mubr.msk.f32.gmra.mxu1 %vm7878_vm5, %v13924_v42  ;;  %v13990_v42 = vld [vmem:[%s20241_s10 + $0x2f8] sm:$0xff] }
0x1306   :  { %16542 = vmatpush3.bf16.msra.mxu0 %v17408_v25  ;;  %16204 = vmatprep.mubr.msk.f32.mxu1 %vm7878_vm5, %v13925_v52  ;;  %v17421_v25 = vld [vmem:[%s20240_s9 + $0x368] sm:$0xff]  }
0x1307   :  { %16543 = vmatprep.subr.bf16.mxu0 %v17409_v2 }
0x1309   :  { %16205 = vmatmul.mubr.msk.f32.gmra.mxu1 %vm7878_vm5, %v13926_v3  ;;  %v17422_v3 = vld [vmem:[%s20240_s9 + $0x360] sm:$0xff]  }
0x130a   :  { %16544 = vmatpush3.bf16.msra.mxu0 %v17409_v2  ;;  %16207 = vmatprep.mubr.msk.f32.mxu1 %vm7878_vm5, %v13927_v58  ;;  %v14031_v2 = vld [vmem:[%s20241_s10 + $0x300] sm:$0xff]  ;;  %v14032_v58 = vld [vmem:[%s20241_s10 + $0x308] sm:$0xff] }
0x130b   :  { %16545 = vmatprep.subr.bf16.mxu0 %v17410_v55 }
0x130d   :  { %16208 = vmatmul.mubr.msk.f32.gmra.mxu1 %vm7878_vm5, %v13928_v5  ;;  %v17423_v5 = vld [vmem:[%s20240_s9 + $0x358] sm:$0xff]  }
0x130e   :  { %16546 = vmatpush3.bf16.msra.mxu0 %v17410_v55  ;;  %16210 = vmatprep.mubr.msk.f32.mxu1 %vm7878_vm5, %v13929_v53  ;;  %v14033_v55 = vld [vmem:[%s20241_s10 + $0x310] sm:$0xff]  ;;  %v14034_v53 = vld [vmem:[%s20241_s10 + $0x318] sm:$0xff] }
0x130f   :  { %16583 = vmatprep.subr.bf16.mxu0 %v17411_v23 }
0x1310   :  { %v16237_v7 = vpop.f32.mrf.mxu0 }
0x1311   :  { %16548 = vmatmul.mubr.bf16.vlgmr.msra.gmra.mxu0 %v18309_v33  ;;  %16211 = vmatmul.mubr.msk.f32.gmra.mxu1 %vm7878_vm5, %v13930_v60  ;;  %v17424_v60 = vld [vmem:[%s20240_s9 + $0x350] sm:$0xff]  }
0x1312   :  { %16584 = vmatpush3.bf16.msra.mxu0 %v17411_v23  ;;  %16599 = vmatprep.mubr.bf16.mxu0 %v18307_v30  ;;  %v9384_v59 = vpop.f32.mrf.mxu0  ;;  %v14035_v23 = vld [vmem:[%s20241_s10 + $0x320] sm:$0xff] }
0x1313   :  { %16213 = vmatprep.mubr.msk.f32.mxu1 %vm7878_vm5, %v13931_v15  ;;  %16585 = vmatprep.subr.bf16.mxu0 %v17412_v6  ;;  %v17425_v15 = vld [vmem:[%s20240_s9 + $0x348] sm:$0xff]  }
0x1314   :  { %v16238_v61 = vpop.f32.mrf.mxu0 }
0x1315   :  { %16214 = vmatmul.mubr.msk.f32.gmra.mxu1 %vm7878_vm5, %v13932_v8  ;;  %16239 = vmatprep.subr.mxu1 %v16238_v61  ;;  %v14039_v8 = vld [vmem:[%s20241_s10 + $0x340] sm:$0xff] }
0x1316   :  { %16586 = vmatpush3.bf16.msra.mxu0 %v17412_v6  ;;  %16240 = vmatpush3.msra.mxu1 %v16238_v61  ;;  %v9387_v18 = vpop.f32.mrf.mxu0  ;;  %v14036_v6 = vld [vmem:[%s20241_s10 + $0x328] sm:$0xff]  ;;  %v17426_v61 = vld [vmem:[%s20240_s9 + $0x340] sm:$0xff]  }
0x1317   :  { %16241 = vmatprep.subr.mxu1 %v16237_v7  ;;  %16216 = vmatprep.mubr.msk.f32.mxu1 %vm7878_vm5, %v13933_v19  ;;  %v14040_v19 = vld [vmem:[%s20241_s10 + $0x348] sm:$0xff] }
0x1318   :  { %16242 = vmatpush3.msra.mxu1 %v16237_v7  ;;  %16587 = vmatprep.subr.bf16.mxu0 %v17413_v14  ;;  %v14037_v7 = vld [vmem:[%s20241_s10 + $0x330] sm:$0xff] }
0x1319   :  { %16217 = vmatmul.mubr.msk.f32.gmra.mxu1 %vm7878_vm5, %v13934_v27  ;;  %16243 = vmatprep.subr.mxu1 %v9387_v18  ;;  %v17427_v27 = vld [vmem:[%s20240_s9 + $0x3b8] sm:$0xff]  }
0x131a   :  { %16588 = vmatpush3.bf16.msra.mxu0 %v17413_v14  ;;  %16244 = vmatpush3.msra.mxu1 %v9387_v18  ;;  %v14041_v14 = vld [vmem:[%s20241_s10 + $0x350] sm:$0xff]  ;;  %v14042_v18 = vld [vmem:[%s20241_s10 + $0x358] sm:$0xff] }
0x131b   :  { %16245 = vmatprep.subr.mxu1 %v9384_v59  ;;  %16247 = vmatprep.mubr.msk.f32.mxu1 %vm7878_vm5, %v13975_v45  ;;  %v17428_v45 = vld [vmem:[%s20240_s9 + $0x3b0] sm:$0xff]  }
0x131c   :  { %16246 = vmatpush3.msra.mxu1 %v9384_v59  ;;  %16589 = vmatprep.subr.bf16.mxu0 %v17414_v51  ;;  %v14038_v59 = vld [vmem:[%s20241_s10 + $0x338] sm:$0xff] }
0x131d   :  { %16248 = vmatmul.mubr.msk.f32.vlgmr.msra.gmra.mxu1 %vm7878_vm5, %v13976_v54  ;;  %v14043_v54 = vld [vmem:[%s20241_s10 + $0x360] sm:$0xff] }
0x131e   :  { %16590 = vmatpush3.bf16.msra.mxu0 %v17414_v51  ;;  %16250 = vmatprep.mubr.msk.f32.mxu1 %vm7878_vm5, %v13977_v48 }
0x131f   :  { %16591 = vmatprep.subr.bf16.mxu0 %v17415_v49 }
0x1321   :  { %16251 = vmatmul.mubr.msk.f32.gmra.mxu1 %vm7878_vm5, %v13978_v56 }
0x1322   :  { %16592 = vmatpush3.bf16.msra.mxu0 %v17415_v49  ;;  %16253 = vmatprep.mubr.msk.f32.mxu1 %vm7878_vm5, %v13979_v22  ;;  %v14044_v49 = vld [vmem:[%s20241_s10 + $0x368] sm:$0xff]  ;;  %v14045_v22 = vld [vmem:[%s20241_s10 + $0x370] sm:$0xff] }
0x1323   :  { %16593 = vmatprep.subr.bf16.mxu0 %v17416_v37 }
0x1325   :  { %16254 = vmatmul.mubr.msk.f32.gmra.mxu1 %vm7878_vm5, %v13980_v28  ;;  %v14046_v28 = vld [vmem:[%s20241_s10 + $0x378] sm:$0xff] }
0x1326   :  { %16594 = vmatpush3.bf16.msra.mxu0 %v17416_v37  ;;  %16256 = vmatprep.mubr.msk.f32.mxu1 %vm7878_vm5, %v13981_v10  ;;  %v17429_v37 = vld [vmem:[%s20240_s9 + $0x3a8] sm:$0xff]  }
0x1327   :  { %16595 = vmatprep.subr.bf16.mxu0 %v17417_v9 }
0x1329   :  { %16257 = vmatmul.mubr.msk.f32.gmra.mxu1 %vm7878_vm5, %v13982_v39  ;;  %v17430_v39 = vld [vmem:[%s20240_s9 + $0x3a0] sm:$0xff]  }
0x132a   :  { %16596 = vmatpush3.bf16.msra.mxu0 %v17417_v9  ;;  %16259 = vmatprep.mubr.msk.f32.mxu1 %vm7878_vm5, %v13983_v21  ;;  %v14087_v9 = vld [vmem:[%s20241_s10 + $0x380] sm:$0xff]  ;;  %v14088_v21 = vld [vmem:[%s20241_s10 + $0x388] sm:$0xff] }
0x132b   :  { %16597 = vmatprep.subr.bf16.mxu0 %v17418_v34 }
0x132d   :  { %16260 = vmatmul.mubr.msk.f32.gmra.mxu1 %vm7878_vm5, %v13984_v0  ;;  %v17431_v0 = vld [vmem:[%s20240_s9 + $0x398] sm:$0xff]  }
0x132e   :  { %16598 = vmatpush3.bf16.msra.mxu0 %v17418_v34  ;;  %16262 = vmatprep.mubr.msk.f32.mxu1 %vm7878_vm5, %v13985_v41  ;;  %v14089_v34 = vld [vmem:[%s20241_s10 + $0x390] sm:$0xff]  ;;  %v14090_v41 = vld [vmem:[%s20241_s10 + $0x398] sm:$0xff] }
0x132f   :  { %16635 = vmatprep.subr.bf16.mxu0 %v17419_v16 }
0x1330   :  { %v16289_v44 = vpop.f32.mrf.mxu0 }
0x1331   :  { %16600 = vmatmul.mubr.bf16.vlgmr.msra.gmra.mxu0 %v18309_v33  ;;  %16263 = vmatmul.mubr.msk.f32.gmra.mxu1 %vm7878_vm5, %v13986_v35  ;;  %v17432_v35 = vld [vmem:[%s20240_s9 + $0x390] sm:$0xff]  }
0x1332   :  { %16636 = vmatpush3.bf16.msra.mxu0 %v17419_v16  ;;  %16651 = vmatprep.mubr.bf16.mxu0 %v18307_v30  ;;  %v9724_v24 = vpop.f32.mrf.mxu0  ;;  %v14091_v16 = vld [vmem:[%s20241_s10 + $0x3a0] sm:$0xff] }
0x1333   :  { %16265 = vmatprep.mubr.msk.f32.mxu1 %vm7878_vm5, %v13987_v47  ;;  %16637 = vmatprep.subr.bf16.mxu0 %v17420_v26  ;;  %v17433_v47 = vld [vmem:[%s20240_s9 + $0x388] sm:$0xff]  }
0x1334   :  { %v16290_v13 = vpop.f32.mrf.mxu0 }
0x1335   :  { %16266 = vmatmul.mubr.msk.f32.gmra.mxu1 %vm7878_vm5, %v13988_v32  ;;  %16291 = vmatprep.subr.mxu1 %v16290_v13  ;;  %v14095_v32 = vld [vmem:[%s20241_s10 + $0x3c0] sm:$0xff] }
0x1336   :  { %16638 = vmatpush3.bf16.msra.mxu0 %v17420_v26  ;;  %16292 = vmatpush3.msra.mxu1 %v16290_v13  ;;  %v9727_v52 = vpop.f32.mrf.mxu0  ;;  %v14092_v26 = vld [vmem:[%s20241_s10 + $0x3a8] sm:$0xff]  ;;  %v17434_v13 = vld [vmem:[%s20240_s9 + $0x380] sm:$0xff]  }
0x1337   :  { %16293 = vmatprep.subr.mxu1 %v16289_v44  ;;  %16268 = vmatprep.mubr.msk.f32.mxu1 %vm7878_vm5, %v13989_v46  ;;  %v14096_v46 = vld [vmem:[%s20241_s10 + $0x3c8] sm:$0xff] }
0x1338   :  { %16294 = vmatpush3.msra.mxu1 %v16289_v44  ;;  %16639 = vmatprep.subr.bf16.mxu0 %v17421_v25  ;;  %v14093_v44 = vld [vmem:[%s20241_s10 + $0x3b0] sm:$0xff] }
0x1339   :  { %16269 = vmatmul.mubr.msk.f32.gmra.mxu1 %vm7878_vm5, %v13990_v42  ;;  %16295 = vmatprep.subr.mxu1 %v9727_v52  ;;  %v17435_v42 = vld [vmem:[%s20240_s9 + $0x3f8] sm:$0xff]  }
0x133a   :  { %16640 = vmatpush3.bf16.msra.mxu0 %v17421_v25  ;;  %16296 = vmatpush3.msra.mxu1 %v9727_v52  ;;  %v14097_v25 = vld [vmem:[%s20241_s10 + $0x3d0] sm:$0xff]  ;;  %v14098_v52 = vld [vmem:[%s20241_s10 + $0x3d8] sm:$0xff] }
0x133b   :  { %16297 = vmatprep.subr.mxu1 %v9724_v24  ;;  %16299 = vmatprep.mubr.msk.f32.mxu1 %vm7878_vm5, %v14031_v2  ;;  %v17436_v2 = vld [vmem:[%s20240_s9 + $0x3f0] sm:$0xff]  }
0x133c   :  { %16298 = vmatpush3.msra.mxu1 %v9724_v24  ;;  %16641 = vmatprep.subr.bf16.mxu0 %v17422_v3  ;;  %v14094_v24 = vld [vmem:[%s20241_s10 + $0x3b8] sm:$0xff] }
0x133d   :  { %16300 = vmatmul.mubr.msk.f32.vlgmr.msra.gmra.mxu1 %vm7878_vm5, %v14032_v58  ;;  %v14099_v58 = vld [vmem:[%s20241_s10 + $0x3e0] sm:$0xff] }
0x133e   :  { %16642 = vmatpush3.bf16.msra.mxu0 %v17422_v3  ;;  %16302 = vmatprep.mubr.msk.f32.mxu1 %vm7878_vm5, %v14033_v55 }
0x133f   :  { %16643 = vmatprep.subr.bf16.mxu0 %v17423_v5 }
0x1341   :  { %16303 = vmatmul.mubr.msk.f32.gmra.mxu1 %vm7878_vm5, %v14034_v53 }
0x1342   :  { %16644 = vmatpush3.bf16.msra.mxu0 %v17423_v5  ;;  %16305 = vmatprep.mubr.msk.f32.mxu1 %vm7878_vm5, %v14035_v23  ;;  %v14100_v5 = vld [vmem:[%s20241_s10 + $0x3e8] sm:$0xff]  ;;  %v14101_v23 = vld [vmem:[%s20241_s10 + $0x3f0] sm:$0xff] }
0x1343   :  { %16645 = vmatprep.subr.bf16.mxu0 %v17424_v60 }
0x1345   :  { %16306 = vmatmul.mubr.msk.f32.gmra.mxu1 %vm7878_vm5, %v14036_v6 }
0x1346   :  { %16646 = vmatpush3.bf16.msra.mxu0 %v17424_v60  ;;  %16308 = vmatprep.mubr.msk.f32.mxu1 %vm7878_vm5, %v14037_v7  ;;  %v17437_v60 = vld [vmem:[%s20240_s9 + $0x3e8] sm:$0xff]   ;;  %v14143_v7 = vld [vmem:[%s20241_s10 + $0x400] sm:$0xff] }
0x1347   :  { %16647 = vmatprep.subr.bf16.mxu0 %v17425_v15 }
0x1349   :  { %16309 = vmatmul.mubr.msk.f32.gmra.mxu1 %vm7878_vm5, %v14038_v59  ;;  %v14144_v59 = vld [vmem:[%s20241_s10 + $0x408] sm:$0xff] }
0x134a   :  { %16648 = vmatpush3.bf16.msra.mxu0 %v17425_v15  ;;  %16311 = vmatprep.mubr.msk.f32.mxu1 %vm7878_vm5, %v14039_v8  ;;  %v17438_v15 = vld [vmem:[%s20240_s9 + $0x3e0] sm:$0xff]   ;;  %v14145_v8 = vld [vmem:[%s20241_s10 + $0x410] sm:$0xff] }
0x134b   :  { %16649 = vmatprep.subr.bf16.mxu0 %v17426_v61 }
0x134d   :  { %16312 = vmatmul.mubr.msk.f32.gmra.mxu1 %vm7878_vm5, %v14040_v19  ;;  %v14146_v19 = vld [vmem:[%s20241_s10 + $0x418] sm:$0xff] }
0x134e   :  { %16650 = vmatpush3.bf16.msra.mxu0 %v17426_v61  ;;  %16314 = vmatprep.mubr.msk.f32.mxu1 %vm7878_vm5, %v14041_v14  ;;  %v17439_v61 = vld [vmem:[%s20240_s9 + $0x3d8] sm:$0xff]   ;;  %v14147_v14 = vld [vmem:[%s20241_s10 + $0x420] sm:$0xff] }
0x134f   :  { %16687 = vmatprep.subr.bf16.mxu0 %v17427_v27 }
0x1350   :  { %v16341_v51 = vpop.f32.mrf.mxu0 }
0x1351   :  { %16652 = vmatmul.mubr.bf16.vlgmr.msra.gmra.mxu0 %v18309_v33  ;;  %16315 = vmatmul.mubr.msk.f32.gmra.mxu1 %vm7878_vm5, %v14042_v18  ;;  %v14148_v18 = vld [vmem:[%s20241_s10 + $0x428] sm:$0xff] }
0x1352   :  { %16688 = vmatpush3.bf16.msra.mxu0 %v17427_v27  ;;  %16703 = vmatprep.mubr.bf16.mxu0 %v18307_v30  ;;  %v10064_v48 = vpop.f32.mrf.mxu0  ;;  %v17440_v27 = vld [vmem:[%s20240_s9 + $0x3d0] sm:$0xff]  }
0x1353   :  { %16317 = vmatprep.mubr.msk.f32.mxu1 %vm7878_vm5, %v14043_v54  ;;  %16689 = vmatprep.subr.bf16.mxu0 %v17428_v45  ;;  %v14150_v54 = vld [vmem:[%s20241_s10 + $0x438] sm:$0xff] }
0x1354   :  { %v16342_v56 = vpop.f32.mrf.mxu0 }
0x1355   :  { %16318 = vmatmul.mubr.msk.f32.gmra.mxu1 %vm7878_vm5, %v14044_v49  ;;  %16343 = vmatprep.subr.mxu1 %v16342_v56  ;;  %v17442_v49 = vld [vmem:[%s20240_s9 + $0x3c0] sm:$0xff]  }
0x1356   :  { %16690 = vmatpush3.bf16.msra.mxu0 %v17428_v45  ;;  %16344 = vmatpush3.msra.mxu1 %v16342_v56  ;;  %v10067_v10 = vpop.f32.mrf.mxu0  ;;  %v14149_v45 = vld [vmem:[%s20241_s10 + $0x430] sm:$0xff]  ;;  %v14152_v56 = vld [vmem:[%s20241_s10 + $0x448] sm:$0xff] }
0x1357   :  { %16345 = vmatprep.subr.mxu1 %v16341_v51  ;;  %16320 = vmatprep.mubr.msk.f32.mxu1 %vm7878_vm5, %v14045_v22  ;;  %v14153_v22 = vld [vmem:[%s20241_s10 + $0x450] sm:$0xff] }
0x1358   :  { %16346 = vmatpush3.msra.mxu1 %v16341_v51  ;;  %16691 = vmatprep.subr.bf16.mxu0 %v17429_v37  ;;  %v17441_v51 = vld [vmem:[%s20240_s9 + $0x3c8] sm:$0xff]  }
0x1359   :  { %16321 = vmatmul.mubr.msk.f32.gmra.mxu1 %vm7878_vm5, %v14046_v28  ;;  %16347 = vmatprep.subr.mxu1 %v10067_v10  ;;  %v14155_v28 = vld [vmem:[%s20241_s10 + $0x460] sm:$0xff] }
0x135a   :  { %16692 = vmatpush3.bf16.msra.mxu0 %v17429_v37  ;;  %16348 = vmatpush3.msra.mxu1 %v10067_v10  ;;  %v14154_v37 = vld [vmem:[%s20241_s10 + $0x458] sm:$0xff] }
0x135b   :  { %16349 = vmatprep.subr.mxu1 %v10064_v48  ;;  %16351 = vmatprep.mubr.msk.f32.mxu1 %vm7878_vm5, %v14087_v9 }
0x135c   :  { %16350 = vmatpush3.msra.mxu1 %v10064_v48  ;;  %16693 = vmatprep.subr.bf16.mxu0 %v17430_v39  ;;  %v14151_v48 = vld [vmem:[%s20241_s10 + $0x440] sm:$0xff] }
0x135d   :  { %16352 = vmatmul.mubr.msk.f32.vlgmr.msra.gmra.mxu1 %vm7878_vm5, %v14088_v21  ;;  %v14157_v21 = vld [vmem:[%s20241_s10 + $0x470] sm:$0xff] }
0x135e   :  { %16694 = vmatpush3.bf16.msra.mxu0 %v17430_v39  ;;  %16354 = vmatprep.mubr.msk.f32.mxu1 %vm7878_vm5, %v14089_v34  ;;  %v14156_v39 = vld [vmem:[%s20241_s10 + $0x468] sm:$0xff] }
0x135f   :  { %16695 = vmatprep.subr.bf16.mxu0 %v17431_v0 }
0x1361   :  { %16355 = vmatmul.mubr.msk.f32.gmra.mxu1 %vm7878_vm5, %v14090_v41 }
0x1362   :  { %16696 = vmatpush3.bf16.msra.mxu0 %v17431_v0  ;;  %16357 = vmatprep.mubr.msk.f32.mxu1 %vm7878_vm5, %v14091_v16  ;;  %v14199_v0 = vld [vmem:[%s20241_s10 + $0x480] sm:$0xff]  ;;  %v14200_v16 = vld [vmem:[%s20241_s10 + $0x488] sm:$0xff] }
0x1363   :  { %16697 = vmatprep.subr.bf16.mxu0 %v17432_v35 }
0x1365   :  { %16358 = vmatmul.mubr.msk.f32.gmra.mxu1 %vm7878_vm5, %v14092_v26 }
0x1366   :  { %16698 = vmatpush3.bf16.msra.mxu0 %v17432_v35  ;;  %16360 = vmatprep.mubr.msk.f32.mxu1 %vm7878_vm5, %v14093_v44  ;;  %v14201_v35 = vld [vmem:[%s20241_s10 + $0x490] sm:$0xff] }
0x1367   :  { %16699 = vmatprep.subr.bf16.mxu0 %v17433_v47 }
0x1369   :  { %16361 = vmatmul.mubr.msk.f32.gmra.mxu1 %vm7878_vm5, %v14094_v24 }
0x136a   :  { %16700 = vmatpush3.bf16.msra.mxu0 %v17433_v47  ;;  %16363 = vmatprep.mubr.msk.f32.mxu1 %vm7878_vm5, %v14095_v32  ;;  %v14202_v47 = vld [vmem:[%s20241_s10 + $0x498] sm:$0xff]  ;;  %v14203_v32 = vld [vmem:[%s20241_s10 + $0x4a0] sm:$0xff] }
0x136b   :  { %16701 = vmatprep.subr.bf16.mxu0 %v17434_v13 }
0x136d   :  { %16364 = vmatmul.mubr.msk.f32.gmra.mxu1 %vm7878_vm5, %v14096_v46 }
0x136e   :  { %16702 = vmatpush3.bf16.msra.mxu0 %v17434_v13  ;;  %16366 = vmatprep.mubr.msk.f32.mxu1 %vm7878_vm5, %v14097_v25  ;;  %v14204_v25 = vld [vmem:[%s20241_s10 + $0x4a8] sm:$0xff] }
0x136f   :  { %16739 = vmatprep.subr.bf16.mxu0 %v17435_v42 }
0x1370   :  { %v16393_v3 = vpop.f32.mrf.mxu0 }
0x1371   :  { %16704 = vmatmul.mubr.bf16.vlgmr.msra.gmra.mxu0 %v18309_v33  ;;  %16367 = vmatmul.mubr.msk.f32.gmra.mxu1 %vm7878_vm5, %v14098_v52  ;;  %v14205_v52 = vld [vmem:[%s20241_s10 + $0x4b0] sm:$0xff] }
0x1372   :  { %16740 = vmatpush3.bf16.msra.mxu0 %v17435_v42  ;;  %16755 = vmatprep.mubr.bf16.mxu0 %v18307_v30  ;;  %v10404_v55 = vpop.f32.mrf.mxu0  ;;  %v14102_v30 = vld [vmem:[%s20241_s10 + $0x3f8] sm:$0xff] }
0x1373   :  { %16369 = vmatprep.mubr.msk.f32.mxu1 %vm7878_vm5, %v14099_v58  ;;  %16741 = vmatprep.subr.bf16.mxu0 %v17436_v2 }
0x1374   :  { %v16394_v53 = vpop.f32.mrf.mxu0 }
0x1375   :  { %16370 = vmatmul.mubr.msk.f32.gmra.mxu1 %vm7878_vm5, %v14100_v5  ;;  %16395 = vmatprep.subr.mxu1 %v16394_v53 }
0x1376   :  { %16742 = vmatpush3.bf16.msra.mxu0 %v17436_v2  ;;  %16396 = vmatpush3.msra.mxu1 %v16394_v53  ;;  %v10407_v6 = vpop.f32.mrf.mxu0  ;;  %v14208_v53 = vld [vmem:[%s20241_s10 + $0x4c8] sm:$0xff] }
0x1377   :  { %16397 = vmatprep.subr.mxu1 %v16393_v3  ;;  %16372 = vmatprep.mubr.msk.f32.mxu1 %vm7878_vm5, %v14101_v23 }
0x1378   :  { %16398 = vmatpush3.msra.mxu1 %v16393_v3  ;;  %16743 = vmatprep.subr.bf16.mxu0 %v17437_v60  ;;  %v14206_v3 = vld [vmem:[%s20241_s10 + $0x4b8] sm:$0xff] }
0x1379   :  { %16373 = vmatmul.mubr.msk.f32.gmra.mxu1 %vm7878_vm5, %v14102_v30  ;;  %16399 = vmatprep.subr.mxu1 %v10407_v6 }
0x137a   :  { %16744 = vmatpush3.bf16.msra.mxu0 %v17437_v60  ;;  %16400 = vmatpush3.msra.mxu1 %v10407_v6  ;;  %v14209_v60 = vld [vmem:[%s20241_s10 + $0x4d0] sm:$0xff]  ;;  %v14210_v6 = vld [vmem:[%s20241_s10 + $0x4d8] sm:$0xff] }
0x137b   :  { %16401 = vmatprep.subr.mxu1 %v10404_v55  ;;  %16403 = vmatprep.mubr.msk.f32.mxu1 %vm7878_vm5, %v14143_v7 }
0x137c   :  { %16402 = vmatpush3.msra.mxu1 %v10404_v55  ;;  %16745 = vmatprep.subr.bf16.mxu0 %v17438_v15  ;;  %v14207_v55 = vld [vmem:[%s20241_s10 + $0x4c0] sm:$0xff] }
0x137d   :  { %16404 = vmatmul.mubr.msk.f32.vlgmr.msra.gmra.mxu1 %vm7878_vm5, %v14144_v59 }
0x137e   :  { %16746 = vmatpush3.bf16.msra.mxu0 %v17438_v15  ;;  %16406 = vmatprep.mubr.msk.f32.mxu1 %vm7878_vm5, %v14145_v8  ;;  %v14211_v15 = vld [vmem:[%s20241_s10 + $0x4e0] sm:$0xff] }
0x137f   :  { %16747 = vmatprep.subr.bf16.mxu0 %v17439_v61 }
0x1381   :  { %16407 = vmatmul.mubr.msk.f32.gmra.mxu1 %vm7878_vm5, %v14146_v19  ;;  %v14212_v19 = vld [vmem:[%s20241_s10 + $0x4e8] sm:$0xff] }
0x1382   :  { %16748 = vmatpush3.bf16.msra.mxu0 %v17439_v61  ;;  %16409 = vmatprep.mubr.msk.f32.mxu1 %vm7878_vm5, %v14147_v14 }
0x1383   :  { %16749 = vmatprep.subr.bf16.mxu0 %v17440_v27 }
0x1385   :  { %16410 = vmatmul.mubr.msk.f32.gmra.mxu1 %vm7878_vm5, %v14148_v18 }
0x1386   :  { %16750 = vmatpush3.bf16.msra.mxu0 %v17440_v27  ;;  %16412 = vmatprep.mubr.msk.f32.mxu1 %vm7878_vm5, %v14149_v45 }
0x1387   :  { %16751 = vmatprep.subr.bf16.mxu0 %v17441_v51 }
0x1389   :  { %16413 = vmatmul.mubr.msk.f32.gmra.mxu1 %vm7878_vm5, %v14150_v54 }
0x138a   :  { %16752 = vmatpush3.bf16.msra.mxu0 %v17441_v51  ;;  %16415 = vmatprep.mubr.msk.f32.mxu1 %vm7878_vm5, %v14151_v48  ;;  %v14214_v51 = vld [vmem:[%s20241_s10 + $0x4f8] sm:$0xff] }
0x138b   :  { %16753 = vmatprep.subr.bf16.mxu0 %v17442_v49 }
0x138d   :  { %16416 = vmatmul.mubr.msk.f32.gmra.mxu1 %vm7878_vm5, %v14152_v56 }
0x138e   :  { %16754 = vmatpush3.bf16.msra.mxu0 %v17442_v49  ;;  %16418 = vmatprep.mubr.msk.f32.mxu1 %vm7878_vm5, %v14153_v22  ;;  %v14256_v22 = vld [vmem:[%s20241_s10 + $0x508] sm:$0xff] }
0x1390   :  { %v16445_v10 = vpop.f32.mrf.mxu0 }
0x1391   :  { %16756 = vmatmul.mubr.bf16.vlgmr.msra.gmra.mxu0 %v18309_v33  ;;  %16419 = vmatmul.mubr.msk.f32.gmra.mxu1 %vm7878_vm5, %v14154_v37  ;;  %v14158_v33 = vld [vmem:[%s20241_s10 + $0x478] sm:$0xff] }
0x1392   :  { %v10744_v9 = vpop.f32.mrf.mxu0  ;;  %16421 = vmatprep.mubr.msk.f32.mxu1 %vm7878_vm5, %v14155_v28 }
0x1394   :  { %v16446_v34 = vpop.f32.mrf.mxu0 }
0x1395   :  { %16422 = vmatmul.mubr.msk.f32.gmra.mxu1 %vm7878_vm5, %v14156_v39  ;;  %16447 = vmatprep.subr.mxu1 %v16446_v34 }
0x1396   :  { %16448 = vmatpush3.msra.mxu1 %v16446_v34  ;;  %16424 = vmatprep.mubr.msk.f32.mxu1 %vm7878_vm5, %v14157_v21  ;;  %v10747_v41 = vpop.f32.mrf.mxu0  ;;  %v14259_v21 = vld [vmem:[%s20241_s10 + $0x520] sm:$0xff] }
0x1397   :  { %16449 = vmatprep.subr.mxu1 %v16445_v10 }
0x1398   :  { %16450 = vmatpush3.msra.mxu1 %v16445_v10 }
0x1399   :  { %16425 = vmatmul.mubr.msk.f32.gmra.mxu1 %vm7878_vm5, %v14158_v33  ;;  %16451 = vmatprep.subr.mxu1 %v10747_v41 }
0x139a   :  { %16452 = vmatpush3.msra.mxu1 %v10747_v41  ;;  %16455 = vmatprep.mubr.msk.f32.mxu1 %vm7878_vm5, %v14199_v0  ;;  %v14260_v0 = vld [vmem:[%s20241_s10 + $0x528] sm:$0xff] }
0x139b   :  { %16453 = vmatprep.subr.mxu1 %v10744_v9 }
0x139c   :  { %16454 = vmatpush3.msra.mxu1 %v10744_v9  ;;  %v14258_v9 = vld [vmem:[%s20241_s10 + $0x518] sm:$0xff] }
0x139d   :  { %v16145_v26 = vpop.f32.mrf.mxu1  ;;  %16456 = vmatmul.mubr.msk.f32.vlgmr.msra.gmra.mxu1 %vm7878_vm5, %v14200_v16  ;;  %v14261_v16 = vld [vmem:[%s20241_s10 + $0x530] sm:$0xff] }
0x139e   :  { %v19368_v44 = vadd.f32 %v16145_v26, %v18748_v29  ;;  %16458 = vmatprep.mubr.msk.f32.mxu1 %vm7878_vm5, %v14201_v35 }
0x139f   :  { %v8850_v24 = vpop.f32.mrf.mxu1 }
0x13a0   :  { %v19378_v13 = vadd.f32 %v8850_v24, %v18754_v31 }
0x13a1   :  { %v16148_v46 = vpop.f32.mrf.mxu1  ;;  %16459 = vmatmul.mubr.msk.f32.gmra.mxu1 %vm7878_vm5, %v14202_v47  ;;  %v14262_v47 = vld [vmem:[%s20241_s10 + $0x538] sm:$0xff] }
0x13a2   :  { %v19382_v29 = vadd.f32 %v16148_v46, %v18759_v57  ;;  %16461 = vmatprep.mubr.msk.f32.mxu1 %vm7878_vm5, %v14203_v32  ;;  %v14263_v32 = vld [vmem:[%s20241_s10 + $0x540] sm:$0xff] }
0x13a3   :  { %v8860_v42 = vpop.f32.mrf.mxu1 }
0x13a4   :  { %v19392_v31 = vadd.f32 %v8860_v42, %v18764_v62 }
0x13a5   :  { %v16151_v2 = vpop.f32.mrf.mxu1  ;;  %16462 = vmatmul.mubr.msk.f32.gmra.mxu1 %vm7878_vm5, %v14204_v25  ;;  %v14264_v25 = vld [vmem:[%s20241_s10 + $0x548] sm:$0xff] }
0x13a6   :  { %v19396_v57 = vadd.f32 %v16151_v2, %v18769_v17  ;;  %16464 = vmatprep.mubr.msk.f32.mxu1 %vm7878_vm5, %v14205_v52  ;;  %v14265_v52 = vld [vmem:[%s20241_s10 + $0x550] sm:$0xff] }
0x13a7   :  { %v8870_v58 = vpop.f32.mrf.mxu1 }
0x13a8   :  { %v19406_v62 = vadd.f32 %v8870_v58, %v18774_v11 }
0x13a9   :  { %v16154_v5 = vpop.f32.mrf.mxu1  ;;  %16465 = vmatmul.mubr.msk.f32.gmra.mxu1 %vm7878_vm5, %v14206_v3  ;;  %v14266_v3 = vld [vmem:[%s20241_s10 + $0x558] sm:$0xff] }
0x13aa   :  { %v19410_v17 = vadd.f32 %v16154_v5, %v18779_v40  ;;  %16467 = vmatprep.mubr.msk.f32.mxu1 %vm7878_vm5, %v14207_v55  ;;  %v14267_v55 = vld [vmem:[%s20241_s10 + $0x560] sm:$0xff] }
0x13ab   :  { %v8880_v23 = vpop.f32.mrf.mxu1 }
0x13ac   :  { %v19420_v11 = vadd.f32 %v8880_v23, %v18784_v38  ;;  %v14268_v23 = vld [vmem:[%s20241_s10 + $0x568] sm:$0xff] }
0x13ad   :  { %v16157_v30 = vpop.f32.mrf.mxu1  ;;  %16468 = vmatmul.mubr.msk.f32.gmra.mxu1 %vm7878_vm5, %v14208_v53 }
0x13ae   :  { %v19424_v40 = vadd.f32 %v16157_v30, %v18789_v20  ;;  %16470 = vmatprep.mubr.msk.f32.mxu1 %vm7878_vm5, %v14209_v60  ;;  %v14269_v30 = vld [vmem:[%s20241_s10 + $0x570] sm:$0xff] }
0x13af   :  { %v8890_v7 = vpop.f32.mrf.mxu1 }
0x13b0   :  { %v19434_v38 = vadd.f32 %v8890_v7, %v18794_v12  ;;  %v16497_v59 = vpop.f32.mrf.mxu0  ;;  %v14213_v12 = vld [vmem:[%s20241_s10 + $0x4f0] sm:$0xff] }
0x13b1   :  { %v16160_v8 = vpop.f32.mrf.mxu1  ;;  %16471 = vmatmul.mubr.msk.f32.gmra.mxu1 %vm7878_vm5, %v14210_v6 }
0x13b2   :  { %v19438_v20 = vadd.f32 %v16160_v8, %v18799_v50  ;;  %v11084_v61 = vpop.f32.mrf.mxu0  ;;  %16473 = vmatprep.mubr.msk.f32.mxu1 %vm7878_vm5, %v14211_v15 }
0x13b3   :  { %v8900_v14 = vpop.f32.mrf.mxu1 }
0x13b4   :  { %v19448_v27 = vadd.f32 %v8900_v14, %v18804_v43  ;;  %v16498_v18 = vpop.f32.mrf.mxu0  ;;  %v14255_v43 = vld [vmem:[%s20241_s10 + $0x500] sm:$0xff] }
0x13b5   :  { %v16163_v45 = vpop.f32.mrf.mxu1  ;;  %16474 = vmatmul.mubr.msk.f32.gmra.mxu1 %vm7878_vm5, %v14212_v19  ;;  %16499 = vmatprep.subr.mxu1 %v16498_v18 }
0x13b6   :  { %v19452_v50 = vadd.f32 %v16163_v45, %v18809_v1  ;;  %16500 = vmatpush3.msra.mxu1 %v16498_v18  ;;  %16476 = vmatprep.mubr.msk.f32.mxu1 %vm7878_vm5, %v14213_v12  ;;  %v11087_v48 = vpop.f32.mrf.mxu0  ;;  %v14313_v45 = vld [vmem:[%s20241_s10 + $0x590] sm:$0xff] }
0x13b7   :  { %v8910_v54 = vpop.f32.mrf.mxu1  ;;  %16501 = vmatprep.subr.mxu1 %v16497_v59 }
0x13b8   :  { %v19462_v49 = vadd.f32 %v8910_v54, %v18814_v63  ;;  %16502 = vmatpush3.msra.mxu1 %v16497_v59  ;;  %v14257_v63 = vld [vmem:[%s20241_s10 + $0x510] sm:$0xff]  ;;  %v14270_v59 = vld [vmem:[%s20241_s10 + $0x578] sm:$0xff] }
0x13b9   :  { %v16166_v1 = vpop.f32.mrf.mxu1  ;;  %16477 = vmatmul.mubr.msk.f32.gmra.mxu1 %vm7878_vm5, %v14214_v51  ;;  %16503 = vmatprep.subr.mxu1 %v11087_v48 }
0x13ba   :  { %v19466_v56 = vadd.f32 %v16166_v1, %v18818_v4  ;;  %16504 = vmatpush3.msra.mxu1 %v11087_v48  ;;  %16507 = vmatprep.mubr.msk.f32.mxu1 %vm7878_vm5, %v14255_v43  ;;  %v14314_v43 = vld [vmem:[%s20241_s10 + $0x598] sm:$0xff] }
0x13bb   :  { %v8920_v37 = vpop.f32.mrf.mxu1  ;;  %16505 = vmatprep.subr.mxu1 %v11084_v61 }
0x13bc   :  { %v19476_v28 = vadd.f32 %v8920_v37, %v18823_v36  ;;  %16506 = vmatpush3.msra.mxu1 %v11084_v61  ;;  %v14316_v37 = vld [vmem:[%s20241_s10 + $0x5a8] sm:$0xff] }
0x13bd   :  { %v16197_v10 = vpop.f32.mrf.mxu1  ;;  %16508 = vmatmul.mubr.msk.f32.vlgmr.msra.gmra.mxu1 %vm7878_vm5, %v14256_v22 }
0x13be   :  { %v19480_v4 = vadd.f32 %v16197_v10, %v19368_v44  ;;  %16510 = vmatprep.mubr.msk.f32.mxu1 %vm7878_vm5, %v14257_v63 }
0x13bf   :  { %v9190_v39 = vpop.f32.mrf.mxu1 }
0x13c0   :  { %v19490_v36 = vadd.f32 %v9190_v39, %v19378_v13  ;;  %v14318_v39 = vld [vmem:[%s20241_s10 + $0x5b8] sm:$0xff] }
0x13c1   :  { %v16200_v34 = vpop.f32.mrf.mxu1  ;;  %16511 = vmatmul.mubr.msk.f32.gmra.mxu1 %vm7878_vm5, %v14258_v9 }
0x13c2   :  { %v19494_v33 = vadd.f32 %v16200_v34, %v19382_v29  ;;  %16513 = vmatprep.mubr.msk.f32.mxu1 %vm7878_vm5, %v14259_v21 }
0x13c3   :  { %v9200_v41 = vpop.f32.mrf.mxu1 }
0x13c4   :  { %v19504_v35 = vadd.f32 %v9200_v41, %v19392_v31  ;;  %v14320_v41 = vld [vmem:[%s20241_s10 + $0x5c8] sm:$0xff] }
0x13c5   :  { %v16203_v26 = vpop.f32.mrf.mxu1  ;;  %16514 = vmatmul.mubr.msk.f32.gmra.mxu1 %vm7878_vm5, %v14260_v0 }
0x13c6   :  { %v19508_v44 = vadd.f32 %v16203_v26, %v19396_v57  ;;  %16516 = vmatprep.mubr.msk.f32.mxu1 %vm7878_vm5, %v14261_v16 }
0x13c7   :  { %v9210_v24 = vpop.f32.mrf.mxu1 }
0x13c8   :  { %v19518_v13 = vadd.f32 %v9210_v24, %v19406_v62  ;;  %v14322_v24 = vld [vmem:[%s20241_s10 + $0x5d8] sm:$0xff] }
0x13c9   :  { %v16206_v46 = vpop.f32.mrf.mxu1  ;;  %16517 = vmatmul.mubr.msk.f32.gmra.mxu1 %vm7878_vm5, %v14262_v47 }
0x13ca   :  { %v19522_v29 = vadd.f32 %v16206_v46, %v19410_v17  ;;  %16519 = vmatprep.mubr.msk.f32.mxu1 %vm7878_vm5, %v14263_v32 }
0x13cb   :  { %v9220_v42 = vpop.f32.mrf.mxu1 }
0x13cc   :  { %v19532_v31 = vadd.f32 %v9220_v42, %v19420_v11 }
0x13cd   :  { %v16209_v2 = vpop.f32.mrf.mxu1  ;;  %16520 = vmatmul.mubr.msk.f32.gmra.mxu1 %vm7878_vm5, %v14264_v25 }
0x13ce   :  { %v19536_v57 = vadd.f32 %v16209_v2, %v19424_v40  ;;  %16522 = vmatprep.mubr.msk.f32.mxu1 %vm7878_vm5, %v14265_v52 }
0x13cf   :  { %v9230_v58 = vpop.f32.mrf.mxu1 }
0x13d0   :  { %v19546_v62 = vadd.f32 %v9230_v58, %v19434_v38 }
0x13d1   :  { %v16549_v5 = vpop.f32.mrf.mxu0  ;;  %v16212_v17 = vpop.f32.mrf.mxu1  ;;  %16523 = vmatmul.mubr.msk.f32.gmra.mxu1 %vm7878_vm5, %v14266_v3 }
0x13d2   :  { %v19550_v53 = vadd.f32 %v16212_v17, %v19438_v20  ;;  %16525 = vmatprep.mubr.msk.f32.mxu1 %vm7878_vm5, %v14267_v55  ;;  %v14311_v20 = vld [vmem:[%s20241_s10 + $0x580] sm:$0xff] }
0x13d3   :  { %v11424_v60 = vpop.f32.mrf.mxu0  ;;  %v9240_v11 = vpop.f32.mrf.mxu1 }
0x13d4   :  { %v19560_v40 = vadd.f32 %v9240_v11, %v19448_v27  ;;  %v14312_v27 = vld [vmem:[%s20241_s10 + $0x588] sm:$0xff] }
0x13d5   :  { %v16550_v6 = vpop.f32.mrf.mxu0  ;;  %v16215_v7 = vpop.f32.mrf.mxu1  ;;  %16526 = vmatmul.mubr.msk.f32.gmra.mxu1 %vm7878_vm5, %v14268_v23 }
0x13d6   :  { %v19564_v15 = vadd.f32 %v16215_v7, %v19452_v50  ;;  %16551 = vmatprep.subr.mxu1 %v16550_v6  ;;  %16528 = vmatprep.mubr.msk.f32.mxu1 %vm7878_vm5, %v14269_v30  ;;  %v14369_v7 = vld [vmem:[%s20241_s10 + $0x610] sm:$0xff] }
0x13d7   :  { %16552 = vmatpush3.msra.mxu1 %v16550_v6  ;;  %v9250_v38 = vpop.f32.mrf.mxu1  ;;  %v11427_v61 = vpop.f32.mrf.mxu0 }
0x13d8   :  { %v19571_v8 = vadd.f32 %v9250_v38, %v19462_v49  ;;  %16553 = vmatprep.subr.mxu1 %v16549_v5  ;;  %v14315_v49 = vld [vmem:[%s20241_s10 + $0x5a0] sm:$0xff] }
0x13d9   :  { %16554 = vmatpush3.msra.mxu1 %v16549_v5  ;;  %v16218_v19 = vpop.f32.mrf.mxu1  ;;  %v14326_v5 = vld [vmem:[%s20241_s10 + $0x5f8] sm:$0xff] }
0x13da   :  { %v19577_v14 = vadd.f32 %v16218_v19, %v19466_v56  ;;  %16529 = vmatmul.mubr.msk.f32.gmra.mxu1 %vm7878_vm5, %v14270_v59  ;;  %16555 = vmatprep.subr.mxu1 %v11427_v61 }
0x13db   :  { %16556 = vmatpush3.msra.mxu1 %v11427_v61  ;;  %v9260_v12 = vpop.f32.mrf.mxu1  ;;  %16559 = vmatprep.mubr.msk.f32.mxu1 %vm7878_vm5, %v14311_v20  ;;  %v14371_v61 = vld [vmem:[%s20241_s10 + $0x620] sm:$0xff] }
0x13dc   :  { %v19585_v18 = vadd.f32 %v9260_v12, %v19476_v28  ;;  %16557 = vmatprep.subr.mxu1 %v11424_v60  ;;  %v14317_v28 = vld [vmem:[%s20241_s10 + $0x5b0] sm:$0xff] }
0x13dd   :  { %16558 = vmatpush3.msra.mxu1 %v11424_v60  ;;  %v16249_v50 = vpop.f32.mrf.mxu1 }
0x13de   :  { %v19591_v51 = vadd.f32 %v16249_v50, %v19480_v4  ;;  %16560 = vmatmul.mubr.msk.f32.vlgmr.msra.gmra.mxu1 %vm7878_vm5, %v14312_v27  ;;  %v14372_v27 = vld [vmem:[%s20241_s10 + $0x628] sm:$0xff] }
0x13df   :  { %v9530_v54 = vpop.f32.mrf.mxu1  ;;  %16562 = vmatprep.mubr.msk.f32.mxu1 %vm7878_vm5, %v14313_v45  ;;  %v14373_v45 = vld [vmem:[%s20241_s10 + $0x630] sm:$0xff] }
0x13e0   :  { %v19599_v48 = vadd.f32 %v9530_v54, %v19490_v36  ;;  %v14319_v36 = vld [vmem:[%s20241_s10 + $0x5c0] sm:$0xff] }
0x13e1   :  { %v16252_v1 = vpop.f32.mrf.mxu1 }
0x13e2   :  { %v19605_v56 = vadd.f32 %v16252_v1, %v19494_v33  ;;  %16563 = vmatmul.mubr.msk.f32.gmra.mxu1 %vm7878_vm5, %v14314_v43  ;;  %v14374_v43 = vld [vmem:[%s20241_s10 + $0x638] sm:$0xff] }
0x13e3   :  { %v9540_v22 = vpop.f32.mrf.mxu1  ;;  %16565 = vmatprep.mubr.msk.f32.mxu1 %vm7878_vm5, %v14315_v49  ;;  %v14375_v49 = vld [vmem:[%s20241_s10 + $0x640] sm:$0xff] }
0x13e4   :  { %v19613_v63 = vadd.f32 %v9540_v22, %v19504_v35  ;;  %v14321_v35 = vld [vmem:[%s20241_s10 + $0x5d0] sm:$0xff] }
0x13e5   :  { %v16255_v10 = vpop.f32.mrf.mxu1 }
0x13e6   :  { %v19619_v4 = vadd.f32 %v16255_v10, %v19508_v44  ;;  %16566 = vmatmul.mubr.msk.f32.gmra.mxu1 %vm7878_vm5, %v14316_v37  ;;  %v14376_v37 = vld [vmem:[%s20241_s10 + $0x648] sm:$0xff] }
0x13e7   :  { %v9550_v9 = vpop.f32.mrf.mxu1  ;;  %16568 = vmatprep.mubr.msk.f32.mxu1 %vm7878_vm5, %v14317_v28  ;;  %v14377_v28 = vld [vmem:[%s20241_s10 + $0x650] sm:$0xff] }
0x13e8   :  { %v19627_v21 = vadd.f32 %v9550_v9, %v19518_v13  ;;  %v14323_v13 = vld [vmem:[%s20241_s10 + $0x5e0] sm:$0xff] }
0x13e9   :  { %v16258_v34 = vpop.f32.mrf.mxu1 }
0x13ea   :  { %v19633_v33 = vadd.f32 %v16258_v34, %v19522_v29  ;;  %16569 = vmatmul.mubr.msk.f32.gmra.mxu1 %vm7878_vm5, %v14318_v39  ;;  %v14378_v39 = vld [vmem:[%s20241_s10 + $0x658] sm:$0xff] }
0x13eb   :  { %v9560_v0 = vpop.f32.mrf.mxu1  ;;  %16571 = vmatprep.mubr.msk.f32.mxu1 %vm7878_vm5, %v14319_v36  ;;  %v14379_v36 = vld [vmem:[%s20241_s10 + $0x660] sm:$0xff] }
0x13ec   :  { %v19641_v16 = vadd.f32 %v9560_v0, %v19532_v31  ;;  %v14324_v31 = vld [vmem:[%s20241_s10 + $0x5e8] sm:$0xff] }
0x13ed   :  { %v16261_v26 = vpop.f32.mrf.mxu1 }
0x13ee   :  { %v19647_v44 = vadd.f32 %v16261_v26, %v19536_v57  ;;  %16572 = vmatmul.mubr.msk.f32.gmra.mxu1 %vm7878_vm5, %v14320_v41  ;;  %v14325_v57 = vld [vmem:[%s20241_s10 + $0x5f0] sm:$0xff] }
0x13ef   :  { %v9570_v47 = vpop.f32.mrf.mxu1  ;;  %16574 = vmatprep.mubr.msk.f32.mxu1 %vm7878_vm5, %v14321_v35  ;;  %v14380_v35 = vld [vmem:[%s20241_s10 + $0x668] sm:$0xff] }
0x13f0   :  { %v19655_v32 = vadd.f32 %v9570_v47, %v19546_v62 }
0x13f1   :  { %v16601_v46 = vpop.f32.mrf.mxu0  ;;  %v16264_v29 = vpop.f32.mrf.mxu1 }
0x13f2   :  { %v19661_v25 = vadd.f32 %v16264_v29, %v19550_v53  ;;  %16575 = vmatmul.mubr.msk.f32.gmra.mxu1 %vm7878_vm5, %v14322_v24  ;;  %v14367_v53 = vld [vmem:[%s20241_s10 + $0x600] sm:$0xff] }
0x13f3   :  { %v11764_v42 = vpop.f32.mrf.mxu0  ;;  %v9580_v52 = vpop.f32.mrf.mxu1  ;;  %16577 = vmatprep.mubr.msk.f32.mxu1 %vm7878_vm5, %v14323_v13 }
0x13f4   :  { %v19669_v2 = vadd.f32 %v9580_v52, %v19560_v40  ;;  %v14368_v40 = vld [vmem:[%s20241_s10 + $0x608] sm:$0xff] }
0x13f5   :  { %v16602_v3 = vpop.f32.mrf.mxu0  ;;  %v16267_v58 = vpop.f32.mrf.mxu1 }
0x13f6   :  { %v19675_v55 = vadd.f32 %v16267_v58, %v19564_v15  ;;  %16578 = vmatmul.mubr.msk.f32.gmra.mxu1 %vm7878_vm5, %v14324_v31  ;;  %16603 = vmatprep.subr.mxu1 %v16602_v3  ;;  %v14425_v58 = vld [vmem:[%s20241_s10 + $0x690] sm:$0xff] }
0x13f7   :  { %16604 = vmatpush3.msra.mxu1 %v16602_v3  ;;  %v9590_v62 = vpop.f32.mrf.mxu1  ;;  %16580 = vmatprep.mubr.msk.f32.mxu1 %vm7878_vm5, %v14325_v57  ;;  %v11767_v23 = vpop.f32.mrf.mxu0  ;;  %v14424_v57 = vld [vmem:[%s20241_s10 + $0x688] sm:$0xff] }
0x13f8   :  { %v19683_v17 = vadd.f32 %v9590_v62, %v19571_v8  ;;  %16605 = vmatprep.subr.mxu1 %v16601_v46  ;;  %v14370_v8 = vld [vmem:[%s20241_s10 + $0x618] sm:$0xff] }
0x13f9   :  { %16606 = vmatpush3.msra.mxu1 %v16601_v46  ;;  %v16270_v60 = vpop.f32.mrf.mxu1  ;;  %v14382_v46 = vld [vmem:[%s20241_s10 + $0x678] sm:$0xff] }
0x13fa   :  { %v19689_v11 = vadd.f32 %v16270_v60, %v19577_v14  ;;  %16581 = vmatmul.mubr.msk.f32.gmra.mxu1 %vm7878_vm5, %v14326_v5  ;;  %16607 = vmatprep.subr.mxu1 %v11767_v23 }
0x13fb   :  { %16608 = vmatpush3.msra.mxu1 %v11767_v23  ;;  %v9600_v30 = vpop.f32.mrf.mxu1  ;;  %16611 = vmatprep.mubr.msk.f32.mxu1 %vm7878_vm5, %v14367_v53  ;;  %v14427_v23 = vld [vmem:[%s20241_s10 + $0x6a0] sm:$0xff] }
0x13fc   :  { %v19697_v6 = vadd.f32 %v9600_v30, %v19585_v18  ;;  %16609 = vmatprep.subr.mxu1 %v11764_v42 }
0x13fd   :  { %16610 = vmatpush3.msra.mxu1 %v11764_v42  ;;  %v16301_v15 = vpop.f32.mrf.mxu1 }
0x13fe   :  { %v19703_v38 = vadd.f32 %v16301_v15, %v19591_v51  ;;  %16612 = vmatmul.mubr.msk.f32.vlgmr.msra.gmra.mxu1 %vm7878_vm5, %v14368_v40  ;;  %v14428_v40 = vld [vmem:[%s20241_s10 + $0x6a8] sm:$0xff] }
0x13ff   :  { %v9870_v59 = vpop.f32.mrf.mxu1  ;;  %16614 = vmatprep.mubr.msk.f32.mxu1 %vm7878_vm5, %v14369_v7  ;;  %v14429_v7 = vld [vmem:[%s20241_s10 + $0x6b0] sm:$0xff] }
0x1400   :  { %v19711_v20 = vadd.f32 %v9870_v59, %v19599_v48 }
0x1401   :  { %v16304_v19 = vpop.f32.mrf.mxu1 }
0x1402   :  { %v19717_v14 = vadd.f32 %v16304_v19, %v19605_v56  ;;  %16615 = vmatmul.mubr.msk.f32.gmra.mxu1 %vm7878_vm5, %v14370_v8  ;;  %v14430_v8 = vld [vmem:[%s20241_s10 + $0x6b8] sm:$0xff] }
0x1403   :  { %v9880_v12 = vpop.f32.mrf.mxu1  ;;  %16617 = vmatprep.mubr.msk.f32.mxu1 %vm7878_vm5, %v14371_v61  ;;  %v14431_v61 = vld [vmem:[%s20241_s10 + $0x6c0] sm:$0xff] }
0x1404   :  { %v19725_v18 = vadd.f32 %v9880_v12, %v19613_v63 }
0x1405   :  { %v16307_v50 = vpop.f32.mrf.mxu1 }
0x1406   :  { %v19731_v51 = vadd.f32 %v16307_v50, %v19619_v4  ;;  %16618 = vmatmul.mubr.msk.f32.gmra.mxu1 %vm7878_vm5, %v14372_v27  ;;  %v14432_v27 = vld [vmem:[%s20241_s10 + $0x6c8] sm:$0xff] }
0x1407   :  { %v9890_v54 = vpop.f32.mrf.mxu1  ;;  %16620 = vmatprep.mubr.msk.f32.mxu1 %vm7878_vm5, %v14373_v45  ;;  %v14433_v45 = vld [vmem:[%s20241_s10 + $0x6d0] sm:$0xff] }
0x1408   :  { %v19739_v48 = vadd.f32 %v9890_v54, %v19627_v21 }
0x1409   :  { %v16310_v1 = vpop.f32.mrf.mxu1 }
0x140a   :  { %v19745_v56 = vadd.f32 %v16310_v1, %v19633_v33  ;;  %16621 = vmatmul.mubr.msk.f32.gmra.mxu1 %vm7878_vm5, %v14374_v43  ;;  %v14434_v43 = vld [vmem:[%s20241_s10 + $0x6d8] sm:$0xff] }
0x140b   :  { %v9900_v22 = vpop.f32.mrf.mxu1  ;;  %16623 = vmatprep.mubr.msk.f32.mxu1 %vm7878_vm5, %v14375_v49  ;;  %v14435_v49 = vld [vmem:[%s20241_s10 + $0x6e0] sm:$0xff] }
0x140c   :  { %v19753_v63 = vadd.f32 %v9900_v22, %v19641_v16 }
0x140d   :  { %v16313_v10 = vpop.f32.mrf.mxu1 }
0x140e   :  { %v19759_v4 = vadd.f32 %v16313_v10, %v19647_v44  ;;  %16624 = vmatmul.mubr.msk.f32.gmra.mxu1 %vm7878_vm5, %v14376_v37  ;;  %v14381_v44 = vld [vmem:[%s20241_s10 + $0x670] sm:$0xff] }
0x140f   :  { %v9910_v9 = vpop.f32.mrf.mxu1  ;;  %16626 = vmatprep.mubr.msk.f32.mxu1 %vm7878_vm5, %v14377_v28  ;;  %v14436_v28 = vld [vmem:[%s20241_s10 + $0x6e8] sm:$0xff] }
0x1410   :  { %v19767_v21 = vadd.f32 %v9910_v9, %v19655_v32 }
0x1411   :  { %v16653_v34 = vpop.f32.mrf.mxu0  ;;  %v16316_v33 = vpop.f32.mrf.mxu1 }
0x1412   :  { %v19773_v0 = vadd.f32 %v16316_v33, %v19661_v25  ;;  %16627 = vmatmul.mubr.msk.f32.gmra.mxu1 %vm7878_vm5, %v14378_v39  ;;  %v14423_v25 = vld [vmem:[%s20241_s10 + $0x680] sm:$0xff] }
0x1413   :  { %v12104_v41 = vpop.f32.mrf.mxu0  ;;  %v9920_v16 = vpop.f32.mrf.mxu1  ;;  %16629 = vmatprep.mubr.msk.f32.mxu1 %vm7878_vm5, %v14379_v36 }
0x1414   :  { %v19781_v26 = vadd.f32 %v9920_v16, %v19669_v2 }
0x1415   :  { %v16654_v47 = vpop.f32.mrf.mxu0  ;;  %v16319_v24 = vpop.f32.mrf.mxu1 }
0x1416   :  { %v19787_v32 = vadd.f32 %v16319_v24, %v19675_v55  ;;  %16630 = vmatmul.mubr.msk.f32.gmra.mxu1 %vm7878_vm5, %v14380_v35  ;;  %16655 = vmatprep.subr.mxu1 %v16654_v47  ;;  %v14481_v24 = vld [vmem:[%s20241_s10 + $0x710] sm:$0xff] }
0x1417   :  { %16656 = vmatpush3.msra.mxu1 %v16654_v47  ;;  %v9930_v13 = vpop.f32.mrf.mxu1  ;;  %16632 = vmatprep.mubr.msk.f32.mxu1 %vm7878_vm5, %v14381_v44  ;;  %v12107_v42 = vpop.f32.mrf.mxu0  ;;  %v14480_v44 = vld [vmem:[%s20241_s10 + $0x708] sm:$0xff] }
0x1418   :  { %v19795_v29 = vadd.f32 %v9930_v13, %v19683_v17  ;;  %16657 = vmatprep.subr.mxu1 %v16653_v34  ;;  %v14426_v17 = vld [vmem:[%s20241_s10 + $0x698] sm:$0xff] }
0x1419   :  { %16658 = vmatpush3.msra.mxu1 %v16653_v34  ;;  %v16322_v52 = vpop.f32.mrf.mxu1  ;;  %v14438_v34 = vld [vmem:[%s20241_s10 + $0x6f8] sm:$0xff] }
0x141a   :  { %v19801_v31 = vadd.f32 %v16322_v52, %v19689_v11  ;;  %16633 = vmatmul.mubr.msk.f32.gmra.mxu1 %vm7878_vm5, %v14382_v46  ;;  %16659 = vmatprep.subr.mxu1 %v12107_v42 }
0x141b   :  { %16660 = vmatpush3.msra.mxu1 %v12107_v42  ;;  %v9940_v2 = vpop.f32.mrf.mxu1  ;;  %16663 = vmatprep.mubr.msk.f32.mxu1 %vm7878_vm5, %v14423_v25  ;;  %v14483_v42 = vld [vmem:[%s20241_s10 + $0x720] sm:$0xff] }
0x141c   :  { %v19809_v3 = vadd.f32 %v9940_v2, %v19697_v6  ;;  %16661 = vmatprep.subr.mxu1 %v12104_v41 }
0x141d   :  { %16662 = vmatpush3.msra.mxu1 %v12104_v41  ;;  %v16353_v55 = vpop.f32.mrf.mxu1 }
0x141e   :  { %v19815_v62 = vadd.f32 %v16353_v55, %v19703_v38  ;;  %16664 = vmatmul.mubr.msk.f32.vlgmr.msra.gmra.mxu1 %vm7878_vm5, %v14424_v57  ;;  %v14484_v57 = vld [vmem:[%s20241_s10 + $0x728] sm:$0xff] }
0x141f   :  { %v10210_v5 = vpop.f32.mrf.mxu1  ;;  %16666 = vmatprep.mubr.msk.f32.mxu1 %vm7878_vm5, %v14425_v58  ;;  %v14485_v58 = vld [vmem:[%s20241_s10 + $0x730] sm:$0xff] }
0x1420   :  { %v19823_v53 = vadd.f32 %v10210_v5, %v19711_v20 }
0x1421   :  { %v16356_v60 = vpop.f32.mrf.mxu1 }
0x1422   :  { %v19829_v11 = vadd.f32 %v16356_v60, %v19717_v14  ;;  %16667 = vmatmul.mubr.msk.f32.gmra.mxu1 %vm7878_vm5, %v14426_v17  ;;  %v14486_v17 = vld [vmem:[%s20241_s10 + $0x738] sm:$0xff] }
0x1423   :  { %v10220_v30 = vpop.f32.mrf.mxu1  ;;  %16669 = vmatprep.mubr.msk.f32.mxu1 %vm7878_vm5, %v14427_v23  ;;  %v14487_v23 = vld [vmem:[%s20241_s10 + $0x740] sm:$0xff] }
0x1424   :  { %v19837_v6 = vadd.f32 %v10220_v30, %v19725_v18 }
0x1425   :  { %v16359_v15 = vpop.f32.mrf.mxu1 }
0x1426   :  { %v19843_v38 = vadd.f32 %v16359_v15, %v19731_v51  ;;  %16670 = vmatmul.mubr.msk.f32.gmra.mxu1 %vm7878_vm5, %v14428_v40  ;;  %v14488_v40 = vld [vmem:[%s20241_s10 + $0x748] sm:$0xff] }
0x1427   :  { %v10230_v59 = vpop.f32.mrf.mxu1  ;;  %16672 = vmatprep.mubr.msk.f32.mxu1 %vm7878_vm5, %v14429_v7  ;;  %v14489_v7 = vld [vmem:[%s20241_s10 + $0x750] sm:$0xff] }
0x1428   :  { %v19851_v20 = vadd.f32 %v10230_v59, %v19739_v48 }
0x1429   :  { %v16362_v19 = vpop.f32.mrf.mxu1 }
0x142a   :  { %v19857_v14 = vadd.f32 %v16362_v19, %v19745_v56  ;;  %16673 = vmatmul.mubr.msk.f32.gmra.mxu1 %vm7878_vm5, %v14430_v8  ;;  %v14490_v8 = vld [vmem:[%s20241_s10 + $0x758] sm:$0xff] }
0x142b   :  { %v10240_v12 = vpop.f32.mrf.mxu1  ;;  %16675 = vmatprep.mubr.msk.f32.mxu1 %vm7878_vm5, %v14431_v61  ;;  %v14491_v61 = vld [vmem:[%s20241_s10 + $0x760] sm:$0xff] }
0x142c   :  { %v19865_v18 = vadd.f32 %v10240_v12, %v19753_v63 }
0x142d   :  { %v16365_v50 = vpop.f32.mrf.mxu1 }
0x142e   :  { %v19871_v51 = vadd.f32 %v16365_v50, %v19759_v4  ;;  %16676 = vmatmul.mubr.msk.f32.gmra.mxu1 %vm7878_vm5, %v14432_v27  ;;  %v14437_v4 = vld [vmem:[%s20241_s10 + $0x6f0] sm:$0xff] }
0x142f   :  { %v10250_v54 = vpop.f32.mrf.mxu1  ;;  %16678 = vmatprep.mubr.msk.f32.mxu1 %vm7878_vm5, %v14433_v45  ;;  %v14492_v45 = vld [vmem:[%s20241_s10 + $0x768] sm:$0xff] }
0x1430   :  { %v19879_v48 = vadd.f32 %v10250_v54, %v19767_v21 }
0x1431   :  { %v16705_v1 = vpop.f32.mrf.mxu0  ;;  %v16368_v56 = vpop.f32.mrf.mxu1 }
0x1432   :  { %v19885_v22 = vadd.f32 %v16368_v56, %v19773_v0  ;;  %16679 = vmatmul.mubr.msk.f32.gmra.mxu1 %vm7878_vm5, %v14434_v43  ;;  %v14479_v0 = vld [vmem:[%s20241_s10 + $0x700] sm:$0xff] }
0x1433   :  { %v12444_v37 = vpop.f32.mrf.mxu0  ;;  %v10260_v63 = vpop.f32.mrf.mxu1  ;;  %16681 = vmatprep.mubr.msk.f32.mxu1 %vm7878_vm5, %v14435_v49 }
0x1434   :  { %v19893_v10 = vadd.f32 %v10260_v63, %v19781_v26 }
0x1435   :  { %v16706_v9 = vpop.f32.mrf.mxu0  ;;  %v16371_v39 = vpop.f32.mrf.mxu1 }
0x1436   :  { %v19899_v21 = vadd.f32 %v16371_v39, %v19787_v32  ;;  %16682 = vmatmul.mubr.msk.f32.gmra.mxu1 %vm7878_vm5, %v14436_v28  ;;  %16707 = vmatprep.subr.mxu1 %v16706_v9  ;;  %v14537_v39 = vld [vmem:[%s20241_s10 + $0x790] sm:$0xff] }
0x1437   :  { %16708 = vmatpush3.msra.mxu1 %v16706_v9  ;;  %v10270_v36 = vpop.f32.mrf.mxu1  ;;  %16684 = vmatprep.mubr.msk.f32.mxu1 %vm7878_vm5, %v14437_v4  ;;  %v12447_v41 = vpop.f32.mrf.mxu0  ;;  %v14536_v4 = vld [vmem:[%s20241_s10 + $0x788] sm:$0xff] }
0x1438   :  { %v19907_v33 = vadd.f32 %v10270_v36, %v19795_v29  ;;  %16709 = vmatprep.subr.mxu1 %v16705_v1  ;;  %v14482_v29 = vld [vmem:[%s20241_s10 + $0x718] sm:$0xff] }
0x1439   :  { %16710 = vmatpush3.msra.mxu1 %v16705_v1  ;;  %v16374_v16 = vpop.f32.mrf.mxu1  ;;  %v14494_v1 = vld [vmem:[%s20241_s10 + $0x778] sm:$0xff] }
0x143a   :  { %v19913_v35 = vadd.f32 %v16374_v16, %v19801_v31  ;;  %16685 = vmatmul.mubr.msk.f32.gmra.mxu1 %vm7878_vm5, %v14438_v34  ;;  %16711 = vmatprep.subr.mxu1 %v12447_v41 }
0x143b   :  { %16712 = vmatpush3.msra.mxu1 %v12447_v41  ;;  %v10280_v26 = vpop.f32.mrf.mxu1  ;;  %16715 = vmatprep.mubr.msk.f32.mxu1 %vm7878_vm5, %v14479_v0  ;;  %v14539_v41 = vld [vmem:[%s20241_s10 + $0x7a0] sm:$0xff] }
0x143c   :  { %v19921_v47 = vadd.f32 %v10280_v26, %v19809_v3  ;;  %16713 = vmatprep.subr.mxu1 %v12444_v37 }
0x143d   :  { %16714 = vmatpush3.msra.mxu1 %v12444_v37  ;;  %v16405_v32 = vpop.f32.mrf.mxu1 }
0x143e   :  { %v19927_v13 = vadd.f32 %v16405_v32, %v19815_v62  ;;  %16716 = vmatmul.mubr.msk.f32.vlgmr.msra.gmra.mxu1 %vm7878_vm5, %v14480_v44  ;;  %v14540_v44 = vld [vmem:[%s20241_s10 + $0x7a8] sm:$0xff] }
0x143f   :  { %v10550_v46 = vpop.f32.mrf.mxu1  ;;  %16718 = vmatprep.mubr.msk.f32.mxu1 %vm7878_vm5, %v14481_v24  ;;  %v14541_v24 = vld [vmem:[%s20241_s10 + $0x7b0] sm:$0xff] }
0x1440   :  { %v19935_v25 = vadd.f32 %v10550_v46, %v19823_v53 }
0x1441   :  { %v16408_v52 = vpop.f32.mrf.mxu1 }
0x1442   :  { %v19941_v31 = vadd.f32 %v16408_v52, %v19829_v11  ;;  %16719 = vmatmul.mubr.msk.f32.gmra.mxu1 %vm7878_vm5, %v14482_v29  ;;  %v14542_v29 = vld [vmem:[%s20241_s10 + $0x7b8] sm:$0xff] }
0x1443   :  { %v10560_v2 = vpop.f32.mrf.mxu1  ;;  %16721 = vmatprep.mubr.msk.f32.mxu1 %vm7878_vm5, %v14483_v42  ;;  %v14543_v42 = vld [vmem:[%s20241_s10 + $0x7c0] sm:$0xff] }
0x1444   :  { %v19949_v3 = vadd.f32 %v10560_v2, %v19837_v6 }
0x1445   :  { %v16411_v55 = vpop.f32.mrf.mxu1 }
0x1446   :  { %v19955_v62 = vadd.f32 %v16411_v55, %v19843_v38  ;;  %16722 = vmatmul.mubr.msk.f32.gmra.mxu1 %vm7878_vm5, %v14484_v57  ;;  %v14544_v57 = vld [vmem:[%s20241_s10 + $0x7c8] sm:$0xff] }
0x1447   :  { %v10570_v5 = vpop.f32.mrf.mxu1  ;;  %16724 = vmatprep.mubr.msk.f32.mxu1 %vm7878_vm5, %v14485_v58  ;;  %v14545_v58 = vld [vmem:[%s20241_s10 + $0x7d0] sm:$0xff] }
0x1448   :  { %v19963_v53 = vadd.f32 %v10570_v5, %v19851_v20 }
0x1449   :  { %v16414_v60 = vpop.f32.mrf.mxu1 }
0x144a   :  { %v19969_v11 = vadd.f32 %v16414_v60, %v19857_v14  ;;  %16725 = vmatmul.mubr.msk.f32.gmra.mxu1 %vm7878_vm5, %v14486_v17  ;;  %v14546_v17 = vld [vmem:[%s20241_s10 + $0x7d8] sm:$0xff] }
0x144b   :  { %v10580_v30 = vpop.f32.mrf.mxu1  ;;  %16727 = vmatprep.mubr.msk.f32.mxu1 %vm7878_vm5, %v14487_v23  ;;  %v14547_v23 = vld [vmem:[%s20241_s10 + $0x7e0] sm:$0xff] }
0x144c   :  { %v19977_v6 = vadd.f32 %v10580_v30, %v19865_v18 }
0x144d   :  { %v16417_v15 = vpop.f32.mrf.mxu1 }
0x144e   :  { %v19983_v38 = vadd.f32 %v16417_v15, %v19871_v51  ;;  %16728 = vmatmul.mubr.msk.f32.gmra.mxu1 %vm7878_vm5, %v14488_v40  ;;  %v14493_v51 = vld [vmem:[%s20241_s10 + $0x770] sm:$0xff]  ;;  %v14548_v40 = vld [vmem:[%s20241_s10 + $0x7e8] sm:$0xff] }
0x144f   :  { %v10590_v59 = vpop.f32.mrf.mxu1  ;;  %16730 = vmatprep.mubr.msk.f32.mxu1 %vm7878_vm5, %v14489_v7  ;;  %v14549_v7 = vld [vmem:[%s20241_s10 + $0x7f0] sm:$0xff] }
0x1450   :  { %v19991_v20 = vadd.f32 %v10590_v59, %v19879_v48 }
0x1451   :  { %v16757_v19 = vpop.f32.mrf.mxu0  ;;  %v16420_v14 = vpop.f32.mrf.mxu1 }
0x1452   :  { %v19997_v12 = vadd.f32 %v16420_v14, %v19885_v22  ;;  %16731 = vmatmul.mubr.msk.f32.gmra.mxu1 %vm7878_vm5, %v14490_v8  ;;  %v14535_v22 = vld [vmem:[%s20241_s10 + $0x780] sm:$0xff]  ;;  %v14550_v8 = vld [vmem:[%s20241_s10 + $0x7f8] sm:$0xff] }
0x1453   :  { %v12784_v27 = vpop.f32.mrf.mxu0  ;;  %v10600_v18 = vpop.f32.mrf.mxu1  ;;  %16733 = vmatprep.mubr.msk.f32.mxu1 %vm7878_vm5, %v14491_v61 }
0x1454   :  { %v20005_v50 = vadd.f32 %v10600_v18, %v19893_v10 }
0x1455   :  { %v16758_v54 = vpop.f32.mrf.mxu0  ;;  %v16423_v43 = vpop.f32.mrf.mxu1 }
0x1456   :  { %v20011_v48 = vadd.f32 %v16423_v43, %v19899_v21  ;;  %16734 = vmatmul.mubr.msk.f32.gmra.mxu1 %vm7878_vm5, %v14492_v45  ;;  %16759 = vmatprep.subr.mxu1 %v16758_v54 }
0x1457   :  { %16760 = vmatpush3.msra.mxu1 %v16758_v54  ;;  %v10610_v49 = vpop.f32.mrf.mxu1  ;;  %16736 = vmatprep.mubr.msk.f32.mxu1 %vm7878_vm5, %v14493_v51  ;;  %v12787_v37 = vpop.f32.mrf.mxu0 }
0x1458   :  { %v20019_v56 = vadd.f32 %v10610_v49, %v19907_v33  ;;  %16761 = vmatprep.subr.mxu1 %v16757_v19  ;;  %v14538_v33 = vld [vmem:[%s20241_s10 + $0x798] sm:$0xff] }
0x1459   :  { %16762 = vmatpush3.msra.mxu1 %v16757_v19  ;;  %v16426_v63 = vpop.f32.mrf.mxu1 }
0x145a   :  { %v20025_v28 = vadd.f32 %v16426_v63, %v19913_v35  ;;  %16737 = vmatmul.mubr.msk.f32.gmra.mxu1 %vm7878_vm5, %v14494_v1  ;;  %16763 = vmatprep.subr.mxu1 %v12787_v37 }
0x145b   :  { %16764 = vmatpush3.msra.mxu1 %v12787_v37  ;;  %v10620_v10 = vpop.f32.mrf.mxu1  ;;  %16767 = vmatprep.mubr.msk.f32.mxu1 %vm7878_vm5, %v14535_v22 }
0x145c   :  { %v20033_v9 = vadd.f32 %v10620_v10, %v19921_v47  ;;  %16765 = vmatprep.subr.mxu1 %v12784_v27 }
0x145d   :  { %16766 = vmatpush3.msra.mxu1 %v12784_v27  ;;  %v16457_v21 = vpop.f32.mrf.mxu1 }
0x145e   :  { %v10970_v36 = vadd.f32 %v16457_v21, %v19927_v13  ;;  %16768 = vmatmul.mubr.msk.f32.vlgmr.msra.gmra.mxu1 %vm7878_vm5, %v14536_v4 }
0x145f   :  { %v10890_v34 = vpop.f32.mrf.mxu1  ;;  %16770 = vmatprep.mubr.msk.f32.mxu1 %vm7878_vm5, %v14537_v39 }
0x1460   :  { %v10969_v0 = vadd.f32 %v10890_v34, %v19935_v25 }
0x1461   :  { %v16460_v16 = vpop.f32.mrf.mxu1 }
0x1462   :  { %v10972_v35 = vadd.f32 %v16460_v16, %v19941_v31  ;;  %16771 = vmatmul.mubr.msk.f32.gmra.mxu1 %vm7878_vm5, %v14538_v33 }
0x1463   :  { %v10900_v26 = vpop.f32.mrf.mxu1  ;;  %16773 = vmatprep.mubr.msk.f32.mxu1 %vm7878_vm5, %v14539_v41 }
0x1464   :  { %v10971_v47 = vadd.f32 %v10900_v26, %v19949_v3 }
0x1465   :  { %v16463_v32 = vpop.f32.mrf.mxu1 }
0x1466   :  { %v10974_v13 = vadd.f32 %v16463_v32, %v19955_v62  ;;  %16774 = vmatmul.mubr.msk.f32.gmra.mxu1 %vm7878_vm5, %v14540_v44 }
0x1467   :  { %v10910_v46 = vpop.f32.mrf.mxu1  ;;  %16776 = vmatprep.mubr.msk.f32.mxu1 %vm7878_vm5, %v14541_v24 }
0x1468   :  { %v10973_v25 = vadd.f32 %v10910_v46, %v19963_v53 }
0x1469   :  { %v16466_v52 = vpop.f32.mrf.mxu1 }
0x146a   :  { %v10976_v31 = vadd.f32 %v16466_v52, %v19969_v11  ;;  %16777 = vmatmul.mubr.msk.f32.gmra.mxu1 %vm7878_vm5, %v14542_v29 }
0x146b   :  { %v10920_v2 = vpop.f32.mrf.mxu1  ;;  %16779 = vmatprep.mubr.msk.f32.mxu1 %vm7878_vm5, %v14543_v42 }
0x146c   :  { %v10975_v3 = vadd.f32 %v10920_v2, %v19977_v6 }
0x146d   :  { %v16469_v55 = vpop.f32.mrf.mxu1 }
0x146e   :  { %v10978_v62 = vadd.f32 %v16469_v55, %v19983_v38  ;;  %16780 = vmatmul.mubr.msk.f32.gmra.mxu1 %vm7878_vm5, %v14544_v57 }
0x146f   :  { %v10930_v5 = vpop.f32.mrf.mxu1  ;;  %16782 = vmatprep.mubr.msk.f32.mxu1 %vm7878_vm5, %v14545_v58 }
0x1470   :  { %v10977_v53 = vadd.f32 %v10930_v5, %v19991_v20 }
0x1471   :  { %v16472_v60 = vpop.f32.mrf.mxu1 }
0x1472   :  { %v10980_v11 = vadd.f32 %v16472_v60, %v19997_v12  ;;  %16783 = vmatmul.mubr.msk.f32.gmra.mxu1 %vm7878_vm5, %v14546_v17 }
0x1473   :  { %v10940_v30 = vpop.f32.mrf.mxu1  ;;  %16785 = vmatprep.mubr.msk.f32.mxu1 %vm7878_vm5, %v14547_v23 }
0x1474   :  { %v10979_v6 = vadd.f32 %v10940_v30, %v20005_v50 }
0x1475   :  { %v16475_v15 = vpop.f32.mrf.mxu1 }
0x1476   :  { %v10982_v38 = vadd.f32 %v16475_v15, %v20011_v48  ;;  %16786 = vmatmul.mubr.msk.f32.gmra.mxu1 %vm7878_vm5, %v14548_v40 }
0x1477   :  { %v10950_v59 = vpop.f32.mrf.mxu1  ;;  %16788 = vmatprep.mubr.msk.f32.mxu1 %vm7878_vm5, %v14549_v7 }
0x1478   :  { %v10981_v20 = vadd.f32 %v10950_v59, %v20019_v56 }
0x1479   :  { %v16478_v61 = vpop.f32.mrf.mxu1 }
0x147a   :  { %v10984_v19 = vadd.f32 %v16478_v61, %v20025_v28  ;;  %16789 = vmatmul.mubr.msk.f32.gmra.mxu1 %vm7878_vm5, %v14550_v8 }
0x147b   :  { %v10960_v14 = vpop.f32.mrf.mxu1 }
0x147c   :  { %v10983_v12 = vadd.f32 %v10960_v14, %v20033_v9 }
0x147d   :  { %v16509_v27 = vpop.f32.mrf.mxu1 }
0x147e   :  { %v11310_v18 = vadd.f32 %v16509_v27, %v10970_v36 }
0x147f   :  { %v11230_v45 = vpop.f32.mrf.mxu1 }
0x1480   :  { %v11309_v50 = vadd.f32 %v11230_v45, %v10969_v0 }
0x1481   :  { %v16512_v51 = vpop.f32.mrf.mxu1 }
0x1482   :  { %v11312_v54 = vadd.f32 %v16512_v51, %v10972_v35 }
0x1483   :  { %v11240_v43 = vpop.f32.mrf.mxu1 }
0x1484   :  { %v11311_v48 = vadd.f32 %v11240_v43, %v10971_v47 }
0x1485   :  { %v16515_v49 = vpop.f32.mrf.mxu1 }
0x1486   :  { %v11314_v1 = vadd.f32 %v16515_v49, %v10974_v13 }
0x1487   :  { %v11250_v22 = vpop.f32.mrf.mxu1 }
0x1488   :  { %v11313_v56 = vadd.f32 %v11250_v22, %v10973_v25 }
0x1489   :  { %v16518_v37 = vpop.f32.mrf.mxu1 }
0x148a   :  { %v11316_v63 = vadd.f32 %v16518_v37, %v10976_v31 }
0x148b   :  { %v11260_v28 = vpop.f32.mrf.mxu1 }
0x148c   :  { %v11315_v10 = vadd.f32 %v11260_v28, %v10975_v3 }
0x148d   :  { %v16521_v4 = vpop.f32.mrf.mxu1 }
0x148e   :  { %v11318_v39 = vadd.f32 %v16521_v4, %v10978_v62 }
0x148f   :  { %v11270_v21 = vpop.f32.mrf.mxu1 }
0x1490   :  { %v11317_v9 = vadd.f32 %v11270_v21, %v10977_v53 }
0x1491   :  { %v16524_v34 = vpop.f32.mrf.mxu1 }
0x1492   :  { %v11320_v36 = vadd.f32 %v16524_v34, %v10980_v11 }
0x1493   :  { %v11280_v33 = vpop.f32.mrf.mxu1 }
0x1494   :  { %v11319_v0 = vadd.f32 %v11280_v33, %v10979_v6 }
0x1495   :  { %v16527_v41 = vpop.f32.mrf.mxu1 }
0x1496   :  { %v11322_v16 = vadd.f32 %v16527_v41, %v10982_v38 }
0x1497   :  { %v11290_v35 = vpop.f32.mrf.mxu1 }
0x1498   :  { %v11321_v26 = vadd.f32 %v11290_v35, %v10981_v20 }
0x149a   :  { %v16530_v44 = vpop.f32.mrf.mxu1 }
0x149b   :  { %v11324_v47 = vadd.f32 %v16530_v44, %v10984_v19 }
0x149c   :  { %v11300_v24 = vpop.f32.mrf.mxu1 }
0x149d   :  { %v11323_v32 = vadd.f32 %v11300_v24, %v10983_v12 }
0x149e   :  { %v16561_v13 = vpop.f32.mrf.mxu1 }
0x149f   :  { %v11650_v46 = vadd.f32 %v16561_v13, %v11310_v18 }
0x14a0   :  { %v11570_v29 = vpop.f32.mrf.mxu1 }
0x14a1   :  { %v11649_v25 = vadd.f32 %v11570_v29, %v11309_v50 }
0x14a2   :  { %v16564_v42 = vpop.f32.mrf.mxu1 }
0x14a3   :  { %v11652_v52 = vadd.f32 %v16564_v42, %v11312_v54 }
0x14a4   :  { %v11580_v31 = vpop.f32.mrf.mxu1 }
0x14a5   :  { %v11651_v2 = vadd.f32 %v11580_v31, %v11311_v48 }
0x14a6   :  { %v16567_v57 = vpop.f32.mrf.mxu1 }
0x14a7   :  { %v11654_v3 = vadd.f32 %v16567_v57, %v11314_v1 }
0x14a8   :  { %v11590_v58 = vpop.f32.mrf.mxu1 }
0x14a9   :  { %v11653_v55 = vadd.f32 %v11590_v58, %v11313_v56 }
0x14aa   :  { %v16570_v62 = vpop.f32.mrf.mxu1 }
0x14ab   :  { %v11656_v5 = vadd.f32 %v16570_v62, %v11316_v63 }
0x14ac   :  { %v11600_v17 = vpop.f32.mrf.mxu1 }
0x14ad   :  { %v11655_v53 = vadd.f32 %v11600_v17, %v11315_v10 }
0x14ae   :  { %v16573_v23 = vpop.f32.mrf.mxu1 }
0x14af   :  { %v11658_v60 = vadd.f32 %v16573_v23, %v11318_v39 }
0x14b0   :  { %v11610_v11 = vpop.f32.mrf.mxu1 }
0x14b1   :  { %v11657_v30 = vadd.f32 %v11610_v11, %v11317_v9 }
0x14b2   :  { %v16576_v40 = vpop.f32.mrf.mxu1 }
0x14b3   :  { %v11660_v6 = vadd.f32 %v16576_v40, %v11320_v36 }
0x14b4   :  { %v11620_v7 = vpop.f32.mrf.mxu1 }
0x14b5   :  { %v11659_v15 = vadd.f32 %v11620_v7, %v11319_v0 }
0x14b6   :  { %v16579_v38 = vpop.f32.mrf.mxu1 }
0x14b7   :  { %v11662_v59 = vadd.f32 %v16579_v38, %v11322_v16 }
0x14b8   :  { %v11630_v8 = vpop.f32.mrf.mxu1 }
0x14b9   :  { %v11661_v20 = vadd.f32 %v11630_v8, %v11321_v26 }
0x14ba   :  { %v16582_v61 = vpop.f32.mrf.mxu1 }
0x14bb   :  { %v11664_v19 = vadd.f32 %v16582_v61, %v11324_v47 }
0x14bc   :  { %v11640_v14 = vpop.f32.mrf.mxu1 }
0x14bd   :  { %v11663_v12 = vadd.f32 %v11640_v14, %v11323_v32 }
0x14be   :  { %v16613_v27 = vpop.f32.mrf.mxu1 }
0x14bf   :  { %v11990_v18 = vadd.f32 %v16613_v27, %v11650_v46 }
0x14c0   :  { %v11910_v45 = vpop.f32.mrf.mxu1 }
0x14c1   :  { %v11989_v50 = vadd.f32 %v11910_v45, %v11649_v25 }
0x14c2   :  { %v16616_v51 = vpop.f32.mrf.mxu1 }
0x14c3   :  { %v20108_v54 = vadd.f32 %v16616_v51, %v11652_v52 }
0x14c4   :  { %v11920_v43 = vpop.f32.mrf.mxu1 }
0x14c5   :  { %v20110_v48 = vadd.f32 %v11920_v43, %v11651_v2 }
0x14c6   :  { %v16619_v49 = vpop.f32.mrf.mxu1 }
0x14c7   :  { %v20112_v1 = vadd.f32 %v16619_v49, %v11654_v3 }
0x14c8   :  { %v11930_v22 = vpop.f32.mrf.mxu1 }
0x14c9   :  { %v20114_v56 = vadd.f32 %v11930_v22, %v11653_v55 }
0x14ca   :  { %v16622_v37 = vpop.f32.mrf.mxu1 }
0x14cb   :  { %v20116_v63 = vadd.f32 %v16622_v37, %v11656_v5 }
0x14cc   :  { %v11940_v28 = vpop.f32.mrf.mxu1 }
0x14cd   :  { %v20118_v10 = vadd.f32 %v11940_v28, %v11655_v53 }
0x14ce   :  { %v16625_v4 = vpop.f32.mrf.mxu1 }
0x14cf   :  { %v20120_v39 = vadd.f32 %v16625_v4, %v11658_v60 }
0x14d0   :  { %v11950_v21 = vpop.f32.mrf.mxu1 }
0x14d1   :  { %v20122_v9 = vadd.f32 %v11950_v21, %v11657_v30 }
0x14d2   :  { %v16628_v34 = vpop.f32.mrf.mxu1 }
0x14d3   :  { %v20124_v36 = vadd.f32 %v16628_v34, %v11660_v6 }
0x14d4   :  { %v11960_v33 = vpop.f32.mrf.mxu1 }
0x14d5   :  { %v20126_v0 = vadd.f32 %v11960_v33, %v11659_v15 }
0x14d6   :  { %v16631_v41 = vpop.f32.mrf.mxu1 }
0x14d7   :  { %v20128_v16 = vadd.f32 %v16631_v41, %v11662_v59 }
0x14d8   :  { %v11970_v35 = vpop.f32.mrf.mxu1 }
0x14d9   :  { %v20130_v26 = vadd.f32 %v11970_v35, %v11661_v20 }
0x14da   :  { %v16634_v44 = vpop.f32.mrf.mxu1 }
0x14db   :  { %v20132_v47 = vadd.f32 %v16634_v44, %v11664_v19 }
0x14dc   :  { %v11980_v24 = vpop.f32.mrf.mxu1 }
0x14dd   :  { %v20134_v32 = vadd.f32 %v11980_v24, %v11663_v12 }
0x14de   :  { %v16665_v13 = vpop.f32.mrf.mxu1 }
0x14df   :  { %v12330_v12 = vadd.f32 %v16665_v13, %v11990_v18 }
0x14e0   :  { %v12250_v46 = vpop.f32.mrf.mxu1 }
0x14e1   :  { %v12329_v45 = vadd.f32 %v12250_v46, %v11989_v50 }
0x14e2   :  { %v16668_v29 = vpop.f32.mrf.mxu1 }
0x14e3   :  { %v12332_v49 = vadd.f32 %v16668_v29, %v20108_v54 }
0x14e4   :  { %v12260_v25 = vpop.f32.mrf.mxu1 }
0x14e5   :  { %v12331_v4 = vadd.f32 %v12260_v25, %v20110_v48 }
0x14e6   :  { %v16671_v42 = vpop.f32.mrf.mxu1 }
0x14e7   :  { %v12334_v41 = vadd.f32 %v16671_v42, %v20112_v1 }
0x14e8   :  { %v12270_v52 = vpop.f32.mrf.mxu1 }
0x14e9   :  { %v12333_v50 = vadd.f32 %v12270_v52, %v20114_v56 }
0x14ea   :  { %v16674_v31 = vpop.f32.mrf.mxu1 }
0x14eb   :  { %v12336_v46 = vadd.f32 %v16674_v31, %v20116_v63 }
0x14ec   :  { %v12280_v2 = vpop.f32.mrf.mxu1 }
0x14ee   :  { %v16677_v57 = vpop.f32.mrf.mxu1 }
0x14f0   :  { %v12290_v3 = vpop.f32.mrf.mxu1 }
0x14f2   :  { %v20136_v58 = vpop.f32.mrf.mxu1 }
0x14f4   :  { %v20138_v55 = vpop.f32.mrf.mxu1 }
0x14f6   :  { %v20140_v62 = vpop.f32.mrf.mxu1 }
0x14f8   :  { %v20142_v5 = vpop.f32.mrf.mxu1 }
0x14fa   :  { %v20144_v17 = vpop.f32.mrf.mxu1 }
0x14fc   :  { %v20146_v53 = vpop.f32.mrf.mxu1 }
0x14fe   :  { %v16717_v23 = vpop.f32.mrf.mxu1 }
0x14ff   :  { %v12670_v51 = vadd.f32 %v16717_v23, %v12330_v12  ;;  %v12335_v23 = vadd.f32 %v12280_v2, %v20118_v10  ;;  %v12340_v10 = vadd.f32 %v20136_v58, %v20124_v36 }
0x1500   :  { %v12590_v60 = vpop.f32.mrf.mxu1 }
0x1501   :  { %v12669_v22 = vadd.f32 %v12590_v60, %v12329_v45  ;;  %v12341_v45 = vadd.f32 %v20142_v5, %v20130_v26 }
0x1502   :  { %v16720_v11 = vpop.f32.mrf.mxu1 }
0x1503   :  { %v12672_v21 = vadd.f32 %v16720_v11, %v12332_v49  ;;  %v12338_v11 = vadd.f32 %v16677_v57, %v20120_v39 }
0x1504   :  { %v12600_v30 = vpop.f32.mrf.mxu1 }
0x1505   :  { %v12671_v35 = vadd.f32 %v12600_v30, %v12331_v4 }
0x1506   :  { %v16723_v40 = vpop.f32.mrf.mxu1 }
0x1507   :  { %v12674_v24 = vadd.f32 %v16723_v40, %v12334_v41  ;;  %v12337_v40 = vadd.f32 %v12290_v3, %v20122_v9  ;;  %v12339_v9 = vadd.f32 %v20138_v55, %v20126_v0 }
0x1508   :  { %v12610_v6 = vpop.f32.mrf.mxu1 }
0x1509   :  { %v12673_v29 = vadd.f32 %v12610_v6, %v12333_v50 }
0x150a   :  { %v16726_v7 = vpop.f32.mrf.mxu1 }
0x150b   :  { %v12676_v60 = vadd.f32 %v16726_v7, %v12336_v46 }
0x150c   :  { %v12620_v15 = vpop.f32.mrf.mxu1 }
0x150d   :  { %v12675_v30 = vadd.f32 %v12620_v15, %v12335_v23 }
0x150e   :  { %v16729_v38 = vpop.f32.mrf.mxu1 }
0x150f   :  { %v12678_v12 = vadd.f32 %v16729_v38, %v12338_v11  ;;  %v12342_v38 = vadd.f32 %v20140_v62, %v20128_v16 }
0x1510   :  { %v12630_v59 = vpop.f32.mrf.mxu1 }
0x1511   :  { %v12677_v2 = vadd.f32 %v12630_v59, %v12337_v40 }
0x1512   :  { %v16732_v8 = vpop.f32.mrf.mxu1 }
0x1513   :  { %v12680_v3 = vadd.f32 %v16732_v8, %v12340_v10 }
0x1514   :  { %v20148_v20 = vpop.f32.mrf.mxu1 }
0x1515   :  { %v12679_v59 = vadd.f32 %v20148_v20, %v12339_v9 }
0x1516   :  { %v20150_v61 = vpop.f32.mrf.mxu1 }
0x1518   :  { %v20152_v19 = vpop.f32.mrf.mxu1 }
0x1519   :  { %v12681_v49 = vadd.f32 %v20152_v19, %v12341_v45 }
0x151a   :  { %v20154_v14 = vpop.f32.mrf.mxu1 }
0x151c   :  { %v20156_v27 = vpop.f32.mrf.mxu1 }
0x151e   :  { %v16769_v43 = vpop.f32.mrf.mxu1 }
0x151f   :  { %v13010_v37 = vadd.f32 %v16769_v43, %v12670_v51  ;;  %v12682_v51 = vadd.f32 %v20150_v61, %v12342_v38  ;;  %v12344_v43 = vadd.f32 %v20144_v17, %v20132_v47 }
0x1520   :  { %v12930_v28 = vpop.f32.mrf.mxu1 }
0x1521   :  { %17453 = vtanh.f32 %v13010_v37  ;;  %v13009_v34 = vadd.f32 %v12930_v28, %v12669_v22  ;;  %v12343_v22 = vadd.f32 %v20146_v53, %v20134_v32  ;;  %v12684_v37 = vadd.f32 %v20154_v14, %v12344_v43 }
0x1522   :  { %v16772_v33 = vpop.f32.mrf.mxu1 }
0x1523   :  { %17455 = vtanh.f32 %v13009_v34  ;;  %v13012_v18 = vadd.f32 %v16772_v33, %v12672_v21  ;;  %v12683_v28 = vadd.f32 %v20156_v27, %v12343_v22 }
0x1524   :  { %v12940_v44 = vpop.f32.mrf.mxu1 }
0x1525   :  { %17457 = vtanh.f32 %v13012_v18  ;;  %v13011_v54 = vadd.f32 %v12940_v44, %v12671_v35 }
0x1526   :  { %v16775_v13 = vpop.f32.mrf.mxu1 }
0x1527   :  { %17459 = vtanh.f32 %v13011_v54  ;;  %v13014_v48 = vadd.f32 %v16775_v13, %v12674_v24 }
0x1528   :  { %v12950_v25 = vpop.f32.mrf.mxu1 }
0x1529   :  { %17461 = vtanh.f32 %v13014_v48  ;;  %v13013_v1 = vadd.f32 %v12950_v25, %v12673_v29 }
0x152a   :  { %v16778_v42 = vpop.f32.mrf.mxu1 }
0x152b   :  { %17463 = vtanh.f32 %v13013_v1  ;;  %v13016_v56 = vadd.f32 %v16778_v42, %v12676_v60 }
0x152c   :  { %v12960_v52 = vpop.f32.mrf.mxu1 }
0x152d   :  { %17465 = vtanh.f32 %v13016_v56  ;;  %v13015_v63 = vadd.f32 %v12960_v52, %v12675_v30 }
0x152e   :  { %v17454_v31 = vpop.eup %17453  ;;  %v16781_v6 = vpop.f32.mrf.mxu1 }
0x152f   :  { %13042 = vst [vmem:[%s20242_s11 + $0x8] sm:$0xff] %v17454_v31  ;;  %17467 = vtanh.f32 %v13015_v63  ;;  %v13018_v39 = vadd.f32 %v16781_v6, %v12678_v12 }
0x1530   :  { %v17456_v57 = vpop.eup %17455  ;;  %v12970_v7 = vpop.f32.mrf.mxu1 }
0x1531   :  { %13041 = vst [vmem:[%s20242_s11] sm:$0xff] %v17456_v57  ;;  %17469 = vtanh.f32 %v13018_v39  ;;  %v13017_v15 = vadd.f32 %v12970_v7, %v12677_v2 }
0x1532   :  { %v17458_v36 = vpop.eup %17457  ;;  %v16784_v58 = vpop.f32.mrf.mxu1 }
0x1533   :  { %13044 = vst [vmem:[%s20242_s11 + $0x18] sm:$0xff] %v17458_v36  ;;  %17471 = vtanh.f32 %v13017_v15  ;;  %v13020_v0 = vadd.f32 %v16784_v58, %v12680_v3 }
0x1534   :  { %v17460_v55 = vpop.eup %17459  ;;  %v12980_v8 = vpop.f32.mrf.mxu1 }
0x1535   :  { %13043 = vst [vmem:[%s20242_s11 + $0x10] sm:$0xff] %v17460_v55  ;;  %17473 = vtanh.f32 %v13020_v0  ;;  %v13019_v16 = vadd.f32 %v12980_v8, %v12679_v59 }
0x1536   :  { %v17462_v62 = vpop.eup %17461  ;;  %v16787_v20 = vpop.f32.mrf.mxu1 }
0x1537   :  { %13046 = vst [vmem:[%s20242_s11 + $0x28] sm:$0xff] %v17462_v62  ;;  %17475 = vtanh.f32 %v13019_v16  ;;  %v13022_v26 = vadd.f32 %v16787_v20, %v12682_v51 }
0x1538   :  { %v17464_v5 = vpop.eup %17463  ;;  %v12990_v61 = vpop.f32.mrf.mxu1 }
0x1539   :  { %13045 = vst [vmem:[%s20242_s11 + $0x20] sm:$0xff] %v17464_v5  ;;  %17477 = vtanh.f32 %v13022_v26  ;;  %v13021_v47 = vadd.f32 %v12990_v61, %v12681_v49 }
0x153a   :  { %v17466_v17 = vpop.eup %17465  ;;  %v16790_v19 = vpop.f32.mrf.mxu1 }
0x153b   :  { %13048 = vst [vmem:[%s20242_s11 + $0x38] sm:$0xff] %v17466_v17  ;;  %17479 = vtanh.f32 %v13021_v47  ;;  %v13024_v4 = vadd.f32 %v16790_v19, %v12684_v37 }
0x153c   :  { %v17468_v21 = vpop.eup %17467  ;;  %v13000_v32 = vpop.f32.mrf.mxu1 }
0x153d   :  { %13047 = vst [vmem:[%s20242_s11 + $0x30] sm:$0xff] %v17468_v21  ;;  %17481 = vtanh.f32 %v13024_v4  ;;  %v13023_v53 = vadd.f32 %v13000_v32, %v12683_v28 }
0x153e   :  { %v17470_v14 = vpop.eup %17469 }
0x153f   :  { %13050 = vst [vmem:[%s20242_s11 + $0x48] sm:$0xff] %v17470_v14  ;;  %17483 = vtanh.f32 %v13023_v53 }
0x1540   :  { %v17472_v27 = vpop.eup %17471 }
0x1541   :  { %13049 = vst [vmem:[%s20242_s11 + $0x40] sm:$0xff] %v17472_v27 }
0x1542   :  { %v17474_v34 = vpop.eup %17473 }
0x1543   :  { %13052 = vst [vmem:[%s20242_s11 + $0x58] sm:$0xff] %v17474_v34 }
0x1544   :  { %v17476_v33 = vpop.eup %17475 }
0x1545   :  { %13051 = vst [vmem:[%s20242_s11 + $0x50] sm:$0xff] %v17476_v33 }
0x1546   :  { %v17478_v41 = vpop.eup %17477 }
0x1547   :  { %13054 = vst [vmem:[%s20242_s11 + $0x68] sm:$0xff] %v17478_v41 }
0x1548   :  { %v17480_v35 = vpop.eup %17479 }
0x1549   :  { %13053 = vst [vmem:[%s20242_s11 + $0x60] sm:$0xff] %v17480_v35 }
0x154a   :  { %v17482_v18 = vpop.eup %17481 }
0x154b   :  { %13056 = vst [vmem:[%s20242_s11 + $0x78] sm:$0xff] %v17482_v18 }
0x154c   :  { %v17484_v44 = vpop.eup %17483 }
0x154d   :  { %13055 = vst [vmem:[%s20242_s11 + $0x70] sm:$0xff] %v17484_v44 }
0x154e   :  { %13061 = vsyncpa [#allocation3], 1 }
0x154f   :  { %13062 = vsyncpa [#allocation5], 1 }
0x1550   :  { %13063 = vsyncpa [#allocation8], 1 }
0x1551   :  { %13064 = vsyncpa [#allocation11], 1 }

</bundles_post_ra>
